<compile_context>
chip_gen: v6e
topology: v6e:2x2x1
jax: 0.10.0
libtpu: 0.0.40
codegen_flags: <defaults>
</compile_context>

<pallas_src>
import functools

import jax
import jax.numpy as jnp
from jax import lax
from jax.experimental import pallas as pl
from jax.experimental.pallas import tpu as pltpu

EPS = float(jnp.finfo(jnp.float32).eps)      # torch.finfo(torch.float32).eps
ROPE_BASE = 10000.0
NEG_BIG = -1e30                              # finite "masked" score (avoids -inf/NaN paths)
VMEM_LIMIT = 32 * 1024 * 1024                # plenty for these tiles; re-derive for big models


# ---------------------------------------------------------------------------
# Kernel 1: RMSNorm (pre-attention) + QKV projection
# ---------------------------------------------------------------------------
def _rmsnorm_qkv_kernel(x_ref, gain_ref, w_qkv_ref, qkv_ref, *, rms_scale):
    x = x_ref[...]                                            # (ts, E) f32
    ss = jnp.sum(x * x, axis=-1, keepdims=True)               # (ts, 1)
    inv = pl.reciprocal(jnp.sqrt(ss) + EPS, approx=True)      # EUP slot
    xn = (rms_scale * gain_ref[...]) * x * inv                # f32 elementwise
    qkv = jnp.dot(xn.astype(jnp.bfloat16), w_qkv_ref[...],    # bf16 x bf16 -> f32 MXU
                  preferred_element_type=jnp.float32)
    qkv_ref[...] = qkv.astype(jnp.bfloat16)


# ---------------------------------------------------------------------------
# Kernel 2: RoPE + causal flash attention, heads batched into one einsum
# ---------------------------------------------------------------------------
def _flash_attn_kernel(q_ref, k_ref, v_ref, cos_q_ref, sin_q_ref, cos_k_ref, sin_k_ref,
                       o_ref, qrot_ref, m_ref, l_ref, acc_ref,
                       *, tq, tk, half, scale):
    qi = pl.program_id(1)
    ki = pl.program_id(2)
    q_start = qi * tq
    kv_start = ki * tk

    def rope(t, cos, sin_signed):
        # t: (nh, T, Dh) f32; cos/sin_signed: (T, Dh) f32.
        # rotate_half(t) == roll(t, Dh/2) with the first-half sign folded into sin_signed
        # (direction-agnostic since the shift is exactly half of Dh).
        rot = pltpu.roll(t, shift=half, axis=t.ndim - 1)      # XLU lane rotation
        return t * cos[None] + rot * sin_signed[None]

    @pl.when(ki == 0)
    def _init():
        m_ref[...] = jnp.full(m_ref.shape, NEG_BIG, jnp.float32)
        l_ref[...] = jnp.zeros(l_ref.shape, jnp.float32)
        acc_ref[...] = jnp.zeros(acc_ref.shape, jnp.float32)
        q = q_ref[...].astype(jnp.float32)
        # fold the 1/sqrt(dim_k) score scale into q once per Q tile, cache as bf16
        qrot_ref[...] = (rope(q, cos_q_ref[...], sin_q_ref[...]) * scale).astype(jnp.bfloat16)

    # Skip KV tiles that lie entirely in the causal future of this Q tile.
    @pl.when(kv_start <= q_start + tq - 1)
    def _update():
        k = k_ref[...].astype(jnp.float32)
        k_rot = rope(k, cos_k_ref[...], sin_k_ref[...]).astype(jnp.bfloat16)
        s = jnp.einsum("hqd,hkd->hqk", qrot_ref[...], k_rot,
                       preferred_element_type=jnp.float32)    # (nh, tq, tk) f32
        row = q_start + lax.broadcasted_iota(jnp.int32, s.shape, 1)
        col = kv_start + lax.broadcasted_iota(jnp.int32, s.shape, 2)
        s = jnp.where(col > row, NEG_BIG, s)                  # causal mask (finite)

        m_new = jnp.maximum(m_ref[...], jnp.max(s, axis=-1, keepdims=True))
        alpha = jnp.exp(m_ref[...] - m_new)
        p = jnp.exp(s - m_new)
        l_ref[...] = alpha * l_ref[...] + jnp.sum(p, axis=-1, keepdims=True)
        acc_ref[...] = alpha * acc_ref[...] + jnp.einsum(
            "hqk,hkd->hqd", p.astype(jnp.bfloat16), v_ref[...],
            preferred_element_type=jnp.float32)
        m_ref[...] = m_new

    @pl.when(ki == pl.num_programs(2) - 1)
    def _finalize():
        o_ref[...] = (acc_ref[...] * pl.reciprocal(l_ref[...], approx=True)
                      ).astype(o_ref.dtype)


# ---------------------------------------------------------------------------
# Kernel 3: out-projection + residual + RMSNorm + FFN(SwiGLU) + residual
# ---------------------------------------------------------------------------
def _post_block_kernel(x_ref, attn_ref, w_out_ref, gain_ref, w_ff1_ref, w_sw_ref,
                       b_sw_ref, w_ff2_ref, o_ref, *, rms_scale, ffn_hidden):
    x = x_ref[...]                                            # (ts, E) f32
    attn = jnp.dot(attn_ref[...], w_out_ref[...],             # bf16 x bf16 -> f32
                   preferred_element_type=jnp.float32)
    x = x + attn                                              # residual 1

    ss = jnp.sum(x * x, axis=-1, keepdims=True)
    inv = pl.reciprocal(jnp.sqrt(ss) + EPS, approx=True)
    xn = (rms_scale * gain_ref[...]) * x * inv

    h1 = jnp.dot(xn.astype(jnp.bfloat16), w_ff1_ref[...],
                 preferred_element_type=jnp.float32)          # (ts, H)
    g = jnp.dot(h1.astype(jnp.bfloat16), w_sw_ref[...],
                preferred_element_type=jnp.float32) + b_sw_ref[...]   # (ts, 2H)
    a = g[:, :ffn_hidden]
    b = g[:, ffn_hidden:]
    sw = a * jax.nn.sigmoid(a) + b                            # SwiGLU, f32 (sigmoid on EUP)
    ff = jnp.dot(sw.astype(jnp.bfloat16), w_ff2_ref[...],
                 preferred_element_type=jnp.float32)          # (ts, E)
    o_ref[...] = x + ff                                       # residual 2


# ---------------------------------------------------------------------------
# Wrapper
# ---------------------------------------------------------------------------
@functools.partial(jax.jit, static_argnames=("num_heads", "ffn_hidden", "seq_tile"))
def transformer_block(x, params, *, num_heads, ffn_hidden, seq_tile=128):
    (gain_attn, w_qkv, w_out, cos, sin, gain_ffn, w_ff1, w_sw, b_sw, w_ff2) = params
    B, S, E = x.shape
    H = ffn_hidden
    nh = num_heads
    dh = E // nh
    half = dh // 2
    rms_scale = float(E) ** 0.5
    scale = float(E) ** -0.5                 # torch: dim_k defaults to dim_emb

    # NOTE: use 256-row tiles on v6e/v7x for very long S to fill the MXU M dim.
    ts = min(seq_tile, S)
    assert S % ts == 0 and E % nh == 0 and dh % 2 == 0
    tq = tk = ts
    n_s = S // ts

    def cparams(sem):
        return pltpu.CompilerParams(dimension_semantics=sem,
                                    vmem_limit_bytes=VMEM_LIMIT)

    # bf16 weights: MXU-native on v6e/v7x, halves HBM/VMEM traffic everywhere.
    w_qkv_b = w_qkv.astype(jnp.bfloat16)
    w_out_b = w_out.astype(jnp.bfloat16)
    w_ff1_b = w_ff1.astype(jnp.bfloat16)
    w_sw_b = w_sw.astype(jnp.bfloat16)
    w_ff2_b = w_ff2.astype(jnp.bfloat16)
    # TODO(synk): for non-toy E/H, N-tile the FFN / projection weights over extra grid axes
    # instead of keeping them fully VMEM-resident (constant index maps).

    # rotate_half sign folded into sin:  rope(t) = t*cos + roll(t, Dh/2) * sin_signed
    sin_signed = jnp.concatenate([-sin[:, :half], sin[:, half:]], axis=-1)

    # ---- kernel 1: RMSNorm + QKV projection --------------------------------
    qkv = pl.pallas_call(
        functools.partial(_rmsnorm_qkv_kernel, rms_scale=rms_scale),
        out_shape=jax.ShapeDtypeStruct((B, S, 3 * E), jnp.bfloat16),
        grid=(B, n_s),
        in_specs=[
            pl.BlockSpec((None, ts, E), lambda b, s: (b, s, 0)),
            pl.BlockSpec((1, E), lambda b, s: (0, 0)),
            pl.BlockSpec((E, 3 * E), lambda b, s: (0, 0)),
        ],
        out_specs=pl.BlockSpec((None, ts, 3 * E), lambda b, s: (b, s, 0)),
        compiler_params=cparams(("parallel", "parallel")),
    )(x, gain_attn, w_qkv_b)

    # head split (torch .view(B,S,nh,dh).permute(0,2,1,3)) as cheap XLA glue.
    q, k, v = jnp.split(qkv, 3, axis=-1)
    to_heads = lambda t: t.reshape(B, S, nh, dh).transpose(0, 2, 1, 3)
    q, k, v = to_heads(q), to_heads(k), to_heads(v)

    # ---- kernel 2: RoPE + causal flash attention (heads batched) -----------
    attn_h = pl.pallas_call(
        functools.partial(_flash_attn_kernel, tq=tq, tk=tk, half=half, scale=scale),
        out_shape=jax.ShapeDtypeStruct((B, nh, S, dh), jnp.bfloat16),
        grid=(B, S // tq, S // tk),
        in_specs=[
            pl.BlockSpec((None, nh, tq, dh), lambda b, i, j: (b, 0, i, 0)),  # q
            pl.BlockSpec((None, nh, tk, dh), lambda b, i, j: (b, 0, j, 0)),  # k
            pl.BlockSpec((None, nh, tk, dh), lambda b, i, j: (b, 0, j, 0)),  # v
            pl.BlockSpec((tq, dh), lambda b, i, j: (i, 0)),                  # cos (q rows)
            pl.BlockSpec((tq, dh), lambda b, i, j: (i, 0)),                  # signed sin (q rows)
            pl.BlockSpec((tk, dh), lambda b, i, j: (j, 0)),                  # cos (k rows)
            pl.BlockSpec((tk, dh), lambda b, i, j: (j, 0)),                  # signed sin (k rows)
        ],
        out_specs=pl.BlockSpec((None, nh, tq, dh), lambda b, i, j: (b, 0, i, 0)),
        scratch_shapes=[
            pltpu.VMEM((nh, tq, dh), jnp.bfloat16),   # rope(q) * scale cached per Q tile
            pltpu.VMEM((nh, tq, 1), jnp.float32),     # running max
            pltpu.VMEM((nh, tq, 1), jnp.float32),     # running sum
            pltpu.VMEM((nh, tq, dh), jnp.float32),    # output accumulator
        ],
        compiler_params=cparams(("parallel", "parallel", "arbitrary")),
    )(q, k, v, cos, sin_signed, cos, sin_signed)

    # head merge (torch .permute(0,2,1,3).contiguous().view(B,S,E)).
    attn = attn_h.transpose(0, 2, 1, 3).reshape(B, S, E)

    # ---- kernel 3: out-proj + residual + RMSNorm + FFN + residual ----------
    out = pl.pallas_call(
        functools.partial(_post_block_kernel, rms_scale=rms_scale, ffn_hidden=H),
        out_shape=jax.ShapeDtypeStruct((B, S, E), jnp.float32),
        grid=(B, n_s),
        in_specs=[
            pl.BlockSpec((None, ts, E), lambda b, s: (b, s, 0)),   # x (residual, f32)
            pl.BlockSpec((None, ts, E), lambda b, s: (b, s, 0)),   # attention out (bf16)
            pl.BlockSpec((E, E), lambda b, s: (0, 0)),
            pl.BlockSpec((1, E), lambda b, s: (0, 0)),
            pl.BlockSpec((E, H), lambda b, s: (0, 0)),
            pl.BlockSpec((H, 2 * H), lambda b, s: (0, 0)),
            pl.BlockSpec((1, 2 * H), lambda b, s: (0, 0)),
            pl.BlockSpec((H, E), lambda b, s: (0, 0)),
        ],
        out_specs=pl.BlockSpec((None, ts, E), lambda b, s: (b, s, 0)),
        compiler_params=cparams(("parallel", "parallel")),
    )(x, attn, w_out_b, gain_ffn, w_ff1_b, w_sw_b, b_sw, w_ff2_b)
    return out


# ---------------------------------------------------------------------------
# Pure-JAX f32 reference (direct translation of the PyTorch module).
# ---------------------------------------------------------------------------
def reference_block(x, params, *, num_heads, ffn_hidden):
    (gain_attn, w_qkv, w_out, cos, sin, gain_ffn, w_ff1, w_sw, b_sw, w_ff2) = params
    B, S, E = x.shape
    dh = E // num_heads
    rms_scale = E ** 0.5

    def rmsnorm(t, gain):
        n = jnp.linalg.norm(t, axis=-1, keepdims=True)
        return rms_scale * gain * t / (n + EPS)

    def rope(t):  # (B, nh, S, dh)
        half = dh // 2
        t1, t2 = t[..., :half], t[..., half:]
        rot = jnp.concatenate([-t2, t1], axis=-1)
        return t * cos[None, None] + rot * sin[None, None]

    xn = rmsnorm(x, gain_attn)
    qkv = xn @ w_qkv
    q, k, v = jnp.split(qkv, 3, axis=-1)
    to_heads = lambda t: t.reshape(B, S, num_heads, dh).transpose(0, 2, 1, 3)
    q, k, v = to_heads(q), to_heads(k), to_heads(v)
    q, k = rope(q), rope(k)
    scores = jnp.einsum("bhqd,bhkd->bhqk", q, k) * E ** (-0.5)
    mask = jnp.triu(jnp.ones((S, S), dtype=bool), k=1)
    scores = jnp.where(mask[None, None], -jnp.inf, scores)
    p = jax.nn.softmax(scores, axis=-1)
    out = jnp.einsum("bhqk,bhkd->bhqd", p, v)
    out = out.transpose(0, 2, 1, 3).reshape(B, S, E) @ w_out
    x = x + out

    xn2 = rmsnorm(x, gain_ffn)
    h1 = xn2 @ w_ff1
    g = h1 @ w_sw + b_sw
    sw = jax.nn.silu(g[..., :ffn_hidden]) + g[..., ffn_hidden:]
    return x + sw @ w_ff2


if __name__ == "__main__":
    # "Small" but TPU-aligned sizes: every dim is an (8,128) multiple so all loads/stores
    # are lane-dense and Dh equals the native 128-lane width.
    B, S, E = 2, 256, 256
    num_heads = 2
    dim_head = E // num_heads          # 128
    ffn_hidden = 512

    key = jax.random.PRNGKey(0)
    kx, k1, k2, k3, k4, k5, k6 = jax.random.split(key, 7)

    x = jax.random.normal(kx, (B, S, E), dtype=jnp.float32)

    gain_attn = jnp.ones((1, E), jnp.float32)
    w_qkv = 0.05 * jax.random.normal(k1, (E, 3 * E), jnp.float32)
    w_out = 0.05 * jax.random.normal(k2, (E, E), jnp.float32)
    gain_ffn = jnp.ones((1, E), jnp.float32)
    w_ff1 = 0.05 * jax.random.normal(k3, (E, ffn_hidden), jnp.float32)
    w_sw = 0.05 * jax.random.normal(k4, (ffn_hidden, 2 * ffn_hidden), jnp.float32)
    b_sw = 0.05 * jax.random.normal(k5, (1, 2 * ffn_hidden), jnp.float32)
    w_ff2 = 0.05 * jax.random.normal(k6, (ffn_hidden, E), jnp.float32)

    # rotary positional encoding buffers (per-head dim), as in the torch module
    idx = jnp.arange(S, dtype=jnp.float32)
    rscale = 1.0 / (ROPE_BASE ** (jnp.arange(0, dim_head, 2, dtype=jnp.float32) / dim_head) + EPS)
    pos = jnp.outer(idx, rscale)
    pos = jnp.concatenate([pos, pos], axis=-1)     # (S, Dh)
    cos = jnp.cos(pos)
    sin = jnp.sin(pos)

    params = (gain_attn, w_qkv, w_out, cos, sin, gain_ffn, w_ff1, w_sw, b_sw, w_ff2)

    out = transformer_block(x, params, num_heads=num_heads, ffn_hidden=ffn_hidden)
    out = jax.block_until_ready(out)

    ref = reference_block(x, params, num_heads=num_heads, ffn_hidden=ffn_hidden)
    assert out.shape == (B, S, E)
    # bf16 MXU inputs + approximate EUP reciprocals => compare at bf16-level tolerance.
    max_err = float(jnp.max(jnp.abs(out - ref)))
    assert jnp.allclose(out, ref, atol=5e-2, rtol=5e-2), f"mismatch vs reference (max abs err {max_err})"

    print("KERNEL_OK")
</pallas_src>

<mosaic_0001>
module attributes {stable_mosaic.version = 11 : i64} {
  func.func @_rmsnorm_qkv_kernel(%arg0: i32, %arg1: i32, %arg2: memref<1x128x256xf32, #tpu.memory_space<vmem>>, %arg3: memref<1x256xf32, #tpu.memory_space<vmem>>, %arg4: memref<256x768xbf16, #tpu.memory_space<vmem>>, %arg5: memref<1x128x768xbf16, #tpu.memory_space<vmem>>) attributes {dimension_semantics = [#tpu.dimension_semantics<parallel>, #tpu.dimension_semantics<parallel>], iteration_bounds = array<i64: 2, 2>, scalar_prefetch = 0 : i64, scratch_operands = 0 : i64, tpu.core_type = #tpu.core_type<tc>, window_params = [{transform_indices = @transform_0, window_bounds = array<i64: 1, 128, 256>}, {pipeline_mode = #tpu.pipeline_mode<synchronous>, transform_indices = @transform_1, window_bounds = array<i64: 1, 256>}, {pipeline_mode = #tpu.pipeline_mode<synchronous>, transform_indices = @transform_2, window_bounds = array<i64: 256, 768>}, {transform_indices = @transform_3, window_bounds = array<i64: 1, 128, 768>}]} {
    %c0 = arith.constant 0 : index
    %c0_0 = arith.constant 0 : index
    %c0_1 = arith.constant 0 : index
    %0 = vector.load %arg2[%c0, %c0_0, %c0_1] : memref<1x128x256xf32, #tpu.memory_space<vmem>>, vector<1x128x256xf32>
    %1 = vector.shape_cast %0 : vector<1x128x256xf32> to vector<128x256xf32>
    %2 = arith.mulf %1, %1 : vector<128x256xf32>
    %cst = arith.constant dense<0.000000e+00> : vector<128xf32>
    %3 = vector.multi_reduction <add>, %2, %cst [1] : vector<128x256xf32> to vector<128xf32>
    %4 = vector.shape_cast %3 : vector<128xf32> to vector<128x1xf32>
    %5 = math.sqrt %4 : vector<128x1xf32>
    %cst_2 = arith.constant 1.1920929E-7 : f32
    %6 = vector.broadcast %cst_2 : f32 to vector<128x1xf32>
    %7 = arith.addf %5, %6 : vector<128x1xf32>
    %8 = tpu.reciprocal %7 {approx = true} : vector<128x1xf32> -> vector<128x1xf32>
    %c0_3 = arith.constant 0 : index
    %c0_4 = arith.constant 0 : index
    %9 = vector.load %arg3[%c0_3, %c0_4] : memref<1x256xf32, #tpu.memory_space<vmem>>, vector<1x256xf32>
    %cst_5 = arith.constant 1.600000e+01 : f32
    %10 = vector.broadcast %cst_5 : f32 to vector<1x256xf32>
    %11 = arith.mulf %10, %9 : vector<1x256xf32>
    %12 = vector.broadcast %11 : vector<1x256xf32> to vector<128x256xf32>
    %13 = arith.mulf %12, %1 : vector<128x256xf32>
    %14 = vector.broadcast %8 : vector<128x1xf32> to vector<128x256xf32>
    %15 = arith.mulf %13, %14 : vector<128x256xf32>
    %16 = arith.truncf %15 : vector<128x256xf32> to vector<128x256xbf16>
    %c0_6 = arith.constant 0 : index
    %c0_7 = arith.constant 0 : index
    %17 = vector.load %arg4[%c0_6, %c0_7] : memref<256x768xbf16, #tpu.memory_space<vmem>>, vector<256x768xbf16>
    %cst_8 = arith.constant dense<0.000000e+00> : vector<128x768xf32>
    %18 = tpu.matmul %16, %17, %cst_8 {dimension_numbers = #tpu.dot_dimension_numbers<[1], [0], [0], [1], [0, 0, 1, 1], [], []>} : vector<128x256xbf16>, vector<256x768xbf16>, vector<128x768xf32> -> vector<128x768xf32>
    %19 = arith.truncf %18 : vector<128x768xf32> to vector<128x768xbf16>
    %c0_9 = arith.constant 0 : index
    %c0_10 = arith.constant 0 : index
    %c0_11 = arith.constant 0 : index
    %20 = vector.load %arg5[%c0_9, %c0_10, %c0_11] : memref<1x128x768xbf16, #tpu.memory_space<vmem>>, vector<1x128x768xbf16>
    %21 = vector.shape_cast %20 : vector<1x128x768xbf16> to vector<128x768xbf16>
    %22 = vector.shape_cast %19 : vector<128x768xbf16> to vector<1x128x768xbf16>
    tpu.vector_store %arg5[%c0_9, %c0_10, %c0_11], %22 {strides = array<i32>} : memref<1x128x768xbf16, #tpu.memory_space<vmem>>, vector<1x128x768xbf16>,
    return
  }
  func.func @transform_0(%arg0: i32, %arg1: i32) -> (i32, i32, i32) {
    %c0_i32 = arith.constant 0 : i32
    %c0_i32_0 = arith.constant 0 : i32
    return %arg0, %arg1, %c0_i32 : i32, i32, i32
  }
  func.func @transform_1(%arg0: i32, %arg1: i32) -> (i32, i32) {
    %c0_i32 = arith.constant 0 : i32
    %c0_i32_0 = arith.constant 0 : i32
    %c0_i32_1 = arith.constant 0 : i32
    return %c0_i32, %c0_i32_0 : i32, i32
  }
  func.func @transform_2(%arg0: i32, %arg1: i32) -> (i32, i32) {
    %c0_i32 = arith.constant 0 : i32
    %c0_i32_0 = arith.constant 0 : i32
    %c0_i32_1 = arith.constant 0 : i32
    return %c0_i32, %c0_i32_0 : i32, i32
  }
  func.func @transform_3(%arg0: i32, %arg1: i32) -> (i32, i32, i32) {
    %c0_i32 = arith.constant 0 : i32
    %c0_i32_0 = arith.constant 0 : i32
    return %arg0, %arg1, %c0_i32 : i32, i32, i32
  }
}

module attributes {stable_mosaic.version = 11 : i64} {
  func.func @_flash_attn_kernel(%arg0: i32, %arg1: i32, %arg2: i32, %arg3: memref<1x2x128x128xbf16, #tpu.memory_space<vmem>>, %arg4: memref<1x2x128x128xbf16, #tpu.memory_space<vmem>>, %arg5: memref<1x2x128x128xbf16, #tpu.memory_space<vmem>>, %arg6: memref<128x128xf32, #tpu.memory_space<vmem>>, %arg7: memref<128x128xf32, #tpu.memory_space<vmem>>, %arg8: memref<128x128xf32, #tpu.memory_space<vmem>>, %arg9: memref<128x128xf32, #tpu.memory_space<vmem>>, %arg10: memref<1x2x128x128xbf16, #tpu.memory_space<vmem>>, %arg11: memref<2x128x128xbf16, #tpu.memory_space<vmem>>, %arg12: memref<2x128x1xf32, #tpu.memory_space<vmem>>, %arg13: memref<2x128x1xf32, #tpu.memory_space<vmem>>, %arg14: memref<2x128x128xf32, #tpu.memory_space<vmem>>) attributes {dimension_semantics = [#tpu.dimension_semantics<parallel>, #tpu.dimension_semantics<parallel>, #tpu.dimension_semantics<arbitrary>], iteration_bounds = array<i64: 2, 2, 2>, scalar_prefetch = 0 : i64, scratch_operands = 4 : i64, tpu.core_type = #tpu.core_type<tc>, window_params = [{transform_indices = @transform_0, window_bounds = array<i64: 1, 2, 128, 128>}, {transform_indices = @transform_1, window_bounds = array<i64: 1, 2, 128, 128>}, {transform_indices = @transform_2, window_bounds = array<i64: 1, 2, 128, 128>}, {transform_indices = @transform_3, window_bounds = array<i64: 128, 128>}, {transform_indices = @transform_4, window_bounds = array<i64: 128, 128>}, {transform_indices = @transform_5, window_bounds = array<i64: 128, 128>}, {transform_indices = @transform_6, window_bounds = array<i64: 128, 128>}, {transform_indices = @transform_7, window_bounds = array<i64: 1, 2, 128, 128>}]} {
    %c128_i32 = arith.constant 128 : i32
    %0 = arith.muli %arg1, %c128_i32 : i32
    %c128_i32_0 = arith.constant 128 : i32
    %1 = arith.muli %arg2, %c128_i32_0 : i32
    %c0_i32 = arith.constant 0 : i32
    %2 = arith.cmpi eq, %arg2, %c0_i32 : i32
    %3 = arith.extui %2 : i1 to i32
    %c0_i32_1 = arith.constant 0 : i32
    %4 = arith.cmpi ne, %3, %c0_i32_1 : i32
    scf.if %4 {
      %cst = arith.constant -1.000000e+30 : f32
      %13 = vector.broadcast %cst : f32 to vector<2x128x1xf32>
      %c0 = arith.constant 0 : index
      %c0_6 = arith.constant 0 : index
      %c0_7 = arith.constant 0 : index
      %14 = vector.load %arg12[%c0, %c0_6, %c0_7] : memref<2x128x1xf32, #tpu.memory_space<vmem>>, vector<2x128x1xf32>
      tpu.vector_store %arg12[%c0, %c0_6, %c0_7], %13 {strides = array<i32>} : memref<2x128x1xf32, #tpu.memory_space<vmem>>, vector<2x128x1xf32>,
      %cst_8 = arith.constant 0.000000e+00 : f32
      %15 = vector.broadcast %cst_8 : f32 to vector<2x128x1xf32>
      %c0_9 = arith.constant 0 : index
      %c0_10 = arith.constant 0 : index
      %c0_11 = arith.constant 0 : index
      %16 = vector.load %arg13[%c0_9, %c0_10, %c0_11] : memref<2x128x1xf32, #tpu.memory_space<vmem>>, vector<2x128x1xf32>
      tpu.vector_store %arg13[%c0_9, %c0_10, %c0_11], %15 {strides = array<i32>} : memref<2x128x1xf32, #tpu.memory_space<vmem>>, vector<2x128x1xf32>,
      %cst_12 = arith.constant 0.000000e+00 : f32
      %17 = vector.broadcast %cst_12 : f32 to vector<2x128x128xf32>
      %c0_13 = arith.constant 0 : index
      %c0_14 = arith.constant 0 : index
      %c0_15 = arith.constant 0 : index
      %18 = vector.load %arg14[%c0_13, %c0_14, %c0_15] : memref<2x128x128xf32, #tpu.memory_space<vmem>>, vector<2x128x128xf32>
      tpu.vector_store %arg14[%c0_13, %c0_14, %c0_15], %17 {strides = array<i32>} : memref<2x128x128xf32, #tpu.memory_space<vmem>>, vector<2x128x128xf32>,
      %c0_16 = arith.constant 0 : index
      %c0_17 = arith.constant 0 : index
      %c0_18 = arith.constant 0 : index
      %c0_19 = arith.constant 0 : index
      %19 = vector.load %arg3[%c0_16, %c0_17, %c0_18, %c0_19] : memref<1x2x128x128xbf16, #tpu.memory_space<vmem>>, vector<1x2x128x128xbf16>
      %20 = vector.shape_cast %19 : vector<1x2x128x128xbf16> to vector<2x128x128xbf16>
      %21 = arith.extf %20 : vector<2x128x128xbf16> to vector<2x128x128xf32>
      %c0_20 = arith.constant 0 : index
      %c0_21 = arith.constant 0 : index
      %22 = vector.load %arg6[%c0_20, %c0_21] : memref<128x128xf32, #tpu.memory_space<vmem>>, vector<128x128xf32>
      %c0_22 = arith.constant 0 : index
      %c0_23 = arith.constant 0 : index
      %23 = vector.load %arg7[%c0_22, %c0_23] : memref<128x128xf32, #tpu.memory_space<vmem>>, vector<128x128xf32>
      %c64_i32 = arith.constant 64 : i32
      %24 = tpu.dynamic_rotate %21 by %c64_i32 dim 2 : vector<2x128x128xf32>, i32 -> vector<2x128x128xf32>
      %25 = vector.shape_cast %22 : vector<128x128xf32> to vector<1x128x128xf32>
      %26 = vector.broadcast %25 : vector<1x128x128xf32> to vector<2x128x128xf32>
      %27 = arith.mulf %21, %26 : vector<2x128x128xf32>
      %28 = vector.shape_cast %23 : vector<128x128xf32> to vector<1x128x128xf32>
      %29 = vector.broadcast %28 : vector<1x128x128xf32> to vector<2x128x128xf32>
      %30 = arith.mulf %24, %29 : vector<2x128x128xf32>
      %31 = arith.addf %27, %30 : vector<2x128x128xf32>
      %cst_24 = arith.constant 6.250000e-02 : f32
      %32 = vector.broadcast %cst_24 : f32 to vector<2x128x128xf32>
      %33 = arith.mulf %31, %32 : vector<2x128x128xf32>
      %34 = arith.truncf %33 : vector<2x128x128xf32> to vector<2x128x128xbf16>
      %c0_25 = arith.constant 0 : index
      %c0_26 = arith.constant 0 : index
      %c0_27 = arith.constant 0 : index
      %35 = vector.load %arg11[%c0_25, %c0_26, %c0_27] : memref<2x128x128xbf16, #tpu.memory_space<vmem>>, vector<2x128x128xbf16>
      tpu.vector_store %arg11[%c0_25, %c0_26, %c0_27], %34 {strides = array<i32>} : memref<2x128x128xbf16, #tpu.memory_space<vmem>>, vector<2x128x128xbf16>,
    } else {
    }
    %c128_i32_2 = arith.constant 128 : i32
    %5 = arith.addi %0, %c128_i32_2 : i32
    %c1_i32 = arith.constant 1 : i32
    %6 = arith.subi %5, %c1_i32 : i32
    %7 = arith.cmpi sle, %1, %6 : i32
    %8 = arith.extui %7 : i1 to i32
    %c0_i32_3 = arith.constant 0 : i32
    %9 = arith.cmpi ne, %8, %c0_i32_3 : i32
    scf.if %9 {
      %c0 = arith.constant 0 : index
      %c0_6 = arith.constant 0 : index
      %c0_7 = arith.constant 0 : index
      %c0_8 = arith.constant 0 : index
      %13 = vector.load %arg4[%c0, %c0_6, %c0_7, %c0_8] : memref<1x2x128x128xbf16, #tpu.memory_space<vmem>>, vector<1x2x128x128xbf16>
      %14 = vector.shape_cast %13 : vector<1x2x128x128xbf16> to vector<2x128x128xbf16>
      %15 = arith.extf %14 : vector<2x128x128xbf16> to vector<2x128x128xf32>
      %c0_9 = arith.constant 0 : index
      %c0_10 = arith.constant 0 : index
      %16 = vector.load %arg8[%c0_9, %c0_10] : memref<128x128xf32, #tpu.memory_space<vmem>>, vector<128x128xf32>
      %c0_11 = arith.constant 0 : index
      %c0_12 = arith.constant 0 : index
      %17 = vector.load %arg9[%c0_11, %c0_12] : memref<128x128xf32, #tpu.memory_space<vmem>>, vector<128x128xf32>
      %c64_i32 = arith.constant 64 : i32
      %18 = tpu.dynamic_rotate %15 by %c64_i32 dim 2 : vector<2x128x128xf32>, i32 -> vector<2x128x128xf32>
      %19 = vector.shape_cast %16 : vector<128x128xf32> to vector<1x128x128xf32>
      %20 = vector.broadcast %19 : vector<1x128x128xf32> to vector<2x128x128xf32>
      %21 = arith.mulf %15, %20 : vector<2x128x128xf32>
      %22 = vector.shape_cast %17 : vector<128x128xf32> to vector<1x128x128xf32>
      %23 = vector.broadcast %22 : vector<1x128x128xf32> to vector<2x128x128xf32>
      %24 = arith.mulf %18, %23 : vector<2x128x128xf32>
      %25 = arith.addf %21, %24 : vector<2x128x128xf32>
      %26 = arith.truncf %25 : vector<2x128x128xf32> to vector<2x128x128xbf16>
      %c0_13 = arith.constant 0 : index
      %c0_14 = arith.constant 0 : index
      %c0_15 = arith.constant 0 : index
      %27 = vector.load %arg11[%c0_13, %c0_14, %c0_15] : memref<2x128x128xbf16, #tpu.memory_space<vmem>>, vector<2x128x128xbf16>
      "tpu.trace_start"() <{level = 10 : i32, message = "hqd,hkd->hqk"}> : () -> ()
      %cst = arith.constant dense<0.000000e+00> : vector<2x128x128xf32>
      %28 = tpu.matmul %27, %26, %cst {dimension_numbers = #tpu.dot_dimension_numbers<[2], [2], [1], [1], [0, 0, 0, 1, 1, 1], [0], [0]>} : vector<2x128x128xbf16>, vector<2x128x128xbf16>, vector<2x128x128xf32> -> vector<2x128x128xf32>
      "tpu.trace_stop"() : () -> ()
      %29 = tpu.iota {dimensions = array<i32: 1>} : vector<2x128x128xi32>
      %30 = vector.broadcast %0 : i32 to vector<2x128x128xi32>
      %31 = arith.addi %30, %29 : vector<2x128x128xi32>
      %32 = tpu.iota {dimensions = array<i32: 2>} : vector<2x128x128xi32>
      %33 = vector.broadcast %1 : i32 to vector<2x128x128xi32>
      %34 = arith.addi %33, %32 : vector<2x128x128xi32>
      %35 = arith.cmpi sgt, %34, %31 : vector<2x128x128xi32>
      %cst_16 = arith.constant -1.000000e+30 : f32
      %36 = vector.broadcast %cst_16 : f32 to vector<2x128x128xf32>
      %37 = arith.select %35, %36, %28 : vector<2x128x128xi1>, vector<2x128x128xf32>
      %c0_17 = arith.constant 0 : index
      %c0_18 = arith.constant 0 : index
      %c0_19 = arith.constant 0 : index
      %38 = vector.load %arg12[%c0_17, %c0_18, %c0_19] : memref<2x128x1xf32, #tpu.memory_space<vmem>>, vector<2x128x1xf32>
      %cst_20 = arith.constant dense<0xFF800000> : vector<2x128xf32>
      %39 = vector.multi_reduction <maximumf>, %37, %cst_20 [2] : vector<2x128x128xf32> to vector<2x128xf32>
      %40 = vector.shape_cast %39 : vector<2x128xf32> to vector<2x128x1xf32>
      %41 = arith.maximumf %38, %40 : vector<2x128x1xf32>
      %c0_21 = arith.constant 0 : index
      %c0_22 = arith.constant 0 : index
      %c0_23 = arith.constant 0 : index
      %42 = vector.load %arg12[%c0_21, %c0_22, %c0_23] : memref<2x128x1xf32, #tpu.memory_space<vmem>>, vector<2x128x1xf32>
      %43 = arith.subf %42, %41 : vector<2x128x1xf32>
      %44 = math.exp %43 : vector<2x128x1xf32>
      %45 = vector.broadcast %41 : vector<2x128x1xf32> to vector<2x128x128xf32>
      %46 = arith.subf %37, %45 : vector<2x128x128xf32>
      %47 = math.exp %46 : vector<2x128x128xf32>
      %c0_24 = arith.constant 0 : index
      %c0_25 = arith.constant 0 : index
      %c0_26 = arith.constant 0 : index
      %48 = vector.load %arg13[%c0_24, %c0_25, %c0_26] : memref<2x128x1xf32, #tpu.memory_space<vmem>>, vector<2x128x1xf32>
      %49 = arith.mulf %44, %48 : vector<2x128x1xf32>
      %cst_27 = arith.constant dense<0.000000e+00> : vector<2x128xf32>
      %50 = vector.multi_reduction <add>, %47, %cst_27 [2] : vector<2x128x128xf32> to vector<2x128xf32>
      %51 = vector.shape_cast %50 : vector<2x128xf32> to vector<2x128x1xf32>
      %52 = arith.addf %49, %51 : vector<2x128x1xf32>
      %c0_28 = arith.constant 0 : index
      %c0_29 = arith.constant 0 : index
      %c0_30 = arith.constant 0 : index
      %53 = vector.load %arg13[%c0_28, %c0_29, %c0_30] : memref<2x128x1xf32, #tpu.memory_space<vmem>>, vector<2x128x1xf32>
      tpu.vector_store %arg13[%c0_28, %c0_29, %c0_30], %52 {strides = array<i32>} : memref<2x128x1xf32, #tpu.memory_space<vmem>>, vector<2x128x1xf32>,
      %c0_31 = arith.constant 0 : index
      %c0_32 = arith.constant 0 : index
      %c0_33 = arith.constant 0 : index
      %54 = vector.load %arg14[%c0_31, %c0_32, %c0_33] : memref<2x128x128xf32, #tpu.memory_space<vmem>>, vector<2x128x128xf32>
      %55 = vector.broadcast %44 : vector<2x128x1xf32> to vector<2x128x128xf32>
      %56 = arith.mulf %55, %54 : vector<2x128x128xf32>
      %57 = arith.truncf %47 : vector<2x128x128xf32> to vector<2x128x128xbf16>
      %c0_34 = arith.constant 0 : index
      %c0_35 = arith.constant 0 : index
      %c0_36 = arith.constant 0 : index
      %c0_37 = arith.constant 0 : index
      %58 = vector.load %arg5[%c0_34, %c0_35, %c0_36, %c0_37] : memref<1x2x128x128xbf16, #tpu.memory_space<vmem>>, vector<1x2x128x128xbf16>
      %59 = vector.shape_cast %58 : vector<1x2x128x128xbf16> to vector<2x128x128xbf16>
      "tpu.trace_start"() <{level = 10 : i32, message = "hqk,hkd->hqd"}> : () -> ()
      %cst_38 = arith.constant dense<0.000000e+00> : vector<2x128x128xf32>
      %60 = tpu.matmul %57, %59, %cst_38 {dimension_numbers = #tpu.dot_dimension_numbers<[2], [1], [1], [2], [0, 0, 0, 1, 1, 2], [0], [0]>} : vector<2x128x128xbf16>, vector<2x128x128xbf16>, vector<2x128x128xf32> -> vector<2x128x128xf32>
      "tpu.trace_stop"() : () -> ()
      %61 = arith.addf %56, %60 : vector<2x128x128xf32>
      %c0_39 = arith.constant 0 : index
      %c0_40 = arith.constant 0 : index
      %c0_41 = arith.constant 0 : index
      %62 = vector.load %arg14[%c0_39, %c0_40, %c0_41] : memref<2x128x128xf32, #tpu.memory_space<vmem>>, vector<2x128x128xf32>
      tpu.vector_store %arg14[%c0_39, %c0_40, %c0_41], %61 {strides = array<i32>} : memref<2x128x128xf32, #tpu.memory_space<vmem>>, vector<2x128x128xf32>,
      %c0_42 = arith.constant 0 : index
      %c0_43 = arith.constant 0 : index
      %c0_44 = arith.constant 0 : index
      %63 = vector.load %arg12[%c0_42, %c0_43, %c0_44] : memref<2x128x1xf32, #tpu.memory_space<vmem>>, vector<2x128x1xf32>
      tpu.vector_store %arg12[%c0_42, %c0_43, %c0_44], %41 {strides = array<i32>} : memref<2x128x1xf32, #tpu.memory_space<vmem>>, vector<2x128x1xf32>,
    } else {
    }
    %c1_i32_4 = arith.constant 1 : i32
    %10 = arith.cmpi eq, %arg2, %c1_i32_4 : i32
    %11 = arith.extui %10 : i1 to i32
    %c0_i32_5 = arith.constant 0 : i32
    %12 = arith.cmpi ne, %11, %c0_i32_5 : i32
    scf.if %12 {
      %c0 = arith.constant 0 : index
      %c0_6 = arith.constant 0 : index
      %c0_7 = arith.constant 0 : index
      %13 = vector.load %arg14[%c0, %c0_6, %c0_7] : memref<2x128x128xf32, #tpu.memory_space<vmem>>, vector<2x128x128xf32>
      %c0_8 = arith.constant 0 : index
      %c0_9 = arith.constant 0 : index
      %c0_10 = arith.constant 0 : index
      %14 = vector.load %arg13[%c0_8, %c0_9, %c0_10] : memref<2x128x1xf32, #tpu.memory_space<vmem>>, vector<2x128x1xf32>
      %15 = tpu.reciprocal %14 {approx = true} : vector<2x128x1xf32> -> vector<2x128x1xf32>
      %16 = vector.broadcast %15 : vector<2x128x1xf32> to vector<2x128x128xf32>
      %17 = arith.mulf %13, %16 : vector<2x128x128xf32>
      %18 = arith.truncf %17 : vector<2x128x128xf32> to vector<2x128x128xbf16>
      %c0_11 = arith.constant 0 : index
      %c0_12 = arith.constant 0 : index
      %c0_13 = arith.constant 0 : index
      %c0_14 = arith.constant 0 : index
      %19 = vector.load %arg10[%c0_11, %c0_12, %c0_13, %c0_14] : memref<1x2x128x128xbf16, #tpu.memory_space<vmem>>, vector<1x2x128x128xbf16>
      %20 = vector.shape_cast %19 : vector<1x2x128x128xbf16> to vector<2x128x128xbf16>
      %21 = vector.shape_cast %18 : vector<2x128x128xbf16> to vector<1x2x128x128xbf16>
      tpu.vector_store %arg10[%c0_11, %c0_12, %c0_13, %c0_14], %21 {strides = array<i32>} : memref<1x2x128x128xbf16, #tpu.memory_space<vmem>>, vector<1x2x128x128xbf16>,
    } else {
    }
    return
  }
  func.func @transform_0(%arg0: i32, %arg1: i32, %arg2: i32) -> (i32, i32, i32, i32) {
    %c0_i32 = arith.constant 0 : i32
    %c0_i32_0 = arith.constant 0 : i32
    %c0_i32_1 = arith.constant 0 : i32
    return %arg0, %c0_i32, %arg1, %c0_i32_0 : i32, i32, i32, i32
  }
  func.func @transform_1(%arg0: i32, %arg1: i32, %arg2: i32) -> (i32, i32, i32, i32) {
    %c0_i32 = arith.constant 0 : i32
    %c0_i32_0 = arith.constant 0 : i32
    %c0_i32_1 = arith.constant 0 : i32
    return %arg0, %c0_i32, %arg2, %c0_i32_0 : i32, i32, i32, i32
  }
  func.func @transform_2(%arg0: i32, %arg1: i32, %arg2: i32) -> (i32, i32, i32, i32) {
    %c0_i32 = arith.constant 0 : i32
    %c0_i32_0 = arith.constant 0 : i32
    %c0_i32_1 = arith.constant 0 : i32
    return %arg0, %c0_i32, %arg2, %c0_i32_0 : i32, i32, i32, i32
  }
  func.func @transform_3(%arg0: i32, %arg1: i32, %arg2: i32) -> (i32, i32) {
    %c0_i32 = arith.constant 0 : i32
    %c0_i32_0 = arith.constant 0 : i32
    return %arg1, %c0_i32 : i32, i32
  }
  func.func @transform_4(%arg0: i32, %arg1: i32, %arg2: i32) -> (i32, i32) {
    %c0_i32 = arith.constant 0 : i32
    %c0_i32_0 = arith.constant 0 : i32
    return %arg1, %c0_i32 : i32, i32
  }
  func.func @transform_5(%arg0: i32, %arg1: i32, %arg2: i32) -> (i32, i32) {
    %c0_i32 = arith.constant 0 : i32
    %c0_i32_0 = arith.constant 0 : i32
    return %arg2, %c0_i32 : i32, i32
  }
  func.func @transform_6(%arg0: i32, %arg1: i32, %arg2: i32) -> (i32, i32) {
    %c0_i32 = arith.constant 0 : i32
    %c0_i32_0 = arith.constant 0 : i32
    return %arg2, %c0_i32 : i32, i32
  }
  func.func @transform_7(%arg0: i32, %arg1: i32, %arg2: i32) -> (i32, i32, i32, i32) {
    %c0_i32 = arith.constant 0 : i32
    %c0_i32_0 = arith.constant 0 : i32
    %c0_i32_1 = arith.constant 0 : i32
    return %arg0, %c0_i32, %arg1, %c0_i32_0 : i32, i32, i32, i32
  }
}

module attributes {stable_mosaic.version = 11 : i64} {
  func.func @_post_block_kernel(%arg0: i32, %arg1: i32, %arg2: memref<1x128x256xf32, #tpu.memory_space<vmem>>, %arg3: memref<1x128x256xbf16, #tpu.memory_space<vmem>>, %arg4: memref<256x256xbf16, #tpu.memory_space<vmem>>, %arg5: memref<1x256xf32, #tpu.memory_space<vmem>>, %arg6: memref<256x512xbf16, #tpu.memory_space<vmem>>, %arg7: memref<512x1024xbf16, #tpu.memory_space<vmem>>, %arg8: memref<1x1024xf32, #tpu.memory_space<vmem>>, %arg9: memref<512x256xbf16, #tpu.memory_space<vmem>>, %arg10: memref<1x128x256xf32, #tpu.memory_space<vmem>>) attributes {dimension_semantics = [#tpu.dimension_semantics<parallel>, #tpu.dimension_semantics<parallel>], iteration_bounds = array<i64: 2, 2>, scalar_prefetch = 0 : i64, scratch_operands = 0 : i64, tpu.core_type = #tpu.core_type<tc>, window_params = [{transform_indices = @transform_0, window_bounds = array<i64: 1, 128, 256>}, {transform_indices = @transform_1, window_bounds = array<i64: 1, 128, 256>}, {pipeline_mode = #tpu.pipeline_mode<synchronous>, transform_indices = @transform_2, window_bounds = array<i64: 256, 256>}, {pipeline_mode = #tpu.pipeline_mode<synchronous>, transform_indices = @transform_3, window_bounds = array<i64: 1, 256>}, {pipeline_mode = #tpu.pipeline_mode<synchronous>, transform_indices = @transform_4, window_bounds = array<i64: 256, 512>}, {pipeline_mode = #tpu.pipeline_mode<synchronous>, transform_indices = @transform_5, window_bounds = array<i64: 512, 1024>}, {pipeline_mode = #tpu.pipeline_mode<synchronous>, transform_indices = @transform_6, window_bounds = array<i64: 1, 1024>}, {pipeline_mode = #tpu.pipeline_mode<synchronous>, transform_indices = @transform_7, window_bounds = array<i64: 512, 256>}, {transform_indices = @transform_8, window_bounds = array<i64: 1, 128, 256>}]} {
    %c0 = arith.constant 0 : index
    %c0_0 = arith.constant 0 : index
    %c0_1 = arith.constant 0 : index
    %0 = vector.load %arg2[%c0, %c0_0, %c0_1] : memref<1x128x256xf32, #tpu.memory_space<vmem>>, vector<1x128x256xf32>
    %1 = vector.shape_cast %0 : vector<1x128x256xf32> to vector<128x256xf32>
    %c0_2 = arith.constant 0 : index
    %c0_3 = arith.constant 0 : index
    %c0_4 = arith.constant 0 : index
    %2 = vector.load %arg3[%c0_2, %c0_3, %c0_4] : memref<1x128x256xbf16, #tpu.memory_space<vmem>>, vector<1x128x256xbf16>
    %3 = vector.shape_cast %2 : vector<1x128x256xbf16> to vector<128x256xbf16>
    %c0_5 = arith.constant 0 : index
    %c0_6 = arith.constant 0 : index
    %4 = vector.load %arg4[%c0_5, %c0_6] : memref<256x256xbf16, #tpu.memory_space<vmem>>, vector<256x256xbf16>
    %cst = arith.constant dense<0.000000e+00> : vector<128x256xf32>
    %5 = tpu.matmul %3, %4, %cst {dimension_numbers = #tpu.dot_dimension_numbers<[1], [0], [0], [1], [0, 0, 1, 1], [], []>} : vector<128x256xbf16>, vector<256x256xbf16>, vector<128x256xf32> -> vector<128x256xf32>
    %6 = arith.addf %1, %5 : vector<128x256xf32>
    %7 = arith.mulf %6, %6 : vector<128x256xf32>
    %cst_7 = arith.constant dense<0.000000e+00> : vector<128xf32>
    %8 = vector.multi_reduction <add>, %7, %cst_7 [1] : vector<128x256xf32> to vector<128xf32>
    %9 = vector.shape_cast %8 : vector<128xf32> to vector<128x1xf32>
    %10 = math.sqrt %9 : vector<128x1xf32>
    %cst_8 = arith.constant 1.1920929E-7 : f32
    %11 = vector.broadcast %cst_8 : f32 to vector<128x1xf32>
    %12 = arith.addf %10, %11 : vector<128x1xf32>
    %13 = tpu.reciprocal %12 {approx = true} : vector<128x1xf32> -> vector<128x1xf32>
    %c0_9 = arith.constant 0 : index
    %c0_10 = arith.constant 0 : index
    %14 = vector.load %arg5[%c0_9, %c0_10] : memref<1x256xf32, #tpu.memory_space<vmem>>, vector<1x256xf32>
    %cst_11 = arith.constant 1.600000e+01 : f32
    %15 = vector.broadcast %cst_11 : f32 to vector<1x256xf32>
    %16 = arith.mulf %15, %14 : vector<1x256xf32>
    %17 = vector.broadcast %16 : vector<1x256xf32> to vector<128x256xf32>
    %18 = arith.mulf %17, %6 : vector<128x256xf32>
    %19 = vector.broadcast %13 : vector<128x1xf32> to vector<128x256xf32>
    %20 = arith.mulf %18, %19 : vector<128x256xf32>
    %21 = arith.truncf %20 : vector<128x256xf32> to vector<128x256xbf16>
    %c0_12 = arith.constant 0 : index
    %c0_13 = arith.constant 0 : index
    %22 = vector.load %arg6[%c0_12, %c0_13] : memref<256x512xbf16, #tpu.memory_space<vmem>>, vector<256x512xbf16>
    %cst_14 = arith.constant dense<0.000000e+00> : vector<128x512xf32>
    %23 = tpu.matmul %21, %22, %cst_14 {dimension_numbers = #tpu.dot_dimension_numbers<[1], [0], [0], [1], [0, 0, 1, 1], [], []>} : vector<128x256xbf16>, vector<256x512xbf16>, vector<128x512xf32> -> vector<128x512xf32>
    %24 = arith.truncf %23 : vector<128x512xf32> to vector<128x512xbf16>
    %c0_15 = arith.constant 0 : index
    %c0_16 = arith.constant 0 : index
    %25 = vector.load %arg7[%c0_15, %c0_16] : memref<512x1024xbf16, #tpu.memory_space<vmem>>, vector<512x1024xbf16>
    %cst_17 = arith.constant dense<0.000000e+00> : vector<128x1024xf32>
    %26 = tpu.matmul %24, %25, %cst_17 {dimension_numbers = #tpu.dot_dimension_numbers<[1], [0], [0], [1], [0, 0, 1, 1], [], []>} : vector<128x512xbf16>, vector<512x1024xbf16>, vector<128x1024xf32> -> vector<128x1024xf32>
    %c0_18 = arith.constant 0 : index
    %c0_19 = arith.constant 0 : index
    %27 = vector.load %arg8[%c0_18, %c0_19] : memref<1x1024xf32, #tpu.memory_space<vmem>>, vector<1x1024xf32>
    %28 = vector.broadcast %27 : vector<1x1024xf32> to vector<128x1024xf32>
    %29 = arith.addf %26, %28 : vector<128x1024xf32>
    %30 = vector.extract_strided_slice %29 {offsets = [0, 0], sizes = [128, 512], strides = [1, 1]} : vector<128x1024xf32> to vector<128x512xf32>
    %31 = vector.extract_strided_slice %29 {offsets = [0, 512], sizes = [128, 512], strides = [1, 1]} : vector<128x1024xf32> to vector<128x512xf32>
    %32 = arith.negf %30 : vector<128x512xf32>
    %33 = math.exp %32 : vector<128x512xf32>
    %cst_20 = arith.constant 1.000000e+00 : f32
    %34 = vector.broadcast %cst_20 : f32 to vector<128x512xf32>
    %35 = arith.addf %34, %33 : vector<128x512xf32>
    %36 = arith.divf %34, %35 : vector<128x512xf32>
    %37 = arith.mulf %30, %36 : vector<128x512xf32>
    %38 = arith.addf %37, %31 : vector<128x512xf32>
    %39 = arith.truncf %38 : vector<128x512xf32> to vector<128x512xbf16>
    %c0_21 = arith.constant 0 : index
    %c0_22 = arith.constant 0 : index
    %40 = vector.load %arg9[%c0_21, %c0_22] : memref<512x256xbf16, #tpu.memory_space<vmem>>, vector<512x256xbf16>
    %cst_23 = arith.constant dense<0.000000e+00> : vector<128x256xf32>
    %41 = tpu.matmul %39, %40, %cst_23 {dimension_numbers = #tpu.dot_dimension_numbers<[1], [0], [0], [1], [0, 0, 1, 1], [], []>} : vector<128x512xbf16>, vector<512x256xbf16>, vector<128x256xf32> -> vector<128x256xf32>
    %42 = arith.addf %6, %41 : vector<128x256xf32>
    %c0_24 = arith.constant 0 : index
    %c0_25 = arith.constant 0 : index
    %c0_26 = arith.constant 0 : index
    %43 = vector.load %arg10[%c0_24, %c0_25, %c0_26] : memref<1x128x256xf32, #tpu.memory_space<vmem>>, vector<1x128x256xf32>
    %44 = vector.shape_cast %43 : vector<1x128x256xf32> to vector<128x256xf32>
    %45 = vector.shape_cast %42 : vector<128x256xf32> to vector<1x128x256xf32>
    tpu.vector_store %arg10[%c0_24, %c0_25, %c0_26], %45 {strides = array<i32>} : memref<1x128x256xf32, #tpu.memory_space<vmem>>, vector<1x128x256xf32>,
    return
  }
  func.func @transform_0(%arg0: i32, %arg1: i32) -> (i32, i32, i32) {
    %c0_i32 = arith.constant 0 : i32
    %c0_i32_0 = arith.constant 0 : i32
    return %arg0, %arg1, %c0_i32 : i32, i32, i32
  }
  func.func @transform_1(%arg0: i32, %arg1: i32) -> (i32, i32, i32) {
    %c0_i32 = arith.constant 0 : i32
    %c0_i32_0 = arith.constant 0 : i32
    return %arg0, %arg1, %c0_i32 : i32, i32, i32
  }
  func.func @transform_2(%arg0: i32, %arg1: i32) -> (i32, i32) {
    %c0_i32 = arith.constant 0 : i32
    %c0_i32_0 = arith.constant 0 : i32
    %c0_i32_1 = arith.constant 0 : i32
    return %c0_i32, %c0_i32_0 : i32, i32
  }
  func.func @transform_3(%arg0: i32, %arg1: i32) -> (i32, i32) {
    %c0_i32 = arith.constant 0 : i32
    %c0_i32_0 = arith.constant 0 : i32
    %c0_i32_1 = arith.constant 0 : i32
    return %c0_i32, %c0_i32_0 : i32, i32
  }
  func.func @transform_4(%arg0: i32, %arg1: i32) -> (i32, i32) {
    %c0_i32 = arith.constant 0 : i32
    %c0_i32_0 = arith.constant 0 : i32
    %c0_i32_1 = arith.constant 0 : i32
    return %c0_i32, %c0_i32_0 : i32, i32
  }
  func.func @transform_5(%arg0: i32, %arg1: i32) -> (i32, i32) {
    %c0_i32 = arith.constant 0 : i32
    %c0_i32_0 = arith.constant 0 : i32
    %c0_i32_1 = arith.constant 0 : i32
    return %c0_i32, %c0_i32_0 : i32, i32
  }
  func.func @transform_6(%arg0: i32, %arg1: i32) -> (i32, i32) {
    %c0_i32 = arith.constant 0 : i32
    %c0_i32_0 = arith.constant 0 : i32
    %c0_i32_1 = arith.constant 0 : i32
    return %c0_i32, %c0_i32_0 : i32, i32
  }
  func.func @transform_7(%arg0: i32, %arg1: i32) -> (i32, i32) {
    %c0_i32 = arith.constant 0 : i32
    %c0_i32_0 = arith.constant 0 : i32
    %c0_i32_1 = arith.constant 0 : i32
    return %c0_i32, %c0_i32_0 : i32, i32
  }
  func.func @transform_8(%arg0: i32, %arg1: i32) -> (i32, i32, i32) {
    %c0_i32 = arith.constant 0 : i32
    %c0_i32_0 = arith.constant 0 : i32
    return %arg0, %arg1, %c0_i32 : i32, i32, i32
  }
}

</mosaic_0001>

<bundles_post_ra>
// kernel: transformer_block.3
= control target key start
LH: loop header
LB: loop body
LE: loop exit
PB: predicated region body
PF: predicated region fallthrough
CT: control target
= control target key end

     0   :  { %s2461_s12 = smov 0   ;;  %s2463_s13 = smov 0   ;;  %s3420_s0 = inlined_call_operand.vmem [shape: f32[2,256,256], index: 0, kind: input, shape index: {}]   ;;  %s3421_s1 = inlined_call_operand.vmem [shape: f32[1,256], index: 1, kind: input, shape index: {}]   ;;  %s3422_s2 = inlined_call_operand.vmem [shape: bf16[256,768], index: 2, kind: input, shape index: {}]   ;;  %s3423_s3 = inlined_call_operand.vmem [shape: bf16[2,256,768], index: 3, kind: output, shape index: {}]  }
   0x1   :  { %s2465_s14 = smov 0   ;;  %s2467_s15 = smov 0  }
   0x2   :  { %s2469_s16 = smov 0  }
   0x3 LB: > { %s22_s17 = sadd.s32 1, %s2431_s14  ;;  %s25_s18 = sadd.s32 1, %s2435_s15  ;;  %s2439_s16 = sphi %s2469_s16, %s13_s16   ;;  %s2435_s15 = sphi %s2467_s15, %s3427_s15   ;;  %s2431_s14 = sphi %s2465_s14, %s3426_s14   ;;  %s2427_s13 = sphi %s2463_s13, %s3425_s13   ;;  %s2423_s12 = sphi %s2461_s12, %s3424_s12  }
   0x4   : > { %p23_p0 = scmp.ge.s32.totalorder %s22_s17, 2  ;;  %p1918_p1 = scmp.ge.s32.totalorder %s2439_s16, 1 }
   0x5   : > { %p159_p2 = scmp.lt.s32.totalorder %s2439_s16, 5 }
   0x6   : > { %s3429_s17 = smov (%p23_p0, %s22_s17), 0  ;;  %s3431_s18 = smov (!%p23_p0, %s25_s18), %s2435_s15 }
   0x7   : > { %p160_p3 = pnand %p1918_p1, %p159_p2  ;;  %p27_p4 = scmp.ge.s32.totalorder %s3431_s18, 2 }
   0x8   : > { %s1919_s19 = sshll.u32 (!%p160_p3), %s2423_s12, 4  ;;  %p194_p5 = scmp.lt.s32.totalorder (!%p160_p3), %s2427_s13, 1 }
   0x9   : > { %s3433_s18 = smov (%p27_p4, %s3431_s18), 0  ;;  %163 = sbr.rel (%p160_p3) target bundleno = 497 (0x1f1), region = 32 }
   0xa   : > { %p196_p6 = scmp.lt.s32.totalorder (!%p160_p3), %s1919_s19, 31 }
   0xe   : > { %v2193_v0 = vld [vmem:[%s3422_s2 + $0x154] ss:$24 sps:$4 sm:$0xff]   ;;  %s3435_s13 = smov (!%p194_p5, %s2427_s13), 1  ;;  %v2197_v2 = vld [vmem:[%s3422_s2 + $0x150] ss:$24 sps:$4 sm:$0xff]   ;;  %s3437_s19 = smov (!%p196_p6, %s1919_s19), 31 }
   0xf   : > { %v2195_v1 = vld [vmem:[%s3422_s2 + $0x15c] ss:$24 sps:$4 sm:$0xff]   ;;  %1140 = vmatprep.subr.bf16.mxu0 %v2193_v0  ;;  %v2198_v3 = vld [vmem:[%s3422_s2 + $0x158] ss:$24 sps:$4 sm:$0xff]   ;;  %s1921_s28 = sshll.u32 %s3435_s13, 6  ;;  %s2152_s29 = smul.u32 192, %s3435_s13 }
  0x10   : > { %1253 = vmatprep.subr.bf16.mxu1 %v2195_v1  ;;  %1141 = vmatpush1.bf16.msra.mxu0 %v2197_v2  ;;  %v2199_v4 = vld [vmem:[%s3422_s2 + $0x124] ss:$24 sps:$4 sm:$0xff]   ;;  %s1920_s5 = sshll.u32 %s3437_s19, 1  ;;  %s2151_s6 = smul.u32 6, %s3437_s19  ;;  %v2203_v6 = vld [vmem:[%s3422_s2 + $0x120] ss:$24 sps:$4 sm:$0xff]  }
  0x11   : > { %1254 = vmatpush1.bf16.msra.mxu1 %v2198_v3  ;;  %v2201_v5 = vld [vmem:[%s3422_s2 + $0x12c] ss:$24 sps:$4 sm:$0xff]   ;;  %s200_s9 = sadd.s32 %s1921_s28, %s1920_s5  ;;  %1142 = vmatprep.subr.bf16.mxu0 %v2199_v4  ;;  %v2204_v7 = vld [vmem:[%s3422_s2 + $0x128] ss:$24 sps:$4 sm:$0xff]   ;;  %v2207_v9 = vld [vmem:[%s3422_s2 + $0xfc] ss:$24 sps:$4 sm:$0xff]  }
  0x12   : > { %s1922_s20 = sshll.u32 %s200_s9, 3  ;;  %s2515_s21 = sadd.s32 %s2152_s29, %s2151_s6  ;;  %1255 = vmatprep.subr.bf16.mxu1 %v2201_v5  ;;  %v2205_v8 = vld [vmem:[%s3422_s2 + $0xf4] ss:$24 sps:$4 sm:$0xff]   ;;  %v2209_v10 = vld [vmem:[%s3422_s2 + $0xf0] ss:$24 sps:$4 sm:$0xff]  }
  0x13   : > { %s2523_s25 = scalar_lea.vmem %s3420_s0, %s1922_s20  ;;  %v2210_v53 = vld [vmem:[%s3422_s2 + $0xf8] ss:$24 sps:$4 sm:$0xff]   ;;  %v2211_v54 = vld [vmem:[%s3422_s2 + $0xc4] ss:$24 sps:$4 sm:$0xff]   ;;  %v2216_v3 = vld [vmem:[%s3422_s2 + $0xc8] ss:$24 sps:$4 sm:$0xff]  }
  0x14   : > { %1143 = vmatpush1.bf16.msra.mxu0 %v2203_v6  ;;  %v2532_v11 = vld [vmem:[%s2523_s25 + $0x20] sm:$0xff]  ;;  %v2535_v12 = vld [vmem:[%s2523_s25 + $0x28] sm:$0xff]  ;;  %v2548_v17 = vld [vmem:[%s2523_s25 + $0x30] sm:$0xff]  ;;  %s1924_s8 = sshll.u32 %s2515_s21, 2 }
  0x15   : > { %v2538_v13 = vld [vmem:[%s2523_s25] sm:$0xff]  ;;  %1256 = vmatpush1.bf16.msra.mxu1 %v2204_v7  ;;  %1144 = vmatprep.subr.bf16.mxu0 %v2205_v8  ;;  %v251_v14 = vmul.f32 %v2532_v11, %v2532_v11  ;;  %v252_v15 = vmul.f32 %v2535_v12, %v2535_v12  ;;  %v2545_v16 = vld [vmem:[%s2523_s25 + $0x8] sm:$0xff]  ;;  %v2551_v18 = vld [vmem:[%s2523_s25 + $0x38] sm:$0xff]  ;;  %v253_v25 = vmul.f32 %v2548_v17, %v2548_v17 }
  0x16   : > { %1257 = vmatprep.subr.bf16.mxu1 %v2207_v9  ;;  %v247_v19 = vmul.f32 %v2538_v13, %v2538_v13  ;;  %v248_v20 = vmul.f32 %v2545_v16, %v2545_v16  ;;  %v2558_v21 = vld [vmem:[%s2523_s25 + $0x10] sm:$0xff]  ;;  %v2561_v22 = vld [vmem:[%s2523_s25 + $0x18] sm:$0xff]  ;;  %v254_v26 = vmul.f32 %v2551_v18, %v2551_v18  ;;  %v2578_v31 = vld [vmem:[%s2523_s25 + $0x40] sm:$0xff] }
  0x17   : > { %v2564_v23 = vld [vmem:[%s2523_s25 + $0x50] sm:$0xff]  ;;  %v285_v24 = vadd.f32 %v252_v15, %v251_v14  ;;  %v2571_v27 = vld [vmem:[%s2523_s25 + $0x58] sm:$0xff]  ;;  %v249_v29 = vmul.f32 %v2558_v21, %v2558_v21  ;;  %v250_v30 = vmul.f32 %v2561_v22, %v2561_v22  ;;  %v2581_v32 = vld [vmem:[%s2523_s25 + $0x48] sm:$0xff]  ;;  %v255_v39 = vmul.f32 %v2578_v31, %v2578_v31 }
  0x18   : > { %1145 = vmatpush1.bf16.msra.mxu0 %v2209_v10  ;;  %v279_v28 = vadd.f32 %v248_v20, %v247_v19  ;;  %v288_v33 = vadd.f32 %v254_v26, %v253_v25  ;;  %v257_v34 = vmul.f32 %v2564_v23, %v2564_v23  ;;  %v258_v36 = vmul.f32 %v2571_v27, %v2571_v27  ;;  %v2588_v37 = vld [vmem:[%s2523_s25 + $0x70] sm:$0xff]  ;;  %v2591_v38 = vld [vmem:[%s2523_s25 + $0x78] sm:$0xff]  ;;  %v2598_v41 = vld [vmem:[%s2523_s25 + $0x60] sm:$0xff] }
  0x19   : > { %286 = vadd.xlane.f32.xlu1 %v285_v24  ;;  %v282_v35 = vadd.f32 %v250_v30, %v249_v29  ;;  %v256_v40 = vmul.f32 %v2581_v32, %v2581_v32  ;;  %v2601_v42 = vld [vmem:[%s2523_s25 + $0x68] sm:$0xff]  ;;  %v261_v44 = vmul.f32 %v2588_v37, %v2588_v37  ;;  %v262_v45 = vmul.f32 %v2591_v38, %v2591_v38  ;;  %v2608_v46 = vld [vmem:[%s2523_s25 + $0x90] sm:$0xff]  ;;  %v2611_v47 = vld [vmem:[%s2523_s25 + $0x98] sm:$0xff] }
  0x1a   : > { %280 = vadd.xlane.f32.xlu0 %v279_v28  ;;  %v294_v43 = vadd.f32 %v258_v36, %v257_v34  ;;  %v259_v49 = vmul.f32 %v2598_v41, %v2598_v41  ;;  %v260_v50 = vmul.f32 %v2601_v42, %v2601_v42  ;;  %v2618_v51 = vld [vmem:[%s2523_s25 + $0x80] sm:$0xff]  ;;  %v2621_v52 = vld [vmem:[%s2523_s25 + $0x88] sm:$0xff]  ;;  %v2630_v55 = vld [vmem:[%s2523_s25 + $0xb0] sm:$0xff]  ;;  %1258 = vmatpush1.bf16.msra.mxu1 %v2210_v53 }
  0x1b   : > { %v291_v48 = vadd.f32 %v256_v40, %v255_v39  ;;  %v2213_v56 = vld [vmem:[%s3422_s2 + $0xcc] ss:$24 sps:$4 sm:$0xff]   ;;  %v300_v57 = vadd.f32 %v262_v45, %v261_v44  ;;  %v265_v58 = vmul.f32 %v2608_v46, %v2608_v46  ;;  %v266_v59 = vmul.f32 %v2611_v47, %v2611_v47  ;;  %v2640_v60 = vld [vmem:[%s2523_s25 + $0xb8] sm:$0xff]  ;;  %1146 = vmatprep.subr.bf16.mxu0 %v2211_v54  ;;  %v2659_v4 = vld [vmem:[%s2523_s25 + $0xd0] sm:$0xff] }
  0x1c   : > { %v2643_v61 = vld [vmem:[%s2523_s25 + $0xa0] sm:$0xff]  ;;  %v297_v62 = vadd.f32 %v260_v50, %v259_v49  ;;  %v263_v63 = vmul.f32 %v2618_v51, %v2618_v51  ;;  %v264_v0 = vmul.f32 %v2621_v52, %v2621_v52  ;;  %v2650_v1 = vld [vmem:[%s2523_s25 + $0xa8] sm:$0xff]  ;;  %v2662_v5 = vld [vmem:[%s2523_s25 + $0xd8] sm:$0xff]  ;;  %1259 = vmatprep.subr.bf16.mxu1 %v2213_v56  ;;  %v269_v8 = vmul.f32 %v2630_v55, %v2630_v55 }
  0x1d   : > { %289 = vadd.xlane.f32.xlu1 %v288_v33  ;;  %v2215_v2 = vld [vmem:[%s3422_s2 + $0xc0] ss:$24 sps:$4 sm:$0xff]   ;;  %v2217_v6 = vld [vmem:[%s3422_s2 + $0x94] ss:$24 sps:$4 sm:$0xff]   ;;  %v306_v7 = vadd.f32 %v266_v59, %v265_v58  ;;  %v270_v9 = vmul.f32 %v2640_v60, %v2640_v60  ;;  %v267_v15 = vmul.f32 %v2643_v61, %v2643_v61  ;;  %v268_v19 = vmul.f32 %v2650_v1, %v2650_v1  ;;  %v2221_v25 = vld [vmem:[%s3422_s2 + $0x90] ss:$24 sps:$4 sm:$0xff]  }
  0x1e   : > { %283 = vadd.xlane.f32.xlu0 %v282_v35  ;;  %v2219_v10 = vld [vmem:[%s3422_s2 + $0x9c] ss:$24 sps:$4 sm:$0xff]   ;;  %v303_v14 = vadd.f32 %v264_v0, %v263_v63  ;;  %v2679_v20 = vld [vmem:[%s2523_s25 + $0xc0] sm:$0xff]  ;;  %v2682_v24 = vld [vmem:[%s2523_s25 + $0xc8] sm:$0xff]  ;;  %1147 = vmatpush1.bf16.msra.mxu0 %v2215_v2  ;;  %v273_v34 = vmul.f32 %v2659_v4, %v2659_v4  ;;  %v274_v35 = vmul.f32 %v2662_v5, %v2662_v5 }
  0x1f   : > { %v2222_v26 = vld [vmem:[%s3422_s2 + $0x98] ss:$24 sps:$4 sm:$0xff]   ;;  %1260 = vmatpush1.bf16.msra.mxu1 %v2216_v3  ;;  %1148 = vmatprep.subr.bf16.mxu0 %v2217_v6  ;;  %v2223_v30 = vld [vmem:[%s3422_s2 + $0x64] ss:$24 sps:$4 sm:$0xff]   ;;  %v312_v33 = vadd.f32 %v270_v9, %v269_v8  ;;  %v309_v40 = vadd.f32 %v268_v19, %v267_v15  ;;  %v272_v44 = vmul.f32 %v2682_v24, %v2682_v24  ;;  %v2714_v45 = vld [vmem:[%s2523_s25 + $0xe8] sm:$0xff] }
  0x20   : > { %v2691_v28 = vld [vmem:[%s2523_s25 + $0xf0] sm:$0xff]  ;;  %v2694_v29 = vld [vmem:[%s2523_s25 + $0xf8] sm:$0xff]  ;;  %v2704_v36 = vld [vmem:[%s2523_s25 + $0xe0] sm:$0xff]  ;;  %1261 = vmatprep.subr.bf16.mxu1 %v2219_v10  ;;  %v318_v53 = vadd.f32 %v274_v35, %v273_v34  ;;  %s3355_s25 = scalar_lea.vmem %s3423_s3, %s1924_s8 }
  0x21   : > { %295 = vadd.xlane.f32.xlu1 %v294_v43  ;;  %v2225_v39 = vld [vmem:[%s3422_s2 + $0x6c] ss:$24 sps:$4 sm:$0xff]   ;;  %v271_v43 = vmul.f32 %v2679_v20, %v2679_v20  ;;  %v2228_v49 = vld [vmem:[%s3422_s2 + $0x68] ss:$24 sps:$4 sm:$0xff]   ;;  %v277_v54 = vmul.f32 %v2691_v28, %v2691_v28  ;;  %v278_v56 = vmul.f32 %v2694_v29, %v2694_v29  ;;  %v275_v59 = vmul.f32 %v2704_v36, %v2704_v36  ;;  %v2234_v0 = vld [vmem:[%s3422_s2 + $0x38] ss:$24 sps:$4 sm:$0xff]  }
  0x22   : > { %292 = vadd.xlane.f32.xlu0 %v291_v48  ;;  %1149 = vmatpush1.bf16.msra.mxu0 %v2221_v25  ;;  %v2227_v48 = vld [vmem:[%s3422_s2 + $0x60] ss:$24 sps:$4 sm:$0xff]   ;;  %v2229_v50 = vld [vmem:[%s3422_s2 + $0x34] ss:$24 sps:$4 sm:$0xff]   ;;  %v2233_v63 = vld [vmem:[%s3422_s2 + $0x30] ss:$24 sps:$4 sm:$0xff]  }
  0x23   : > { %1262 = vmatpush1.bf16.msra.mxu1 %v2222_v26  ;;  %1150 = vmatprep.subr.bf16.mxu0 %v2223_v30  ;;  %v315_v58 = vadd.f32 %v272_v44, %v271_v43  ;;  %v2235_v2 = vld [vmem:[%s3422_s2 + $0x4] ss:$24 sps:$4 sm:$0xff]   ;;  %v324_v3 = vadd.f32 %v278_v56, %v277_v54  ;;  %v2240_v9 = vld [vmem:[%s3422_s2 + $0x8] ss:$24 sps:$4 sm:$0xff]   ;;  %v2241_v10 = vld [vmem:[%s3422_s2 + $0x2d4] ss:$24 sps:$4 sm:$0xff]  }
  0x24   : > { %1263 = vmatprep.subr.bf16.mxu1 %v2225_v39  ;;  %v2237_v6 = vld [vmem:[%s3422_s2 + $0xc] ss:$24 sps:$4 sm:$0xff]   ;;  %v2245_v15 = vld [vmem:[%s3422_s2 + $0x2d0] ss:$24 sps:$4 sm:$0xff]   ;;  %v2251_v30 = vld [vmem:[%s3422_s2 + $0x2a0] ss:$24 sps:$4 sm:$0xff]  }
  0x25   : > { %301 = vadd.xlane.f32.xlu1 %v300_v57  ;;  %v2231_v57 = vld [vmem:[%s3422_s2 + $0x3c] ss:$24 sps:$4 sm:$0xff]   ;;  %v2246_v19 = vld [vmem:[%s3422_s2 + $0x2d8] ss:$24 sps:$4 sm:$0xff]   ;;  %v2249_v26 = vld [vmem:[%s3422_s2 + $0x2ac] ss:$24 sps:$4 sm:$0xff]  }
  0x26   : > { %298 = vadd.xlane.f32.xlu0 %v297_v62  ;;  %v276_v62 = vmul.f32 %v2714_v45, %v2714_v45  ;;  %1151 = vmatpush1.bf16.msra.mxu0 %v2227_v48  ;;  %v2247_v25 = vld [vmem:[%s3422_s2 + $0x2a4] ss:$24 sps:$4 sm:$0xff]   ;;  %v2253_v34 = vld [vmem:[%s3422_s2 + $0x274] ss:$24 sps:$4 sm:$0xff]   ;;  %v2257_v39 = vld [vmem:[%s3422_s2 + $0x270] ss:$24 sps:$4 sm:$0xff]  }
  0x27   : > { %1264 = vmatpush1.bf16.msra.mxu1 %v2228_v49  ;;  %1152 = vmatprep.subr.bf16.mxu0 %v2229_v50  ;;  %v2255_v35 = vld [vmem:[%s3422_s2 + $0x27c] ss:$24 sps:$4 sm:$0xff]   ;;  %v2261_v44 = vld [vmem:[%s3422_s2 + $0x24c] ss:$24 sps:$4 sm:$0xff]   ;;  %v2263_v48 = vld [vmem:[%s3422_s2 + $0x240] ss:$24 sps:$4 sm:$0xff]  }
  0x28   : > { %1265 = vmatprep.subr.bf16.mxu1 %v2231_v57  ;;  %v321_v8 = vadd.f32 %v276_v62, %v275_v59  ;;  %v2259_v43 = vld [vmem:[%s3422_s2 + $0x244] ss:$24 sps:$4 sm:$0xff]   ;;  %v2264_v49 = vld [vmem:[%s3422_s2 + $0x248] ss:$24 sps:$4 sm:$0xff]   ;;  %v2265_v50 = vld [vmem:[%s3422_s2 + $0x214] ss:$24 sps:$4 sm:$0xff]  }
  0x29   : > { %307 = vadd.xlane.f32.xlu1 %v306_v7  ;;  %v2239_v7 = vld [vmem:[%s3422_s2] ss:$24 sps:$4 sm:$0xff]   ;;  %v2269_v54 = vld [vmem:[%s3422_s2 + $0x210] ss:$24 sps:$4 sm:$0xff]   ;;  %v2271_v57 = vld [vmem:[%s3422_s2 + $0x1e4] ss:$24 sps:$4 sm:$0xff]  }
  0x2a   : > { %304 = vadd.xlane.f32.xlu0 %v303_v14  ;;  %1153 = vmatpush1.bf16.msra.mxu0 %v2233_v63  ;;  %v2243_v14 = vld [vmem:[%s3422_s2 + $0x2dc] ss:$24 sps:$4 sm:$0xff]   ;;  %v2270_v56 = vld [vmem:[%s3422_s2 + $0x218] ss:$24 sps:$4 sm:$0xff]   ;;  %v2276_v62 = vld [vmem:[%s3422_s2 + $0x1e8] ss:$24 sps:$4 sm:$0xff]  }
  0x2b   : > { %1266 = vmatpush1.bf16.msra.mxu1 %v2234_v0  ;;  %1154 = vmatprep.subr.bf16.mxu0 %v2235_v2  ;;  %v2275_v59 = vld [vmem:[%s3422_s2 + $0x1e0] ss:$24 sps:$4 sm:$0xff]   ;;  %v2277_v63 = vld [vmem:[%s3422_s2 + $0x1b4] ss:$24 sps:$4 sm:$0xff]   ;;  %v2281_v2 = vld [vmem:[%s3422_s2 + $0x1b0] ss:$24 sps:$4 sm:$0xff]  }
  0x2c   : > { %1267 = vmatprep.subr.bf16.mxu1 %v2237_v6  ;;  %v2279_v0 = vld [vmem:[%s3422_s2 + $0x1bc] ss:$24 sps:$4 sm:$0xff]  }
  0x2d   : > { %313 = vadd.xlane.f32.xlu1 %v312_v33  ;;  %v2252_v33 = vld [vmem:[%s3422_s2 + $0x2a8] ss:$24 sps:$4 sm:$0xff]   ;;  %v2283_v6 = vld [vmem:[%s3422_s2 + $0x184] ss:$24 sps:$4 sm:$0xff]  }
  0x2e   : > { %310 = vadd.xlane.f32.xlu0 %v309_v40  ;;  %1155 = vmatpush1.bf16.msra.mxu0 %v2239_v7  ;;  %v2258_v40 = vld [vmem:[%s3422_s2 + $0x278] ss:$24 sps:$4 sm:$0xff]   ;;  %v2285_v7 = vld [vmem:[%s3422_s2 + $0x18c] ss:$24 sps:$4 sm:$0xff]  }
  0x2f   : > { %1268 = vmatpush1.bf16.msra.mxu1 %v2240_v9  ;;  %1156 = vmatprep.subr.bf16.mxu0 %v2241_v10  ;;  %v2288_v9 = vld [vmem:[%s3422_s2 + $0x188] ss:$24 sps:$4 sm:$0xff]   ;;  %v2291_v10 = vld [vmem:[%s3422_s2 + $0x164] ss:$24 sps:$4 sm:$0xff]  }
  0x30   : > { %1269 = vmatprep.subr.bf16.mxu1 %v2243_v14  ;;  %v474_v14 = vlaneseq }
  0x31   : > { %319 = vadd.xlane.f32.xlu1 %v318_v53  ;;  %v2267_v53 = vld [vmem:[%s3422_s2 + $0x21c] ss:$24 sps:$4 sm:$0xff]  }
  0x32   : > { %316 = vadd.xlane.f32.xlu0 %v315_v58  ;;  %1157 = vmatpush2.bf16.msra.mxu0 %v2245_v15  ;;  %v2273_v58 = vld [vmem:[%s3422_s2 + $0x1ec] ss:$24 sps:$4 sm:$0xff]   ;;  %v475_v15 = vshrl.u32 %v474_v14, 7 }
  0x33   : > { %1270 = vmatpush2.bf16.msra.mxu1 %v2246_v19  ;;  %1158 = vmatprep.subr.bf16.mxu0 %v2247_v25  ;;  %v471_v19 = vld [vmem:[%s3421_s1] sm:$0x3] }
  0x34   : > { %1271 = vmatprep.subr.bf16.mxu1 %v2249_v26  ;;  %v472_v25 = vmul.f32 16.0, %v471_v19  ;;  %v476_v26 = vsub.s32 0, %v475_v15 }
  0x35   : > { %325 = vadd.xlane.f32.xlu1 %v324_v3  ;;  %v2282_v3 = vld [vmem:[%s3422_s2 + $0x1b8] ss:$24 sps:$4 sm:$0xff]  }
  0x36   : > { %322 = vadd.xlane.f32.xlu0 %v321_v8  ;;  %1159 = vmatpush2.bf16.msra.mxu0 %v2251_v30  ;;  %v2287_v8 = vld [vmem:[%s3422_s2 + $0x180] ss:$24 sps:$4 sm:$0xff]   ;;  %v480_v30 = vsub.s32 1, %v475_v15 }
  0x37   : > { %1272 = vmatpush2.bf16.msra.mxu1 %v2252_v33  ;;  %1160 = vmatprep.subr.bf16.mxu0 %v2253_v34 }
  0x38   : > { %1273 = vmatprep.subr.bf16.mxu1 %v2255_v35  ;;  %v2862_v35 = vrot.slane %v472_v25, %v476_v26 }
  0x3a   : > { %1161 = vmatpush2.bf16.msra.mxu0 %v2257_v39  ;;  %v2864_v39 = vrot.slane %v472_v25, %v480_v30 }
  0x3b   : > { %1274 = vmatpush2.bf16.msra.mxu1 %v2258_v40  ;;  %1162 = vmatprep.subr.bf16.mxu0 %v2259_v43 }
  0x3c   : > { %1275 = vmatprep.subr.bf16.mxu1 %v2261_v44  ;;  %v2874_v44 = vmul.f32 %v2862_v35, %v2532_v11  ;;  %v2894_v11 = vmul.f32 %v2864_v39, %v2551_v18 }
  0x3e   : > { %1163 = vmatpush2.bf16.msra.mxu0 %v2263_v48  ;;  %v2878_v48 = vmul.f32 %v2864_v39, %v2535_v12  ;;  %v2898_v12 = vmul.f32 %v2862_v35, %v2558_v21  ;;  %v2919_v21 = vmul.f32 %v2862_v35, %v2578_v31  ;;  %v2940_v31 = vmul.f32 %v2864_v39, %v2601_v42 }
  0x3f   : > { %1276 = vmatpush2.bf16.msra.mxu1 %v2264_v49  ;;  %1164 = vmatprep.subr.bf16.mxu0 %v2265_v50  ;;  %v2882_v49 = vmul.f32 %v2862_v35, %v2538_v13  ;;  %v2886_v50 = vmul.f32 %v2864_v39, %v2545_v16  ;;  %v2904_v13 = vmul.f32 %v2864_v39, %v2561_v22 }
  0x40   : > { %1277 = vmatprep.subr.bf16.mxu1 %v2267_v53  ;;  %v2890_v53 = vmul.f32 %v2862_v35, %v2548_v17  ;;  %v2908_v16 = vmul.f32 %v2862_v35, %v2564_v23  ;;  %v2912_v17 = vmul.f32 %v2864_v39, %v2571_v27  ;;  %v2923_v22 = vmul.f32 %v2864_v39, %v2581_v32 }
  0x41   : > { %v2927_v23 = vmul.f32 %v2862_v35, %v2588_v37  ;;  %v2932_v27 = vmul.f32 %v2864_v39, %v2591_v38  ;;  %v2944_v32 = vmul.f32 %v2862_v35, %v2608_v46  ;;  %v2948_v37 = vmul.f32 %v2864_v39, %v2611_v47 }
  0x42   : > { %1165 = vmatpush2.bf16.msra.mxu0 %v2269_v54  ;;  %v2952_v38 = vmul.f32 %v2862_v35, %v2618_v51 }
  0x43   : > { %1278 = vmatpush2.bf16.msra.mxu1 %v2270_v56  ;;  %1166 = vmatprep.subr.bf16.mxu0 %v2271_v57  ;;  %v2936_v56 = vmul.f32 %v2862_v35, %v2598_v41  ;;  %v2956_v41 = vmul.f32 %v2864_v39, %v2621_v52 }
  0x44   : > { %1279 = vmatprep.subr.bf16.mxu1 %v2273_v58 }
  0x46   : > { %1167 = vmatpush2.bf16.msra.mxu0 %v2275_v59 }
  0x47   : > { %1280 = vmatpush2.bf16.msra.mxu1 %v2276_v62  ;;  %1168 = vmatprep.subr.bf16.mxu0 %v2277_v63 }
  0x48   : > { %1281 = vmatprep.subr.bf16.mxu1 %v2279_v0 }
  0x4a   : > { %1169 = vmatpush2.bf16.msra.mxu0 %v2281_v2 }
  0x4b   : > { %1282 = vmatpush2.bf16.msra.mxu1 %v2282_v3  ;;  %1170 = vmatprep.subr.bf16.mxu0 %v2283_v6 }
  0x4c   : > { %1283 = vmatprep.subr.bf16.mxu1 %v2285_v7 }
  0x4e   : > { %1171 = vmatpush2.bf16.msra.mxu0 %v2287_v8 }
  0x4f   : > { %1284 = vmatpush2.bf16.msra.mxu1 %v2288_v9  ;;  %1366 = vmatprep.subr.bf16.mxu0 %v2291_v10 }
  0x50   : > { %2119 = vmatprep.subr.bf16.mxu1 %v2291_v10 }
  0xa2   : > { %v2856_v33 = vpop.xlane.xlu1 %286 }
  0xa3   : > { %2337 = vrsqrt.f32 %v2856_v33  ;;  %v2859_v34 = vpop.xlane.xlu0 %280  ;;  %vm343_vm0 = vcmp.eq.f32.partialorder %v2856_v33, inf  ;;  %vm345_vm1 = vcmp.eq.f32.partialorder %v2856_v33, 0.0  ;;  %v346_v46 = vand.u32 2147483648, %v2856_v33 }
  0xa4   : > { %2339 = vrsqrt.f32 %v2859_v34  ;;  %vm329_vm2 = vcmp.eq.f32.partialorder %v2859_v34, inf  ;;  %vm331_vm3 = vcmp.eq.f32.partialorder %v2859_v34, 0.0  ;;  %v332_v52 = vand.u32 2147483648, %v2859_v34 }
  0xa6   : > { %v2866_v40 = vpop.xlane.xlu1 %289 }
  0xa7   : > { %2341 = vrsqrt.f32 %v2866_v40  ;;  %v2869_v43 = vpop.xlane.xlu0 %283  ;;  %vm350_vm4 = vcmp.eq.f32.partialorder %v2866_v40, inf  ;;  %vm352_vm5 = vcmp.eq.f32.partialorder %v2866_v40, 0.0  ;;  %v353_v59 = vand.u32 2147483648, %v2866_v40 }
  0xa8   : > { %2343 = vrsqrt.f32 %v2869_v43  ;;  %vm336_vm6 = vcmp.eq.f32.partialorder %v2869_v43, inf  ;;  %vm338_vm7 = vcmp.eq.f32.partialorder %v2869_v43, 0.0  ;;  %v339_v63 = vand.u32 2147483648, %v2869_v43 }
  0xaa   : > { %v2900_v54 = vpop.xlane.xlu1 %295 }
  0xab   : > { %2345 = vrsqrt.f32 %v2900_v54  ;;  %v2915_v18 = vpop.xlane.xlu0 %292  ;;  %vm364_vm8 = vcmp.eq.f32.partialorder %v2900_v54, inf  ;;  %vm366_vm9 = vcmp.eq.f32.partialorder %v2900_v54, 0.0  ;;  %v367_v3 = vand.u32 2147483648, %v2900_v54 }
  0xac   : > { %2347 = vrsqrt.f32 %v2915_v18  ;;  %vm357_vm10 = vcmp.eq.f32.partialorder %v2915_v18, inf  ;;  %vm359_vm11 = vcmp.eq.f32.partialorder %v2915_v18, 0.0  ;;  %v360_v10 = vand.u32 2147483648, %v2915_v18 }
  0xae   : > { %v2959_v42 = vpop.xlane.xlu1 %301 }
  0xaf   : > { %2349 = vrsqrt.f32 %v2959_v42  ;;  %v2965_v47 = vpop.xlane.xlu0 %298  ;;  %vm378_vm12 = vcmp.eq.f32.partialorder %v2959_v42, inf  ;;  %vm380_vm13 = vcmp.eq.f32.partialorder %v2959_v42, 0.0 }
  0xb0   : > { %v2338_v51 = vpop.eup %2337  ;;  %2351 = vrsqrt.f32 %v2965_v47  ;;  %vm371_vm14 = vcmp.eq.f32.partialorder %v2965_v47, inf  ;;  %vm373_vm15 = vcmp.eq.f32.partialorder %v2965_v47, 0.0 }
  0xb1   : > { %v2340_v57 = vpop.eup %2339  ;;  %v342_v58 = vmul.f32 %v2338_v51, %v2856_v33 }
  0xb2   : > { %v328_v62 = vmul.f32 %v2340_v57, %v2859_v34  ;;  %v2979_v0 = vpop.xlane.xlu1 %307 }
  0xb3   : > { %v344_v2 = vsel %vm343_vm0, %v2856_v33, %v342_v58  ;;  %2353 = vrsqrt.f32 %v2979_v0  ;;  %v2988_v6 = vpop.xlane.xlu0 %304  ;;  %v381_v33 = vand.u32 2147483648, %v2959_v42  ;;  %vm392_vm0 = vcmp.eq.f32.partialorder %v2979_v0, inf }
  0xb4   : > { %v2342_v7 = vpop.eup %2341  ;;  %v347_v8 = vsel %vm345_vm1, %v346_v46, %v344_v2  ;;  %v330_v9 = vsel %vm329_vm2, %v2859_v34, %v328_v62  ;;  %2355 = vrsqrt.f32 %v2988_v6  ;;  %v374_v62 = vand.u32 2147483648, %v2965_v47 }
  0xb5   : > { %v2344_v14 = vpop.eup %2343  ;;  %v441_v15 = vadd.f32 1.1920929e-07, %v347_v8  ;;  %v333_v19 = vsel %vm331_vm3, %v332_v52, %v330_v9  ;;  %v349_v25 = vmul.f32 %v2342_v7, %v2866_v40  ;;  %vm394_vm1 = vcmp.eq.f32.partialorder %v2979_v0, 0.0 }
  0xb6   : > { %v439_v26 = vadd.f32 1.1920929e-07, %v333_v19  ;;  %v335_v30 = vmul.f32 %v2344_v14, %v2869_v43  ;;  %v3005_v46 = vpop.xlane.xlu1 %313  ;;  %vm385_vm2 = vcmp.eq.f32.partialorder %v2988_v6, inf  ;;  %vm387_vm3 = vcmp.eq.f32.partialorder %v2988_v6, 0.0 }
  0xb7   : > { %2357 = vrcp.f32 %v441_v15  ;;  %v351_v51 = vsel %vm350_vm4, %v2866_v40, %v349_v25  ;;  %v3012_v34 = vpop.xlane.xlu0 %310  ;;  %vm406_vm4 = vcmp.eq.f32.partialorder %v3005_v46, inf }
  0xb8   : > { %v2346_v52 = vpop.eup %2345  ;;  %2359 = vrcp.f32 %v439_v26  ;;  %v354_v57 = vsel %vm352_vm5, %v353_v59, %v351_v51  ;;  %v337_v58 = vsel %vm336_vm6, %v2869_v43, %v335_v30  ;;  %v395_v43 = vand.u32 2147483648, %v2979_v0 }
  0xb9   : > { %v2348_v2 = vpop.eup %2347  ;;  %v442_v7 = vadd.f32 1.1920929e-07, %v354_v57  ;;  %v340_v8 = vsel %vm338_vm7, %v339_v63, %v337_v58  ;;  %v363_v9 = vmul.f32 %v2346_v52, %v2900_v54  ;;  %2361 = vrsqrt.f32 %v3005_v46 }
  0xba   : > { %v440_v14 = vadd.f32 1.1920929e-07, %v340_v8  ;;  %v356_v15 = vmul.f32 %v2348_v2, %v2915_v18  ;;  %2363 = vrsqrt.f32 %v3012_v34  ;;  %v3027_v40 = vpop.xlane.xlu1 %319  ;;  %vm408_vm5 = vcmp.eq.f32.partialorder %v3005_v46, 0.0 }
  0xbb   : > { %2365 = vrcp.f32 %v442_v7  ;;  %v365_v59 = vsel %vm364_vm8, %v2900_v54, %v363_v9  ;;  %v388_v54 = vand.u32 2147483648, %v2988_v6  ;;  %v409_v9 = vand.u32 2147483648, %v3005_v46 }
  0xbc   : > { %v2350_v63 = vpop.eup %2349  ;;  %2367 = vrcp.f32 %v440_v14  ;;  %v368_v19 = vsel %vm366_vm9, %v367_v3, %v365_v59  ;;  %v358_v25 = vsel %vm357_vm10, %v2915_v18, %v356_v15  ;;  %v3047_v3 = vpop.xlane.xlu0 %316  ;;  %vm399_vm6 = vcmp.eq.f32.partialorder %v3012_v34, inf }
  0xbd   : > { %v2352_v26 = vpop.eup %2351  ;;  %v444_v30 = vadd.f32 1.1920929e-07, %v368_v19  ;;  %v361_v51 = vsel %vm359_vm11, %v360_v10, %v358_v25  ;;  %v377_v52 = vmul.f32 %v2350_v63, %v2959_v42  ;;  %2369 = vrsqrt.f32 %v3027_v40 }
  0xbe   : > { %v443_v57 = vadd.f32 1.1920929e-07, %v361_v51  ;;  %v370_v58 = vmul.f32 %v2352_v26, %v2965_v47  ;;  %v3054_v18 = vpop.xlane.xlu1 %325  ;;  %vm401_vm7 = vcmp.eq.f32.partialorder %v3012_v34, 0.0  ;;  %vm420_vm8 = vcmp.eq.f32.partialorder %v3027_v40, inf }
  0xbf   : > { %2371 = vrcp.f32 %v444_v30  ;;  %v379_v2 = vsel %vm378_vm12, %v2959_v42, %v377_v52  ;;  %vm422_vm9 = vcmp.eq.f32.partialorder %v3027_v40, 0.0  ;;  %vm413_vm10 = vcmp.eq.f32.partialorder %v3047_v3, inf }
  0xc0   : > { %v2354_v10 = vpop.eup %2353  ;;  %2373 = vrcp.f32 %v443_v57  ;;  %v382_v7 = vsel %vm380_vm13, %v381_v33, %v379_v2  ;;  %v372_v8 = vsel %vm371_vm14, %v2965_v47, %v370_v58  ;;  %v3069_v42 = vpop.xlane.xlu0 %322  ;;  %v402_v47 = vand.u32 2147483648, %v3012_v34 }
  0xc1   : > { %v2356_v14 = vpop.eup %2355  ;;  %v446_v15 = vadd.f32 1.1920929e-07, %v382_v7  ;;  %v375_v59 = vsel %vm373_vm15, %v374_v62, %v372_v8  ;;  %v391_v63 = vmul.f32 %v2354_v10, %v2979_v0  ;;  %2375 = vrsqrt.f32 %v3047_v3 }
  0xc2   : > { %v445_v19 = vadd.f32 1.1920929e-07, %v375_v59  ;;  %v384_v25 = vmul.f32 %v2356_v14, %v2988_v6  ;;  %2377 = vrsqrt.f32 %v3054_v18  ;;  %vm415_vm11 = vcmp.eq.f32.partialorder %v3047_v3, 0.0 }
  0xc3   : > { %2379 = vrcp.f32 %v446_v15  ;;  %v393_v33 = vsel %vm392_vm0, %v2979_v0, %v391_v63  ;;  %v423_v0 = vand.u32 2147483648, %v3027_v40  ;;  %vm434_vm12 = vcmp.eq.f32.partialorder %v3054_v18, inf }
  0xc4   : > { %v2358_v62 = vpop.eup %2357  ;;  %2381 = vrcp.f32 %v445_v19  ;;  %v396_v26 = vsel %vm394_vm1, %v395_v43, %v393_v33  ;;  %v386_v30 = vsel %vm385_vm2, %v2988_v6, %v384_v25  ;;  %v416_v43 = vand.u32 2147483648, %v3047_v3 }
  0xc5   : > { %v2360_v51 = vpop.eup %2359  ;;  %v448_v52 = vadd.f32 1.1920929e-07, %v396_v26  ;;  %v389_v57 = vsel %vm387_vm3, %v388_v54, %v386_v30  ;;  %2383 = vrsqrt.f32 %v3069_v42  ;;  %vm436_vm13 = vcmp.eq.f32.partialorder %v3054_v18, 0.0 }
  0xc6   : > { %v2362_v58 = vpop.eup %2361  ;;  %v447_v2 = vadd.f32 1.1920929e-07, %v389_v57  ;;  %v517_v6 = vmul.f32 %v2360_v51, %v2886_v50  ;;  %v516_v14 = vmul.f32 %v2360_v51, %v2882_v49  ;;  %v521_v15 = vmul.f32 %v2358_v62, %v2878_v48 }
  0xc7   : > { %v2364_v10 = vpop.eup %2363  ;;  %2385 = vrcp.f32 %v448_v52  ;;  %v405_v7 = vmul.f32 %v2362_v58, %v3005_v46  ;;  %v520_v50 = vmul.f32 %v2358_v62, %v2874_v44  ;;  %vm427_vm14 = vcmp.eq.f32.partialorder %v3069_v42, inf }
  0xc8   : > { %v2366_v54 = vpop.eup %2365  ;;  %2387 = vrcp.f32 %v447_v2  ;;  %v398_v8 = vmul.f32 %v2364_v10, %v3012_v34  ;;  %vm429_vm15 = vcmp.eq.f32.partialorder %v3069_v42, 0.0 }
  0xc9   : > { %v2368_v59 = vpop.eup %2367  ;;  %v407_v63 = vsel %vm406_vm4, %v3005_v46, %v405_v7  ;;  %v523_v19 = vmul.f32 %v2366_v54, %v2894_v11  ;;  %v522_v25 = vmul.f32 %v2366_v54, %v2890_v53  ;;  %v2294_v7 = vld [vmem:[%s3422_s2 + $0x134] ss:$24 sps:$4 sm:$0xff]  }
  0xca   : > { %v2370_v33 = vpop.eup %2369  ;;  %v410_v26 = vsel %vm408_vm5, %v409_v9, %v407_v63  ;;  %v400_v49 = vsel %vm399_vm6, %v3012_v34, %v398_v8  ;;  %v519_v48 = vmul.f32 %v2368_v59, %v2904_v13  ;;  %v518_v30 = vmul.f32 %v2368_v59, %v2898_v12  ;;  %v2289_v9 = vld [vmem:[%s3422_s2 + $0x160] ss:$24 sps:$4 sm:$0xff]  }
  0xcb   : > { %v450_v51 = vadd.f32 1.1920929e-07, %v410_v26  ;;  %v403_v11 = vsel %vm401_vm7, %v402_v47, %v400_v49  ;;  %v419_v44 = vmul.f32 %v2370_v33, %v3027_v40  ;;  %v3113_v62 = vpack.c.bf16 %v523_v19, %v521_v15  ;;  %v2297_v19 = vld [vmem:[%s3422_s2 + $0x104] ss:$24 sps:$4 sm:$0xff]  }
  0xcc   : > { %v2372_v53 = vpop.eup %2371  ;;  %v449_v52 = vadd.f32 1.1920929e-07, %v403_v11  ;;  %v3115_v46 = vpack.c.bf16 %v519_v48, %v517_v6  ;;  %v3120_v57 = vpack.c.bf16 %v518_v30, %v516_v14  ;;  %v3122_v13 = vpack.c.bf16 %v522_v25, %v520_v50 }
  0xcd   : > { %v2374_v12 = vpop.eup %2373  ;;  %2389 = vrcp.f32 %v450_v51  ;;  %v421_v34 = vsel %vm420_vm8, %v3027_v40, %v419_v44  ;;  %v527_v47 = vmul.f32 %v2372_v53, %v2912_v17  ;;  %v526_v58 = vmul.f32 %v2372_v53, %v2908_v16  ;;  %v2295_v44 = vld [vmem:[%s3422_s2 + $0x100] ss:$24 sps:$4 sm:$0xff]  }
  0xce   : > { %v2376_v2 = vpop.eup %2375  ;;  %2391 = vrcp.f32 %v449_v52  ;;  %v424_v10 = vsel %vm422_vm9, %v423_v0, %v421_v34  ;;  %1172 = vmatprep.mubr.bf16.mxu0 %v3115_v46  ;;  %1285 = vmatprep.mubr.bf16.mxu1 %v3115_v46  ;;  %v525_v6 = vmul.f32 %v2374_v12, %v2923_v22  ;;  %v524_v54 = vmul.f32 %v2374_v12, %v2919_v21  ;;  %v2292_v21 = vld [vmem:[%s3422_s2 + $0x130] ss:$24 sps:$4 sm:$0xff]   ;;  %v2300_v12 = vld [vmem:[%s3422_s2 + $0xd4] ss:$24 sps:$4 sm:$0xff]  }
  0xcf   : > { %v2378_v17 = vpop.eup %2377  ;;  %v452_v8 = vadd.f32 1.1920929e-07, %v424_v10  ;;  %v412_v16 = vmul.f32 %v2376_v2, %v3047_v3  ;;  %v437_v14 = vand.u32 2147483648, %v3054_v18  ;;  %1173 = vmatmul.mubr.bf16.vlgmr.msra.gmra.mxu0 %v3120_v57  ;;  %1286 = vmatmul.mubr.bf16.vlgmr.msra.gmra.mxu1 %v3120_v57  ;;  %v430_v48 = vand.u32 2147483648, %v3069_v42 }
  0xd0   : > { %v2380_v40 = vpop.eup %2379  ;;  %v433_v0 = vmul.f32 %v2378_v17, %v3054_v18  ;;  %1367 = vmatpush1.bf16.msra.mxu0 %v2289_v9  ;;  %2135 = vmatpush1.bf16.msra.mxu1 %v2289_v9  ;;  %v3148_v22 = vpack.c.bf16 %v527_v47, %v525_v6  ;;  %v3150_v15 = vpack.c.bf16 %v526_v58, %v524_v54  ;;  %v2301_v54 = vld [vmem:[%s3422_s2 + $0xa0] ss:$24 sps:$4 sm:$0xff]  }
  0xd1   : > { %v2382_v59 = vpop.eup %2381  ;;  %2393 = vrcp.f32 %v452_v8  ;;  %v414_v63 = vsel %vm413_vm10, %v3047_v3, %v412_v16  ;;  %1182 = vmatprep.mubr.bf16.mxu0 %v3113_v62  ;;  %1295 = vmatprep.mubr.bf16.mxu1 %v3113_v62  ;;  %v531_v50 = vmul.f32 %v2380_v40, %v2932_v27  ;;  %v530_v25 = vmul.f32 %v2380_v40, %v2927_v23 }
  0xd2   : > { %v2384_v33 = vpop.eup %2383  ;;  %v417_v26 = vsel %vm415_vm11, %v416_v43, %v414_v63  ;;  %v435_v49 = vsel %vm434_vm12, %v3054_v18, %v433_v0  ;;  %1368 = vmatprep.subr.bf16.mxu0 %v2294_v7  ;;  %2120 = vmatprep.subr.bf16.mxu1 %v2294_v7  ;;  %v529_v30 = vmul.f32 %v2382_v59, %v2940_v31  ;;  %v2306_v0 = vld [vmem:[%s3422_s2 + $0x74] ss:$24 sps:$4 sm:$0xff]  }
  0xd3   : > { %v451_v51 = vadd.f32 1.1920929e-07, %v417_v26  ;;  %v438_v23 = vsel %vm436_vm13, %v437_v14, %v435_v49  ;;  %v426_v27 = vmul.f32 %v2384_v33, %v3069_v42  ;;  %v528_v11 = vmul.f32 %v2382_v59, %v2936_v56 }
  0xd4   : > { %v2386_v3 = vpop.eup %2385  ;;  %v454_v43 = vadd.f32 1.1920929e-07, %v438_v23  ;;  %1369 = vmatpush1.bf16.msra.mxu0 %v2292_v21  ;;  %2136 = vmatpush1.bf16.msra.mxu1 %v2292_v21  ;;  %v3178_v53 = vpack.c.bf16 %v531_v50, %v529_v30  ;;  %v506_v58 = vmul.f32 %v2862_v35, %v2630_v55  ;;  %v507_v2 = vmul.f32 %v2864_v39, %v2640_v60  ;;  %v2298_v55 = vld [vmem:[%s3422_s2 + $0xd0] ss:$24 sps:$4 sm:$0xff]   ;;  %v2307_v30 = vld [vmem:[%s3422_s2 + $0x40] ss:$24 sps:$4 sm:$0xff]  }
  0xd5   : > { %v2388_v52 = vpop.eup %2387  ;;  %2395 = vrcp.f32 %v451_v51  ;;  %v428_v31 = vsel %vm427_vm14, %v3069_v42, %v426_v27  ;;  %1370 = vmatprep.subr.bf16.mxu0 %v2297_v19  ;;  %2121 = vmatprep.subr.bf16.mxu1 %v2297_v19  ;;  %v3183_v18 = vpack.c.bf16 %v530_v25, %v528_v11  ;;  %v535_v56 = vmul.f32 %v2386_v3, %v2948_v37  ;;  %v2304_v19 = vld [vmem:[%s3422_s2 + $0x70] ss:$24 sps:$4 sm:$0xff]  }
  0xd6   : > { %2397 = vrcp.f32 %v454_v43  ;;  %v431_v9 = vsel %vm429_vm15, %v430_v48, %v428_v31  ;;  %v533_v34 = vmul.f32 %v2388_v52, %v2956_v41  ;;  %v532_v47 = vmul.f32 %v2388_v52, %v2952_v38  ;;  %v2315_v43 = vld [vmem:[%s3422_s2 + $0x2e4] ss:$24 sps:$4 sm:$0xff]   ;;  %v2313_v31 = vld [vmem:[%s3422_s2 + $0x2e0] ss:$24 sps:$4 sm:$0xff]  }
  0xd7   : > { %v453_v10 = vadd.f32 1.1920929e-07, %v431_v9  ;;  %1183 = vmatmul.mubr.bf16.gmra.mxu0 %v3122_v13  ;;  %1296 = vmatmul.mubr.bf16.gmra.mxu1 %v3122_v13  ;;  %v534_v37 = vmul.f32 %v2386_v3, %v2944_v32  ;;  %v504_v42 = vmul.f32 %v2862_v35, %v2643_v61  ;;  %v505_v41 = vmul.f32 %v2864_v39, %v2650_v1  ;;  %v2303_v61 = vld [vmem:[%s3422_s2 + $0xa4] ss:$24 sps:$4 sm:$0xff]   ;;  %v2310_v3 = vld [vmem:[%s3422_s2 + $0x10] ss:$24 sps:$4 sm:$0xff]  }
  0xd8   : > { %1371 = vmatpush1.bf16.msra.mxu0 %v2295_v44  ;;  %2137 = vmatpush1.bf16.msra.mxu1 %v2295_v44  ;;  %v3207_v60 = vpack.c.bf16 %v535_v56, %v533_v34  ;;  %v510_v16 = vmul.f32 %v2862_v35, %v2659_v4  ;;  %v511_v14 = vmul.f32 %v2864_v39, %v2662_v5  ;;  %v2318_v56 = vld [vmem:[%s3422_s2 + $0x2b4] ss:$24 sps:$4 sm:$0xff]   ;;  %v2316_v9 = vld [vmem:[%s3422_s2 + $0x2b0] ss:$24 sps:$4 sm:$0xff]   ;;  %v2319_v34 = vld [vmem:[%s3422_s2 + $0x280] ss:$24 sps:$4 sm:$0xff]  }
  0xd9   : > { %2399 = vrcp.f32 %v453_v10  ;;  %1192 = vmatprep.mubr.bf16.mxu0 %v3148_v22  ;;  %1305 = vmatprep.mubr.bf16.mxu1 %v3148_v22  ;;  %v3214_v32 = vpack.c.bf16 %v534_v37, %v532_v47  ;;  %v508_v63 = vmul.f32 %v2862_v35, %v2679_v20  ;;  %v509_v4 = vmul.f32 %v2864_v39, %v2682_v24  ;;  %v2309_v20 = vld [vmem:[%s3422_s2 + $0x44] ss:$24 sps:$4 sm:$0xff]   ;;  %v2324_v47 = vld [vmem:[%s3422_s2 + $0x254] ss:$24 sps:$4 sm:$0xff]   ;;  %v2325_v10 = vld [vmem:[%s3422_s2 + $0x220] ss:$24 sps:$4 sm:$0xff]  }
  0xda   : > { %v2390_v1 = vpop.eup %2389  ;;  %1372 = vmatprep.subr.bf16.mxu0 %v2300_v12  ;;  %2122 = vmatprep.subr.bf16.mxu1 %v2300_v12  ;;  %v515_v5 = vmul.f32 %v2864_v39, %v2694_v29  ;;  %v514_v50 = vmul.f32 %v2862_v35, %v2691_v28  ;;  %v512_v26 = vmul.f32 %v2862_v35, %v2704_v36  ;;  %v2321_v12 = vld [vmem:[%s3422_s2 + $0x284] ss:$24 sps:$4 sm:$0xff]   ;;  %v2330_v37 = vld [vmem:[%s3422_s2 + $0x1f4] ss:$24 sps:$4 sm:$0xff]  }
  0xdb   : > { %v2392_v38 = vpop.eup %2391  ;;  %v539_v7 = vmul.f32 %v2390_v1, %v507_v2  ;;  %v538_v6 = vmul.f32 %v2390_v1, %v506_v58  ;;  %v513_v28 = vmul.f32 %v2864_v39, %v2714_v45  ;;  %v2312_v45 = vld [vmem:[%s3422_s2 + $0x14] ss:$24 sps:$4 sm:$0xff]   ;;  %v2322_v58 = vld [vmem:[%s3422_s2 + $0x250] ss:$24 sps:$4 sm:$0xff]   ;;  %v2327_v2 = vld [vmem:[%s3422_s2 + $0x224] ss:$24 sps:$4 sm:$0xff]  }
  0xdc   : > { %1373 = vmatpush1.bf16.msra.mxu0 %v2298_v55  ;;  %2138 = vmatpush1.bf16.msra.mxu1 %v2298_v55  ;;  %v537_v17 = vmul.f32 %v2392_v38, %v505_v41  ;;  %v536_v8 = vmul.f32 %v2392_v38, %v504_v42  ;;  %v2328_v42 = vld [vmem:[%s3422_s2 + $0x1f0] ss:$24 sps:$4 sm:$0xff]   ;;  %v2333_v41 = vld [vmem:[%s3422_s2 + $0x1c4] ss:$24 sps:$4 sm:$0xff]   ;;  %v2331_v55 = vld [vmem:[%s3422_s2 + $0x1c0] ss:$24 sps:$4 sm:$0xff]  }
  0xdd   : > { %1374 = vmatprep.subr.bf16.mxu0 %v2303_v61  ;;  %2123 = vmatprep.subr.bf16.mxu1 %v2303_v61  ;;  %v2336_v61 = vld [vmem:[%s3422_s2 + $0x194] ss:$24 sps:$4 sm:$0xff]   ;;  %v2334_v1 = vld [vmem:[%s3422_s2 + $0x190] ss:$24 sps:$4 sm:$0xff]  }
  0xde   : > { %v2394_v40 = vpop.eup %2393  ;;  %v3226_v21 = vpack.c.bf16 %v539_v7, %v537_v17  ;;  %v3228_v59 = vpack.c.bf16 %v538_v6, %v536_v8 }
  0xdf   : > { %1193 = vmatmul.mubr.bf16.gmra.mxu0 %v3150_v15  ;;  %1306 = vmatmul.mubr.bf16.gmra.mxu1 %v3150_v15  ;;  %v543_v24 = vmul.f32 %v2394_v40, %v511_v14  ;;  %v542_v25 = vmul.f32 %v2394_v40, %v510_v16 }
  0xe0   : > { %1375 = vmatpush1.bf16.msra.mxu0 %v2301_v54  ;;  %2139 = vmatpush1.bf16.msra.mxu1 %v2301_v54 }
  0xe1   : > { %1202 = vmatprep.mubr.bf16.mxu0 %v3178_v53  ;;  %1315 = vmatprep.mubr.bf16.mxu1 %v3178_v53 }
  0xe2   : > { %v2396_v29 = vpop.eup %2395  ;;  %1376 = vmatprep.subr.bf16.mxu0 %v2306_v0  ;;  %2124 = vmatprep.subr.bf16.mxu1 %v2306_v0 }
  0xe3   : > { %v2398_v33 = vpop.eup %2397  ;;  %v541_v49 = vmul.f32 %v2396_v29, %v509_v4  ;;  %v540_v48 = vmul.f32 %v2396_v29, %v508_v63 }
  0xe4   : > { %1377 = vmatpush1.bf16.msra.mxu0 %v2304_v19  ;;  %2140 = vmatpush1.bf16.msra.mxu1 %v2304_v19  ;;  %v547_v51 = vmul.f32 %v2398_v33, %v515_v5  ;;  %v546_v11 = vmul.f32 %v2398_v33, %v514_v50 }
  0xe5   : > { %1378 = vmatprep.subr.bf16.mxu0 %v2309_v20  ;;  %2125 = vmatprep.subr.bf16.mxu1 %v2309_v20  ;;  %v3255_v23 = vpack.c.bf16 %v543_v24, %v541_v49  ;;  %v3257_v27 = vpack.c.bf16 %v542_v25, %v540_v48 }
  0xe6   : > { %v2400_v36 = vpop.eup %2399 }
  0xe7   : > { %1203 = vmatmul.mubr.bf16.gmra.mxu0 %v3183_v18  ;;  %1316 = vmatmul.mubr.bf16.gmra.mxu1 %v3183_v18  ;;  %v545_v35 = vmul.f32 %v2400_v36, %v513_v28  ;;  %v544_v39 = vmul.f32 %v2400_v36, %v512_v26 }
  0xe8   : > { %1379 = vmatpush1.bf16.msra.mxu0 %v2307_v30  ;;  %2141 = vmatpush1.bf16.msra.mxu1 %v2307_v30 }
  0xe9   : > { %1212 = vmatprep.mubr.bf16.mxu0 %v3207_v60  ;;  %1325 = vmatprep.mubr.bf16.mxu1 %v3207_v60  ;;  %v3272_v44 = vpack.c.bf16 %v547_v51, %v545_v35  ;;  %v3274_v52 = vpack.c.bf16 %v546_v11, %v544_v39 }
  0xea   : > { %1380 = vmatprep.subr.bf16.mxu0 %v2312_v45  ;;  %2126 = vmatprep.subr.bf16.mxu1 %v2312_v45 }
  0xec   : > { %1381 = vmatpush1.bf16.msra.mxu0 %v2310_v3  ;;  %2142 = vmatpush1.bf16.msra.mxu1 %v2310_v3 }
  0xed   : > { %1382 = vmatprep.subr.bf16.mxu0 %v2315_v43  ;;  %2127 = vmatprep.subr.bf16.mxu1 %v2315_v43 }
  0xef   : > { %1213 = vmatmul.mubr.bf16.gmra.mxu0 %v3214_v32  ;;  %1326 = vmatmul.mubr.bf16.gmra.mxu1 %v3214_v32 }
  0xf0   : > { %1383 = vmatpush2.bf16.msra.mxu0 %v2313_v31  ;;  %2143 = vmatpush2.bf16.msra.mxu1 %v2313_v31 }
  0xf1   : > { %1222 = vmatprep.mubr.bf16.mxu0 %v3226_v21  ;;  %1335 = vmatprep.mubr.bf16.mxu1 %v3226_v21 }
  0xf2   : > { %1384 = vmatprep.subr.bf16.mxu0 %v2318_v56  ;;  %2128 = vmatprep.subr.bf16.mxu1 %v2318_v56 }
  0xf4   : > { %1385 = vmatpush2.bf16.msra.mxu0 %v2316_v9  ;;  %2144 = vmatpush2.bf16.msra.mxu1 %v2316_v9 }
  0xf5   : > { %1386 = vmatprep.subr.bf16.mxu0 %v2321_v12  ;;  %2129 = vmatprep.subr.bf16.mxu1 %v2321_v12 }
  0xf7   : > { %1223 = vmatmul.mubr.bf16.gmra.mxu0 %v3228_v59  ;;  %1336 = vmatmul.mubr.bf16.gmra.mxu1 %v3228_v59 }
  0xf8   : > { %1387 = vmatpush2.bf16.msra.mxu0 %v2319_v34  ;;  %2145 = vmatpush2.bf16.msra.mxu1 %v2319_v34 }
  0xf9   : > { %1232 = vmatprep.mubr.bf16.mxu0 %v3255_v23  ;;  %1345 = vmatprep.mubr.bf16.mxu1 %v3255_v23 }
  0xfa   : > { %1388 = vmatprep.subr.bf16.mxu0 %v2324_v47  ;;  %2130 = vmatprep.subr.bf16.mxu1 %v2324_v47 }
  0xfc   : > { %1389 = vmatpush2.bf16.msra.mxu0 %v2322_v58  ;;  %2146 = vmatpush2.bf16.msra.mxu1 %v2322_v58 }
  0xfd   : > { %1390 = vmatprep.subr.bf16.mxu0 %v2327_v2  ;;  %2131 = vmatprep.subr.bf16.mxu1 %v2327_v2 }
  0xff   : > { %1233 = vmatmul.mubr.bf16.gmra.mxu0 %v3257_v27  ;;  %1346 = vmatmul.mubr.bf16.gmra.mxu1 %v3257_v27 }
 0x100   : > { %1391 = vmatpush2.bf16.msra.mxu0 %v2325_v10  ;;  %2147 = vmatpush2.bf16.msra.mxu1 %v2325_v10 }
 0x101   : > { %1242 = vmatprep.mubr.bf16.mxu0 %v3272_v44  ;;  %1355 = vmatprep.mubr.bf16.mxu1 %v3272_v44 }
 0x102   : > { %1392 = vmatprep.subr.bf16.mxu0 %v2330_v37  ;;  %2132 = vmatprep.subr.bf16.mxu1 %v2330_v37 }
 0x104   : > { %1393 = vmatpush2.bf16.msra.mxu0 %v2328_v42  ;;  %2148 = vmatpush2.bf16.msra.mxu1 %v2328_v42 }
 0x105   : > { %1394 = vmatprep.subr.bf16.mxu0 %v2333_v41  ;;  %2133 = vmatprep.subr.bf16.mxu1 %v2333_v41 }
 0x107   : > { %1243 = vmatmul.mubr.bf16.gmra.mxu0 %v3274_v52  ;;  %1356 = vmatmul.mubr.bf16.gmra.mxu1 %v3274_v52 }
 0x108   : > { %1395 = vmatpush2.bf16.msra.mxu0 %v2331_v55  ;;  %2149 = vmatpush2.bf16.msra.mxu1 %v2331_v55 }
 0x109   : > { %1398 = vmatprep.mubr.bf16.mxu0 %v3115_v46  ;;  %1438 = vmatprep.mubr.bf16.mxu1 %v3207_v60 }
 0x10a   : > { %1396 = vmatprep.subr.bf16.mxu0 %v2336_v61  ;;  %2134 = vmatprep.subr.bf16.mxu1 %v2336_v61 }
 0x10c   : > { %1397 = vmatpush2.bf16.msra.mxu0 %v2334_v1  ;;  %2150 = vmatpush2.bf16.msra.mxu1 %v2334_v1 }
 0x10f   : > { %1399 = vmatmul.mubr.bf16.vlgmr.msra.gmra.mxu0 %v3120_v57  ;;  %1439 = vmatmul.mubr.bf16.vlgmr.msra.gmra.mxu1 %v3214_v32 }
 0x110   : > { %1408 = vmatprep.mubr.bf16.mxu0 %v3113_v62  ;;  %1448 = vmatprep.mubr.bf16.mxu1 %v3226_v21 }
 0x117   : > { %1409 = vmatmul.mubr.bf16.gmra.mxu0 %v3122_v13  ;;  %1449 = vmatmul.mubr.bf16.gmra.mxu1 %v3228_v59 }
 0x118   : > { %1418 = vmatprep.mubr.bf16.mxu0 %v3148_v22  ;;  %1458 = vmatprep.mubr.bf16.mxu1 %v3255_v23 }
 0x11f   : > { %1419 = vmatmul.mubr.bf16.gmra.mxu0 %v3150_v15  ;;  %1459 = vmatmul.mubr.bf16.gmra.mxu1 %v3257_v27 }
 0x120   : > { %1428 = vmatprep.mubr.bf16.mxu0 %v3178_v53  ;;  %1468 = vmatprep.mubr.bf16.mxu1 %v3272_v44 }
 0x127   : > { %1429 = vmatmul.mubr.bf16.gmra.mxu0 %v3183_v18  ;;  %1469 = vmatmul.mubr.bf16.gmra.mxu1 %v3274_v52 }
 0x18f   : > { %v1174_v62 = vpop.f32.mrf.mxu0  ;;  %v1287_v46 = vpop.f32.mrf.mxu1 }
 0x191   : > { %v1176_v57 = vpop.f32.mrf.mxu0  ;;  %v1289_v13 = vpop.f32.mrf.mxu1 }
 0x192   : > { %v2071_v22 = vpack.c.bf16 %v1176_v57, %v1174_v62  ;;  %v2072_v15 = vpack.c.bf16 %v1289_v13, %v1287_v46 }
 0x193   : > { %v1178_v53 = vpop.f32.mrf.mxu0  ;;  %v1291_v18 = vpop.f32.mrf.mxu1 }
 0x194   : > { %1767 = vst [vmem:[%s3355_s25] sm:$0xff] %v2071_v22  ;;  %1768 = vst [vmem:[%s3355_s25 + $0x8] sm:$0xff] %v2072_v15 }
 0x195   : > { %v1180_v60 = vpop.f32.mrf.mxu0  ;;  %v1293_v32 = vpop.f32.mrf.mxu1 }
 0x196   : > { %v2074_v38 = vpack.c.bf16 %v1180_v60, %v1178_v53  ;;  %v2075_v7 = vpack.c.bf16 %v1293_v32, %v1291_v18 }
 0x197   : > { %v1184_v6 = vpop.f32.mrf.mxu0  ;;  %v1297_v54 = vpop.f32.mrf.mxu1 }
 0x198   : > { %1770 = vst [vmem:[%s3355_s25 + $0x18] sm:$0xff] %v2074_v38  ;;  %1771 = vst [vmem:[%s3355_s25 + $0x20] sm:$0xff] %v2075_v7 }
 0x199   : > { %v1186_v17 = vpop.f32.mrf.mxu0  ;;  %v1299_v8 = vpop.f32.mrf.mxu1 }
 0x19a   : > { %v2077_v16 = vpack.c.bf16 %v1186_v17, %v1184_v6  ;;  %v2078_v14 = vpack.c.bf16 %v1299_v8, %v1297_v54 }
 0x19b   : > { %v1188_v40 = vpop.f32.mrf.mxu0  ;;  %v1301_v0 = vpop.f32.mrf.mxu1 }
 0x19c   : > { %1773 = vst [vmem:[%s3355_s25 + $0x30] sm:$0xff] %v2077_v16  ;;  %1774 = vst [vmem:[%s3355_s25 + $0x38] sm:$0xff] %v2078_v14 }
 0x19d   : > { %v1190_v21 = vpop.f32.mrf.mxu0  ;;  %v1303_v59 = vpop.f32.mrf.mxu1 }
 0x19e   : > { %v2080_v63 = vpack.c.bf16 %v1190_v21, %v1188_v40  ;;  %v2081_v4 = vpack.c.bf16 %v1303_v59, %v1301_v0 }
 0x19f   : > { %v1194_v5 = vpop.f32.mrf.mxu0  ;;  %v1307_v19 = vpop.f32.mrf.mxu1 }
 0x1a0   : > { %1776 = vst [vmem:[%s3355_s25 + $0x48] sm:$0xff] %v2080_v63  ;;  %1777 = vst [vmem:[%s3355_s25 + $0x50] sm:$0xff] %v2081_v4 }
 0x1a1   : > { %v1196_v50 = vpop.f32.mrf.mxu0  ;;  %v1309_v20 = vpop.f32.mrf.mxu1 }
 0x1a2   : > { %v2083_v24 = vpack.c.bf16 %v1196_v50, %v1194_v5  ;;  %v2084_v25 = vpack.c.bf16 %v1309_v20, %v1307_v19 }
 0x1a3   : > { %v1198_v29 = vpop.f32.mrf.mxu0  ;;  %v1311_v33 = vpop.f32.mrf.mxu1 }
 0x1a4   : > { %1779 = vst [vmem:[%s3355_s25 + $0x60] sm:$0xff] %v2083_v24  ;;  %1780 = vst [vmem:[%s3355_s25 + $0x68] sm:$0xff] %v2084_v25 }
 0x1a5   : > { %v1200_v26 = vpop.f32.mrf.mxu0  ;;  %v1313_v28 = vpop.f32.mrf.mxu1 }
 0x1a6   : > { %v2086_v49 = vpack.c.bf16 %v1200_v26, %v1198_v29  ;;  %v2087_v48 = vpack.c.bf16 %v1313_v28, %v1311_v33 }
 0x1a7   : > { %v1204_v30 = vpop.f32.mrf.mxu0  ;;  %v1317_v51 = vpop.f32.mrf.mxu1 }
 0x1a8   : > { %1782 = vst [vmem:[%s3355_s25 + $0x78] sm:$0xff] %v2086_v49  ;;  %1783 = vst [vmem:[%s3355_s25 + $0x80] sm:$0xff] %v2087_v48 }
 0x1a9   : > { %v1206_v23 = vpop.f32.mrf.mxu0  ;;  %v1319_v27 = vpop.f32.mrf.mxu1 }
 0x1aa   : > { %v2089_v11 = vpack.c.bf16 %v1206_v23, %v1204_v30  ;;  %v2090_v36 = vpack.c.bf16 %v1319_v27, %v1317_v51 }
 0x1ab   : > { %v1208_v45 = vpop.f32.mrf.mxu0  ;;  %v1321_v35 = vpop.f32.mrf.mxu1 }
 0x1ac   : > { %1785 = vst [vmem:[%s3355_s25 + $0x90] sm:$0xff] %v2089_v11  ;;  %1786 = vst [vmem:[%s3355_s25 + $0x98] sm:$0xff] %v2090_v36 }
 0x1ad   : > { %v1210_v39 = vpop.f32.mrf.mxu0  ;;  %v1323_v3 = vpop.f32.mrf.mxu1 }
 0x1ae   : > { %v2092_v43 = vpack.c.bf16 %v1210_v39, %v1208_v45  ;;  %v2093_v44 = vpack.c.bf16 %v1323_v3, %v1321_v35 }
 0x1af   : > { %v1214_v52 = vpop.f32.mrf.mxu0  ;;  %v1327_v31 = vpop.f32.mrf.mxu1 }
 0x1b0   : > { %1788 = vst [vmem:[%s3355_s25 + $0xa8] sm:$0xff] %v2092_v43  ;;  %1789 = vst [vmem:[%s3355_s25 + $0xb0] sm:$0xff] %v2093_v44 }
 0x1b1   : > { %v1216_v56 = vpop.f32.mrf.mxu0  ;;  %v1329_v9 = vpop.f32.mrf.mxu1 }
 0x1b2   : > { %v2095_v12 = vpack.c.bf16 %v1216_v56, %v1214_v52  ;;  %v2096_v34 = vpack.c.bf16 %v1329_v9, %v1327_v31 }
 0x1b3   : > { %v1218_v47 = vpop.f32.mrf.mxu0  ;;  %v1331_v58 = vpop.f32.mrf.mxu1 }
 0x1b4   : > { %1791 = vst [vmem:[%s3355_s25 + $0xc0] sm:$0xff] %v2095_v12  ;;  %1792 = vst [vmem:[%s3355_s25 + $0xc8] sm:$0xff] %v2096_v34 }
 0x1b5   : > { %v1220_v2 = vpop.f32.mrf.mxu0  ;;  %v1333_v10 = vpop.f32.mrf.mxu1 }
 0x1b6   : > { %v2098_v37 = vpack.c.bf16 %v1220_v2, %v1218_v47  ;;  %v2099_v42 = vpack.c.bf16 %v1333_v10, %v1331_v58 }
 0x1b7   : > { %v1224_v41 = vpop.f32.mrf.mxu0  ;;  %v1337_v55 = vpop.f32.mrf.mxu1 }
 0x1b8   : > { %1794 = vst [vmem:[%s3355_s25 + $0xd8] sm:$0xff] %v2098_v37  ;;  %1795 = vst [vmem:[%s3355_s25 + $0xe0] sm:$0xff] %v2099_v42 }
 0x1b9   : > { %v1226_v61 = vpop.f32.mrf.mxu0  ;;  %v1339_v1 = vpop.f32.mrf.mxu1 }
 0x1ba   : > { %v2101_v62 = vpack.c.bf16 %v1226_v61, %v1224_v41  ;;  %v2102_v46 = vpack.c.bf16 %v1339_v1, %v1337_v55 }
 0x1bb   : > { %v1228_v57 = vpop.f32.mrf.mxu0  ;;  %v1341_v13 = vpop.f32.mrf.mxu1 }
 0x1bc   : > { %1797 = vst [vmem:[%s3355_s25 + $0xf0] sm:$0xff] %v2101_v62  ;;  %1798 = vst [vmem:[%s3355_s25 + $0xf8] sm:$0xff] %v2102_v46 }
 0x1bd   : > { %v1230_v22 = vpop.f32.mrf.mxu0  ;;  %v1343_v15 = vpop.f32.mrf.mxu1 }
 0x1be   : > { %v2104_v53 = vpack.c.bf16 %v1230_v22, %v1228_v57  ;;  %v2105_v18 = vpack.c.bf16 %v1343_v15, %v1341_v13 }
 0x1bf   : > { %v1234_v60 = vpop.f32.mrf.mxu0  ;;  %v1347_v32 = vpop.f32.mrf.mxu1 }
 0x1c0   : > { %1800 = vst [vmem:[%s3355_s25 + $0x108] sm:$0xff] %v2104_v53  ;;  %1801 = vst [vmem:[%s3355_s25 + $0x110] sm:$0xff] %v2105_v18 }
 0x1c1   : > { %v1236_v38 = vpop.f32.mrf.mxu0  ;;  %v1349_v7 = vpop.f32.mrf.mxu1 }
 0x1c2   : > { %v2107_v6 = vpack.c.bf16 %v1236_v38, %v1234_v60  ;;  %v2108_v54 = vpack.c.bf16 %v1349_v7, %v1347_v32 }
 0x1c3   : > { %v1238_v17 = vpop.f32.mrf.mxu0  ;;  %v1351_v8 = vpop.f32.mrf.mxu1 }
 0x1c4   : > { %1803 = vst [vmem:[%s3355_s25 + $0x120] sm:$0xff] %v2107_v6  ;;  %1804 = vst [vmem:[%s3355_s25 + $0x128] sm:$0xff] %v2108_v54 }
 0x1c5   : > { %v1240_v16 = vpop.f32.mrf.mxu0  ;;  %v1353_v14 = vpop.f32.mrf.mxu1 }
 0x1c6   : > { %v2110_v40 = vpack.c.bf16 %v1240_v16, %v1238_v17  ;;  %v2111_v0 = vpack.c.bf16 %v1353_v14, %v1351_v8 }
 0x1c7   : > { %v1244_v21 = vpop.f32.mrf.mxu0  ;;  %v1357_v59 = vpop.f32.mrf.mxu1 }
 0x1c8   : > { %1806 = vst [vmem:[%s3355_s25 + $0x138] sm:$0xff] %v2110_v40  ;;  %1807 = vst [vmem:[%s3355_s25 + $0x140] sm:$0xff] %v2111_v0 }
 0x1c9   : > { %v1246_v63 = vpop.f32.mrf.mxu0  ;;  %v1359_v4 = vpop.f32.mrf.mxu1 }
 0x1ca   : > { %v2113_v5 = vpack.c.bf16 %v1246_v63, %v1244_v21  ;;  %v2114_v19 = vpack.c.bf16 %v1359_v4, %v1357_v59 }
 0x1cb   : > { %v1248_v50 = vpop.f32.mrf.mxu0  ;;  %v1361_v20 = vpop.f32.mrf.mxu1 }
 0x1cc   : > { %1809 = vst [vmem:[%s3355_s25 + $0x150] sm:$0xff] %v2113_v5  ;;  %1810 = vst [vmem:[%s3355_s25 + $0x158] sm:$0xff] %v2114_v19 }
 0x1cd   : > { %v1250_v24 = vpop.f32.mrf.mxu0  ;;  %v1363_v25 = vpop.f32.mrf.mxu1 }
 0x1ce   : > { %v2116_v29 = vpack.c.bf16 %v1250_v24, %v1248_v50  ;;  %v2117_v33 = vpack.c.bf16 %v1363_v25, %v1361_v20 }
 0x1cf   : > { %v1400_v26 = vpop.f32.mrf.mxu0  ;;  %v1440_v28 = vpop.f32.mrf.mxu1 }
 0x1d0   : > { %1812 = vst [vmem:[%s3355_s25 + $0x168] sm:$0xff] %v2116_v29  ;;  %1813 = vst [vmem:[%s3355_s25 + $0x170] sm:$0xff] %v2117_v33 }
 0x1d1   : > { %v1402_v49 = vpop.f32.mrf.mxu0  ;;  %v1442_v48 = vpop.f32.mrf.mxu1 }
 0x1d2   : > { %v2073_v30 = vpack.c.bf16 %v1402_v49, %v1400_v26  ;;  %v2097_v51 = vpack.c.bf16 %v1442_v48, %v1440_v28 }
 0x1d3   : > { %v1404_v23 = vpop.f32.mrf.mxu0  ;;  %v1444_v27 = vpop.f32.mrf.mxu1 }
 0x1d4   : > { %1769 = vst [vmem:[%s3355_s25 + $0x10] sm:$0xff] %v2073_v30  ;;  %1793 = vst [vmem:[%s3355_s25 + $0xd0] sm:$0xff] %v2097_v51 }
 0x1d5   : > { %v1406_v11 = vpop.f32.mrf.mxu0  ;;  %v1446_v36 = vpop.f32.mrf.mxu1 }
 0x1d6   : > { %v2076_v45 = vpack.c.bf16 %v1406_v11, %v1404_v23  ;;  %v2100_v35 = vpack.c.bf16 %v1446_v36, %v1444_v27 }
 0x1d7   : > { %v1410_v39 = vpop.f32.mrf.mxu0  ;;  %v1450_v3 = vpop.f32.mrf.mxu1 }
 0x1d8   : > { %1772 = vst [vmem:[%s3355_s25 + $0x28] sm:$0xff] %v2076_v45  ;;  %1796 = vst [vmem:[%s3355_s25 + $0xe8] sm:$0xff] %v2100_v35 }
 0x1d9   : > { %v1412_v43 = vpop.f32.mrf.mxu0  ;;  %v1452_v44 = vpop.f32.mrf.mxu1 }
 0x1da   : > { %v2079_v52 = vpack.c.bf16 %v1412_v43, %v1410_v39  ;;  %v2103_v31 = vpack.c.bf16 %v1452_v44, %v1450_v3 }
 0x1db   : > { %v1414_v56 = vpop.f32.mrf.mxu0  ;;  %v1454_v9 = vpop.f32.mrf.mxu1 }
 0x1dc   : > { %1775 = vst [vmem:[%s3355_s25 + $0x40] sm:$0xff] %v2079_v52  ;;  %1799 = vst [vmem:[%s3355_s25 + $0x100] sm:$0xff] %v2103_v31 }
 0x1dd   : > { %v1416_v12 = vpop.f32.mrf.mxu0  ;;  %v1456_v34 = vpop.f32.mrf.mxu1 }
 0x1de   : > { %v2082_v47 = vpack.c.bf16 %v1416_v12, %v1414_v56  ;;  %v2106_v58 = vpack.c.bf16 %v1456_v34, %v1454_v9 }
 0x1df   : > { %v1420_v2 = vpop.f32.mrf.mxu0  ;;  %v1460_v10 = vpop.f32.mrf.mxu1 }
 0x1e0   : > { %1778 = vst [vmem:[%s3355_s25 + $0x58] sm:$0xff] %v2082_v47  ;;  %1802 = vst [vmem:[%s3355_s25 + $0x118] sm:$0xff] %v2106_v58 }
 0x1e1   : > { %v1422_v37 = vpop.f32.mrf.mxu0  ;;  %v1462_v42 = vpop.f32.mrf.mxu1 }
 0x1e2   : > { %v2085_v41 = vpack.c.bf16 %v1422_v37, %v1420_v2  ;;  %v2109_v55 = vpack.c.bf16 %v1462_v42, %v1460_v10 }
 0x1e3   : > { %v1424_v61 = vpop.f32.mrf.mxu0  ;;  %v1464_v1 = vpop.f32.mrf.mxu1 }
 0x1e4   : > { %1781 = vst [vmem:[%s3355_s25 + $0x70] sm:$0xff] %v2085_v41  ;;  %1805 = vst [vmem:[%s3355_s25 + $0x130] sm:$0xff] %v2109_v55 }
 0x1e5   : > { %v1426_v62 = vpop.f32.mrf.mxu0  ;;  %v1466_v46 = vpop.f32.mrf.mxu1 }
 0x1e6   : > { %v2088_v57 = vpack.c.bf16 %v1426_v62, %v1424_v61  ;;  %v2112_v13 = vpack.c.bf16 %v1466_v46, %v1464_v1 }
 0x1e7   : > { %v1430_v22 = vpop.f32.mrf.mxu0  ;;  %v1470_v15 = vpop.f32.mrf.mxu1 }
 0x1e8   : > { %1784 = vst [vmem:[%s3355_s25 + $0x88] sm:$0xff] %v2088_v57  ;;  %1808 = vst [vmem:[%s3355_s25 + $0x148] sm:$0xff] %v2112_v13 }
 0x1e9   : > { %v1432_v53 = vpop.f32.mrf.mxu0  ;;  %v1472_v18 = vpop.f32.mrf.mxu1 }
 0x1ea   : > { %v2091_v60 = vpack.c.bf16 %v1432_v53, %v1430_v22  ;;  %v2115_v32 = vpack.c.bf16 %v1472_v18, %v1470_v15 }
 0x1eb   : > { %v1434_v38 = vpop.f32.mrf.mxu0  ;;  %v1474_v7 = vpop.f32.mrf.mxu1 }
 0x1ec   : > { %1787 = vst [vmem:[%s3355_s25 + $0xa0] sm:$0xff] %v2091_v60  ;;  %1811 = vst [vmem:[%s3355_s25 + $0x160] sm:$0xff] %v2115_v32 }
 0x1ed   : > { %v1436_v6 = vpop.f32.mrf.mxu0  ;;  %v1476_v54 = vpop.f32.mrf.mxu1 }
 0x1ee   : > { %v2094_v17 = vpack.c.bf16 %v1436_v6, %v1434_v38  ;;  %v2118_v8 = vpack.c.bf16 %v1476_v54, %v1474_v7 }
 0x1f0   : > { %1790 = vst [vmem:[%s3355_s25 + $0xb8] sm:$0xff] %v2094_v17  ;;  %1814 = vst [vmem:[%s3355_s25 + $0x178] sm:$0xff] %v2118_v8 }
 0x1f1 PF: > { %s13_s16 = sadd.s32 1, %s2439_s16   ;;  %s3424_s12 = smov %s2431_s14 }
 0x1f2   : > { %p10_p7 = scmp.ge.s32.totalorder %s13_s16, 6   ;;  %s3425_s13 = smov %s2435_s15 }
 0x1f3   : > { %s3426_s14 = smov %s3429_s17  ;;  %s3427_s15 = smov %s3433_s18 }
 0x1f4   :  { %12 = sbr.rel (!%p10_p7) target bundleno = 3 (0x3), region = 62 }

// kernel: transformer_block.4
= control target key start
LH: loop header
LB: loop body
LE: loop exit
PB: predicated region body
PF: predicated region fallthrough
CT: control target
= control target key end

     0   :  { %s7664_s0 = inlined_call_operand.vmem [shape: bf16[2,2,256,128], index: 0, kind: input, shape index: {}]   ;;  %s7665_s1 = inlined_call_operand.vmem [shape: bf16[2,2,256,128], index: 1, kind: input, shape index: {}]   ;;  %s7666_s2 = inlined_call_operand.vmem [shape: bf16[2,2,256,128], index: 2, kind: input, shape index: {}]   ;;  %s7667_s3 = inlined_call_operand.vmem [shape: f32[256,128], index: 3, kind: input, shape index: {}, may-alias: {3,5}]   ;;  %s7668_s4 = inlined_call_operand.vmem [shape: f32[256,128], index: 4, kind: input, shape index: {}, may-alias: {4,6}]   ;;  %s7669_s5 = inlined_call_operand.vmem [shape: f32[256,128], index: 5, kind: input, shape index: {}, may-alias: {3,5}]   ;;  %s7670_s6 = inlined_call_operand.vmem [shape: f32[256,128], index: 6, kind: input, shape index: {}, may-alias: {4,6}]   ;;  %s7671_s7 = inlined_call_operand.vmem [shape: bf16[2,2,256,128], index: 7, kind: output, shape index: {}]  }
   0x1   :  { %7714 = sst [smem:[#allocation49_spill]] %s7664_s0 }
   0x2   :  { %7715 = sst [smem:[#allocation50_spill]] %s7665_s1 }
   0x3   :  { %7716 = sst [smem:[#allocation51_spill]] %s7666_s2 }
   0x4   :  { %7717 = sst [smem:[#allocation52_spill]] %s7671_s7 }
   0x5   :  { %s5665_s24 = smov 0   ;;  %s5667_s25 = smov 0  }
   0x6   :  { %s5669_s26 = smov 0   ;;  %s5671_s27 = smov 0  }
   0x7   :  { %s5673_s28 = smov 0   ;;  %s5675_s29 = smov 0  }
   0x8   :  { %s5677_s30 = smov 0   ;;  %s5679_s8 = smov 0  }
   0x9   :  { %s5681_s9 = smov 0   ;;  %s5683_s10 = smov 0  }
   0xa   :  { %s5685_s11 = smov 0  }
   0xb LB: > { %7718 = sst [smem:[#allocation10_spill]] %s5601_s30  ;;  %s29_s12 = sadd.s32 1, %s5605_s8  ;;  %s5617_s11 = sphi %s5685_s11, %s17_s11   ;;  %s5613_s10 = sphi %s5683_s10, %s7830_s10   ;;  %s5609_s9 = sphi %s5681_s9, %s7829_s9   ;;  %s5605_s8 = sphi %s5679_s8, %s7836_s8   ;;  %s5601_s30 = sphi %s5677_s30, %s7827_s30   ;;  %s5597_s29 = sphi %s5675_s29, %s7826_s29   ;;  %s5593_s28 = sphi %s5673_s28, %s7835_s28   ;;  %s5589_s27 = sphi %s5671_s27, %s7834_s27   ;;  %s5585_s26 = sphi %s5669_s26, %s7833_s26   ;;  %s5581_s25 = sphi %s5667_s25, %s7832_s25   ;;  %s5577_s24 = sphi %s5665_s24, %s7831_s24  }
   0xc   : > { %7719 = sst [smem:[#allocation11_spill]] %s5609_s9  ;;  %p30_p0 = scmp.ge.s32.totalorder %s29_s12, 2 }
   0xd   : > { %7720 = sst [smem:[#allocation12_spill]] %s5613_s10  ;;  %s32_s13 = sadd.s32 1, %s5609_s9 }
   0xe   : > { %s7838_s12 = smov (%p30_p0, %s29_s12), 0  ;;  %s7840_s13 = smov (!%p30_p0, %s32_s13), %s5609_s9 }
   0xf   : > { %7721 = sst [smem:[#allocation13_spill]] %s7838_s12  ;;  %p52_p1 = scmp.ne.s32.totalorder %s5589_s27, %s5585_s26 }
  0x10   : > { %p53_p2 = scmp.eq.s32.totalorder %s5617_s11, 0  ;;  %p34_p3 = scmp.ge.s32.totalorder %s7840_s13, 2 }
  0x11   : > { %s36_s14 = sadd.s32 1, %s5613_s10  ;;  %s4309_s15 = sadd.s32 4294967295, %s5617_s11  }
  0x12   : > { %p5733_p4 = por %p53_p2, %p52_p1  ;;  %s7842_s13 = smov (%p34_p3, %s7840_s13), 0 }
  0x13   : > { %7723 = sst [smem:[#allocation14_spill]] %s7842_s13  ;;  %s7844_s14 = smov (!%p34_p3, %s36_s14), %s5613_s10 }
  0x14   : > { %s69_s17 = ssub.s32 %s5605_s8, %s7838_s12  ;;  %p80_p5 = scmp.ne.s32.totalorder %s5581_s25, %s5577_s24 }
  0x15   : > { %p38_p6 = scmp.ge.s32.totalorder %s7844_s14, 2  ;;  %p244_p7 = scmp.eq.s32.totalorder %s4309_s15, 7 }
  0x16   : > { %s41_s18 = ssub.s32 %s5609_s9, %s7842_s13  ;;  %p5746_p8 = por %p80_p5, %p53_p2 }
  0x17   : > { %s7846_s14 = smov (%p38_p6, %s7844_s14), 0  ;;  %s45_s20 = sadd.s32 1, %s5589_s27 }
  0x18   : > { %7725 = sst [smem:[#allocation15_spill]] %s7846_s14  ;;  %p5756_p9 = por %p244_p7, %p52_p1 }
  0x19   : > { %s40_s22 = ssub.s32 %s5613_s10, %s7846_s14  ;;  %s73_s23 = sadd.s32 1, %s5581_s25 }
  0x1a   : > { %s7726_s21 = scalar_select %p5756_p9, 1, 0 }
  0x1b   : > { %s42_s12 = sor.u32 %s41_s18, %s40_s22  ;;  %s70_s7 = sor.u32 %s69_s17, %s40_s22 }
  0x1c   : > { %7727 = sst [smem:[#allocation16_spill]] %s7726_s21  ;;  %p43_p10 = scmp.eq.s32.totalorder %s42_s12, 0 }
  0x1d   : > { %p71_p11 = scmp.eq.s32.totalorder %s70_s7, 0  ;;  %p4312_p12 = scmp.ge.s32.totalorder %s5617_s11, 8 }
  0x1e   : > { %s5764_s15 = scalar_select %p43_p10, %s5589_s27, %s45_s20  }
  0x1f   : > { %s5767_s13 = scalar_select %p71_p11, %s5581_s25, %s73_s23  }
  0x20   : > { %266 = sbr.rel (%p4312_p12) target bundleno = 91 (0x5b), region = 16 }
  0x25   : > { %269 = sbr.rel (!%p5733_p4) target bundleno = 55 (0x37), region = 20  ;;  %s271_s30 = sand.u32 (%p5733_p4), 1, %s5589_s27  }
  0x26   : > { %s4314_s14 = sshll.u32 (%p5733_p4), %s5609_s9, 4  ;;  %s4313_s21 = sshll.u32 (%p5733_p4), %s271_s30, 7 }
  0x27   : > { %s4315_s18 = sshll.u32 (%p5733_p4), %s5613_s10, 6  ;;  %s7728_s0 = sld [smem:[#allocation49_spill]] (%p5733_p4) }
  0x28   : > { %s276_s17 = sadd.s32 (%p5733_p4), %s4315_s18, %s4314_s14  ;;  %s273_s30 = scalar_lea.vmem (%p5733_p4), [#allocation6], %s4313_s21 }
  0x29   : > { %s4316_s12 = sshll.u32 (%p5733_p4), %s276_s17, 2 }
  0x2d   : > { %s5778_s22 = scalar_lea.vmem %s7728_s0, %s4316_s12 }
  0x2e   : > { %v295_v0 = vld [vmem:[%s5778_s22] sm:$0xff]   ;;  %v299_v1 = vld [vmem:[%s5778_s22 + $0x8] sm:$0xff]   ;;  %v303_v2 = vld [vmem:[%s5778_s22 + $0x10] sm:$0xff]  }
  0x2f   : > { %296 = vst [vmem:[%s273_s30] sm:$0xff] %v295_v0   ;;  %300 = vst [vmem:[%s273_s30 + $0x8] sm:$0xff] %v299_v1   ;;  %v307_v3 = vld [vmem:[%s5778_s22 + $0x18] sm:$0xff]   ;;  %v311_v4 = vld [vmem:[%s5778_s22 + $0x20] sm:$0xff]  }
  0x30   : > { %304 = vst [vmem:[%s273_s30 + $0x10] sm:$0xff] %v303_v2   ;;  %v315_v5 = vld [vmem:[%s5778_s22 + $0x28] sm:$0xff]   ;;  %308 = vst [vmem:[%s273_s30 + $0x18] sm:$0xff] %v307_v3   ;;  %v319_v6 = vld [vmem:[%s5778_s22 + $0x30] sm:$0xff]  }
  0x31   : > { %312 = vst [vmem:[%s273_s30 + $0x20] sm:$0xff] %v311_v4   ;;  %316 = vst [vmem:[%s273_s30 + $0x28] sm:$0xff] %v315_v5   ;;  %v323_v7 = vld [vmem:[%s5778_s22 + $0x38] sm:$0xff]   ;;  %v327_v8 = vld [vmem:[%s5778_s22 + $0x80] sm:$0xff]  }
  0x32   : > { %320 = vst [vmem:[%s273_s30 + $0x30] sm:$0xff] %v319_v6   ;;  %324 = vst [vmem:[%s273_s30 + $0x38] sm:$0xff] %v323_v7   ;;  %v331_v9 = vld [vmem:[%s5778_s22 + $0x88] sm:$0xff]   ;;  %v335_v10 = vld [vmem:[%s5778_s22 + $0x90] sm:$0xff]  }
  0x33   : > { %328 = vst [vmem:[%s273_s30 + $0x40] sm:$0xff] %v327_v8   ;;  %v339_v11 = vld [vmem:[%s5778_s22 + $0x98] sm:$0xff]   ;;  %332 = vst [vmem:[%s273_s30 + $0x48] sm:$0xff] %v331_v9   ;;  %v343_v12 = vld [vmem:[%s5778_s22 + $0xa0] sm:$0xff]  }
  0x34   : > { %336 = vst [vmem:[%s273_s30 + $0x50] sm:$0xff] %v335_v10   ;;  %340 = vst [vmem:[%s273_s30 + $0x58] sm:$0xff] %v339_v11   ;;  %v347_v13 = vld [vmem:[%s5778_s22 + $0xa8] sm:$0xff]   ;;  %v351_v14 = vld [vmem:[%s5778_s22 + $0xb0] sm:$0xff]  }
  0x35   : > { %344 = vst [vmem:[%s273_s30 + $0x60] sm:$0xff] %v343_v12   ;;  %348 = vst [vmem:[%s273_s30 + $0x68] sm:$0xff] %v347_v13   ;;  %v355_v15 = vld [vmem:[%s5778_s22 + $0xb8] sm:$0xff]  }
  0x36   : > { %352 = vst [vmem:[%s273_s30 + $0x70] sm:$0xff] %v351_v14   ;;  %356 = vst [vmem:[%s273_s30 + $0x78] sm:$0xff] %v355_v15  }
  0x37 PF: > { %446 = sbr.rel (!%p5746_p8) target bundleno = 73 (0x49), region = 61  ;;  %s448_s14 = sand.u32 (%p5746_p8), 1, %s5581_s25  }
  0x38   : > { %s4318_s16 = sshll.u32 (%p5746_p8), %s5605_s8, 4  ;;  %s4317_s21 = sshll.u32 (%p5746_p8), %s448_s14, 7 }
  0x39   : > { %s4319_s23 = sshll.u32 (%p5746_p8), %s5613_s10, 6  ;;  %s7729_s1 = sld [smem:[#allocation50_spill]] (%p5746_p8) }
  0x3a   : > { %s453_s18 = sadd.s32 (%p5746_p8), %s4319_s23, %s4318_s16  ;;  %s450_s22 = scalar_lea.vmem (%p5746_p8), [#allocation7], %s4317_s21 }
  0x3b   : > { %s4320_s17 = sshll.u32 (%p5746_p8), %s453_s18, 2 }
  0x3f   : > { %s5804_s20 = scalar_lea.vmem %s7729_s1, %s4320_s17 }
  0x40   : > { %v472_v16 = vld [vmem:[%s5804_s20] sm:$0xff]   ;;  %v476_v17 = vld [vmem:[%s5804_s20 + $0x8] sm:$0xff]   ;;  %v480_v18 = vld [vmem:[%s5804_s20 + $0x10] sm:$0xff]  }
  0x41   : > { %473 = vst [vmem:[%s450_s22] sm:$0xff] %v472_v16   ;;  %477 = vst [vmem:[%s450_s22 + $0x8] sm:$0xff] %v476_v17   ;;  %v484_v19 = vld [vmem:[%s5804_s20 + $0x18] sm:$0xff]   ;;  %v488_v20 = vld [vmem:[%s5804_s20 + $0x20] sm:$0xff]  }
  0x42   : > { %481 = vst [vmem:[%s450_s22 + $0x10] sm:$0xff] %v480_v18   ;;  %v492_v21 = vld [vmem:[%s5804_s20 + $0x28] sm:$0xff]   ;;  %485 = vst [vmem:[%s450_s22 + $0x18] sm:$0xff] %v484_v19   ;;  %v496_v22 = vld [vmem:[%s5804_s20 + $0x30] sm:$0xff]  }
  0x43   : > { %489 = vst [vmem:[%s450_s22 + $0x20] sm:$0xff] %v488_v20   ;;  %493 = vst [vmem:[%s450_s22 + $0x28] sm:$0xff] %v492_v21   ;;  %v500_v23 = vld [vmem:[%s5804_s20 + $0x38] sm:$0xff]   ;;  %v504_v24 = vld [vmem:[%s5804_s20 + $0x80] sm:$0xff]  }
  0x44   : > { %497 = vst [vmem:[%s450_s22 + $0x30] sm:$0xff] %v496_v22   ;;  %501 = vst [vmem:[%s450_s22 + $0x38] sm:$0xff] %v500_v23   ;;  %v508_v25 = vld [vmem:[%s5804_s20 + $0x88] sm:$0xff]   ;;  %v512_v26 = vld [vmem:[%s5804_s20 + $0x90] sm:$0xff]  }
  0x45   : > { %505 = vst [vmem:[%s450_s22 + $0x40] sm:$0xff] %v504_v24   ;;  %v516_v27 = vld [vmem:[%s5804_s20 + $0x98] sm:$0xff]   ;;  %509 = vst [vmem:[%s450_s22 + $0x48] sm:$0xff] %v508_v25   ;;  %v520_v28 = vld [vmem:[%s5804_s20 + $0xa0] sm:$0xff]  }
  0x46   : > { %513 = vst [vmem:[%s450_s22 + $0x50] sm:$0xff] %v512_v26   ;;  %517 = vst [vmem:[%s450_s22 + $0x58] sm:$0xff] %v516_v27   ;;  %v524_v29 = vld [vmem:[%s5804_s20 + $0xa8] sm:$0xff]   ;;  %v528_v30 = vld [vmem:[%s5804_s20 + $0xb0] sm:$0xff]  }
  0x47   : > { %521 = vst [vmem:[%s450_s22 + $0x60] sm:$0xff] %v520_v28   ;;  %525 = vst [vmem:[%s450_s22 + $0x68] sm:$0xff] %v524_v29   ;;  %v532_v31 = vld [vmem:[%s5804_s20 + $0xb8] sm:$0xff]  }
  0x48   : > { %529 = vst [vmem:[%s450_s22 + $0x70] sm:$0xff] %v528_v30   ;;  %533 = vst [vmem:[%s450_s22 + $0x78] sm:$0xff] %v532_v31  }
  0x49 PF: > { %623 = sbr.rel (!%p5746_p8) target bundleno = 91 (0x5b), region = 102  ;;  %s625_s30 = sand.u32 (%p5746_p8), 1, %s5581_s25  }
  0x4a   : > { %s4322_s14 = sshll.u32 (%p5746_p8), %s5605_s8, 4  ;;  %s4321_s16 = sshll.u32 (%p5746_p8), %s625_s30, 7 }
  0x4b   : > { %s4323_s21 = sshll.u32 (%p5746_p8), %s5613_s10, 6  ;;  %s7730_s2 = sld [smem:[#allocation51_spill]] (%p5746_p8) }
  0x4c   : > { %s630_s23 = sadd.s32 (%p5746_p8), %s4323_s21, %s4322_s14  ;;  %s627_s19 = scalar_lea.vmem (%p5746_p8), [#allocation8], %s4321_s16 }
  0x4d   : > { %s4324_s18 = sshll.u32 (%p5746_p8), %s630_s23, 2 }
  0x51   : > { %s5830_s7 = scalar_lea.vmem %s7730_s2, %s4324_s18 }
  0x52   : > { %v649_v32 = vld [vmem:[%s5830_s7] sm:$0xff]   ;;  %v653_v33 = vld [vmem:[%s5830_s7 + $0x8] sm:$0xff]   ;;  %v657_v34 = vld [vmem:[%s5830_s7 + $0x10] sm:$0xff]  }
  0x53   : > { %650 = vst [vmem:[%s627_s19] sm:$0xff] %v649_v32   ;;  %654 = vst [vmem:[%s627_s19 + $0x8] sm:$0xff] %v653_v33   ;;  %v661_v35 = vld [vmem:[%s5830_s7 + $0x18] sm:$0xff]   ;;  %v665_v36 = vld [vmem:[%s5830_s7 + $0x20] sm:$0xff]  }
  0x54   : > { %658 = vst [vmem:[%s627_s19 + $0x10] sm:$0xff] %v657_v34   ;;  %v669_v37 = vld [vmem:[%s5830_s7 + $0x28] sm:$0xff]   ;;  %662 = vst [vmem:[%s627_s19 + $0x18] sm:$0xff] %v661_v35   ;;  %v673_v38 = vld [vmem:[%s5830_s7 + $0x30] sm:$0xff]  }
  0x55   : > { %666 = vst [vmem:[%s627_s19 + $0x20] sm:$0xff] %v665_v36   ;;  %670 = vst [vmem:[%s627_s19 + $0x28] sm:$0xff] %v669_v37   ;;  %v677_v39 = vld [vmem:[%s5830_s7 + $0x38] sm:$0xff]   ;;  %v681_v40 = vld [vmem:[%s5830_s7 + $0x80] sm:$0xff]  }
  0x56   : > { %674 = vst [vmem:[%s627_s19 + $0x30] sm:$0xff] %v673_v38   ;;  %678 = vst [vmem:[%s627_s19 + $0x38] sm:$0xff] %v677_v39   ;;  %v685_v41 = vld [vmem:[%s5830_s7 + $0x88] sm:$0xff]   ;;  %v689_v42 = vld [vmem:[%s5830_s7 + $0x90] sm:$0xff]  }
  0x57   : > { %682 = vst [vmem:[%s627_s19 + $0x40] sm:$0xff] %v681_v40   ;;  %v693_v43 = vld [vmem:[%s5830_s7 + $0x98] sm:$0xff]   ;;  %686 = vst [vmem:[%s627_s19 + $0x48] sm:$0xff] %v685_v41   ;;  %v697_v44 = vld [vmem:[%s5830_s7 + $0xa0] sm:$0xff]  }
  0x58   : > { %690 = vst [vmem:[%s627_s19 + $0x50] sm:$0xff] %v689_v42   ;;  %694 = vst [vmem:[%s627_s19 + $0x58] sm:$0xff] %v693_v43   ;;  %v701_v45 = vld [vmem:[%s5830_s7 + $0xa8] sm:$0xff]   ;;  %v705_v46 = vld [vmem:[%s5830_s7 + $0xb0] sm:$0xff]  }
  0x59   : > { %698 = vst [vmem:[%s627_s19 + $0x60] sm:$0xff] %v697_v44   ;;  %702 = vst [vmem:[%s627_s19 + $0x68] sm:$0xff] %v701_v45   ;;  %v709_v47 = vld [vmem:[%s5830_s7 + $0xb8] sm:$0xff]  }
  0x5a   : > { %706 = vst [vmem:[%s627_s19 + $0x70] sm:$0xff] %v705_v46   ;;  %710 = vst [vmem:[%s627_s19 + $0x78] sm:$0xff] %v709_v47  }
  0x5b PF: > { %p4325_p13 = scmp.ge.s32.totalorder %s5617_s11, 1  ;;  %p835_p0 = scmp.lt.s32.totalorder %s5617_s11, 9 }
  0x5d   : > { %p836_p1 = pnand %p4325_p13, %p835_p0 }
  0x5e   : > { %s842_s20 = sand.u32 (!%p836_p1), 1, %s5585_s26   ;;  %s849_s22 = sand.u32 (!%p836_p1), 1, %s5577_s24  }
  0x5f   : > { %839 = sbr.rel (%p836_p1) target bundleno = 1462 (0x5b6), region = 159  ;;  %s4326_s30 = sshll.u32 (!%p836_p1), %s842_s20, 7 }
  0x60   : > { %s4327_s14 = sshll.u32 (!%p836_p1), %s849_s22, 7  ;;  %s5853_s16 = sshll.u32 (!%p836_p1), %s5597_s29, 4 }
  0x61   : > { %s4334_s21 = sshll.u32 (!%p836_p1), %s5593_s28, 4  ;;  %p918_p2 = scmp.lt.s32.totalorder (!%p836_p1), %s5853_s16, 31 }
  0x62   : > { %p930_p3 = scmp.lt.s32.totalorder (!%p836_p1), %s4334_s21, 31  ;;  %s5880_s9 = scalar_lea.vmem (!%p836_p1), [#allocation6], %s4326_s30 }
  0x63   : > { %s5882_s7 = scalar_lea.vmem (!%p836_p1), [#allocation7], %s4327_s14  ;;  %s5884_s19 = scalar_lea.vmem (!%p836_p1), [#allocation8], %s4327_s14 }
  0x64   : > { %s919_s17 = scalar_select %p918_p2, %s5853_s16, 31 }
  0x65   : > { %s7848_s21 = smov (!%p930_p3, %s4334_s21), 31  ;;  %s5886_s24 = scalar_lea.vmem [#allocation9], %s4326_s30 }
  0x66   : > { %s4331_s12 = sshll.u32 %s919_s17, 3  ;;  %s4335_s22 = sshll.u32 %s7848_s21, 3 }
  0x67   : > { %s5863_s0 = scalar_lea.vmem %s7667_s3, %s4331_s12  ;;  %s5868_s20 = scalar_lea.vmem %s7668_s4, %s4331_s12 }
  0x68   : > { %s5873_s10 = scalar_lea.vmem %s7669_s5, %s4335_s22  ;;  %s5878_s17 = scalar_lea.vmem %s7670_s6, %s4335_s22 }
  0x69   : > { %p4340_p4 = scmp.ne.s32.totalorder %s5593_s28, 0 }
  0x6a   : > { %s5619_s1 = smov (!%p4340_p4), 64  }
  0x6b   : > { %948 = sbr.rel (%p4340_p4) target bundleno = 275 (0x113), region = 175 }
  0x70   : > { %v5890_v48 = vld [vmem:[%s5880_s9 + $0x10] sm:$0xff]   ;;  %v5895_v51 = vld [vmem:[%s5880_s9] sm:$0xff]   ;;  %v5900_v54 = vld [vmem:[%s5880_s9 + $0x18] sm:$0xff]   ;;  %vm949_vm0 = vcmask 7168  }
  0x71   : > { %v4519_v49 = vunpack.c.l.bf16 %v5890_v48  ;;  %v4520_v50 = vunpack.c.h.bf16 %v5890_v48  ;;  %v4511_v52 = vunpack.c.l.bf16 %v5895_v51  ;;  %v4512_v53 = vunpack.c.h.bf16 %v5895_v51  ;;  %v5903_v55 = vld [vmem:[%s5880_s9 + $0x8] sm:$0xff]   ;;  %v5914_v59 = vld [vmem:[%s5880_s9 + $0x20] sm:$0xff]   ;;  %v5934_v5 = vld [vmem:[%s5880_s9 + $0x38] sm:$0xff]  }
  0x72   : > { %v5906_v56 = vld [vmem:[%s5880_s9 + $0x28] sm:$0xff]   ;;  %v4523_v58 = vunpack.c.l.bf16 %v5900_v54  ;;  %v4524_v61 = vunpack.c.h.bf16 %v5900_v54  ;;  %v4515_v62 = vunpack.c.l.bf16 %v5903_v55  ;;  %v4516_v63 = vunpack.c.h.bf16 %v5903_v55  ;;  %v5941_v7 = vld [vmem:[%s5880_s9 + $0x30] sm:$0xff]   ;;  %v5961_v15 = vld [vmem:[%s5880_s9 + $0x40] sm:$0xff]  }
  0x73   : > { %v5153_v57 = vpack.i.bf16 %v4520_v50, %v4519_v49  ;;  %v5143_v60 = vpack.i.bf16 %v4512_v53, %v4511_v52  ;;  %v4531_v0 = vunpack.c.l.bf16 %v5906_v56  ;;  %v4532_v1 = vunpack.c.h.bf16 %v5906_v56  ;;  %v5958_v14 = vld [vmem:[%s5880_s9 + $0x48] sm:$0xff]   ;;  %v5978_v22 = vld [vmem:[%s5880_s9 + $0x58] sm:$0xff]   ;;  %v5981_v23 = vld [vmem:[%s5880_s9 + $0x50] sm:$0xff]  }
  0x74   : > { %v5158_v2 = vpack.i.bf16 %v4524_v61, %v4523_v58  ;;  %v4527_v3 = vunpack.c.l.bf16 %v5914_v59  ;;  %v4528_v4 = vunpack.c.h.bf16 %v5914_v59  ;;  %v5148_v6 = vpack.i.bf16 %v4516_v63, %v4515_v62  ;;  %v5998_v30 = vld [vmem:[%s5880_s9 + $0x68] sm:$0xff]   ;;  %v6001_v31 = vld [vmem:[%s5880_s9 + $0x60] sm:$0xff]   ;;  %v6018_v38 = vld [vmem:[%s5880_s9 + $0x78] sm:$0xff]  }
  0x75   : > { %5154 = vrot.lane.b32.xlu1 %v5153_v57, %s5619_s1  ;;  %5144 = vrot.lane.b32.xlu0 %v5143_v60, %s5619_s1  ;;  %v5168_v8 = vpack.i.bf16 %v4532_v1, %v4531_v0  ;;  %v4539_v9 = vunpack.c.l.bf16 %v5934_v5  ;;  %v4540_v10 = vunpack.c.h.bf16 %v5934_v5  ;;  %v4535_v12 = vunpack.c.l.bf16 %v5941_v7  ;;  %v6021_v39 = vld [vmem:[%s5880_s9 + $0x70] sm:$0xff]   ;;  %v1125_v55 = vld [vmem:[%s5863_s0 + $0x78] sm:$0xff] }
  0x76   : > { %v5163_v11 = vpack.i.bf16 %v4528_v4, %v4527_v3  ;;  %v4536_v13 = vunpack.c.h.bf16 %v5941_v7  ;;  %v4547_v17 = vunpack.c.l.bf16 %v5958_v14  ;;  %v4548_v18 = vunpack.c.h.bf16 %v5958_v14  ;;  %v6266_v14 = vld [vmem:[%s5868_s20 + $0x20] sm:$0xff] }
  0x77   : > { %v5178_v16 = vpack.i.bf16 %v4540_v10, %v4539_v9  ;;  %v4543_v20 = vunpack.c.l.bf16 %v5961_v15  ;;  %v4544_v21 = vunpack.c.h.bf16 %v5961_v15  ;;  %v4555_v25 = vunpack.c.l.bf16 %v5978_v22  ;;  %v6269_v15 = vld [vmem:[%s5868_s20 + $0x28] sm:$0xff] }
  0x78   : > { %v5173_v19 = vpack.i.bf16 %v4536_v13, %v4535_v12  ;;  %v5188_v24 = vpack.i.bf16 %v4548_v18, %v4547_v17  ;;  %v4556_v26 = vunpack.c.h.bf16 %v5978_v22  ;;  %v4551_v28 = vunpack.c.l.bf16 %v5981_v23 }
  0x79   : > { %5159 = vrot.lane.b32.xlu1 %v5158_v2, %s5619_s1  ;;  %5149 = vrot.lane.b32.xlu0 %v5148_v6, %s5619_s1  ;;  %v5183_v27 = vpack.i.bf16 %v4544_v21, %v4543_v20  ;;  %v4552_v29 = vunpack.c.h.bf16 %v5981_v23  ;;  %v4563_v33 = vunpack.c.l.bf16 %v5998_v30  ;;  %v4564_v34 = vunpack.c.h.bf16 %v5998_v30  ;;  %v1114_v2 = vld [vmem:[%s5863_s0 + $0x20] sm:$0xff]  ;;  %v1115_v6 = vld [vmem:[%s5863_s0 + $0x28] sm:$0xff] }
  0x7a   : > { %v5198_v32 = vpack.i.bf16 %v4556_v26, %v4555_v25  ;;  %v4559_v36 = vunpack.c.l.bf16 %v6001_v31  ;;  %v4560_v37 = vunpack.c.h.bf16 %v6001_v31  ;;  %v4571_v41 = vunpack.c.l.bf16 %v6018_v38 }
  0x7b   : > { %v5193_v35 = vpack.i.bf16 %v4552_v29, %v4551_v28  ;;  %v5208_v40 = vpack.i.bf16 %v4564_v34, %v4563_v33  ;;  %v4572_v42 = vunpack.c.h.bf16 %v6018_v38  ;;  %v7679_v44 = vunpack.c.l.bf16 %v6021_v39 }
  0x7c   : > { %v5203_v43 = vpack.i.bf16 %v4560_v37, %v4559_v36  ;;  %v7678_v45 = vunpack.c.h.bf16 %v6021_v39  ;;  %v5620_v57 = vmov -1e+30   ;;  %v5621_v60 = vmov 0.0  }
  0x7d   : > { %5169 = vrot.lane.b32.xlu1 %v5168_v8, %s5619_s1  ;;  %5164 = vrot.lane.b32.xlu0 %v5163_v11, %s5619_s1  ;;  %v5218_v46 = vpack.i.bf16 %v4572_v42, %v4571_v41  ;;  %950 = vst.msk [vmem:[#allocation3] sm:$0xff] %vm949_vm0, %v5620_v57  ;;  %951 = vst.msk [vmem:[#allocation3 + $0x8] sm:$0xff] %vm949_vm0, %v5620_v57  ;;  %v1110_v8 = vld [vmem:[%s5863_s0] sm:$0xff]  ;;  %v1111_v11 = vld [vmem:[%s5863_s0 + $0x8] sm:$0xff] }
  0x7e   : > { %v5213_v47 = vpack.i.bf16 %v7678_v45, %v7679_v44  ;;  %952 = vst.msk [vmem:[#allocation3 + $0x10] sm:$0xff] %vm949_vm0, %v5620_v57  ;;  %953 = vst.msk [vmem:[#allocation3 + $0x18] sm:$0xff] %vm949_vm0, %v5620_v57  ;;  %v6247_v59 = vmul.f32 %v4544_v21, %v1111_v11 }
  0x7f   : > { %954 = vst.msk [vmem:[#allocation3 + $0x20] sm:$0xff] %vm949_vm0, %v5620_v57  ;;  %955 = vst.msk [vmem:[#allocation3 + $0x28] sm:$0xff] %vm949_vm0, %v5620_v57 }
  0x80   : > { %956 = vst.msk [vmem:[#allocation3 + $0x30] sm:$0xff] %vm949_vm0, %v5620_v57  ;;  %957 = vst.msk [vmem:[#allocation3 + $0x38] sm:$0xff] %vm949_vm0, %v5620_v57 }
  0x81   : > { %5179 = vrot.lane.b32.xlu1 %v5178_v16, %s5619_s1  ;;  %5174 = vrot.lane.b32.xlu0 %v5173_v19, %s5619_s1  ;;  %958 = vst.msk [vmem:[#allocation3 + $0x40] sm:$0xff] %vm949_vm0, %v5620_v57  ;;  %959 = vst.msk [vmem:[#allocation3 + $0x48] sm:$0xff] %vm949_vm0, %v5620_v57  ;;  %v1116_v16 = vld [vmem:[%s5863_s0 + $0x30] sm:$0xff]  ;;  %v1117_v19 = vld [vmem:[%s5863_s0 + $0x38] sm:$0xff] }
  0x82   : > { %960 = vst.msk [vmem:[#allocation3 + $0x50] sm:$0xff] %vm949_vm0, %v5620_v57  ;;  %961 = vst.msk [vmem:[#allocation3 + $0x58] sm:$0xff] %vm949_vm0, %v5620_v57  ;;  %v6199_v45 = vmul.f32 %v4523_v58, %v1116_v16  ;;  %v6203_v44 = vmul.f32 %v4524_v61, %v1117_v19  ;;  %v1122_v58 = vld [vmem:[%s5863_s0 + $0x60] sm:$0xff]  ;;  %v1123_v61 = vld [vmem:[%s5863_s0 + $0x68] sm:$0xff] }
  0x83   : > { %962 = vst.msk [vmem:[#allocation3 + $0x60] sm:$0xff] %vm949_vm0, %v5620_v57  ;;  %963 = vst.msk [vmem:[#allocation3 + $0x68] sm:$0xff] %vm949_vm0, %v5620_v57  ;;  %v6281_v21 = vmul.f32 %v4535_v12, %v1122_v58  ;;  %v6285_v22 = vmul.f32 %v4536_v13, %v1123_v61 }
  0x84   : > { %964 = vst.msk [vmem:[#allocation3 + $0x70] sm:$0xff] %vm949_vm0, %v5620_v57  ;;  %965 = vst.msk [vmem:[#allocation3 + $0x78] sm:$0xff] %vm949_vm0, %v5620_v57 }
  0x85   : > { %5189 = vrot.lane.b32.xlu1 %v5188_v24, %s5619_s1  ;;  %5184 = vrot.lane.b32.xlu0 %v5183_v27, %s5619_s1  ;;  %966 = vst.msk [vmem:[#allocation3 + $0x80] sm:$0xff] %vm949_vm0, %v5620_v57  ;;  %967 = vst.msk [vmem:[#allocation3 + $0x88] sm:$0xff] %vm949_vm0, %v5620_v57  ;;  %v1112_v24 = vld [vmem:[%s5863_s0 + $0x10] sm:$0xff]  ;;  %v1113_v27 = vld [vmem:[%s5863_s0 + $0x18] sm:$0xff] }
  0x86   : > { %968 = vst.msk [vmem:[#allocation3 + $0x90] sm:$0xff] %vm949_vm0, %v5620_v57  ;;  %969 = vst.msk [vmem:[#allocation3 + $0x98] sm:$0xff] %vm949_vm0, %v5620_v57  ;;  %v6211_v48 = vmul.f32 %v4516_v63, %v1113_v27  ;;  %v6239_v56 = vmul.f32 %v4548_v18, %v1113_v27  ;;  %v6243_v63 = vmul.f32 %v4543_v20, %v1110_v8 }
  0x87   : > { %970 = vst.msk [vmem:[#allocation3 + $0xa0] sm:$0xff] %vm949_vm0, %v5620_v57  ;;  %971 = vst.msk [vmem:[#allocation3 + $0xa8] sm:$0xff] %vm949_vm0, %v5620_v57  ;;  %v6277_v20 = vmul.f32 %v4540_v10, %v1125_v55 }
  0x88   : > { %972 = vst.msk [vmem:[#allocation3 + $0xb0] sm:$0xff] %vm949_vm0, %v5620_v57  ;;  %973 = vst.msk [vmem:[#allocation3 + $0xb8] sm:$0xff] %vm949_vm0, %v5620_v57 }
  0x89   : > { %5199 = vrot.lane.b32.xlu1 %v5198_v32, %s5619_s1  ;;  %5194 = vrot.lane.b32.xlu0 %v5193_v35, %s5619_s1  ;;  %974 = vst.msk [vmem:[#allocation3 + $0xc0] sm:$0xff] %vm949_vm0, %v5620_v57  ;;  %975 = vst.msk [vmem:[#allocation3 + $0xc8] sm:$0xff] %vm949_vm0, %v5620_v57  ;;  %v1120_v32 = vld [vmem:[%s5863_s0 + $0x50] sm:$0xff]  ;;  %v1121_v35 = vld [vmem:[%s5863_s0 + $0x58] sm:$0xff] }
  0x8a   : > { %976 = vst.msk [vmem:[#allocation3 + $0xd0] sm:$0xff] %vm949_vm0, %v5620_v57  ;;  %977 = vst.msk [vmem:[#allocation3 + $0xd8] sm:$0xff] %vm949_vm0, %v5620_v57  ;;  %v6216_v51 = vmul.f32 %v4531_v0, %v1120_v32  ;;  %v6251_v0 = vmul.f32 %v4555_v25, %v1116_v16  ;;  %v6295_v5 = vmul.f32 %v4563_v33, %v1120_v32  ;;  %v6336_v32 = vld [vmem:[%s5868_s20 + $0x10] sm:$0xff] }
  0x8b   : > { %978 = vst.msk [vmem:[#allocation3 + $0xe0] sm:$0xff] %vm949_vm0, %v5620_v57  ;;  %979 = vst.msk [vmem:[#allocation3 + $0xe8] sm:$0xff] %vm949_vm0, %v5620_v57  ;;  %v6299_v10 = vmul.f32 %v4564_v34, %v1121_v35  ;;  %v6317_v34 = vmul.f32 %v4572_v42, %v1125_v55 }
  0x8c   : > { %980 = vst.msk [vmem:[#allocation3 + $0xf0] sm:$0xff] %vm949_vm0, %v5620_v57  ;;  %981 = vst.msk [vmem:[#allocation3 + $0xf8] sm:$0xff] %vm949_vm0, %v5620_v57  ;;  %v1207_v57 = vmul.f32 %v4512_v53, %v1111_v11  ;;  %v7731_v11 = vunpack.c.l.bf16 %v6021_v39 }
  0x8d   : > { %5209 = vrot.lane.b32.xlu1 %v5208_v40, %s5619_s1  ;;  %5204 = vrot.lane.b32.xlu0 %v5203_v43, %s5619_s1  ;;  %982 = vst.msk [vmem:[#allocation4] sm:$0xff] %vm949_vm0, %v5621_v60  ;;  %983 = vst.msk [vmem:[#allocation4 + $0x8] sm:$0xff] %vm949_vm0, %v5621_v60  ;;  %v1118_v40 = vld [vmem:[%s5863_s0 + $0x40] sm:$0xff]  ;;  %v1119_v43 = vld [vmem:[%s5863_s0 + $0x48] sm:$0xff] }
  0x8e   : > { %984 = vst.msk [vmem:[#allocation4 + $0x10] sm:$0xff] %vm949_vm0, %v5621_v60  ;;  %985 = vst.msk [vmem:[#allocation4 + $0x18] sm:$0xff] %vm949_vm0, %v5621_v60  ;;  %v6224_v53 = vmul.f32 %v4527_v3, %v1118_v40  ;;  %v6228_v54 = vmul.f32 %v4528_v4, %v1119_v43  ;;  %v6259_v3 = vmul.f32 %v4551_v28, %v1114_v2 }
  0x8f   : > { %986 = vst.msk [vmem:[#allocation4 + $0x20] sm:$0xff] %vm949_vm0, %v5621_v60  ;;  %987 = vst.msk [vmem:[#allocation4 + $0x28] sm:$0xff] %vm949_vm0, %v5621_v60  ;;  %v6263_v4 = vmul.f32 %v4552_v29, %v1115_v6  ;;  %v6303_v13 = vmul.f32 %v4559_v36, %v1118_v40  ;;  %v6307_v29 = vmul.f32 %v4560_v37, %v1119_v43  ;;  %v6322_v37 = vld [vmem:[%s5868_s20 + $0x30] sm:$0xff] }
  0x90   : > { %988 = vst.msk [vmem:[#allocation4 + $0x30] sm:$0xff] %vm949_vm0, %v5621_v60  ;;  %989 = vst.msk [vmem:[#allocation4 + $0x38] sm:$0xff] %vm949_vm0, %v5621_v60  ;;  %v6329_v16 = vmul.f32 %v7731_v11, %v1122_v58 }
  0x91   : > { %5219 = vrot.lane.b32.xlu1 %v5218_v46, %s5619_s1  ;;  %5214 = vrot.lane.b32.xlu0 %v5213_v47, %s5619_s1  ;;  %990 = vst.msk [vmem:[#allocation4 + $0x40] sm:$0xff] %vm949_vm0, %v5621_v60  ;;  %991 = vst.msk [vmem:[#allocation4 + $0x48] sm:$0xff] %vm949_vm0, %v5621_v60  ;;  %v1211_v46 = vmul.f32 %v4520_v50, %v1115_v6  ;;  %v1210_v47 = vmul.f32 %v4519_v49, %v1114_v2  ;;  %v1124_v49 = vld [vmem:[%s5863_s0 + $0x70] sm:$0xff]  ;;  %v6325_v6 = vld [vmem:[%s5868_s20 + $0x38] sm:$0xff] }
  0x92   : > { %992 = vst.msk [vmem:[#allocation4 + $0x50] sm:$0xff] %vm949_vm0, %v5621_v60  ;;  %993 = vst.msk [vmem:[#allocation4 + $0x58] sm:$0xff] %vm949_vm0, %v5621_v60  ;;  %v6207_v50 = vmul.f32 %v4515_v62, %v1112_v24  ;;  %v6235_v62 = vmul.f32 %v4547_v17, %v1112_v24  ;;  %v6273_v18 = vmul.f32 %v4539_v9, %v1124_v49  ;;  %v6291_v9 = vld [vmem:[%s5868_s20 + $0x8] sm:$0xff] }
  0x93   : > { %994 = vst.msk [vmem:[#allocation4 + $0x60] sm:$0xff] %vm949_vm0, %v5621_v60  ;;  %995 = vst.msk [vmem:[#allocation4 + $0x68] sm:$0xff] %vm949_vm0, %v5621_v60  ;;  %v6313_v30 = vmul.f32 %v4571_v41, %v1124_v49  ;;  %v7732_v41 = vunpack.c.h.bf16 %v6021_v39 }
  0x94   : > { %996 = vst.msk [vmem:[#allocation4 + $0x70] sm:$0xff] %vm949_vm0, %v5621_v60  ;;  %997 = vst.msk [vmem:[#allocation4 + $0x78] sm:$0xff] %vm949_vm0, %v5621_v60 }
  0x95   : > { %998 = vst.msk [vmem:[#allocation4 + $0x80] sm:$0xff] %vm949_vm0, %v5621_v60  ;;  %999 = vst.msk [vmem:[#allocation4 + $0x88] sm:$0xff] %vm949_vm0, %v5621_v60 }
  0x96   : > { %1000 = vst.msk [vmem:[#allocation4 + $0x90] sm:$0xff] %vm949_vm0, %v5621_v60  ;;  %1001 = vst.msk [vmem:[#allocation4 + $0x98] sm:$0xff] %vm949_vm0, %v5621_v60 }
  0x97   : > { %1002 = vst.msk [vmem:[#allocation4 + $0xa0] sm:$0xff] %vm949_vm0, %v5621_v60  ;;  %1003 = vst.msk [vmem:[#allocation4 + $0xa8] sm:$0xff] %vm949_vm0, %v5621_v60 }
  0x98   : > { %1004 = vst.msk [vmem:[#allocation4 + $0xb0] sm:$0xff] %vm949_vm0, %v5621_v60  ;;  %1005 = vst.msk [vmem:[#allocation4 + $0xb8] sm:$0xff] %vm949_vm0, %v5621_v60 }
  0x99   : > { %1006 = vst.msk [vmem:[#allocation4 + $0xc0] sm:$0xff] %vm949_vm0, %v5621_v60  ;;  %1007 = vst.msk [vmem:[#allocation4 + $0xc8] sm:$0xff] %vm949_vm0, %v5621_v60 }
  0x9a   : > { %1008 = vst.msk [vmem:[#allocation4 + $0xd0] sm:$0xff] %vm949_vm0, %v5621_v60  ;;  %1009 = vst.msk [vmem:[#allocation4 + $0xd8] sm:$0xff] %vm949_vm0, %v5621_v60 }
  0x9b   : > { %1010 = vst.msk [vmem:[#allocation4 + $0xe0] sm:$0xff] %vm949_vm0, %v5621_v60  ;;  %1011 = vst.msk [vmem:[#allocation4 + $0xe8] sm:$0xff] %vm949_vm0, %v5621_v60 }
  0x9c   : > { %1012 = vst.msk [vmem:[#allocation4 + $0xf0] sm:$0xff] %vm949_vm0, %v5621_v60  ;;  %1013 = vst.msk [vmem:[#allocation4 + $0xf8] sm:$0xff] %vm949_vm0, %v5621_v60 }
  0x9d   : > { %1014 = vst [vmem:[#allocation5 + $0xb0] sm:$0xff] %v5621_v60  ;;  %1015 = vst [vmem:[#allocation5] sm:$0xff] %v5621_v60 }
  0x9e   : > { %1016 = vst [vmem:[#allocation5 + $0xd8] sm:$0xff] %v5621_v60  ;;  %1017 = vst [vmem:[#allocation5 + $0x18] sm:$0xff] %v5621_v60 }
  0x9f   : > { %1018 = vst [vmem:[#allocation5 + $0x50] sm:$0xff] %v5621_v60  ;;  %1019 = vst [vmem:[#allocation5 + $0x68] sm:$0xff] %v5621_v60 }
  0xa0   : > { %1020 = vst [vmem:[#allocation5 + $0x30] sm:$0xff] %v5621_v60  ;;  %1021 = vst [vmem:[#allocation5 + $0x48] sm:$0xff] %v5621_v60 }
  0xa1   : > { %1022 = vst [vmem:[#allocation5 + $0x80] sm:$0xff] %v5621_v60  ;;  %1023 = vst [vmem:[#allocation5 + $0x88] sm:$0xff] %v5621_v60 }
  0xa2   : > { %1024 = vst [vmem:[#allocation5 + $0xe8] sm:$0xff] %v5621_v60  ;;  %1025 = vst [vmem:[#allocation5 + $0xb8] sm:$0xff] %v5621_v60 }
  0xa3   : > { %1026 = vst [vmem:[#allocation5 + $0x60] sm:$0xff] %v5621_v60  ;;  %1027 = vst [vmem:[#allocation5 + $0xf0] sm:$0xff] %v5621_v60 }
  0xa4   : > { %1028 = vst [vmem:[#allocation5 + $0x8] sm:$0xff] %v5621_v60  ;;  %1029 = vst [vmem:[#allocation5 + $0x78] sm:$0xff] %v5621_v60 }
  0xa5   : > { %1030 = vst [vmem:[#allocation5 + $0x38] sm:$0xff] %v5621_v60  ;;  %1031 = vst [vmem:[#allocation5 + $0x58] sm:$0xff] %v5621_v60 }
  0xa6   : > { %1032 = vst [vmem:[#allocation5 + $0x40] sm:$0xff] %v5621_v60  ;;  %1033 = vst [vmem:[#allocation5 + $0xc8] sm:$0xff] %v5621_v60 }
  0xa7   : > { %1034 = vst [vmem:[#allocation5 + $0xe0] sm:$0xff] %v5621_v60  ;;  %1035 = vst [vmem:[#allocation5 + $0x90] sm:$0xff] %v5621_v60 }
  0xa8   : > { %1036 = vst [vmem:[#allocation5 + $0x70] sm:$0xff] %v5621_v60  ;;  %1037 = vst [vmem:[#allocation5 + $0xc0] sm:$0xff] %v5621_v60 }
  0xa9   : > { %1038 = vst [vmem:[#allocation5 + $0xa8] sm:$0xff] %v5621_v60  ;;  %1039 = vst [vmem:[#allocation5 + $0xd0] sm:$0xff] %v5621_v60 }
  0xaa   : > { %1040 = vst [vmem:[#allocation5 + $0x10] sm:$0xff] %v5621_v60  ;;  %1041 = vst [vmem:[#allocation5 + $0x28] sm:$0xff] %v5621_v60 }
  0xab   : > { %1042 = vst [vmem:[#allocation5 + $0xa0] sm:$0xff] %v5621_v60  ;;  %1043 = vst [vmem:[#allocation5 + $0xf8] sm:$0xff] %v5621_v60 }
  0xac   : > { %1044 = vst [vmem:[#allocation5 + $0x20] sm:$0xff] %v5621_v60  ;;  %1045 = vst [vmem:[#allocation5 + $0x98] sm:$0xff] %v5621_v60  ;;  %v1206_v60 = vmul.f32 %v4511_v52, %v1110_v8  ;;  %v6220_v52 = vmul.f32 %v4532_v1, %v1121_v35  ;;  %v6255_v1 = vmul.f32 %v4556_v26, %v1117_v19  ;;  %v6288_v26 = vld [vmem:[%s5868_s20] sm:$0xff]  ;;  %v6339_v35 = vld [vmem:[%s5868_s20 + $0x18] sm:$0xff] }
  0xad   : > { %v6333_v19 = vmul.f32 %v7732_v41, %v1123_v61 }
  0xe7   : > { %v5155_v17 = vpop.permute.xlu1 %5154  ;;  %v5145_v28 = vpop.permute.xlu0 %5144 }
  0xe8   : > { %v5157_v23 = vunpack.i.h.bf16 %v5155_v17  ;;  %v5156_v25 = vunpack.i.l.bf16 %v5155_v17  ;;  %v5147_v7 = vunpack.i.h.bf16 %v5145_v28  ;;  %v5146_v12 = vunpack.i.l.bf16 %v5145_v28 }
  0xea   : > { %v1243_v2 = vmul.f32 %v5157_v23, %v6269_v15  ;;  %v1242_v33 = vmul.f32 %v5156_v25, %v6266_v14  ;;  %v1239_v36 = vmul.f32 %v5147_v7, %v6291_v9  ;;  %v1238_v31 = vmul.f32 %v5146_v12, %v6288_v26  ;;  %v6346_v7 = vld [vmem:[%s5868_s20 + $0x58] sm:$0xff] }
  0xeb   : > { %v5160_v8 = vpop.permute.xlu1 %5159  ;;  %v5150_v40 = vpop.permute.xlu0 %5149 }
  0xec   : > { %v1275_v38 = vadd.f32 %v1243_v2, %v1211_v46  ;;  %v1274_v42 = vadd.f32 %v1242_v33, %v1210_v47  ;;  %v5162_v24 = vunpack.i.h.bf16 %v5160_v8  ;;  %v5161_v27 = vunpack.i.l.bf16 %v5160_v8  ;;  %v6351_v33 = vld [vmem:[%s5868_s20 + $0x50] sm:$0xff] }
  0xed   : > { %v1271_v43 = vadd.f32 %v1239_v36, %v1207_v57  ;;  %v1270_v49 = vadd.f32 %v1238_v31, %v1206_v60  ;;  %v5152_v55 = vunpack.i.h.bf16 %v5150_v40  ;;  %v5151_v58 = vunpack.i.l.bf16 %v5150_v40 }
  0xee   : > { %v1307_v17 = vmul.f32 0.0625, %v1275_v38  ;;  %v1306_v23 = vmul.f32 0.0625, %v1274_v42  ;;  %v1245_v39 = vmul.f32 %v5162_v24, %v6325_v6  ;;  %v1244_v46 = vmul.f32 %v5161_v27, %v6322_v37  ;;  %v6356_v42 = vld [vmem:[%s5868_s20 + $0x48] sm:$0xff] }
  0xef   : > { %v1303_v47 = vmul.f32 0.0625, %v1271_v43  ;;  %v1302_v61 = vmul.f32 0.0625, %v1270_v49  ;;  %v1241_v25 = vmul.f32 %v5152_v55, %v6339_v35  ;;  %v1240_v28 = vmul.f32 %v5151_v58, %v6336_v32  ;;  %v5170_v57 = vpop.permute.xlu1 %5169  ;;  %v5165_v31 = vpop.permute.xlu0 %5164 }
  0xf0   : > { %v4586_v60 = vpack.c.bf16 %v1307_v17, %v1306_v23  ;;  %v1277_v12 = vadd.f32 %v1245_v39, %v6203_v44  ;;  %v1276_v2 = vadd.f32 %v1244_v46, %v6199_v45  ;;  %v5172_v36 = vunpack.i.h.bf16 %v5170_v57  ;;  %v6360_v45 = vld [vmem:[%s5868_s20 + $0x40] sm:$0xff] }
  0xf1   : > { %v4576_v8 = vpack.c.bf16 %v1303_v47, %v1302_v61  ;;  %v1273_v11 = vadd.f32 %v1241_v25, %v6211_v48  ;;  %v1272_v41 = vadd.f32 %v1240_v28, %v6207_v50  ;;  %v5171_v38 = vunpack.i.l.bf16 %v5170_v57  ;;  %v6366_v47 = vld [vmem:[%s5868_s20 + $0x70] sm:$0xff]  ;;  %v6369_v61 = vld [vmem:[%s5868_s20 + $0x78] sm:$0xff] }
  0xf2   : > { %4813 = vst [vmem:[#allocation2 + $0x10] sm:$0xff] %v4586_v60   ;;  %v1309_v24 = vmul.f32 0.0625, %v1277_v12  ;;  %v1308_v27 = vmul.f32 0.0625, %v1276_v2  ;;  %v1249_v44 = vmul.f32 %v5172_v36, %v6346_v7  ;;  %v5167_v40 = vunpack.i.h.bf16 %v5165_v31  ;;  %v6374_v12 = vld [vmem:[%s5868_s20 + $0x60] sm:$0xff] }
  0xf3   : > { %4577 = vst [vmem:[#allocation2] sm:$0xff] %v4576_v8   ;;  %v1305_v43 = vmul.f32 0.0625, %v1273_v11  ;;  %v1304_v49 = vmul.f32 0.0625, %v1272_v41  ;;  %v1248_v48 = vmul.f32 %v5171_v38, %v6351_v33  ;;  %v5166_v50 = vunpack.i.l.bf16 %v5165_v31  ;;  %v5180_v55 = vpop.permute.xlu1 %5179  ;;  %v5175_v46 = vpop.permute.xlu0 %5174 }
  0xf4   : > { %v4591_v58 = vpack.c.bf16 %v1309_v24, %v1308_v27  ;;  %v1281_v17 = vadd.f32 %v1249_v44, %v6220_v52  ;;  %v1247_v23 = vmul.f32 %v5167_v40, %v6356_v42  ;;  %v5182_v39 = vunpack.i.h.bf16 %v5180_v55 }
  0xf5   : > { %v4581_v25 = vpack.c.bf16 %v1305_v43, %v1304_v49  ;;  %v1280_v28 = vadd.f32 %v1248_v48, %v6216_v51  ;;  %v1246_v57 = vmul.f32 %v5166_v50, %v6360_v45  ;;  %v5181_v60 = vunpack.i.l.bf16 %v5180_v55  ;;  %v6381_v43 = vld [vmem:[%s5868_s20 + $0x68] sm:$0xff] }
  0xf6   : > { %4814 = vst [vmem:[#allocation2 + $0x18] sm:$0xff] %v4591_v58   ;;  %v1313_v2 = vmul.f32 0.0625, %v1281_v17  ;;  %v1279_v52 = vadd.f32 %v1247_v23, %v6228_v54  ;;  %v5177_v36 = vunpack.i.h.bf16 %v5175_v46  ;;  %v5176_v31 = vunpack.i.l.bf16 %v5175_v46 }
  0xf7   : > { %4812 = vst [vmem:[#allocation2 + $0x8] sm:$0xff] %v4581_v25   ;;  %v1312_v8 = vmul.f32 0.0625, %v1280_v28  ;;  %v1278_v11 = vadd.f32 %v1246_v57, %v6224_v53  ;;  %v5190_v41 = vpop.permute.xlu1 %5189  ;;  %v1252_v38 = vmul.f32 %v5181_v60, %v6366_v47  ;;  %v1253_v51 = vmul.f32 %v5182_v39, %v6369_v61  ;;  %v5185_v40 = vpop.permute.xlu0 %5184 }
  0xf8   : > { %v1311_v24 = vmul.f32 0.0625, %v1279_v52  ;;  %v5192_v27 = vunpack.i.h.bf16 %v5190_v41  ;;  %v5191_v44 = vunpack.i.l.bf16 %v5190_v41  ;;  %v6384_v49 = vmul.f32 %v5176_v31, %v6374_v12 }
  0xf9   : > { %v4601_v54 = vpack.c.bf16 %v1313_v2, %v1312_v8  ;;  %v1310_v48 = vmul.f32 0.0625, %v1278_v11  ;;  %v5187_v50 = vunpack.i.h.bf16 %v5185_v40  ;;  %v5186_v55 = vunpack.i.l.bf16 %v5185_v40 }
  0xfa   : > { %v1257_v53 = vmul.f32 %v5192_v27, %v6339_v35  ;;  %v1256_v58 = vmul.f32 %v5191_v44, %v6336_v32  ;;  %v1284_v17 = vadd.f32 %v1252_v38, %v6273_v18  ;;  %v6390_v23 = vadd.f32 %v1253_v51, %v6277_v20 }
  0xfb   : > { %4816 = vst [vmem:[#allocation2 + $0x28] sm:$0xff] %v4601_v54   ;;  %v4596_v39 = vpack.c.bf16 %v1311_v24, %v1310_v48  ;;  %v1255_v46 = vmul.f32 %v5187_v50, %v6291_v9  ;;  %v1254_v25 = vmul.f32 %v5186_v55, %v6288_v26  ;;  %v5200_v28 = vpop.permute.xlu1 %5199  ;;  %v6395_v57 = vmul.f32 %v5177_v36, %v6381_v43  ;;  %v5195_v18 = vpop.permute.xlu0 %5194 }
  0xfc   : > { %v1289_v60 = vadd.f32 %v1257_v53, %v6239_v56  ;;  %v1288_v35 = vadd.f32 %v1256_v58, %v6235_v62  ;;  %v5202_v32 = vunpack.i.h.bf16 %v5200_v28  ;;  %v5201_v2 = vunpack.i.l.bf16 %v5200_v28 }
  0xfd   : > { %4815 = vst [vmem:[#allocation2 + $0x20] sm:$0xff] %v4596_v39   ;;  %v1287_v20 = vadd.f32 %v1255_v46, %v6247_v59  ;;  %v1286_v52 = vadd.f32 %v1254_v25, %v6243_v63  ;;  %v5197_v31 = vunpack.i.h.bf16 %v5195_v18  ;;  %v5196_v9 = vunpack.i.l.bf16 %v5195_v18 }
  0xfe   : > { %v1321_v8 = vmul.f32 0.0625, %v1289_v60  ;;  %v1320_v26 = vmul.f32 0.0625, %v1288_v35  ;;  %v1261_v11 = vmul.f32 %v5202_v32, %v6325_v6  ;;  %v1260_v36 = vmul.f32 %v5201_v2, %v6322_v37 }
  0xff   : > { %v1319_v41 = vmul.f32 0.0625, %v1287_v20  ;;  %v1318_v56 = vmul.f32 0.0625, %v1286_v52  ;;  %v1259_v62 = vmul.f32 %v5197_v31, %v6269_v15  ;;  %v1258_v38 = vmul.f32 %v5196_v9, %v6266_v14  ;;  %v5210_v51 = vpop.permute.xlu1 %5209  ;;  %v5205_v44 = vpop.permute.xlu0 %5204 }
 0x100   : > { %v4621_v24 = vpack.c.bf16 %v1321_v8, %v1320_v26  ;;  %v1293_v59 = vadd.f32 %v1261_v11, %v6255_v1  ;;  %v1292_v63 = vadd.f32 %v1260_v36, %v6251_v0  ;;  %v5212_v27 = vunpack.i.h.bf16 %v5210_v51 }
 0x101   : > { %v4616_v40 = vpack.c.bf16 %v1319_v41, %v1318_v56  ;;  %v1291_v54 = vadd.f32 %v1259_v62, %v6263_v4  ;;  %v1290_v6 = vadd.f32 %v1258_v38, %v6259_v3  ;;  %v5211_v37 = vunpack.i.l.bf16 %v5210_v51 }
 0x102   : > { %4820 = vst [vmem:[#allocation2 + $0x48] sm:$0xff] %v4621_v24   ;;  %v1325_v48 = vmul.f32 0.0625, %v1293_v59  ;;  %v1324_v50 = vmul.f32 0.0625, %v1292_v63  ;;  %v1265_v15 = vmul.f32 %v5212_v27, %v6346_v7  ;;  %v5207_v14 = vunpack.i.h.bf16 %v5205_v44 }
 0x103   : > { %4819 = vst [vmem:[#allocation2 + $0x40] sm:$0xff] %v4616_v40   ;;  %v1323_v55 = vmul.f32 0.0625, %v1291_v54  ;;  %v1322_v53 = vmul.f32 0.0625, %v1290_v6  ;;  %v1264_v1 = vmul.f32 %v5211_v37, %v6351_v33  ;;  %v5206_v0 = vunpack.i.l.bf16 %v5205_v44  ;;  %v5220_v58 = vpop.permute.xlu1 %5219  ;;  %v5215_v35 = vpop.permute.xlu0 %5214 }
 0x104   : > { %v4631_v39 = vpack.c.bf16 %v1325_v48, %v1324_v50  ;;  %v1297_v46 = vadd.f32 %v1265_v15, %v6299_v10  ;;  %v1263_v4 = vmul.f32 %v5207_v14, %v6356_v42  ;;  %v5222_v3 = vunpack.i.h.bf16 %v5220_v58 }
 0x105   : > { %v4626_v25 = vpack.c.bf16 %v1323_v55, %v1322_v53  ;;  %v1296_v28 = vadd.f32 %v1264_v1, %v6295_v5  ;;  %v1262_v60 = vmul.f32 %v5206_v0, %v6360_v45  ;;  %v5221_v7 = vunpack.i.l.bf16 %v5220_v58 }
 0x106   : > { %4822 = vst [vmem:[#allocation2 + $0x58] sm:$0xff] %v4631_v39   ;;  %v1329_v32 = vmul.f32 0.0625, %v1297_v46  ;;  %v1295_v2 = vadd.f32 %v1263_v4, %v6307_v29  ;;  %v1269_v33 = vmul.f32 %v5222_v3, %v6369_v61  ;;  %v1316_v18 = vmul.f32 0.0625, %v1284_v17 }
 0x107   : > { %4821 = vst [vmem:[#allocation2 + $0x50] sm:$0xff] %v4626_v25   ;;  %v1328_v20 = vmul.f32 0.0625, %v1296_v28  ;;  %v1294_v10 = vadd.f32 %v1262_v60, %v6303_v13  ;;  %v1268_v42 = vmul.f32 %v5221_v7, %v6366_v47  ;;  %v1317_v52 = vmul.f32 0.0625, %v6390_v23 }
 0x108   : > { %v1327_v5 = vmul.f32 0.0625, %v1295_v2  ;;  %v1301_v45 = vadd.f32 %v1269_v33, %v6317_v34  ;;  %v5217_v31 = vunpack.i.h.bf16 %v5215_v35  ;;  %v5216_v9 = vunpack.i.l.bf16 %v5215_v35 }
 0x109   : > { %v4641_v8 = vpack.c.bf16 %v1329_v32, %v1328_v20  ;;  %v1326_v26 = vmul.f32 0.0625, %v1294_v10  ;;  %v1300_v29 = vadd.f32 %v1268_v42, %v6313_v30  ;;  %v4611_v11 = vpack.c.bf16 %v1317_v52, %v1316_v18 }
 0x10a   : > { %v1333_v61 = vmul.f32 0.0625, %v1301_v45  ;;  %v1267_v17 = vmul.f32 %v5217_v31, %v6381_v43  ;;  %v1266_v36 = vmul.f32 %v5216_v9, %v6374_v12  ;;  %v1282_v13 = vadd.f32 %v6384_v49, %v6281_v21 }
 0x10b   : > { %4824 = vst [vmem:[#allocation2 + $0x68] sm:$0xff] %v4641_v8   ;;  %v4636_v47 = vpack.c.bf16 %v1327_v5, %v1326_v26  ;;  %v1332_v23 = vmul.f32 0.0625, %v1300_v29  ;;  %4818 = vst [vmem:[#allocation2 + $0x38] sm:$0xff] %v4611_v11   ;;  %v1283_v34 = vadd.f32 %v6395_v57, %v6285_v22 }
 0x10c   : > { %v1299_v41 = vadd.f32 %v1267_v17, %v6333_v19  ;;  %v1298_v30 = vadd.f32 %v1266_v36, %v6329_v16  ;;  %v1314_v56 = vmul.f32 0.0625, %v1282_v13 }
 0x10d   : > { %4823 = vst [vmem:[#allocation2 + $0x60] sm:$0xff] %v4636_v47   ;;  %v4651_v62 = vpack.c.bf16 %v1333_v61, %v1332_v23  ;;  %v1315_v43 = vmul.f32 0.0625, %v1283_v34 }
 0x10e   : > { %v1331_v38 = vmul.f32 0.0625, %v1299_v41  ;;  %v1330_v12 = vmul.f32 0.0625, %v1298_v30 }
 0x10f   : > { %4826 = vst [vmem:[#allocation2 + $0x78] sm:$0xff] %v4651_v62   ;;  %v4606_v51 = vpack.c.bf16 %v1315_v43, %v1314_v56 }
 0x110   : > { %v4646_v21 = vpack.c.bf16 %v1331_v38, %v1330_v12 }
 0x111   : > { %4817 = vst [vmem:[#allocation2 + $0x30] sm:$0xff] %v4606_v51  }
 0x112   : > { %4825 = vst [vmem:[#allocation2 + $0x70] sm:$0xff] %v4646_v21  }
 0x113 PF: > { %s7733_s0 = sshll.u32 %s5597_s29, 7  ;;  %s7734_s9 = sshll.u32 %s5593_s28, 7 }
 0x114   : > { %s1494_s2 = sadd.s32 127, %s7733_s0 }
 0x115   : > { %p4373_p5 = scmp.gt.s32.totalorder %s7734_s9, %s1494_s2 }
 0x117   : > { %1498 = sbr.rel (%p4373_p5) target bundleno = 1232 (0x4d0), region = 179 }
 0x11c   : > { %v6435_v22 = vld [vmem:[%s5882_s7 + $0x38] sm:$0xff]   ;;  %v6441_v19 = vld [vmem:[%s5882_s7 + $0x30] sm:$0xff]   ;;  %v6455_v6 = vld [vmem:[%s5882_s7 + $0x28] sm:$0xff]   ;;  %s5622_s30 = smov 64   ;;  %s7738_s14 = sshll.u32 %s5593_s28, 7 }
 0x11d   : > { %v6438_v16 = vld [vmem:[%s5882_s7 + $0x78] sm:$0xff]   ;;  %v4683_v49 = vunpack.c.l.bf16 %v6435_v22  ;;  %v4684_v57 = vunpack.c.h.bf16 %v6435_v22  ;;  %v6448_v63 = vld [vmem:[%s5882_s7 + $0x70] sm:$0xff]   ;;  %v4679_v27 = vunpack.c.l.bf16 %v6441_v19  ;;  %v4680_v44 = vunpack.c.h.bf16 %v6441_v19  ;;  %v6462_v48 = vld [vmem:[%s5882_s7 + $0x68] sm:$0xff]  }
 0x11e   : > { %v4715_v24 = vunpack.c.l.bf16 %v6438_v16  ;;  %v4716_v59 = vunpack.c.h.bf16 %v6438_v16  ;;  %v4711_v40 = vunpack.c.l.bf16 %v6448_v63  ;;  %v4712_v54 = vunpack.c.h.bf16 %v6448_v63  ;;  %v6483_v58 = vld [vmem:[%s5882_s7 + $0x20] sm:$0xff]   ;;  %v6496_v25 = vld [vmem:[%s5882_s7 + $0x18] sm:$0xff]   ;;  %v6516_v18 = vld [vmem:[%s5882_s7 + $0x10] sm:$0xff]  }
 0x11f   : > { %v5223_v37 = vpack.i.bf16 %v4684_v57, %v4683_v49  ;;  %v5233_v50 = vpack.i.bf16 %v4680_v44, %v4679_v27  ;;  %v4675_v14 = vunpack.c.l.bf16 %v6455_v6  ;;  %v4676_v55 = vunpack.c.h.bf16 %v6455_v6  ;;  %v6486_v39 = vld [vmem:[%s5882_s7 + $0x60] sm:$0xff]   ;;  %v6499_v28 = vld [vmem:[%s5882_s7 + $0x58] sm:$0xff]   ;;  %v6519_v20 = vld [vmem:[%s5882_s7 + $0x50] sm:$0xff]  }
 0x120   : > { %v5228_v15 = vpack.i.bf16 %v4716_v59, %v4715_v24  ;;  %v5238_v53 = vpack.i.bf16 %v4712_v54, %v4711_v40  ;;  %v4707_v1 = vunpack.c.l.bf16 %v6462_v48  ;;  %v4708_v0 = vunpack.c.h.bf16 %v6462_v48  ;;  %v6536_v9 = vld [vmem:[%s5882_s7 + $0x8] sm:$0xff]   ;;  %v6556_v13 = vld [vmem:[%s5882_s7] sm:$0xff]   ;;  %v1570_v63 = vld [vmem:[%s5873_s10 + $0x38] sm:$0xff] }
 0x121   : > { %5224 = vrot.lane.b32.xlu0 %v5223_v37, %s5622_s30  ;;  %5234 = vrot.lane.b32.xlu1 %v5233_v50, %s5622_s30  ;;  %v5243_v46 = vpack.i.bf16 %v4676_v55, %v4675_v14  ;;  %v4671_v4 = vunpack.c.l.bf16 %v6483_v58  ;;  %v4672_v3 = vunpack.c.h.bf16 %v6483_v58  ;;  %v4703_v7 = vunpack.c.l.bf16 %v6486_v39  ;;  %v6539_v8 = vld [vmem:[%s5882_s7 + $0x48] sm:$0xff]   ;;  %v6559_v47 = vld [vmem:[%s5882_s7 + $0x40] sm:$0xff]  }
 0x122   : > { %v5248_v60 = vpack.i.bf16 %v4708_v0, %v4707_v1  ;;  %v4704_v35 = vunpack.c.h.bf16 %v6486_v39  ;;  %v4667_v2 = vunpack.c.l.bf16 %v6496_v25  ;;  %v4668_v33 = vunpack.c.h.bf16 %v6496_v25  ;;  %v5305_v37 = vld [vmem:[#allocation2] sm:$0xff]  }
 0x123   : > { %v5253_v32 = vpack.i.bf16 %v4672_v3, %v4671_v4  ;;  %v4699_v42 = vunpack.c.l.bf16 %v6499_v28  ;;  %v4700_v52 = vunpack.c.h.bf16 %v6499_v28  ;;  %v4663_v45 = vunpack.c.l.bf16 %v6516_v18  ;;  %4937 = vmatprep.mubr.bf16.mxu0 %v5305_v37  ;;  %v5307_v50 = vld [vmem:[#allocation2 + $0x40] sm:$0xff]  }
 0x124   : > { %v5258_v10 = vpack.i.bf16 %v4704_v35, %v4703_v7  ;;  %v5263_v5 = vpack.i.bf16 %v4668_v33, %v4667_v2  ;;  %v4664_v31 = vunpack.c.h.bf16 %v6516_v18  ;;  %v4695_v29 = vunpack.c.l.bf16 %v6519_v20  ;;  %4969 = vmatprep.mubr.bf16.mxu1 %v5307_v50  ;;  %v1591_v50 = vld [vmem:[%s5878_s17 + $0x60] sm:$0xff] }
 0x125   : > { %5229 = vrot.lane.b32.xlu0 %v5228_v15, %s5622_s30  ;;  %5239 = vrot.lane.b32.xlu1 %v5238_v53, %s5622_s30  ;;  %v5268_v26 = vpack.i.bf16 %v4700_v52, %v4699_v42  ;;  %v4696_v11 = vunpack.c.h.bf16 %v6519_v20  ;;  %v4659_v17 = vunpack.c.l.bf16 %v6536_v9  ;;  %v4660_v36 = vunpack.c.h.bf16 %v6536_v9  ;;  %v1575_v15 = vld [vmem:[%s5873_s10 + $0x60] sm:$0xff]  ;;  %v1576_v53 = vld [vmem:[%s5873_s10 + $0x68] sm:$0xff] }
 0x126   : > { %v5273_v61 = vpack.i.bf16 %v4664_v31, %v4663_v45  ;;  %v4691_v34 = vunpack.c.l.bf16 %v6539_v8  ;;  %v4692_v41 = vunpack.c.h.bf16 %v6539_v8  ;;  %v4655_v56 = vunpack.c.l.bf16 %v6556_v13 }
 0x127   : > { %v5278_v23 = vpack.i.bf16 %v4696_v11, %v4695_v29  ;;  %v5283_v30 = vpack.i.bf16 %v4660_v36, %v4659_v17  ;;  %v4656_v62 = vunpack.c.h.bf16 %v6556_v13  ;;  %v7681_v38 = vunpack.c.l.bf16 %v6559_v47 }
 0x128   : > { %v5288_v43 = vpack.i.bf16 %v4692_v41, %v4691_v34  ;;  %v7680_v12 = vunpack.c.h.bf16 %v6559_v47  ;;  %v6662_v58 = vmul.f32 %v4668_v33, %v1570_v63  ;;  %v6670_v39 = vmul.f32 %v4700_v52, %v1570_v63 }
 0x129   : > { %5244 = vrot.lane.b32.xlu0 %v5243_v46, %s5622_s30  ;;  %5249 = vrot.lane.b32.xlu1 %v5248_v60, %s5622_s30  ;;  %v5293_v51 = vpack.i.bf16 %v4656_v62, %v4655_v56  ;;  %v1577_v46 = vld [vmem:[%s5873_s10 + $0x70] sm:$0xff]  ;;  %v1578_v60 = vld [vmem:[%s5873_s10 + $0x78] sm:$0xff] }
 0x12a   : > { %v5298_v21 = vpack.i.bf16 %v7680_v12, %v7681_v38  ;;  %v1690_v19 = vmul.f32 %v4716_v59, %v1578_v60  ;;  %v1569_v59 = vld [vmem:[%s5873_s10 + $0x30] sm:$0xff] }
 0x12b   : > { %v1589_v12 = vld [vmem:[%s5878_s17 + $0x50] sm:$0xff] }
 0x12d   : > { %5254 = vrot.lane.b32.xlu0 %v5253_v32, %s5622_s30  ;;  %5259 = vrot.lane.b32.xlu1 %v5258_v10, %s5622_s30  ;;  %v1573_v32 = vld [vmem:[%s5873_s10 + $0x50] sm:$0xff]  ;;  %v1574_v10 = vld [vmem:[%s5873_s10 + $0x58] sm:$0xff] }
 0x12e   : > { %v6626_v37 = vmul.f32 %v4676_v55, %v1574_v10  ;;  %v6630_v16 = vmul.f32 %v4707_v1, %v1573_v32 }
 0x131   : > { %5264 = vrot.lane.b32.xlu0 %v5263_v5, %s5622_s30  ;;  %5269 = vrot.lane.b32.xlu1 %v5268_v26, %s5622_s30  ;;  %v1672_v5 = vmul.f32 %v4680_v44, %v1576_v53  ;;  %v1671_v26 = vmul.f32 %v4679_v27, %v1575_v15  ;;  %v1687_v27 = vmul.f32 %v4711_v40, %v1575_v15  ;;  %v1594_v44 = vld [vmem:[%s5878_s17 + $0x78] sm:$0xff]  ;;  %v1592_v15 = vld [vmem:[%s5878_s17 + $0x68] sm:$0xff] }
 0x135   : > { %5274 = vrot.lane.b32.xlu0 %v5273_v61, %s5622_s30  ;;  %5279 = vrot.lane.b32.xlu1 %v5278_v23, %s5622_s30  ;;  %v1673_v61 = vmul.f32 %v4683_v49, %v1577_v46  ;;  %v1674_v23 = vmul.f32 %v4684_v57, %v1578_v60  ;;  %v1688_v49 = vmul.f32 %v4712_v54, %v1576_v53 }
 0x136   : > { %v6622_v57 = vmul.f32 %v4675_v14, %v1573_v32 }
 0x139   : > { %5284 = vrot.lane.b32.xlu0 %v5283_v30, %s5622_s30  ;;  %5289 = vrot.lane.b32.xlu1 %v5288_v43, %s5622_s30  ;;  %v1571_v30 = vld [vmem:[%s5873_s10 + $0x40] sm:$0xff]  ;;  %v1572_v43 = vld [vmem:[%s5873_s10 + $0x48] sm:$0xff] }
 0x13a   : > { %v6642_v6 = vmul.f32 %v4671_v4, %v1571_v30  ;;  %v6646_v55 = vmul.f32 %v4672_v3, %v1572_v43  ;;  %v6654_v53 = vmul.f32 %v4704_v35, %v1572_v43  ;;  %v6658_v4 = vmul.f32 %v4667_v2, %v1569_v59  ;;  %v1567_v35 = vld [vmem:[%s5873_s10 + $0x20] sm:$0xff] }
 0x13b   : > { %v6676_v28 = vmul.f32 %v4663_v45, %v1567_v35  ;;  %v6686_v18 = vmul.f32 %v4695_v29, %v1567_v35 }
 0x13d   : > { %5294 = vrot.lane.b32.xlu0 %v5293_v51, %s5622_s30  ;;  %5299 = vrot.lane.b32.xlu1 %v5298_v21, %s5622_s30  ;;  %v1593_v51 = vld [vmem:[%s5878_s17 + $0x70] sm:$0xff]  ;;  %v1689_v21 = vmul.f32 %v4715_v24, %v1577_v46  ;;  %v6634_v24 = vmul.f32 %v4708_v0, %v1574_v10  ;;  %v6650_v0 = vmul.f32 %v4703_v7, %v1571_v30 }
 0x13e   : > { %v6666_v7 = vmul.f32 %v4699_v42, %v1569_v59 }
 0x193   : > { %v5225_v22 = vpop.permute.xlu0 %5224  ;;  %v5235_v14 = vpop.permute.xlu1 %5234 }
 0x194   : > { %v5227_v40 = vunpack.i.h.bf16 %v5225_v22  ;;  %v5226_v54 = vunpack.i.l.bf16 %v5225_v22  ;;  %v5237_v1 = vunpack.i.h.bf16 %v5235_v14  ;;  %v5236_v48 = vunpack.i.l.bf16 %v5235_v14  ;;  %v1568_v22 = vld [vmem:[%s5873_s10 + $0x28] sm:$0xff] }
 0x196   : > { %v1705_v46 = vmul.f32 %v5226_v54, %v1593_v51  ;;  %v1706_v60 = vmul.f32 %v5227_v40, %v1594_v44  ;;  %v1704_v32 = vmul.f32 %v5237_v1, %v1592_v15  ;;  %v1703_v10 = vmul.f32 %v5236_v48, %v1591_v50 }
 0x197   : > { %v5230_v3 = vpop.permute.xlu0 %5229  ;;  %v5240_v33 = vpop.permute.xlu1 %5239 }
 0x198   : > { %v5232_v30 = vunpack.i.h.bf16 %v5230_v3  ;;  %v5231_v2 = vunpack.i.l.bf16 %v5230_v3  ;;  %v1737_v43 = vadd.f32 %v1705_v46, %v1673_v61  ;;  %v1738_v25 = vadd.f32 %v1706_v60, %v1674_v23  ;;  %v1590_v3 = vld [vmem:[%s5878_s17 + $0x58] sm:$0xff] }
 0x199   : > { %v5242_v40 = vunpack.i.h.bf16 %v5240_v33  ;;  %v5241_v54 = vunpack.i.l.bf16 %v5240_v33  ;;  %v1735_v14 = vadd.f32 %v1703_v10, %v1671_v26  ;;  %v1736_v1 = vadd.f32 %v1704_v32, %v1672_v5 }
 0x19a   : > { %v1762_v48 = vpack.c.bf16 %v1738_v25, %v1737_v43  ;;  %v1721_v42 = vmul.f32 %v5231_v2, %v1593_v51  ;;  %v1722_v59 = vmul.f32 %v5232_v30, %v1594_v44  ;;  %v6682_v23 = vmul.f32 %v4664_v31, %v1568_v22  ;;  %v1588_v2 = vld [vmem:[%s5878_s17 + $0x48] sm:$0xff] }
 0x19b   : > { %v1720_v52 = vmul.f32 %v5242_v40, %v1592_v15  ;;  %v1719_v63 = vmul.f32 %v5241_v54, %v1591_v50  ;;  %v5245_v38 = vpop.permute.xlu0 %5244  ;;  %v1761_v61 = vpack.c.bf16 %v1736_v1, %v1735_v14  ;;  %v5250_v44 = vpop.permute.xlu1 %5249  ;;  %v6692_v25 = vmul.f32 %v4696_v11, %v1568_v22 }
 0x19c   : > { %4921 = vmatprep.subr.bf16.mxu0 %v1762_v48  ;;  %v1753_v26 = vadd.f32 %v1721_v42, %v1689_v21  ;;  %v1754_v5 = vadd.f32 %v1722_v59, %v1690_v19  ;;  %v5247_v46 = vunpack.i.h.bf16 %v5245_v38  ;;  %v5246_v51 = vunpack.i.l.bf16 %v5245_v38  ;;  %v1587_v19 = vld [vmem:[%s5878_s17 + $0x40] sm:$0xff] }
 0x19d   : > { %4922 = vmatpush3.bf16.xpose.msra.mxu0 %v1762_v48  ;;  %v5252_v45 = vunpack.i.h.bf16 %v5250_v44  ;;  %v5251_v50 = vunpack.i.l.bf16 %v5250_v44  ;;  %v1751_v15 = vadd.f32 %v1719_v63, %v1687_v27  ;;  %v1752_v60 = vadd.f32 %v1720_v52, %v1688_v49  ;;  %v1565_v27 = vld [vmem:[%s5873_s10 + $0x10] sm:$0xff]  ;;  %v1586_v63 = vld [vmem:[%s5878_s17 + $0x38] sm:$0xff] }
 0x19e   : > { %v1770_v32 = vpack.c.bf16 %v1754_v5, %v1753_v26  ;;  %v1702_v10 = vmul.f32 %v5247_v46, %v1590_v3  ;;  %v1701_v30 = vmul.f32 %v5246_v51, %v1589_v12  ;;  %4923 = vmatprep.subr.bf16.mxu0 %v1761_v61  ;;  %v1585_v52 = vld [vmem:[%s5878_s17 + $0x30] sm:$0xff] }
 0x19f   : > { %v1718_v31 = vmul.f32 %v5252_v45, %v1590_v3  ;;  %v1717_v21 = vmul.f32 %v5251_v50, %v1589_v12  ;;  %v1769_v38 = vpack.c.bf16 %v1752_v60, %v1751_v15  ;;  %v5255_v43 = vpop.permute.xlu0 %5254  ;;  %v5260_v29 = vpop.permute.xlu1 %5259  ;;  %v1566_v12 = vld [vmem:[%s5873_s10 + $0x18] sm:$0xff] }
 0x1a0   : > { %4953 = vmatprep.subr.bf16.mxu1 %v1770_v32  ;;  %v5257_v49 = vunpack.i.h.bf16 %v5255_v43  ;;  %v5256_v33 = vunpack.i.l.bf16 %v5255_v43  ;;  %v1733_v40 = vadd.f32 %v1701_v30, %v6622_v57  ;;  %v1734_v54 = vadd.f32 %v1702_v10, %v6626_v37  ;;  %v1584_v10 = vld [vmem:[%s5878_s17 + $0x28] sm:$0xff] }
 0x1a1   : > { %4954 = vmatpush3.bf16.xpose.msra.mxu1 %v1770_v32  ;;  %v5262_v35 = vunpack.i.h.bf16 %v5260_v29  ;;  %v5261_v14 = vunpack.i.l.bf16 %v5260_v29  ;;  %v1749_v1 = vadd.f32 %v1717_v21, %v6630_v16  ;;  %v1750_v20 = vadd.f32 %v1718_v31, %v6634_v24 }
 0x1a2   : > { %4955 = vmatprep.subr.bf16.mxu1 %v1769_v38  ;;  %v1700_v11 = vmul.f32 %v5257_v49, %v1588_v2  ;;  %v1699_v22 = vmul.f32 %v5256_v33, %v1587_v19  ;;  %v1760_v48 = vpack.c.bf16 %v1734_v54, %v1733_v40  ;;  %v6702_v57 = vmul.f32 %v4659_v17, %v1565_v27 }
 0x1a3   : > { %v1716_v37 = vmul.f32 %v5262_v35, %v1588_v2  ;;  %v1715_v42 = vmul.f32 %v5261_v14, %v1587_v19  ;;  %v6704_v59 = vpack.c.bf16 %v1750_v20, %v1749_v1  ;;  %v5265_v3 = vpop.permute.xlu0 %5264  ;;  %v6710_v16 = vmul.f32 %v4660_v36, %v1566_v12  ;;  %v5270_v17 = vpop.permute.xlu1 %5269  ;;  %v1581_v35 = vld [vmem:[%s5878_s17 + $0x10] sm:$0xff]  ;;  %v1582_v14 = vld [vmem:[%s5878_s17 + $0x18] sm:$0xff] }
 0x1a4   : > { %v5267_v24 = vunpack.i.h.bf16 %v5265_v3  ;;  %v5266_v26 = vunpack.i.l.bf16 %v5265_v3  ;;  %v1731_v5 = vadd.f32 %v1699_v22, %v6642_v6  ;;  %v1732_v46 = vadd.f32 %v1700_v11, %v6646_v55 }
 0x1a5   : > { %4924 = vmatpush3.bf16.xpose.msra.mxu0 %v1761_v61  ;;  %v5272_v51 = vunpack.i.h.bf16 %v5270_v17  ;;  %v5271_v44 = vunpack.i.l.bf16 %v5270_v17  ;;  %v1747_v45 = vadd.f32 %v1715_v42, %v6650_v0  ;;  %v1748_v50 = vadd.f32 %v1716_v37, %v6654_v53  ;;  %v1583_v61 = vld [vmem:[%s5878_s17 + $0x20] sm:$0xff] }
 0x1a6   : > { %4925 = vmatprep.subr.bf16.mxu0 %v1760_v48  ;;  %v1698_v9 = vmul.f32 %v5267_v24, %v1586_v63  ;;  %v1697_v36 = vmul.f32 %v5266_v26, %v1585_v52  ;;  %v6716_v15 = vpack.c.bf16 %v1732_v46, %v1731_v5  ;;  %v1677_v6 = vmul.f32 %v4691_v34, %v1565_v27  ;;  %v1563_v53 = vld [vmem:[%s5873_s10] sm:$0xff]  ;;  %v1564_v34 = vld [vmem:[%s5873_s10 + $0x8] sm:$0xff]  ;;  %s7737_s10 = sshll.u32 %s5597_s29, 7 }
 0x1a7   : > { %v1714_v55 = vmul.f32 %v5272_v51, %v1586_v63  ;;  %v1713_v60 = vmul.f32 %v5271_v44, %v1585_v52  ;;  %v6720_v32 = vpack.c.bf16 %v1748_v50, %v1747_v45  ;;  %v5275_v30 = vpop.permute.xlu0 %5274  ;;  %v1678_v0 = vmul.f32 %v4692_v41, %v1566_v12  ;;  %v5280_v43 = vpop.permute.xlu1 %5279  ;;  %v1579_v5 = vld [vmem:[%s5878_s17] sm:$0xff]  ;;  %v1580_v46 = vld [vmem:[%s5878_s17 + $0x8] sm:$0xff] }
 0x1a8   : > { %v5277_v31 = vunpack.i.h.bf16 %v5275_v30  ;;  %v5276_v21 = vunpack.i.l.bf16 %v5275_v30  ;;  %v1729_v19 = vadd.f32 %v1697_v36, %v6658_v4  ;;  %v1730_v2 = vadd.f32 %v1698_v9, %v6662_v58 }
 0x1a9   : > { %4956 = vmatpush3.bf16.xpose.msra.mxu1 %v1769_v38  ;;  %v5282_v27 = vunpack.i.h.bf16 %v5280_v43  ;;  %v5281_v49 = vunpack.i.l.bf16 %v5280_v43  ;;  %v1745_v33 = vadd.f32 %v1713_v60, %v6666_v7  ;;  %v1746_v40 = vadd.f32 %v1714_v55, %v6670_v39  ;;  %v5310_v43 = vld [vmem:[#allocation2 + $0x18] sm:$0xff]  }
 0x1aa   : > { %4957 = vmatprep.subr.bf16.mxu1 %v6704_v59  ;;  %v1696_v8 = vmul.f32 %v5277_v31, %v1584_v10  ;;  %v1695_v41 = vmul.f32 %v5276_v21, %v1583_v61  ;;  %v1758_v54 = vpack.c.bf16 %v1730_v2, %v1729_v19  ;;  %v1659_v4 = vmul.f32 %v4655_v56, %v1563_v53 }
 0x1ab   : > { %v1712_v58 = vmul.f32 %v5282_v27, %v1584_v10  ;;  %v1711_v29 = vmul.f32 %v5281_v49, %v1583_v61  ;;  %v1766_v12 = vpack.c.bf16 %v1746_v40, %v1745_v33  ;;  %v5285_v38 = vpop.permute.xlu0 %5284  ;;  %v1660_v1 = vmul.f32 %v4656_v62, %v1564_v34  ;;  %v5290_v22 = vpop.permute.xlu1 %5289  ;;  %v5312_v27 = vld [vmem:[#allocation2 + $0x58] sm:$0xff]   ;;  %v5315_v49 = vld [vmem:[#allocation2 + $0x60] sm:$0xff]   ;;  %v5314_v33 = vld [vmem:[#allocation2 + $0x28] sm:$0xff]  }
 0x1ac   : > { %v5287_v7 = vunpack.i.h.bf16 %v5285_v38  ;;  %v5286_v20 = vunpack.i.l.bf16 %v5285_v38  ;;  %v1727_v39 = vadd.f32 %v1695_v41, %v6676_v28  ;;  %v1728_v11 = vadd.f32 %v1696_v8, %v6682_v23  ;;  %v5317_v40 = vld [vmem:[#allocation2 + $0x30] sm:$0xff]   ;;  %v5316_v8 = vld [vmem:[#allocation2 + $0x68] sm:$0xff]  }
 0x1ad   : > { %4926 = vmatpush3.bf16.xpose.msra.mxu0 %v1760_v48  ;;  %v5292_v56 = vunpack.i.h.bf16 %v5290_v22  ;;  %v5291_v37 = vunpack.i.l.bf16 %v5290_v22  ;;  %v1743_v42 = vadd.f32 %v1711_v29, %v6686_v18  ;;  %v1744_v52 = vadd.f32 %v1712_v58, %v6692_v25  ;;  %v5319_v41 = vld [vmem:[#allocation2 + $0x70] sm:$0xff]  }
 0x1ae   : > { %4927 = vmatprep.subr.bf16.mxu0 %v6716_v15  ;;  %v1694_v13 = vmul.f32 %v5287_v7, %v1582_v14  ;;  %v1693_v62 = vmul.f32 %v5286_v20, %v1581_v35  ;;  %v1757_v63 = vpack.c.bf16 %v1728_v11, %v1727_v39  ;;  %v7735_v3 = vunpack.c.l.bf16 %v6559_v47 }
 0x1af   : > { %v1710_v24 = vmul.f32 %v5292_v56, %v1582_v14  ;;  %v1709_v26 = vmul.f32 %v5291_v37, %v1581_v35  ;;  %v1765_v23 = vpack.c.bf16 %v1744_v52, %v1743_v42  ;;  %v5295_v48 = vpop.permute.xlu0 %5294  ;;  %v7736_v17 = vunpack.c.h.bf16 %v6559_v47  ;;  %v5300_v50 = vpop.permute.xlu1 %5299 }
 0x1b0   : > { %v1675_v28 = vmul.f32 %v7735_v3, %v1563_v53  ;;  %v5297_v18 = vunpack.i.h.bf16 %v5295_v48  ;;  %v5296_v44 = vunpack.i.l.bf16 %v5295_v48  ;;  %v1725_v25 = vadd.f32 %v1693_v62, %v6702_v57 }
 0x1b1   : > { %v1676_v51 = vmul.f32 %v7736_v17, %v1564_v34  ;;  %v1726_v45 = vadd.f32 %v1694_v13, %v6710_v16  ;;  %4958 = vmatpush3.bf16.xpose.msra.mxu1 %v6704_v59  ;;  %v5302_v9 = vunpack.i.h.bf16 %v5300_v50  ;;  %v5301_v36 = vunpack.i.l.bf16 %v5300_v50  ;;  %v5313_v34 = vld [vmem:[#allocation2 + $0x20] sm:$0xff]  }
 0x1b2   : > { %v1741_v55 = vadd.f32 %v1709_v26, %v1677_v6  ;;  %v1742_v60 = vadd.f32 %v1710_v24, %v1678_v0  ;;  %4959 = vmatprep.subr.bf16.mxu1 %v6720_v32  ;;  %v1692_v61 = vmul.f32 %v5297_v18, %v1580_v46  ;;  %v1691_v10 = vmul.f32 %v5296_v44, %v1579_v5  ;;  %v5309_v6 = vld [vmem:[#allocation2 + $0x10] sm:$0xff]   ;;  %v5308_v0 = vld [vmem:[#allocation2 + $0x48] sm:$0xff]  }
 0x1b3   : > { %v1756_v30 = vpack.c.bf16 %v1726_v45, %v1725_v25  ;;  %v1708_v47 = vmul.f32 %v5302_v9, %v1580_v46  ;;  %v1707_v53 = vmul.f32 %v5301_v36, %v1579_v5  ;;  %v2093_v58 = vlaneseq }
 0x1b4   : > { %v1764_v31 = vpack.c.bf16 %v1742_v60, %v1741_v55  ;;  %v1723_v21 = vadd.f32 %v1691_v10, %v1659_v4  ;;  %v1724_v19 = vadd.f32 %v1692_v61, %v1660_v1  ;;  %v5320_v4 = vld [vmem:[#allocation2 + $0x78] sm:$0xff]   ;;  %v6761_v14 = vstv %s7737_s10 }
 0x1b5   : > { %4928 = vmatpush3.bf16.xpose.msra.mxu0 %v6716_v15  ;;  %v1739_v57 = vadd.f32 %v1707_v53, %v1675_v28  ;;  %v1740_v16 = vadd.f32 %v1708_v47, %v1676_v51  ;;  %v5306_v15 = vld [vmem:[#allocation2 + $0x8] sm:$0xff]   ;;  %v6756_v29 = vshrl.u32 %v2093_v58, 7  ;;  %v2128_v35 = vand.u32 127, %v2093_v58 }
 0x1b6   : > { %4929 = vmatprep.subr.bf16.mxu0 %v1758_v54  ;;  %v1755_v59 = vpack.c.bf16 %v1724_v19, %v1723_v21  ;;  %v2129_v38 = vstv %s7738_s14  ;;  %v5623_v50 = vmov 0  }
 0x1b7   : > { %v1763_v2 = vpack.c.bf16 %v1740_v16, %v1739_v57  ;;  %v6766_v7 = vadd.s32 %v2129_v38, %v2128_v35  ;;  %v2111_v20 = vadd.s32 %v6761_v14, %v6756_v29  ;;  %v2097_v39 = vadd.s32 24, %v6756_v29  ;;  %5303 = vset.pattern.permute.xlu1 %v5623_v50  ;;  %5304 = vset.pattern.permute.xlu0 %v5623_v50 }
 0x1b8   : > { %v2095_v42 = vadd.s32 8, %v6756_v29  ;;  %v2100_v62 = vadd.s32 48, %v6756_v29  ;;  %v2101_v46 = vadd.s32 56, %v6756_v29  ;;  %v2098_v55 = vadd.s32 32, %v6756_v29 }
 0x1b9   : > { %4960 = vmatpush3.bf16.xpose.msra.mxu1 %v6720_v32  ;;  %v5311_v32 = vld [vmem:[#allocation2 + $0x50] sm:$0xff]   ;;  %vm2131_vm2 = vcmp.gt.s32.totalorder %v6766_v7, %v2111_v20  ;;  %v2114_v37 = vadd.s32 %v6761_v14, %v2097_v39  ;;  %v2099_v53 = vadd.s32 40, %v6756_v29  ;;  %v2104_v19 = vadd.s32 80, %v6756_v29 }
 0x1ba   : > { %4961 = vmatprep.subr.bf16.mxu1 %v1766_v12  ;;  %v2112_v24 = vadd.s32 %v6761_v14, %v2095_v42  ;;  %v2117_v5 = vadd.s32 %v6761_v14, %v2100_v62  ;;  %v2118_v44 = vadd.s32 %v6761_v14, %v2101_v46  ;;  %v2115_v47 = vadd.s32 %v6761_v14, %v2098_v55 }
 0x1bb   : > { %vm2134_vm3 = vcmp.gt.s32.totalorder %v6766_v7, %v2114_v37  ;;  %v2116_v16 = vadd.s32 %v6761_v14, %v2099_v53  ;;  %v2103_v35 = vadd.s32 72, %v6756_v29  ;;  %v2108_v20 = vadd.s32 112, %v6756_v29 }
 0x1bc   : > { %vm2132_vm4 = vcmp.gt.s32.totalorder %v6766_v7, %v2112_v24  ;;  %vm2137_vm5 = vcmp.gt.s32.totalorder %v6766_v7, %v2117_v5  ;;  %vm2138_vm6 = vcmp.gt.s32.totalorder %v6766_v7, %v2118_v44  ;;  %vm2135_vm7 = vcmp.gt.s32.totalorder %v6766_v7, %v2115_v47 }
 0x1bd   : > { %4930 = vmatpush3.bf16.xpose.msra.mxu0 %v1758_v54  ;;  %v5318_v54 = vld [vmem:[#allocation2 + $0x38] sm:$0xff]   ;;  %vm2136_vm8 = vcmp.gt.s32.totalorder %v6766_v7, %v2116_v16  ;;  %v2106_v5 = vadd.s32 96, %v6756_v29  ;;  %v2107_v55 = vadd.s32 104, %v6756_v29 }
 0x1be   : > { %4931 = vmatprep.subr.bf16.mxu0 %v1757_v63 }
 0x1bf   : > { %v2124_v53 = vadd.s32 %v6761_v14, %v2107_v55  ;;  %v6997_v55 = vld [vmem:[#allocation3 + $0x88] sm:$0xff] }
 0x1c1   : > { %4962 = vmatpush3.bf16.xpose.msra.mxu1 %v1766_v12  ;;  %v2096_v12 = vadd.s32 16, %v6756_v29  ;;  %vm2144_vm0 = vcmp.gt.s32.totalorder %v6766_v7, %v2124_v53 }
 0x1c2   : > { %4963 = vmatprep.subr.bf16.mxu1 %v1765_v23 }
 0x1c3   : > { %v2113_v1 = vadd.s32 %v6761_v14, %v2096_v12 }
 0x1c5   : > { %4932 = vmatpush3.bf16.xpose.msra.mxu0 %v1757_v63  ;;  %vm2133_vm1 = vcmp.gt.s32.totalorder %v6766_v7, %v2113_v1 }
 0x1c6   : > { %4933 = vmatprep.subr.bf16.mxu0 %v1756_v30 }
 0x1c9   : > { %4964 = vmatpush3.bf16.xpose.msra.mxu1 %v1765_v23 }
 0x1ca   : > { %4965 = vmatprep.subr.bf16.mxu1 %v1764_v31 }
 0x1cd   : > { %4934 = vmatpush3.bf16.xpose.msra.mxu0 %v1756_v30 }
 0x1ce   : > { %4935 = vmatprep.subr.bf16.mxu0 %v1755_v59 }
 0x1d1   : > { %4966 = vmatpush3.bf16.xpose.msra.mxu1 %v1764_v31 }
 0x1d2   : > { %4967 = vmatprep.subr.bf16.mxu1 %v1763_v2 }
 0x1d5   : > { %4936 = vmatpush3.bf16.xpose.msra.mxu0 %v1755_v59 }
 0x1d9   : > { %4968 = vmatpush3.bf16.xpose.msra.mxu1 %v1763_v2 }
 0x1dc   : > { %4938 = vmatmul.mubr.bf16.vlgmr.msra.gmra.mxu0 %v5306_v15  ;;  %v2121_v15 = vadd.s32 %v6761_v14, %v2104_v19 }
 0x1dd   : > { %4941 = vmatprep.mubr.bf16.mxu0 %v5309_v6  ;;  %v2105_v6 = vadd.s32 88, %v6756_v29 }
 0x1de   : > { %vm2141_vm9 = vcmp.gt.s32.totalorder %v6766_v7, %v2121_v15 }
 0x1e0   : > { %4970 = vmatmul.mubr.bf16.vlgmr.msra.gmra.mxu1 %v5308_v0 }
 0x1e1   : > { %4973 = vmatprep.mubr.bf16.mxu1 %v5311_v32 }
 0x1e4   : > { %4942 = vmatmul.mubr.bf16.gmra.mxu0 %v5310_v43 }
 0x1e5   : > { %4945 = vmatprep.mubr.bf16.mxu0 %v5313_v34  ;;  %v2122_v34 = vadd.s32 %v6761_v14, %v2105_v6  ;;  %v6942_v6 = vld [vmem:[#allocation3 + $0x10] sm:$0xff] }
 0x1e7   : > { %vm2142_vm10 = vcmp.gt.s32.totalorder %v6766_v7, %v2122_v34  ;;  %v6949_v34 = vld [vmem:[#allocation3] sm:$0xff] }
 0x1e8   : > { %4974 = vmatmul.mubr.bf16.gmra.mxu1 %v5312_v27 }
 0x1e9   : > { %4977 = vmatprep.mubr.bf16.mxu1 %v5315_v49 }
 0x1ec   : > { %4946 = vmatmul.mubr.bf16.gmra.mxu0 %v5314_v33 }
 0x1ed   : > { %4949 = vmatprep.mubr.bf16.mxu0 %v5317_v40 }
 0x1f0   : > { %4978 = vmatmul.mubr.bf16.gmra.mxu1 %v5316_v8  ;;  %v2102_v8 = vadd.s32 64, %v6756_v29 }
 0x1f1   : > { %4981 = vmatprep.mubr.bf16.mxu1 %v5319_v41 }
 0x1f2   : > { %v2119_v12 = vadd.s32 %v6761_v14, %v2102_v8 }
 0x1f4   : > { %4950 = vmatmul.mubr.bf16.gmra.mxu0 %v5318_v54  ;;  %vm2139_vm11 = vcmp.gt.s32.totalorder %v6766_v7, %v2119_v12 }
 0x1f8   : > { %4982 = vmatmul.mubr.bf16.gmra.mxu1 %v5320_v4 }
 0x29c   : > { %v4939_v11 = vpop.f32.mrf.mxu0 }
 0x29d   : > { %v6772_v22 = vsel %vm2133_vm1, -1e+30, %v4939_v11 }
 0x29e   : > { %2215 = vmax.xlane.f32.xlu0 %v6772_v22  ;;  %v1885_v56 = vpop.f32.mrf.mxu0 }
 0x29f   : > { %v6783_v3 = vsel %vm2131_vm2, -1e+30, %v1885_v56  ;;  %v2120_v56 = vadd.s32 %v6761_v14, %v2103_v35  ;;  %v6963_v35 = vld [vmem:[#allocation3 + $0x80] sm:$0xff] }
 0x2a0   : > { %v4940_v52 = vpop.f32.mrf.mxu0  ;;  %v4971_v13 = vpop.f32.mrf.mxu1 }
 0x2a1   : > { %v6779_v63 = vsel %vm2133_vm1, -1e+30, %v4971_v13  ;;  %v6795_v17 = vsel %vm2134_vm3, -1e+30, %v4940_v52  ;;  %v2125_v52 = vadd.s32 %v6761_v14, %v2108_v20  ;;  %v2109_v13 = vadd.s32 120, %v6756_v29  ;;  %v6965_v20 = vld [vmem:[#allocation3 + $0x18] sm:$0xff] }
 0x2a2   : > { %7739 = vst [vmem:[#allocation17_spill] sm:$0xff] %v6779_v63  ;;  %2247 = vmax.xlane.f32.xlu1 %v6779_v63  ;;  %v2030_v28 = vpop.f32.mrf.mxu1  ;;  %2211 = vmax.xlane.f32.xlu0 %v6783_v3  ;;  %v1888_v26 = vpop.f32.mrf.mxu0  ;;  %7741 = vst [vmem:[#allocation19_spill] sm:$0xff] %v6795_v17  ;;  %vm2140_vm12 = vcmp.gt.s32.totalorder %v6766_v7, %v2120_v56  ;;  %vm2819_vm1 = vcmask 7168   ;;  %v7172_v63 = vld [vmem:[#allocation3 + $0x60] sm:$0xff] }
 0x2a3   : > { %v6793_v48 = vsel %vm2131_vm2, -1e+30, %v2030_v28  ;;  %v6806_v45 = vsel %vm2132_vm4, -1e+30, %v1888_v26  ;;  %vm2145_vm13 = vcmp.gt.s32.totalorder %v6766_v7, %v2125_v52 }
 0x2a4   : > { %v4972_v23 = vpop.f32.mrf.mxu1  ;;  %7740 = vst [vmem:[#allocation18_spill] sm:$0xff] %v6793_v48  ;;  %v4943_v51 = vpop.f32.mrf.mxu0  ;;  %7743 = vst [vmem:[#allocation21_spill] sm:$0xff] %v6806_v45 }
 0x2a5   : > { %v6802_v25 = vsel %vm2134_vm3, -1e+30, %v4972_v23  ;;  %v6813_v60 = vsel %vm2137_vm5, -1e+30, %v4943_v51  ;;  %v2126_v23 = vadd.s32 %v6761_v14, %v2109_v13 }
 0x2a6   : > { %2243 = vmax.xlane.f32.xlu1 %v6793_v48  ;;  %2217 = vmax.xlane.f32.xlu0 %v6795_v17  ;;  %v2033_v18 = vpop.f32.mrf.mxu1  ;;  %7742 = vst [vmem:[#allocation20_spill] sm:$0xff] %v6802_v25  ;;  %v1901_v9 = vpop.f32.mrf.mxu0  ;;  %7744 = vst [vmem:[#allocation22_spill] sm:$0xff] %v6813_v60 }
 0x2a7   : > { %v6818_v61 = vsel %vm2132_vm4, -1e+30, %v2033_v18  ;;  %v6843_v0 = vsel %vm2135_vm7, -1e+30, %v1901_v9  ;;  %vm2146_vm14 = vcmp.gt.s32.totalorder %v6766_v7, %v2126_v23  ;;  %v2123_v9 = vadd.s32 %v6761_v14, %v2106_v5  ;;  %v5325_v23 = vld [vmem:[%s5884_s19 + $0x70] sm:$0xff]  }
 0x2a8   : > { %v4975_v36 = vpop.f32.mrf.mxu1  ;;  %7745 = vst [vmem:[#allocation23_spill] sm:$0xff] %v6818_v61  ;;  %v4944_v10 = vpop.f32.mrf.mxu0  ;;  %7749 = vst [vmem:[#allocation27_spill] sm:$0xff] %v6843_v0 }
 0x2a9   : > { %v6826_v31 = vsel %vm2137_vm5, -1e+30, %v4975_v36  ;;  %v6830_v21 = vsel %vm2138_vm6, -1e+30, %v4944_v10  ;;  %vm2143_vm15 = vcmp.gt.s32.totalorder %v6766_v7, %v2123_v9 }
 0x2aa   : > { %2249 = vmax.xlane.f32.xlu0 %v6802_v25  ;;  %2213 = vmax.xlane.f32.xlu1 %v6806_v45  ;;  %v2046_v30 = vpop.f32.mrf.mxu1  ;;  %7746 = vst [vmem:[#allocation24_spill] sm:$0xff] %v6826_v31  ;;  %7747 = vst [vmem:[#allocation25_spill] sm:$0xff] %v6830_v21  ;;  %v1904_v2 = vpop.f32.mrf.mxu0  ;;  %v7174_v45 = vld [vmem:[#allocation3 + $0xf8] sm:$0xff]  ;;  %v7194_v25 = vld [vmem:[#allocation3 + $0x68] sm:$0xff] }
 0x2ab   : > { %v6850_v27 = vsel %vm2135_vm7, -1e+30, %v2046_v30  ;;  %v6852_v49 = vsel %vm2136_vm8, -1e+30, %v1904_v2  ;;  %7770 = vst [vmem:[#allocation48_spill] sm:$0xff] %v7174_v45 }
 0x2ac   : > { %v4976_v57 = vpop.f32.mrf.mxu1  ;;  %v4947_v32 = vpop.f32.mrf.mxu0  ;;  %7750 = vst [vmem:[#allocation28_spill] sm:$0xff] %v6850_v27  ;;  %7751 = vst [vmem:[#allocation29_spill] sm:$0xff] %v6852_v49 }
 0x2ad   : > { %v6839_v59 = vsel %vm2138_vm6, -1e+30, %v4976_v57  ;;  %v6859_v41 = vsel %vm2141_vm9, -1e+30, %v4947_v32 }
 0x2ae   : > { %2245 = vmax.xlane.f32.xlu0 %v6818_v61  ;;  %2223 = vmax.xlane.f32.xlu1 %v6813_v60  ;;  %7748 = vst [vmem:[#allocation26_spill] sm:$0xff] %v6839_v59  ;;  %v2049_v43 = vpop.f32.mrf.mxu1  ;;  %v1917_v33 = vpop.f32.mrf.mxu0  ;;  %7752 = vst [vmem:[#allocation30_spill] sm:$0xff] %v6859_v41  ;;  %v7139_v60 = vld [vmem:[#allocation3 + $0x70] sm:$0xff] }
 0x2af   : > { %v6862_v54 = vsel %vm2136_vm8, -1e+30, %v2049_v43  ;;  %v6889_v62 = vsel %vm2139_vm11, -1e+30, %v1917_v33  ;;  %v6947_v43 = vld [vmem:[#allocation3 + $0x90] sm:$0xff]  ;;  %v7055_v33 = vld [vmem:[#allocation3 + $0x28] sm:$0xff] }
 0x2b0   : > { %v4979_v40 = vpop.f32.mrf.mxu1  ;;  %7753 = vst [vmem:[#allocation31_spill] sm:$0xff] %v6862_v54  ;;  %v4948_v4 = vpop.f32.mrf.mxu0  ;;  %7757 = vst [vmem:[#allocation35_spill] sm:$0xff] %v6889_v62 }
 0x2b1   : > { %v6870_v38 = vsel %vm2141_vm9, -1e+30, %v4979_v40  ;;  %v6874_v1 = vsel %vm2142_vm10, -1e+30, %v4948_v4  ;;  %v5321_v40 = vld [vmem:[%s5884_s19 + $0x38] sm:$0xff]  }
 0x2b2   : > { %2255 = vmax.xlane.f32.xlu1 %v6826_v31  ;;  %2225 = vmax.xlane.f32.xlu0 %v6830_v21  ;;  %v2062_v58 = vpop.f32.mrf.mxu1  ;;  %7754 = vst [vmem:[#allocation32_spill] sm:$0xff] %v6870_v38  ;;  %7755 = vst [vmem:[#allocation33_spill] sm:$0xff] %v6874_v1  ;;  %v1920_v39 = vpop.f32.mrf.mxu0 }
 0x2b3   : > { %v6899_v46 = vsel %vm2139_vm11, -1e+30, %v2062_v58  ;;  %v6901_v51 = vsel %vm2140_vm12, -1e+30, %v1920_v39  ;;  %4985 = vmatprep.subr.bf16.mxu0 %v5321_v40  ;;  %v5322_v39 = vld [vmem:[%s5884_s19 + $0x30] sm:$0xff]  }
 0x2b4   : > { %v4980_v11 = vpop.f32.mrf.mxu1  ;;  %v4951_v42 = vpop.f32.mrf.mxu0  ;;  %7758 = vst [vmem:[#allocation36_spill] sm:$0xff] %v6899_v46  ;;  %7759 = vst [vmem:[#allocation37_spill] sm:$0xff] %v6901_v51  ;;  %4986 = vmatpush3.bf16.msra.mxu0 %v5321_v40 }
 0x2b5   : > { %v6883_v37 = vsel %vm2142_vm10, -1e+30, %v4980_v11  ;;  %v6907_v18 = vsel %vm2145_vm13, -1e+30, %v4951_v42  ;;  %v5323_v11 = vld [vmem:[%s5884_s19 + $0x78] sm:$0xff]   ;;  %4987 = vmatprep.subr.bf16.mxu0 %v5322_v39 }
 0x2b6   : > { %2219 = vmax.xlane.f32.xlu1 %v6843_v0  ;;  %2257 = vmax.xlane.f32.xlu0 %v6839_v59  ;;  %7756 = vst [vmem:[#allocation34_spill] sm:$0xff] %v6883_v37  ;;  %v2065_v28 = vpop.f32.mrf.mxu1  ;;  %v1933_v24 = vpop.f32.mrf.mxu0  ;;  %7760 = vst [vmem:[#allocation38_spill] sm:$0xff] %v6907_v18  ;;  %v7156_v59 = vld [vmem:[#allocation3 + $0x78] sm:$0xff] }
 0x2b7   : > { %v6911_v36 = vsel %vm2140_vm12, -1e+30, %v2065_v28  ;;  %v6926_v19 = vsel %vm2143_vm15, -1e+30, %v1933_v24  ;;  %5017 = vmatprep.subr.bf16.mxu1 %v5323_v11  ;;  %v6980_v28 = vld [vmem:[#allocation3 + $0x98] sm:$0xff]  ;;  %v6982_v24 = vld [vmem:[#allocation3 + $0x8] sm:$0xff] }
 0x2b8   : > { %v4983_v26 = vpop.f32.mrf.mxu1  ;;  %v4952_v44 = vpop.f32.mrf.mxu0  ;;  %7761 = vst [vmem:[#allocation39_spill] sm:$0xff] %v6911_v36  ;;  %7764 = vst [vmem:[#allocation42_spill] sm:$0xff] %v6926_v19  ;;  %4988 = vmatpush3.bf16.msra.mxu0 %v5322_v39  ;;  %5018 = vmatpush3.bf16.msra.mxu1 %v5323_v11  ;;  %v7017_v39 = vld [vmem:[#allocation3 + $0xb0] sm:$0xff]  ;;  %v7019_v11 = vld [vmem:[#allocation3 + $0x38] sm:$0xff] }
 0x2b9   : > { %v6918_v10 = vsel %vm2145_vm13, -1e+30, %v4983_v26  ;;  %v6920_v30 = vsel %vm2146_vm14, -1e+30, %v4952_v44  ;;  %v5324_v26 = vld [vmem:[%s5884_s19 + $0x28] sm:$0xff]   ;;  %5019 = vmatprep.subr.bf16.mxu1 %v5325_v23 }
 0x2ba   : > { %2251 = vmax.xlane.f32.xlu1 %v6850_v27  ;;  %2221 = vmax.xlane.f32.xlu0 %v6852_v49  ;;  %v2078_v50 = vpop.f32.mrf.mxu1  ;;  %7762 = vst [vmem:[#allocation40_spill] sm:$0xff] %v6918_v10  ;;  %7763 = vst [vmem:[#allocation41_spill] sm:$0xff] %v6920_v30  ;;  %v1936_v29 = vpop.f32.mrf.mxu0  ;;  %v7137_v49 = vld [vmem:[#allocation3 + $0xc8] sm:$0xff]  ;;  %v7154_v27 = vld [vmem:[#allocation3 + $0xf0] sm:$0xff] }
 0x2bb   : > { %v6933_v16 = vsel %vm2143_vm15, -1e+30, %v2078_v50  ;;  %v6935_v2 = vsel %vm2144_vm0, -1e+30, %v1936_v29  ;;  %4989 = vmatprep.subr.bf16.mxu0 %v5324_v26  ;;  %v5326_v29 = vld [vmem:[%s5884_s19 + $0x20] sm:$0xff]   ;;  %7769 = vst [vmem:[#allocation47_spill] sm:$0xff] %v7154_v27 }
 0x2bc   : > { %v4984_v47 = vpop.f32.mrf.mxu1  ;;  %7766 = vst [vmem:[#allocation44_spill] sm:$0xff] %v6933_v16  ;;  %7767 = vst [vmem:[#allocation45_spill] sm:$0xff] %v6935_v2  ;;  %4990 = vmatpush3.bf16.msra.mxu0 %v5324_v26  ;;  %5020 = vmatpush3.bf16.msra.mxu1 %v5325_v23 }
 0x2bd   : > { %v6928_v57 = vsel %vm2146_vm14, -1e+30, %v4984_v47  ;;  %v6999_v47 = vld [vmem:[#allocation3 + $0x30] sm:$0xff]  ;;  %4991 = vmatprep.subr.bf16.mxu0 %v5326_v29 }
 0x2be   : > { %2253 = vmax.xlane.f32.xlu0 %v6862_v54  ;;  %2231 = vmax.xlane.f32.xlu1 %v6859_v41  ;;  %7765 = vst [vmem:[#allocation43_spill] sm:$0xff] %v6928_v57  ;;  %v2081_v15 = vpop.f32.mrf.mxu1 }
 0x2bf   : > { %v6939_v14 = vsel %vm2144_vm0, -1e+30, %v2081_v15  ;;  %v5327_v15 = vld [vmem:[%s5884_s19 + $0x68] sm:$0xff]  }
 0x2c0   : > { %7768 = vst [vmem:[#allocation46_spill] sm:$0xff] %v6939_v14  ;;  %5021 = vmatprep.subr.bf16.mxu1 %v5327_v15  ;;  %4992 = vmatpush3.bf16.msra.mxu0 %v5326_v29  ;;  %v7035_v29 = vld [vmem:[#allocation3 + $0x20] sm:$0xff] }
 0x2c1   : > { %5022 = vmatpush3.bf16.msra.mxu1 %v5327_v15  ;;  %v7037_v15 = vld [vmem:[#allocation3 + $0xb8] sm:$0xff] }
 0x2c2   : > { %2263 = vmax.xlane.f32.xlu1 %v6870_v38  ;;  %2233 = vmax.xlane.f32.xlu0 %v6874_v1  ;;  %v7121_v38 = vld [vmem:[#allocation3 + $0xc0] sm:$0xff] }
 0x2c6   : > { %2227 = vmax.xlane.f32.xlu1 %v6889_v62  ;;  %2265 = vmax.xlane.f32.xlu0 %v6883_v37 }
 0x2ca   : > { %2259 = vmax.xlane.f32.xlu1 %v6899_v46  ;;  %2229 = vmax.xlane.f32.xlu0 %v6901_v51 }
 0x2ce   : > { %2261 = vmax.xlane.f32.xlu0 %v6911_v36  ;;  %2239 = vmax.xlane.f32.xlu1 %v6907_v18 }
 0x2d2   : > { %2271 = vmax.xlane.f32.xlu1 %v6918_v10  ;;  %2241 = vmax.xlane.f32.xlu0 %v6920_v30 }
 0x2d6   : > { %2235 = vmax.xlane.f32.xlu1 %v6926_v19  ;;  %2273 = vmax.xlane.f32.xlu0 %v6928_v57 }
 0x2da   : > { %2267 = vmax.xlane.f32.xlu1 %v6933_v16  ;;  %2237 = vmax.xlane.f32.xlu0 %v6935_v2  ;;  %v7073_v2 = vld [vmem:[#allocation3 + $0x50] sm:$0xff] }
 0x2de   : > { %2269 = vmax.xlane.f32.xlu0 %v6939_v14 }
 0x327   : > { %v2216_v32 = vpop.xlane.xlu0 %2215 }
 0x328   : > { %v6945_v7 = vmax.f32 %v6942_v6, %v2216_v32 }
 0x32a   : > { %3480 = vst.msk [vmem:[#allocation3 + $0x10] sm:$0xff] %vm2819_vm1, %v6945_v7  ;;  %2415 = vperm.xlu1 %5303, %v6945_v7  }
 0x32b   : > { %v2248_v8 = vpop.xlane.xlu1 %2247  ;;  %v2212_v4 = vpop.xlane.xlu0 %2211 }
 0x32c   : > { %v6958_v58 = vmax.f32 %v6947_v43, %v2248_v8  ;;  %v6961_v12 = vmax.f32 %v6949_v34, %v2212_v4 }
 0x32e   : > { %3496 = vst.msk [vmem:[#allocation3 + $0x90] sm:$0xff] %vm2819_vm1, %v6958_v58  ;;  %3478 = vst.msk [vmem:[#allocation3] sm:$0xff] %vm2819_vm1, %v6961_v12  ;;  %2495 = vperm.xlu1 %5303, %v6958_v58  }
 0x32f   : > { %v2244_v56 = vpop.xlane.xlu1 %2243  ;;  %v2218_v42 = vpop.xlane.xlu0 %2217 }
 0x330   : > { %v6975_v52 = vmax.f32 %v6963_v35, %v2244_v56  ;;  %v6978_v13 = vmax.f32 %v6965_v20, %v2218_v42  ;;  %v5328_v56 = vld [vmem:[%s5884_s19 + $0x18] sm:$0xff]   ;;  %v5329_v42 = vld [vmem:[%s5884_s19 + $0x60] sm:$0xff]  }
 0x331   : > { %4993 = vmatprep.subr.bf16.mxu0 %v5328_v56  ;;  %5023 = vmatprep.subr.bf16.mxu1 %v5329_v42 }
 0x332   : > { %3494 = vst.msk [vmem:[#allocation3 + $0x80] sm:$0xff] %vm2819_vm1, %v6975_v52  ;;  %3481 = vst.msk [vmem:[#allocation3 + $0x18] sm:$0xff] %vm2819_vm1, %v6978_v13  ;;  %2405 = vperm.xlu1 %5303, %v6961_v12   ;;  %4994 = vmatpush3.bf16.msra.mxu0 %v5328_v56 }
 0x333   : > { %v2250_v5 = vpop.xlane.xlu0 %2249  ;;  %v2214_v44 = vpop.xlane.xlu1 %2213  ;;  %5024 = vmatpush3.bf16.msra.mxu1 %v5329_v42  ;;  %v7053_v42 = vld [vmem:[#allocation3 + $0xa0] sm:$0xff] }
 0x334   : > { %v6992_v50 = vmax.f32 %v6980_v28, %v2250_v5  ;;  %v6995_v9 = vmax.f32 %v6982_v24, %v2214_v44 }
 0x336   : > { %3497 = vst.msk [vmem:[#allocation3 + $0x98] sm:$0xff] %vm2819_vm1, %v6992_v50  ;;  %3479 = vst.msk [vmem:[#allocation3 + $0x8] sm:$0xff] %vm2819_vm1, %v6995_v9  ;;  %2485 = vperm.xlu1 %5303, %v6975_v52   ;;  %2500 = vperm.xlu0 %5304, %v6992_v50  }
 0x337   : > { %v2246_v32 = vpop.xlane.xlu0 %2245  ;;  %v2224_v40 = vpop.xlane.xlu1 %2223 }
 0x338   : > { %v7012_v8 = vmax.f32 %v6997_v55, %v2246_v32  ;;  %v7015_v4 = vmax.f32 %v6999_v47, %v2224_v40  ;;  %v5330_v32 = vld [vmem:[%s5884_s19 + $0x10] sm:$0xff]   ;;  %v5331_v40 = vld [vmem:[%s5884_s19 + $0x58] sm:$0xff]  }
 0x339   : > { %4995 = vmatprep.subr.bf16.mxu0 %v5330_v32  ;;  %5025 = vmatprep.subr.bf16.mxu1 %v5331_v40 }
 0x33a   : > { %3495 = vst.msk [vmem:[#allocation3 + $0x88] sm:$0xff] %vm2819_vm1, %v7012_v8  ;;  %3484 = vst.msk [vmem:[#allocation3 + $0x30] sm:$0xff] %vm2819_vm1, %v7015_v4  ;;  %2420 = vperm.xlu1 %5303, %v6978_v13   ;;  %2410 = vperm.xlu0 %5304, %v6995_v9  }
 0x33b   : > { %v2256_v26 = vpop.xlane.xlu1 %2255  ;;  %v2226_v23 = vpop.xlane.xlu0 %2225  ;;  %4996 = vmatpush3.bf16.msra.mxu0 %v5330_v32  ;;  %5026 = vmatpush3.bf16.msra.mxu1 %v5331_v40  ;;  %v7071_v40 = vld [vmem:[#allocation3 + $0xa8] sm:$0xff] }
 0x33c   : > { %v7030_v5 = vmax.f32 %v7017_v39, %v2256_v26  ;;  %v7033_v44 = vmax.f32 %v7019_v11, %v2226_v23 }
 0x33e   : > { %3500 = vst.msk [vmem:[#allocation3 + $0xb0] sm:$0xff] %vm2819_vm1, %v7030_v5  ;;  %3485 = vst.msk [vmem:[#allocation3 + $0x38] sm:$0xff] %vm2819_vm1, %v7033_v44  ;;  %2435 = vperm.xlu1 %5303, %v7015_v4   ;;  %2490 = vperm.xlu0 %5304, %v7012_v8  }
 0x33f   : > { %v2220_v26 = vpop.xlane.xlu1 %2219  ;;  %v2258_v23 = vpop.xlane.xlu0 %2257 }
 0x340   : > { %v7048_v53 = vmax.f32 %v7035_v29, %v2220_v26  ;;  %v7051_v56 = vmax.f32 %v7037_v15, %v2258_v23  ;;  %v5332_v26 = vld [vmem:[%s5884_s19 + $0x8] sm:$0xff]   ;;  %v5333_v23 = vld [vmem:[%s5884_s19 + $0x50] sm:$0xff]  }
 0x341   : > { %4997 = vmatprep.subr.bf16.mxu0 %v5332_v26  ;;  %5027 = vmatprep.subr.bf16.mxu1 %v5333_v23 }
 0x342   : > { %3482 = vst.msk [vmem:[#allocation3 + $0x20] sm:$0xff] %vm2819_vm1, %v7048_v53  ;;  %3501 = vst.msk [vmem:[#allocation3 + $0xb8] sm:$0xff] %vm2819_vm1, %v7051_v56  ;;  %2515 = vperm.xlu1 %5303, %v7030_v5   ;;  %2520 = vperm.xlu0 %5304, %v7051_v56  }
 0x343   : > { %v2252_v57 = vpop.xlane.xlu1 %2251  ;;  %v2222_v14 = vpop.xlane.xlu0 %2221  ;;  %4998 = vmatpush3.bf16.msra.mxu0 %v5332_v26  ;;  %5028 = vmatpush3.bf16.msra.mxu1 %v5333_v23  ;;  %v7088_v26 = vld [vmem:[#allocation3 + $0xd0] sm:$0xff]  ;;  %v7090_v23 = vld [vmem:[#allocation3 + $0x58] sm:$0xff] }
 0x344   : > { %v7066_v10 = vmax.f32 %v7053_v42, %v2252_v57  ;;  %v7069_v32 = vmax.f32 %v7055_v33, %v2222_v14  ;;  %v5334_v57 = vld [vmem:[%s5884_s19] sm:$0xff]   ;;  %v5335_v14 = vld [vmem:[%s5884_s19 + $0x48] sm:$0xff]  }
 0x345   : > { %4999 = vmatprep.subr.bf16.mxu0 %v5334_v57  ;;  %5029 = vmatprep.subr.bf16.mxu1 %v5335_v14 }
 0x346   : > { %3498 = vst.msk [vmem:[#allocation3 + $0xa0] sm:$0xff] %vm2819_vm1, %v7066_v10  ;;  %3483 = vst.msk [vmem:[#allocation3 + $0x28] sm:$0xff] %vm2819_vm1, %v7069_v32  ;;  %2425 = vperm.xlu1 %5303, %v7048_v53  }
 0x347   : > { %v2254_v16 = vpop.xlane.xlu0 %2253  ;;  %v2232_v18 = vpop.xlane.xlu1 %2231  ;;  %5000 = vmatpush3.bf16.msra.mxu0 %v5334_v57  ;;  %5030 = vmatpush3.bf16.msra.mxu1 %v5335_v14  ;;  %v7105_v57 = vld [vmem:[#allocation3 + $0x40] sm:$0xff]  ;;  %v7107_v14 = vld [vmem:[#allocation3 + $0xd8] sm:$0xff] }
 0x348   : > { %v7083_v30 = vmax.f32 %v7071_v40, %v2254_v16  ;;  %v7086_v19 = vmax.f32 %v7073_v2, %v2232_v18  ;;  %v5336_v18 = vld [vmem:[%s5884_s19 + $0x40] sm:$0xff]  }
 0x349   : > { %5031 = vmatprep.subr.bf16.mxu1 %v5336_v18 }
 0x34a   : > { %3499 = vst.msk [vmem:[#allocation3 + $0xa8] sm:$0xff] %vm2819_vm1, %v7083_v30  ;;  %3488 = vst.msk [vmem:[#allocation3 + $0x50] sm:$0xff] %vm2819_vm1, %v7086_v19  ;;  %2505 = vperm.xlu1 %5303, %v7066_v10   ;;  %2510 = vperm.xlu0 %5304, %v7083_v30  }
 0x34b   : > { %v2264_v16 = vpop.xlane.xlu1 %2263  ;;  %v2234_v51 = vpop.xlane.xlu0 %2233  ;;  %5032 = vmatpush3.bf16.msra.mxu1 %v5336_v18  ;;  %v7123_v18 = vld [vmem:[#allocation3 + $0x48] sm:$0xff] }
 0x34c   : > { %v7100_v41 = vmax.f32 %v7088_v26, %v2264_v16  ;;  %v7103_v37 = vmax.f32 %v7090_v23, %v2234_v51 }
 0x34e   : > { %3504 = vst.msk [vmem:[#allocation3 + $0xd0] sm:$0xff] %vm2819_vm1, %v7100_v41  ;;  %3489 = vst.msk [vmem:[#allocation3 + $0x58] sm:$0xff] %vm2819_vm1, %v7103_v37  ;;  %2440 = vperm.xlu1 %5303, %v7033_v44   ;;  %2455 = vperm.xlu0 %5304, %v7086_v19  }
 0x34f   : > { %v2228_v16 = vpop.xlane.xlu1 %2227  ;;  %v2266_v62 = vpop.xlane.xlu0 %2265 }
 0x350   : > { %v7116_v51 = vmax.f32 %v7105_v57, %v2228_v16  ;;  %v7119_v1 = vmax.f32 %v7107_v14, %v2266_v62 }
 0x352   : > { %3486 = vst.msk [vmem:[#allocation3 + $0x40] sm:$0xff] %vm2819_vm1, %v7116_v51  ;;  %3505 = vst.msk [vmem:[#allocation3 + $0xd8] sm:$0xff] %vm2819_vm1, %v7119_v1  ;;  %2430 = vperm.xlu1 %5303, %v7069_v32   ;;  %2535 = vperm.xlu0 %5304, %v7100_v41  }
 0x353   : > { %v2260_v36 = vpop.xlane.xlu1 %2259  ;;  %v2230_v16 = vpop.xlane.xlu0 %2229 }
 0x354   : > { %v7132_v46 = vmax.f32 %v7121_v38, %v2260_v36  ;;  %v7135_v62 = vmax.f32 %v7123_v18, %v2230_v16  ;;  %v2308_v36 = vsub.f32 %v6982_v24, %v6995_v9 }
 0x356   : > { %3502 = vst.msk [vmem:[#allocation3 + $0xc0] sm:$0xff] %vm2819_vm1, %v7132_v46  ;;  %3487 = vst.msk [vmem:[#allocation3 + $0x48] sm:$0xff] %vm2819_vm1, %v7135_v62  ;;  %2445 = vperm.xlu1 %5303, %v7116_v51   ;;  %v2341_v9 = vmul.f32 1.442695, %v2308_v36 }
 0x357   : > { %v2262_v21 = vpop.xlane.xlu0 %2261  ;;  %v2240_v0 = vpop.xlane.xlu1 %2239 }
 0x358   : > { %v7149_v16 = vmax.f32 %v7137_v49, %v2262_v21  ;;  %v7152_v54 = vmax.f32 %v7139_v60, %v2240_v0  ;;  %v2311_v0 = vsub.f32 %v7035_v29, %v7048_v53  ;;  %v2313_v53 = vsub.f32 %v6999_v47, %v7015_v4 }
 0x359   : > { %5337 = vpow2.f32 %v2341_v9  ;;  %v2307_v4 = vsub.f32 %v6949_v34, %v6961_v12  ;;  %v2323_v9 = vsub.f32 %v6963_v35, %v6975_v52  ;;  %v2325_v35 = vsub.f32 %v6947_v43, %v6958_v58 }
 0x35a   : > { %3503 = vst.msk [vmem:[#allocation3 + $0xc8] sm:$0xff] %vm2819_vm1, %v7149_v16  ;;  %3492 = vst.msk [vmem:[#allocation3 + $0x70] sm:$0xff] %vm2819_vm1, %v7152_v54  ;;  %2525 = vperm.xlu1 %5303, %v7132_v46   ;;  %2530 = vperm.xlu0 %5304, %v7149_v16   ;;  %v2310_v43 = vsub.f32 %v6965_v20, %v6978_v13 }
 0x35b   : > { %v2272_v24 = vpop.xlane.xlu1 %2271  ;;  %v2242_v21 = vpop.xlane.xlu0 %2241  ;;  %v2339_v34 = vmul.f32 1.442695, %v2307_v4  ;;  %v2371_v52 = vmul.f32 1.442695, %v2323_v9  ;;  %v2375_v58 = vmul.f32 1.442695, %v2325_v35  ;;  %v2327_v9 = vsub.f32 %v7053_v42, %v7066_v10 }
 0x35c   : > { %v7167_v31 = vmax.f32 %v7154_v27, %v2272_v24  ;;  %v7170_v61 = vmax.f32 %v7156_v59, %v2242_v21  ;;  %v2347_v24 = vmul.f32 1.442695, %v2311_v0  ;;  %v7192_v27 = vld [vmem:[#allocation3 + $0xe0] sm:$0xff] }
 0x35d   : > { %v2379_v20 = vmul.f32 1.442695, %v2327_v9 }
 0x35e   : > { %3508 = vst.msk [vmem:[#allocation3 + $0xf0] sm:$0xff] %vm2819_vm1, %v7167_v31  ;;  %3493 = vst.msk [vmem:[#allocation3 + $0x78] sm:$0xff] %vm2819_vm1, %v7170_v61  ;;  %2460 = vperm.xlu1 %5303, %v7103_v37   ;;  %2475 = vperm.xlu0 %5304, %v7152_v54   ;;  %5339 = vpow2.f32 %v2347_v24  ;;  %v7771_v24 = vsub.f32 %v6942_v6, %v6945_v7  ;;  %v2324_v6 = vsub.f32 %v6997_v55, %v7012_v8 }
 0x35f   : > { %v2236_v29 = vpop.xlane.xlu1 %2235  ;;  %v2274_v36 = vpop.xlane.xlu0 %2273  ;;  %v2329_v7 = vsub.f32 %v7017_v39, %v7030_v5  ;;  %v7772_v55 = vsub.f32 %v6980_v28, %v6992_v50  ;;  %v2314_v39 = vsub.f32 %v7019_v11, %v7033_v44  ;;  %v2330_v50 = vsub.f32 %v7037_v15, %v7051_v56 }
 0x360   : > { %v7187_v21 = vmax.f32 %v7172_v63, %v2236_v29  ;;  %v7190_v17 = vmax.f32 %v7174_v45, %v2274_v36  ;;  %v2351_v36 = vmul.f32 1.442695, %v2313_v53  ;;  %v7214_v45 = vld [vmem:[#allocation3 + $0xe8] sm:$0xff]  ;;  %v2343_v4 = vmul.f32 1.442695, %v7771_v24 }
 0x361   : > { %v2373_v10 = vmul.f32 1.442695, %v2324_v6  ;;  %v2383_v42 = vmul.f32 1.442695, %v2329_v7  ;;  %v2377_v8 = vmul.f32 1.442695, %v7772_v55  ;;  %v2315_v44 = vsub.f32 %v7105_v57, %v7116_v51 }
 0x362   : > { %3490 = vst.msk [vmem:[#allocation3 + $0x60] sm:$0xff] %vm2819_vm1, %v7187_v21  ;;  %3509 = vst.msk [vmem:[#allocation3 + $0xf8] sm:$0xff] %vm2819_vm1, %v7190_v17  ;;  %2540 = vperm.xlu1 %5303, %v7119_v1   ;;  %2465 = vperm.xlu0 %5304, %v7187_v21   ;;  %5341 = vpow2.f32 %v2351_v36  ;;  %v2317_v36 = vsub.f32 %v7073_v2, %v7086_v19  ;;  %v2333_v19 = vsub.f32 %v7088_v26, %v7100_v41 }
 0x363   : > { %v2268_v0 = vpop.xlane.xlu1 %2267  ;;  %v2238_v29 = vpop.xlane.xlu0 %2237  ;;  %5343 = vpow2.f32 %v2339_v34  ;;  %v2353_v28 = vmul.f32 1.442695, %v2314_v39  ;;  %v2385_v41 = vmul.f32 1.442695, %v2330_v50  ;;  %v2312_v26 = vsub.f32 %v7055_v33, %v7069_v32 }
 0x364   : > { %v7209_v48 = vmax.f32 %v7192_v27, %v2268_v0  ;;  %v7212_v47 = vmax.f32 %v7194_v25, %v2238_v29  ;;  %5345 = vpow2.f32 %v2371_v52  ;;  %v2345_v29 = vmul.f32 1.442695, %v2310_v43 }
 0x365   : > { %5347 = vpow2.f32 %v2343_v4  ;;  %v2391_v11 = vmul.f32 1.442695, %v2333_v19  ;;  %v2355_v15 = vmul.f32 1.442695, %v2315_v44  ;;  %v2331_v56 = vsub.f32 %v7121_v38, %v7132_v46 }
 0x366   : > { %3506 = vst.msk [vmem:[#allocation3 + $0xe0] sm:$0xff] %vm2819_vm1, %v7209_v48  ;;  %3491 = vst.msk [vmem:[#allocation3 + $0x68] sm:$0xff] %vm2819_vm1, %v7212_v47  ;;  %2450 = vperm.xlu1 %5303, %v7135_v62   ;;  %2545 = vperm.xlu0 %5304, %v7209_v48   ;;  %v7238_v0 = vpop.eup %5337  ;;  %5349 = vpow2.f32 %v2375_v58  ;;  %v2349_v57 = vmul.f32 1.442695, %v2312_v26  ;;  %v2328_v51 = vsub.f32 %v7071_v40, %v7083_v30 }
 0x367   : > { %v2270_v12 = vpop.xlane.xlu0 %2269  ;;  %5351 = vpow2.f32 %v2345_v29  ;;  %v2387_v33 = vmul.f32 1.442695, %v2331_v56  ;;  %v2321_v32 = vsub.f32 %v7139_v60, %v7152_v54  ;;  %v2318_v46 = vsub.f32 %v7090_v23, %v7103_v37 }
 0x368   : > { %v7225_v53 = vmax.f32 %v7214_v45, %v2270_v12  ;;  %5353 = vpow2.f32 %v2379_v20  ;;  %v2359_v12 = vmul.f32 1.442695, %v2317_v36  ;;  %v2381_v38 = vmul.f32 1.442695, %v2328_v51 }
 0x369   : > { %5355 = vpow2.f32 %v2373_v10  ;;  %v2367_v30 = vmul.f32 1.442695, %v2321_v32  ;;  %v2319_v40 = vsub.f32 %v7172_v63, %v7187_v21  ;;  %v2361_v60 = vmul.f32 1.442695, %v2318_v46  ;;  %v7773_v32 = vld [vmem:[#allocation18_spill] sm:$0xff] }
 0x36a   : > { %3507 = vst.msk [vmem:[#allocation3 + $0xe8] sm:$0xff] %vm2819_vm1, %v7225_v53  ;;  %2480 = vperm.xlu1 %5303, %v7170_v61   ;;  %2555 = vperm.xlu0 %5304, %v7167_v31   ;;  %5357 = vpow2.f32 %v2383_v42  ;;  %v2334_v54 = vsub.f32 %v7107_v14, %v7119_v1  ;;  %v2335_v23 = vsub.f32 %v7192_v27, %v7209_v48 }
 0x36b   : > { %v7246_v13 = vpop.eup %5339  ;;  %5359 = vpow2.f32 %v2377_v8  ;;  %v2363_v37 = vmul.f32 1.442695, %v2319_v40  ;;  %v2316_v1 = vsub.f32 %v7123_v18, %v7135_v62  ;;  %v2332_v10 = vsub.f32 %v7137_v49, %v7149_v16 }
 0x36c   : > { %5361 = vpow2.f32 %v2359_v12  ;;  %v2393_v63 = vmul.f32 1.442695, %v2334_v54  ;;  %v2395_v14 = vmul.f32 1.442695, %v2335_v23  ;;  %v2322_v36 = vsub.f32 %v7156_v59, %v7170_v61  ;;  %v7777_v23 = vld [vmem:[#allocation17_spill] sm:$0xff] }
 0x36d   : > { %5363 = vpow2.f32 %v2353_v28  ;;  %v2357_v27 = vmul.f32 1.442695, %v2316_v1  ;;  %v2389_v62 = vmul.f32 1.442695, %v2332_v10  ;;  %v2320_v8 = vsub.f32 %v7194_v25, %v7212_v47 }
 0x36e   : > { %2891 = vperm.xlu0 %5304, %v7238_v0   ;;  %2470 = vperm.xlu1 %5303, %v7212_v47   ;;  %5365 = vpow2.f32 %v2391_v11  ;;  %v2369_v16 = vmul.f32 1.442695, %v2322_v36  ;;  %v2336_v12 = vsub.f32 %v7214_v45, %v7225_v53 }
 0x36f   : > { %v7252_v34 = vpop.eup %5341  ;;  %5367 = vpow2.f32 %v2385_v41  ;;  %v2365_v59 = vmul.f32 1.442695, %v2320_v8 }
 0x370   : > { %v7261_v5 = vpop.eup %5343  ;;  %5369 = vpow2.f32 %v2355_v15  ;;  %v2397_v25 = vmul.f32 1.442695, %v2336_v12 }
 0x371   : > { %v7265_v2 = vpop.eup %5345  ;;  %5371 = vpow2.f32 %v2349_v57 }
 0x372   : > { %2906 = vperm.xlu0 %5304, %v7246_v13   ;;  %2550 = vperm.xlu1 %5303, %v7225_v53   ;;  %v7271_v35 = vpop.eup %5347  ;;  %5373 = vpow2.f32 %v2387_v33 }
 0x373   : > { %v7275_v52 = vpop.eup %5349  ;;  %5375 = vpow2.f32 %v2381_v38 }
 0x374   : > { %v7281_v24 = vpop.eup %5351  ;;  %5377 = vpow2.f32 %v2367_v30  ;;  %v7774_v30 = vld [vmem:[#allocation20_spill] sm:$0xff] }
 0x375   : > { %v7285_v4 = vpop.eup %5353  ;;  %5379 = vpow2.f32 %v2361_v60  ;;  %v7775_v60 = vld [vmem:[#allocation19_spill] sm:$0xff] }
 0x376   : > { %2916 = vperm.xlu0 %5304, %v7252_v34   ;;  %2560 = vperm.xlu1 %5303, %v7190_v17   ;;  %v7291_v43 = vpop.eup %5355  ;;  %5381 = vpow2.f32 %v2363_v37  ;;  %v7776_v37 = vld [vmem:[#allocation21_spill] sm:$0xff] }
 0x377   : > { %v7295_v58 = vpop.eup %5357  ;;  %5383 = vpow2.f32 %v2393_v63 }
 0x378   : > { %v7301_v9 = vpop.eup %5359  ;;  %5385 = vpow2.f32 %v2395_v14 }
 0x379   : > { %v7305_v29 = vpop.eup %5361  ;;  %5387 = vpow2.f32 %v2357_v27 }
 0x37a   : > { %2966 = vperm.xlu0 %5304, %v7265_v2   ;;  %2886 = vperm.xlu1 %5303, %v7261_v5   ;;  %v7311_v6 = vpop.eup %5363  ;;  %5389 = vpow2.f32 %v2389_v62 }
 0x37b   : > { %v7315_v7 = vpop.eup %5365  ;;  %5391 = vpow2.f32 %v2369_v16  ;;  %v7778_v16 = vld [vmem:[#allocation23_spill] sm:$0xff] }
 0x37c   : > { %v7319_v21 = vpop.eup %5367  ;;  %5393 = vpow2.f32 %v2365_v59 }
 0x37d   : > { %v7323_v20 = vpop.eup %5369  ;;  %5395 = vpow2.f32 %v2397_v25 }
 0x37e   : > { %2976 = vperm.xlu0 %5304, %v7275_v52   ;;  %2896 = vperm.xlu1 %5303, %v7271_v35   ;;  %v7327_v48 = vpop.eup %5371 }
 0x37f   : > { %v7331_v42 = vpop.eup %5373 }
 0x380   : > { %v7335_v18 = vpop.eup %5375 }
 0x381   : > { %v7339_v55 = vpop.eup %5377 }
 0x382   : > { %2986 = vperm.xlu0 %5304, %v7285_v4   ;;  %2901 = vperm.xlu1 %5303, %v7281_v24   ;;  %v7343_v49 = vpop.eup %5379 }
 0x383   : > { %v7347_v39 = vpop.eup %5381 }
 0x384   : > { %v7351_v61 = vpop.eup %5383 }
 0x385   : > { %v7355_v19 = vpop.eup %5385 }
 0x386   : > { %2996 = vperm.xlu0 %5304, %v7295_v58   ;;  %2971 = vperm.xlu1 %5303, %v7291_v43   ;;  %v7359_v47 = vpop.eup %5387 }
 0x387   : > { %v7362_v50 = vpop.eup %5389 }
 0x388   : > { %v7366_v53 = vpop.eup %5391 }
 0x389   : > { %v7370_v15 = vpop.eup %5393 }
 0x38a   : > { %2936 = vperm.xlu0 %5304, %v7305_v29   ;;  %2981 = vperm.xlu1 %5303, %v7301_v9   ;;  %v7373_v33 = vpop.eup %5395 }
 0x38e   : > { %3016 = vperm.xlu0 %5304, %v7315_v7   ;;  %2921 = vperm.xlu1 %5303, %v7311_v6  }
 0x392   : > { %2926 = vperm.xlu0 %5304, %v7323_v20   ;;  %3001 = vperm.xlu1 %5303, %v7319_v21  }
 0x396   : > { %3006 = vperm.xlu0 %5304, %v7331_v42   ;;  %2911 = vperm.xlu1 %5303, %v7327_v48  }
 0x39a   : > { %2956 = vperm.xlu0 %5304, %v7339_v55   ;;  %2991 = vperm.xlu1 %5303, %v7335_v18  }
 0x39e   : > { %2946 = vperm.xlu0 %5304, %v7347_v39   ;;  %2941 = vperm.xlu1 %5303, %v7343_v49  }
 0x3a2   : > { %3026 = vperm.xlu0 %5304, %v7355_v19   ;;  %3021 = vperm.xlu1 %5303, %v7351_v61  }
 0x3a5   : > { %v2416_v28 = vpop.permute.xlu1 %2415 }
 0x3a6   : > { %2931 = vperm.xlu1 %5303, %v7359_v47   ;;  %v2565_v45 = vsub.f32 %v6772_v22, %v2416_v28 }
 0x3a8   : > { %v2599_v41 = vmul.f32 1.442695, %v2565_v45 }
 0x3a9   : > { %v2496_v11 = vpop.permute.xlu1 %2495 }
 0x3aa   : > { %3011 = vperm.xlu1 %5303, %v7362_v50   ;;  %5397 = vpow2.f32 %v2599_v41  ;;  %v2581_v63 = vsub.f32 %v7777_v23, %v2496_v11  ;;  %v7779_v11 = vld [vmem:[#allocation24_spill] sm:$0xff]  ;;  %v7780_v41 = vld [vmem:[#allocation26_spill] sm:$0xff] }
 0x3ac   : > { %v2631_v59 = vmul.f32 1.442695, %v2581_v63 }
 0x3ad   : > { %v2406_v44 = vpop.permute.xlu1 %2405 }
 0x3ae   : > { %2961 = vperm.xlu1 %5303, %v7366_v53   ;;  %v2563_v26 = vsub.f32 %v6783_v3, %v2406_v44 }
 0x3b0   : > { %v2595_v51 = vmul.f32 1.442695, %v2563_v26 }
 0x3b1   : > { %v2486_v56 = vpop.permute.xlu1 %2485  ;;  %v2501_v57 = vpop.permute.xlu0 %2500 }
 0x3b2   : > { %2951 = vperm.xlu1 %5303, %v7370_v15   ;;  %v2579_v22 = vsub.f32 %v7773_v32, %v2486_v56  ;;  %v2582_v40 = vsub.f32 %v7774_v30, %v2501_v57  ;;  %5399 = vpow2.f32 %v2595_v51 }
 0x3b4   : > { %v2627_v27 = vmul.f32 1.442695, %v2579_v22  ;;  %v2633_v36 = vmul.f32 1.442695, %v2582_v40  ;;  %v7782_v40 = vld [vmem:[#allocation31_spill] sm:$0xff] }
 0x3b5   : > { %v2421_v38 = vpop.permute.xlu1 %2420  ;;  %v2411_v46 = vpop.permute.xlu0 %2410 }
 0x3b6   : > { %v2566_v54 = vsub.f32 %v7775_v60, %v2421_v38  ;;  %v2564_v3 = vsub.f32 %v7776_v37, %v2411_v46  ;;  %3031 = vperm.xlu1 %5303, %v7373_v33   ;;  %v7781_v46 = vld [vmem:[#allocation28_spill] sm:$0xff] }
 0x3b7   : > { %v5398_v45 = vpop.eup %5397 }
 0x3b8   : > { %v2601_v1 = vmul.f32 1.442695, %v2566_v54  ;;  %v2597_v14 = vmul.f32 1.442695, %v2564_v3 }
 0x3b9   : > { %v2436_v10 = vpop.permute.xlu1 %2435  ;;  %v2491_v62 = vpop.permute.xlu0 %2490 }
 0x3ba   : > { %5401 = vpow2.f32 %v2601_v1  ;;  %v2580_v8 = vsub.f32 %v7778_v16, %v2491_v62  ;;  %v7783_v1 = vld [vmem:[#allocation27_spill] sm:$0xff]  ;;  %v7784_v16 = vld [vmem:[#allocation25_spill] sm:$0xff] }
 0x3bb   : > { %5403 = vpow2.f32 %v2597_v14 }
 0x3bc   : > { %v2629_v12 = vmul.f32 1.442695, %v2580_v8  ;;  %5405 = vpow2.f32 %v2627_v27 }
 0x3bd   : > { %v2516_v25 = vpop.permute.xlu1 %2515  ;;  %5407 = vpow2.f32 %v2633_v36  ;;  %v2521_v28 = vpop.permute.xlu0 %2520 }
 0x3be   : > { %5409 = vpow2.f32 %v2629_v12  ;;  %v2585_v44 = vsub.f32 %v7779_v11, %v2516_v25  ;;  %v2586_v26 = vsub.f32 %v7780_v41, %v2521_v28  ;;  %v7785_v12 = vld [vmem:[#allocation22_spill] sm:$0xff] }
 0x3bf   : > { %5411 = vpow2.f32 %v2631_v59  ;;  %v5400_v57 = vpop.eup %5399  ;;  %v2569_v25 = vsub.f32 %v7785_v12, %v2436_v10 }
 0x3c0   : > { %v2639_v51 = vmul.f32 1.442695, %v2585_v44  ;;  %v2641_v32 = vmul.f32 1.442695, %v2586_v26 }
 0x3c1   : > { %v2426_v56 = vpop.permute.xlu1 %2425  ;;  %2727 = vadd.xlane.f32.xlu0 %v5398_v45 }
 0x3c2   : > { %5413 = vpow2.f32 %v2639_v51  ;;  %v2567_v14 = vsub.f32 %v7783_v1, %v2426_v56 }
 0x3c3   : > { %5415 = vpow2.f32 %v2641_v32 }
 0x3c4   : > { %v2603_v41 = vmul.f32 1.442695, %v2567_v14 }
 0x3c5   : > { %v2506_v22 = vpop.permute.xlu1 %2505  ;;  %2723 = vadd.xlane.f32.xlu0 %v5400_v57  ;;  %v2511_v38 = vpop.permute.xlu0 %2510 }
 0x3c6   : > { %v2583_v30 = vsub.f32 %v7781_v46, %v2506_v22  ;;  %v2584_v60 = vsub.f32 %v7782_v40, %v2511_v38  ;;  %v2607_v22 = vmul.f32 1.442695, %v2569_v25 }
 0x3c7   : > { %v5402_v54 = vpop.eup %5401 }
 0x3c8   : > { %v7386_v37 = vpop.eup %5403  ;;  %v2635_v3 = vmul.f32 1.442695, %v2583_v30  ;;  %v2637_v23 = vmul.f32 1.442695, %v2584_v60  ;;  %v3077_v63 = vpack.c.bf16 %v5402_v54, %v5398_v45 }
 0x3c9   : > { %v2441_v27 = vpop.permute.xlu1 %2440  ;;  %2729 = vadd.xlane.f32.xlu0 %v5402_v54  ;;  %v3076_v62 = vpack.c.bf16 %v7386_v37, %v5400_v57  ;;  %v5406_v36 = vpop.eup %5405  ;;  %v7786_v57 = vld [vmem:[#allocation29_spill] sm:$0xff] }
 0x3ca   : > { %5417 = vpow2.f32 %v2635_v3  ;;  %v2570_v8 = vsub.f32 %v7784_v16, %v2441_v27  ;;  %v5408_v59 = vpop.eup %5407  ;;  %v7392_v28 = vpop.permute.xlu0 %2455  ;;  %v7787_v3 = vld [vmem:[#allocation36_spill] sm:$0xff] }
 0x3cb   : > { %5419 = vpow2.f32 %v2637_v23  ;;  %5001 = vmatprep.mubr.bf16.mxu0 %v3076_v62  ;;  %v5410_v11 = vpop.eup %5409 }
 0x3cc   : > { %v2609_v45 = vmul.f32 1.442695, %v2570_v8  ;;  %5002 = vmatmul.mubr.bf16.vlgmr.msra.gmra.mxu0 %v3077_v63  ;;  %v5412_v44 = vpop.eup %5411  ;;  %v3084_v56 = vpack.c.bf16 %v5410_v11, %v5406_v36  ;;  %v7788_v63 = vld [vmem:[#allocation39_spill] sm:$0xff]  ;;  %v7789_v8 = vld [vmem:[#allocation32_spill] sm:$0xff] }
 0x3cd   : > { %v2431_v26 = vpop.permute.xlu1 %2430  ;;  %2761 = vadd.xlane.f32.xlu0 %v5408_v59  ;;  %v3085_v32 = vpack.c.bf16 %v5408_v59, %v5412_v44 }
 0x3ce   : > { %5421 = vpow2.f32 %v2609_v45  ;;  %v2568_v51 = vsub.f32 %v7786_v57, %v2431_v26  ;;  %5033 = vmatprep.mubr.bf16.mxu1 %v3084_v56  ;;  %v2536_v10 = vpop.permute.xlu0 %2535  ;;  %v7790_v45 = vld [vmem:[#allocation33_spill] sm:$0xff] }
 0x3cf   : > { %5034 = vmatmul.mubr.bf16.vlgmr.msra.gmra.mxu1 %v3085_v32  ;;  %5423 = vpow2.f32 %v2603_v41  ;;  %v7395_v30 = vpop.eup %5413  ;;  %v2589_v59 = vsub.f32 %v7789_v8, %v2536_v10  ;;  %v7791_v32 = vld [vmem:[#allocation35_spill] sm:$0xff] }
 0x3d0   : > { %v2605_v38 = vmul.f32 1.442695, %v2568_v51  ;;  %v5416_v54 = vpop.eup %5415 }
 0x3d1   : > { %v2446_v46 = vpop.permute.xlu1 %2445  ;;  %2757 = vadd.xlane.f32.xlu0 %v5410_v11  ;;  %v3087_v26 = vpack.c.bf16 %v5416_v54, %v7395_v30  ;;  %v2647_v51 = vmul.f32 1.442695, %v2589_v59 }
 0x3d2   : > { %5425 = vpow2.f32 %v2605_v38 }
 0x3d3   : > { %5427 = vpow2.f32 %v2607_v22  ;;  %v2571_v22 = vsub.f32 %v7791_v32, %v2446_v46  ;;  %v7794_v46 = vld [vmem:[#allocation37_spill] sm:$0xff]  ;;  %v7797_v32 = vld [vmem:[#allocation38_spill] sm:$0xff] }
 0x3d5   : > { %v2526_v40 = vpop.permute.xlu1 %2525  ;;  %v2531_v60 = vpop.permute.xlu0 %2530  ;;  %v2611_v8 = vmul.f32 1.442695, %v2571_v22 }
 0x3d6   : > { %v2587_v23 = vsub.f32 %v7787_v3, %v2526_v40  ;;  %v2588_v1 = vsub.f32 %v7788_v63, %v2531_v60  ;;  %v7792_v40 = vld [vmem:[#allocation34_spill] sm:$0xff] }
 0x3d7   : > { %v7399_v14 = vpop.eup %5417 }
 0x3d8   : > { %v5420_v27 = vpop.eup %5419  ;;  %v2643_v62 = vmul.f32 1.442695, %v2587_v23  ;;  %v2645_v16 = vmul.f32 1.442695, %v2588_v1 }
 0x3d9   : > { %v2461_v12 = vpop.permute.xlu1 %2460  ;;  %v2476_v25 = vpop.permute.xlu0 %2475  ;;  %v3086_v11 = vpack.c.bf16 %v5420_v27, %v7399_v14 }
 0x3da   : > { %5429 = vpow2.f32 %v2643_v62  ;;  %v2574_v41 = vsub.f32 %v7790_v45, %v2461_v12  ;;  %2759 = vadd.xlane.f32.xlu1 %v5412_v44  ;;  %v7793_v44 = vld [vmem:[#allocation30_spill] sm:$0xff]  ;;  %v2577_v22 = vsub.f32 %v7797_v32, %v2476_v25 }
 0x3db   : > { %v5422_v56 = vpop.eup %5421  ;;  %5431 = vpow2.f32 %v2645_v16  ;;  %5037 = vmatprep.mubr.bf16.mxu1 %v3086_v11  ;;  %v2573_v63 = vsub.f32 %v7793_v44, %v7392_v28 }
 0x3dc   : > { %v2617_v57 = vmul.f32 1.442695, %v2574_v41  ;;  %5038 = vmatmul.mubr.bf16.gmra.mxu1 %v3087_v26  ;;  %2737 = vadd.xlane.f32.xlu0 %v5422_v56  ;;  %v5424_v10 = vpop.eup %5423 }
 0x3dd   : > { %v2541_v38 = vpop.permute.xlu1 %2540  ;;  %v2466_v3 = vpop.permute.xlu0 %2465  ;;  %v2615_v45 = vmul.f32 1.442695, %v2573_v63 }
 0x3de   : > { %5433 = vpow2.f32 %v2617_v57  ;;  %v2590_v60 = vsub.f32 %v7792_v40, %v2541_v38  ;;  %2755 = vadd.xlane.f32.xlu1 %v5406_v36  ;;  %v7795_v36 = vld [vmem:[#allocation42_spill] sm:$0xff]  ;;  %v7796_v57 = vld [vmem:[#allocation41_spill] sm:$0xff]  ;;  %v7798_v40 = vld [vmem:[#allocation44_spill] sm:$0xff] }
 0x3df   : > { %v5426_v23 = vpop.eup %5425  ;;  %5435 = vpow2.f32 %v2647_v51  ;;  %v2575_v41 = vsub.f32 %v7795_v36, %v2466_v3 }
 0x3e0   : > { %v5428_v1 = vpop.eup %5427  ;;  %v2649_v62 = vmul.f32 1.442695, %v2590_v60  ;;  %2769 = vadd.xlane.f32.xlu0 %v5416_v54  ;;  %v3078_v16 = vpack.c.bf16 %v5426_v23, %v5424_v10 }
 0x3e1   : > { %v2451_v59 = vpop.permute.xlu1 %2450  ;;  %v3079_v12 = vpack.c.bf16 %v5422_v56, %v5428_v1  ;;  %v2546_v28 = vpop.permute.xlu0 %2545  ;;  %v2619_v38 = vmul.f32 1.442695, %v2575_v41 }
 0x3e2   : > { %5437 = vpow2.f32 %v2649_v62  ;;  %v2572_v11 = vsub.f32 %v7794_v46, %v2451_v59  ;;  %2725 = vadd.xlane.f32.xlu1 %v7386_v37  ;;  %5005 = vmatprep.mubr.bf16.mxu0 %v3078_v16  ;;  %v2591_v60 = vsub.f32 %v7798_v40, %v2546_v28  ;;  %v7799_v62 = vld [vmem:[#allocation45_spill] sm:$0xff] }
 0x3e3   : > { %5006 = vmatmul.mubr.bf16.gmra.mxu0 %v3079_v12  ;;  %5439 = vpow2.f32 %v2611_v8  ;;  %v2623_v8 = vmul.f32 1.442695, %v2577_v22 }
 0x3e4   : > { %v2613_v26 = vmul.f32 1.442695, %v2572_v11  ;;  %2733 = vadd.xlane.f32.xlu0 %v5426_v23  ;;  %v2651_v25 = vmul.f32 1.442695, %v2591_v60 }
 0x3e5   : > { %v2481_v54 = vpop.permute.xlu1 %2480  ;;  %v2556_v63 = vpop.permute.xlu0 %2555 }
 0x3e6   : > { %5441 = vpow2.f32 %v2613_v26  ;;  %v2578_v51 = vsub.f32 %v7796_v57, %v2481_v54  ;;  %2735 = vadd.xlane.f32.xlu1 %v5428_v1 }
 0x3e7   : > { %v7413_v56 = vpop.eup %5429  ;;  %5443 = vpow2.f32 %v2615_v45  ;;  %v7801_v45 = vld [vmem:[#allocation46_spill] sm:$0xff] }
 0x3e8   : > { %v5432_v37 = vpop.eup %5431  ;;  %2765 = vadd.xlane.f32.xlu0 %v5420_v27  ;;  %v2625_v3 = vmul.f32 1.442695, %v2578_v51  ;;  %5445 = vpow2.f32 %v2619_v38  ;;  %v7800_v27 = vld [vmem:[#allocation40_spill] sm:$0xff]  ;;  %v7802_v51 = vld [vmem:[#allocation43_spill] sm:$0xff] }
 0x3e9   : > { %v2471_v44 = vpop.permute.xlu1 %2470  ;;  %v3088_v23 = vpack.c.bf16 %v5432_v37, %v7413_v56  ;;  %v2593_v12 = vsub.f32 %v7800_v27, %v2556_v63 }
 0x3ea   : > { %v2576_v16 = vsub.f32 %v7799_v62, %v2471_v44  ;;  %2767 = vadd.xlane.f32.xlu1 %v7395_v30  ;;  %5447 = vpow2.f32 %v2625_v3  ;;  %v7424_v3 = vpop.permute.xlu0 %2891 }
 0x3eb   : > { %v5434_v1 = vpop.eup %5433  ;;  %5041 = vmatprep.mubr.bf16.mxu1 %v3088_v23  ;;  %v2655_v28 = vmul.f32 1.442695, %v2593_v12 }
 0x3ec   : > { %v2621_v59 = vmul.f32 1.442695, %v2576_v16  ;;  %2745 = vadd.xlane.f32.xlu0 %v5434_v1  ;;  %v5436_v11 = vpop.eup %5435 }
 0x3ed   : > { %v2551_v46 = vpop.permute.xlu1 %2550 }
 0x3ee   : > { %5449 = vpow2.f32 %v2621_v59  ;;  %v2592_v36 = vsub.f32 %v7801_v45, %v2551_v46  ;;  %2731 = vadd.xlane.f32.xlu1 %v5424_v10  ;;  %v7426_v59 = vpop.permute.xlu0 %2906 }
 0x3ef   : > { %v5438_v41 = vpop.eup %5437  ;;  %5451 = vpow2.f32 %v2623_v8 }
 0x3f0   : > { %v2653_v26 = vmul.f32 1.442695, %v2592_v36  ;;  %2777 = vadd.xlane.f32.xlu0 %v5438_v41  ;;  %v3089_v30 = vpack.c.bf16 %v5438_v41, %v5436_v11  ;;  %5453 = vpow2.f32 %v2651_v25  ;;  %v5440_v57 = vpop.eup %5439  ;;  %v7803_v41 = vld [vmem:[#allocation47_spill] sm:$0xff] }
 0x3f1   : > { %v2561_v54 = vpop.permute.xlu1 %2560 }
 0x3f2   : > { %5455 = vpow2.f32 %v2653_v26  ;;  %v2594_v32 = vsub.f32 %v7802_v51, %v2561_v54  ;;  %2763 = vadd.xlane.f32.xlu1 %v7399_v14  ;;  %5042 = vmatmul.mubr.bf16.gmra.mxu1 %v3089_v30  ;;  %v7429_v12 = vpop.permute.xlu0 %2916 }
 0x3f3   : > { %v5442_v22 = vpop.eup %5441  ;;  %5457 = vpow2.f32 %v2655_v28  ;;  %v7805_v28 = vld [vmem:[#allocation48_spill] sm:$0xff] }
 0x3f4   : > { %v5444_v38 = vpop.eup %5443  ;;  %v2657_v40 = vmul.f32 1.442695, %v2594_v32  ;;  %2741 = vadd.xlane.f32.xlu0 %v5442_v22  ;;  %v3080_v10 = vpack.c.bf16 %v5442_v22, %v5440_v57  ;;  %v7806_v54 = vsub.f32 %v7805_v28, %v7190_v17  ;;  %v2659_v28 = vld [vmem:[#allocation4] sm:$0xff] }
 0x3f5   : > { %v3081_v60 = vpack.c.bf16 %v5434_v1, %v5444_v38  ;;  %v5446_v44 = vpop.eup %5445 }
 0x3f6   : > { %5459 = vpow2.f32 %v2657_v40  ;;  %5009 = vmatprep.mubr.bf16.mxu0 %v3080_v10  ;;  %2743 = vadd.xlane.f32.xlu1 %v5444_v38  ;;  %v7433_v45 = vpop.permute.xlu0 %2966 }
 0x3f7   : > { %5010 = vmatmul.mubr.bf16.gmra.mxu0 %v3081_v60  ;;  %v5448_v23 = vpop.eup %5447 }
 0x3f8   : > { %2773 = vadd.xlane.f32.xlu0 %v5432_v37 }
 0x3fa   : > { %2775 = vadd.xlane.f32.xlu1 %v5436_v11  ;;  %v7431_v11 = vpop.permute.xlu1 %2886  ;;  %v7440_v30 = vpop.permute.xlu0 %2976 }
 0x3fb   : > { %v5450_v63 = vpop.eup %5449 }
 0x3fc   : > { %v5452_v14 = vpop.eup %5451  ;;  %2753 = vadd.xlane.f32.xlu0 %v5448_v23  ;;  %v3082_v62 = vpack.c.bf16 %v5450_v63, %v5446_v44 }
 0x3fd   : > { %v3083_v16 = vpack.c.bf16 %v5448_v23, %v5452_v14  ;;  %v5454_v8 = vpop.eup %5453 }
 0x3fe   : > { %2739 = vadd.xlane.f32.xlu1 %v5440_v57  ;;  %5013 = vmatprep.mubr.bf16.mxu0 %v3082_v62  ;;  %v7435_v36 = vpop.permute.xlu1 %2896  ;;  %v2401_v57 = vmul.f32 1.442695, %v7806_v54  ;;  %v7447_v32 = vpop.permute.xlu0 %2986 }
 0x3ff   : > { %v5456_v1 = vpop.eup %5455  ;;  %5014 = vmatmul.mubr.bf16.gmra.mxu0 %v3083_v16 }
 0x400   : > { %v3090_v25 = vpack.c.bf16 %v5456_v1, %v5454_v8  ;;  %v5458_v27 = vpop.eup %5457 }
 0x402   : > { %2771 = vadd.xlane.f32.xlu1 %v7413_v56  ;;  %5045 = vmatprep.mubr.bf16.mxu1 %v3090_v25  ;;  %v7804_v56 = vsub.f32 %v7803_v41, %v7167_v31  ;;  %v7445_v51 = vpop.permute.xlu1 %2901  ;;  %v7451_v38 = vpop.permute.xlu0 %2996 }
 0x403   : > { %v5460_v37 = vpop.eup %5459 }
 0x404   : > { %2785 = vadd.xlane.f32.xlu0 %v5460_v37  ;;  %v3091_v46 = vpack.c.bf16 %v5460_v37, %v5458_v27  ;;  %v2399_v26 = vmul.f32 1.442695, %v7804_v56 }
 0x406   : > { %2751 = vadd.xlane.f32.xlu1 %v5452_v14  ;;  %5046 = vmatmul.mubr.bf16.gmra.mxu1 %v3091_v46  ;;  %5461 = vpow2.f32 %v2399_v26  ;;  %v7449_v22 = vpop.permute.xlu1 %2971  ;;  %v7459_v60 = vpop.permute.xlu0 %2936  ;;  %v2661_v46 = vld [vmem:[#allocation4 + $0x10] sm:$0xff] }
 0x407   : > { %5463 = vpow2.f32 %v2401_v57  ;;  %7807 = vst [vmem:[#allocation18_spill] sm:$0xff] %v7459_v60  ;;  %v2693_v56 = vmul.f32 %v7271_v35, %v2661_v46 }
 0x408   : > { %2749 = vadd.xlane.f32.xlu0 %v5450_v63 }
 0x40a   : > { %2783 = vadd.xlane.f32.xlu1 %v5458_v27  ;;  %v7453_v40 = vpop.permute.xlu1 %2981 }
 0x40c   : > { %2781 = vadd.xlane.f32.xlu0 %v5456_v1 }
 0x40e   : > { %2747 = vadd.xlane.f32.xlu1 %v5446_v44  ;;  %v7462_v17 = vpop.permute.xlu1 %2921  ;;  %v7465_v44 = vpop.permute.xlu0 %3016 }
 0x412   : > { %2779 = vadd.xlane.f32.xlu1 %v5454_v8  ;;  %v7467_v23 = vpop.permute.xlu1 %3001  ;;  %v7469_v63 = vpop.permute.xlu0 %2926 }
 0x413   : > { %v7455_v31 = vpop.eup %5461  ;;  %7808 = vst [vmem:[#allocation20_spill] sm:$0xff] %v7469_v63 }
 0x414   : > { %v7457_v10 = vpop.eup %5463 }
 0x416   : > { %v7471_v14 = vpop.permute.xlu1 %2911  ;;  %v7473_v62 = vpop.permute.xlu0 %3006 }
 0x41a   : > { %v7475_v16 = vpop.permute.xlu1 %2991  ;;  %v7477_v8 = vpop.permute.xlu0 %2956 }
 0x41b   : > { %7809 = vst [vmem:[#allocation19_spill] sm:$0xff] %v7477_v8  ;;  %v2691_v8 = vmul.f32 %v7261_v5, %v2659_v28 }
 0x41e   : > { %v7479_v1 = vpop.permute.xlu1 %2941  ;;  %v7481_v25 = vpop.permute.xlu0 %2946 }
 0x41f   : > { %7810 = vst [vmem:[#allocation21_spill] sm:$0xff] %v7479_v1  ;;  %7811 = vst [vmem:[#allocation17_spill] sm:$0xff] %v7481_v25  ;;  %v2662_v25 = vld [vmem:[#allocation4 + $0x18] sm:$0xff] }
 0x422   : > { %3036 = vperm.xlu0 %5304, %v7455_v31   ;;  %v7483_v27 = vpop.permute.xlu1 %3021  ;;  %v7485_v37 = vpop.permute.xlu0 %3026 }
 0x423   : > { %3041 = vperm.xlu1 %5303, %v7457_v10   ;;  %7812 = vst [vmem:[#allocation23_spill] sm:$0xff] %v7483_v27  ;;  %7813 = vst [vmem:[#allocation24_spill] sm:$0xff] %v7485_v37  ;;  %v2694_v37 = vmul.f32 %v7281_v24, %v2662_v25  ;;  %v2666_v25 = vld [vmem:[#allocation4 + $0x38] sm:$0xff] }
 0x426   : > { %v7487_v41 = vpop.permute.xlu1 %2931 }
 0x427   : > { %7814 = vst [vmem:[#allocation26_spill] sm:$0xff] %v7487_v41  ;;  %v2678_v41 = vld [vmem:[#allocation4 + $0x98] sm:$0xff] }
 0x428   : > { %v2710_v46 = vmul.f32 %v7301_v9, %v2678_v41  ;;  %v2675_v41 = vld [vmem:[#allocation4 + $0x80] sm:$0xff] }
 0x42a   : > { %v7490_v57 = vpop.permute.xlu1 %3011 }
 0x42e   : > { %v7496_v27 = vpop.permute.xlu1 %2961 }
 0x432   : > { %v7500_v5 = vpop.permute.xlu1 %2951 }
 0x44a   : > { %v2728_v26 = vpop.xlane.xlu0 %2727 }
 0x44b   : > { %v2789_v54 = vadd.f32 %v2728_v26, %v2693_v56  ;;  %v2676_v26 = vld [vmem:[#allocation4 + $0x88] sm:$0xff] }
 0x44d   : > { %2822 = vst.msk [vmem:[#allocation4 + $0x10] sm:$0xff] %vm2819_vm1, %v2789_v54 }
 0x44e   : > { %v2724_v1 = vpop.xlane.xlu0 %2723 }
 0x44f   : > { %v2787_v63 = vadd.f32 %v2724_v1, %v2691_v8  ;;  %v7505_v1 = vpop.permute.xlu1 %3031 }
 0x451   : > { %2820 = vst.msk [vmem:[#allocation4] sm:$0xff] %vm2819_vm1, %v2787_v63  ;;  %v2708_v63 = vmul.f32 %v7291_v43, %v2676_v26  ;;  %v2707_v26 = vmul.f32 %v7265_v2, %v2675_v41 }
 0x452   : > { %v2730_v60 = vpop.xlane.xlu0 %2729 }
 0x453   : > { %v2790_v35 = vadd.f32 %v2730_v60, %v2694_v37  ;;  %v2677_v60 = vld [vmem:[#allocation4 + $0x90] sm:$0xff] }
 0x454   : > { %v2709_v37 = vmul.f32 %v7275_v52, %v2677_v60  ;;  %v2664_v60 = vld [vmem:[#allocation4 + $0x28] sm:$0xff] }
 0x455   : > { %2823 = vst.msk [vmem:[#allocation4 + $0x18] sm:$0xff] %vm2819_vm1, %v2790_v35  ;;  %v2698_v35 = vmul.f32 %v7311_v6, %v2666_v25  ;;  %v2696_v2 = vmul.f32 %v7327_v48, %v2664_v60 }
 0x456   : > { %v2762_v56 = vpop.xlane.xlu0 %2761 }
 0x457   : > { %v2806_v54 = vadd.f32 %v2762_v56, %v2710_v46  ;;  %v2682_v56 = vld [vmem:[#allocation4 + $0xb8] sm:$0xff] }
 0x459   : > { %2839 = vst.msk [vmem:[#allocation4 + $0x98] sm:$0xff] %vm2819_vm1, %v2806_v54 }
 0x45a   : > { %v2758_v8 = vpop.xlane.xlu0 %2757 }
 0x45b   : > { %v2804_v24 = vadd.f32 %v2758_v8, %v2708_v63  ;;  %v2660_v63 = vld [vmem:[#allocation4 + $0x8] sm:$0xff] }
 0x45c   : > { %v2692_v6 = vmul.f32 %v7238_v0, %v2660_v63  ;;  %v2670_v63 = vld [vmem:[#allocation4 + $0x58] sm:$0xff] }
 0x45d   : > { %2837 = vst.msk [vmem:[#allocation4 + $0x88] sm:$0xff] %vm2819_vm1, %v2804_v24  ;;  %v2714_v24 = vmul.f32 %v7319_v21, %v2682_v56 }
 0x463   : > { %v2760_v9 = vpop.xlane.xlu1 %2759 }
 0x464   : > { %v2805_v28 = vadd.f32 %v2760_v9, %v2709_v37  ;;  %v2665_v9 = vld [vmem:[#allocation4 + $0x30] sm:$0xff] }
 0x465   : > { %v2738_v46 = vpop.xlane.xlu0 %2737  ;;  %v2697_v21 = vmul.f32 %v7252_v34, %v2665_v9  ;;  %v2702_v34 = vmul.f32 %v7343_v49, %v2670_v63 }
 0x466   : > { %2838 = vst.msk [vmem:[#allocation4 + $0x90] sm:$0xff] %vm2819_vm1, %v2805_v28  ;;  %v2794_v43 = vadd.f32 %v2738_v46, %v2698_v35  ;;  %v2680_v35 = vld [vmem:[#allocation4 + $0xa8] sm:$0xff] }
 0x467   : > { %v2756_v54 = vpop.xlane.xlu1 %2755  ;;  %v2712_v0 = vmul.f32 %v7335_v18, %v2680_v35  ;;  %v2668_v35 = vld [vmem:[#allocation4 + $0x48] sm:$0xff] }
 0x468   : > { %2827 = vst.msk [vmem:[#allocation4 + $0x38] sm:$0xff] %vm2819_vm1, %v2794_v43  ;;  %v2803_v8 = vadd.f32 %v2756_v54, %v2707_v26  ;;  %v2681_v43 = vld [vmem:[#allocation4 + $0xb0] sm:$0xff] }
 0x469   : > { %v2770_v52 = vpop.xlane.xlu0 %2769  ;;  %v2713_v48 = vmul.f32 %v7295_v58, %v2681_v43 }
 0x46a   : > { %2836 = vst.msk [vmem:[#allocation4 + $0x80] sm:$0xff] %vm2819_vm1, %v2803_v8  ;;  %v2810_v37 = vadd.f32 %v2770_v52, %v2714_v24  ;;  %v2663_v52 = vld [vmem:[#allocation4 + $0x20] sm:$0xff] }
 0x46b   : > { %v2726_v25 = vpop.xlane.xlu1 %2725  ;;  %v2695_v18 = vmul.f32 %v7246_v13, %v2663_v52  ;;  %v2700_v13 = vmul.f32 %v7359_v47, %v2668_v35  ;;  %v2674_v52 = vld [vmem:[#allocation4 + $0x78] sm:$0xff] }
 0x46c   : > { %2843 = vst.msk [vmem:[#allocation4 + $0xb8] sm:$0xff] %vm2819_vm1, %v2810_v37  ;;  %v2788_v28 = vadd.f32 %v2726_v25, %v2692_v6  ;;  %v2686_v6 = vld [vmem:[#allocation4 + $0xd8] sm:$0xff] }
 0x46d   : > { %v2734_v41 = vpop.xlane.xlu0 %2733  ;;  %v2718_v58 = vmul.f32 %v7351_v61, %v2686_v6 }
 0x46e   : > { %2821 = vst.msk [vmem:[#allocation4 + $0x8] sm:$0xff] %vm2819_vm1, %v2788_v28  ;;  %v2792_v46 = vadd.f32 %v2734_v41, %v2696_v2  ;;  %v2679_v28 = vld [vmem:[#allocation4 + $0xa0] sm:$0xff] }
 0x46f   : > { %v2736_v56 = vpop.xlane.xlu1 %2735  ;;  %v2711_v49 = vmul.f32 %v7285_v4, %v2679_v28  ;;  %v2683_v28 = vld [vmem:[#allocation4 + $0xc0] sm:$0xff] }
 0x470   : > { %2825 = vst.msk [vmem:[#allocation4 + $0x28] sm:$0xff] %vm2819_vm1, %v2792_v46  ;;  %v2793_v26 = vadd.f32 %v2736_v56, %v2697_v21  ;;  %v2669_v56 = vld [vmem:[#allocation4 + $0x50] sm:$0xff]  ;;  %v2715_v35 = vmul.f32 %v7331_v42, %v2683_v28 }
 0x471   : > { %v2766_v54 = vpop.xlane.xlu0 %2765  ;;  %v2701_v61 = vmul.f32 %v7305_v29, %v2669_v56  ;;  %v2706_v29 = vmul.f32 %v7366_v53, %v2674_v52  ;;  %v2855_v56 = vld [vmem:[#allocation5 + $0x18] sm:$0xff] }
 0x472   : > { %2826 = vst.msk [vmem:[#allocation4 + $0x30] sm:$0xff] %vm2819_vm1, %v2793_v26  ;;  %v2808_v8 = vadd.f32 %v2766_v54, %v2712_v0  ;;  %v2684_v0 = vld [vmem:[#allocation4 + $0xc8] sm:$0xff] }
 0x473   : > { %v2768_v24 = vpop.xlane.xlu1 %2767  ;;  %v2716_v4 = vmul.f32 %v7362_v50, %v2684_v0 }
 0x474   : > { %2841 = vst.msk [vmem:[#allocation4 + $0xa8] sm:$0xff] %vm2819_vm1, %v2808_v8  ;;  %v2809_v60 = vadd.f32 %v2768_v24, %v2713_v48  ;;  %v2685_v8 = vld [vmem:[#allocation4 + $0xd0] sm:$0xff] }
 0x475   : > { %v2746_v37 = vpop.xlane.xlu0 %2745  ;;  %v2717_v47 = vmul.f32 %v7315_v7, %v2685_v8  ;;  %v2690_v7 = vld [vmem:[#allocation4 + $0xf8] sm:$0xff] }
 0x476   : > { %2842 = vst.msk [vmem:[#allocation4 + $0xb0] sm:$0xff] %vm2819_vm1, %v2809_v60  ;;  %v2798_v25 = vadd.f32 %v2746_v37, %v2702_v34  ;;  %v2667_v37 = vld [vmem:[#allocation4 + $0x40] sm:$0xff]  ;;  %v2868_v8 = vld [vmem:[#allocation5 + $0x38] sm:$0xff] }
 0x477   : > { %v2732_v9 = vpop.xlane.xlu1 %2731  ;;  %v2699_v50 = vmul.f32 %v7323_v20, %v2667_v37 }
 0x478   : > { %2831 = vst.msk [vmem:[#allocation4 + $0x58] sm:$0xff] %vm2819_vm1, %v2798_v25  ;;  %v2791_v2 = vadd.f32 %v2732_v9, %v2695_v18 }
 0x479   : > { %v2778_v41 = vpop.xlane.xlu0 %2777 }
 0x47a   : > { %2824 = vst.msk [vmem:[#allocation4 + $0x20] sm:$0xff] %vm2819_vm1, %v2791_v2  ;;  %v2814_v46 = vadd.f32 %v2778_v41, %v2718_v58  ;;  %v2854_v2 = vld [vmem:[#allocation5 + $0xd8] sm:$0xff]  ;;  %v2852_v41 = vld [vmem:[#allocation5 + $0xb0] sm:$0xff] }
 0x47b   : > { %v2764_v21 = vpop.xlane.xlu1 %2763  ;;  %v3046_v53 = vmul.f32 %v7435_v36, %v2854_v2 }
 0x47c   : > { %2847 = vst.msk [vmem:[#allocation4 + $0xd8] sm:$0xff] %vm2819_vm1, %v2814_v46  ;;  %v2807_v43 = vadd.f32 %v2764_v21, %v2711_v49  ;;  %v2673_v49 = vld [vmem:[#allocation4 + $0x70] sm:$0xff]  ;;  %v2870_v21 = vld [vmem:[#allocation5 + $0x40] sm:$0xff] }
 0x47d   : > { %v2742_v26 = vpop.xlane.xlu0 %2741  ;;  %v2705_v36 = vmul.f32 %v7339_v55, %v2673_v49  ;;  %v3060_v55 = vmul.f32 %v7433_v45, %v2868_v8  ;;  %v2875_v8 = vld [vmem:[#allocation5 + $0xc0] sm:$0xff] }
 0x47e   : > { %2840 = vst.msk [vmem:[#allocation4 + $0xa0] sm:$0xff] %vm2819_vm1, %v2807_v43  ;;  %v2796_v54 = vadd.f32 %v2742_v26, %v2700_v13  ;;  %v2722_v13 = vmul.f32 %v7457_v10, %v2690_v7  ;;  %v3044_v26 = vmul.f32 %v7431_v11, %v2852_v41  ;;  %v2871_v11 = vld [vmem:[#allocation5 + $0xc8] sm:$0xff]  ;;  %v2671_v41 = vld [vmem:[#allocation4 + $0x60] sm:$0xff] }
 0x47f   : > { %v2744_v63 = vpop.xlane.xlu1 %2743  ;;  %v3063_v7 = vmul.f32 %v7453_v40, %v2871_v11 }
 0x480   : > { %2829 = vst.msk [vmem:[#allocation4 + $0x48] sm:$0xff] %vm2819_vm1, %v2796_v54  ;;  %v2797_v48 = vadd.f32 %v2744_v63, %v2701_v61  ;;  %v2672_v61 = vld [vmem:[#allocation4 + $0x68] sm:$0xff]  ;;  %v2853_v63 = vld [vmem:[#allocation5] sm:$0xff] }
 0x481   : > { %v2774_v24 = vpop.xlane.xlu0 %2773 }
 0x482   : > { %2830 = vst.msk [vmem:[#allocation4 + $0x50] sm:$0xff] %vm2819_vm1, %v2797_v48  ;;  %v2812_v60 = vadd.f32 %v2774_v24, %v2716_v4  ;;  %v3062_v4 = vmul.f32 %v7440_v30, %v2870_v21  ;;  %v3047_v24 = vmul.f32 %v7445_v51, %v2855_v56 }
 0x483   : > { %v2776_v34 = vpop.xlane.xlu1 %2775 }
 0x484   : > { %2845 = vst.msk [vmem:[#allocation4 + $0xc8] sm:$0xff] %vm2819_vm1, %v2812_v60  ;;  %v2813_v6 = vadd.f32 %v2776_v34, %v2717_v47  ;;  %v2689_v60 = vld [vmem:[#allocation4 + $0xf0] sm:$0xff] }
 0x485   : > { %v2754_v25 = vpop.xlane.xlu0 %2753 }
 0x486   : > { %2846 = vst.msk [vmem:[#allocation4 + $0xd0] sm:$0xff] %vm2819_vm1, %v2813_v6  ;;  %v2802_v18 = vadd.f32 %v2754_v25, %v2706_v29  ;;  %v2704_v6 = vmul.f32 %v7370_v15, %v2672_v61  ;;  %v3045_v29 = vmul.f32 %v7424_v3, %v2853_v63 }
 0x487   : > { %v2740_v9 = vpop.xlane.xlu1 %2739 }
 0x488   : > { %2835 = vst.msk [vmem:[#allocation4 + $0x78] sm:$0xff] %vm2819_vm1, %v2802_v18  ;;  %v2795_v58 = vadd.f32 %v2740_v9, %v2699_v50  ;;  %v2688_v18 = vld [vmem:[#allocation4 + $0xe8] sm:$0xff]  ;;  %v2869_v50 = vld [vmem:[#allocation5 + $0x58] sm:$0xff] }
 0x489   : > { %v3061_v49 = vmul.f32 %v7449_v22, %v2869_v50  ;;  %v2872_v22 = vld [vmem:[#allocation5 + $0xe0] sm:$0xff] }
 0x48a   : > { %2828 = vst.msk [vmem:[#allocation4 + $0x40] sm:$0xff] %vm2819_vm1, %v2795_v58  ;;  %v2721_v58 = vmul.f32 %v7455_v31, %v2689_v60 }
 0x48b   : > { %v2772_v46 = vpop.xlane.xlu1 %2771 }
 0x48c   : > { %v5003_v43 = vpop.f32.mrf.mxu0  ;;  %v2811_v20 = vadd.f32 %v2772_v46, %v2715_v35  ;;  %v2720_v46 = vmul.f32 %v7373_v33, %v2688_v18 }
 0x48d   : > { %v3416_v0 = vadd.f32 %v5003_v43, %v3046_v53  ;;  %v2786_v54 = vpop.xlane.xlu0 %2785  ;;  %v2703_v43 = vmul.f32 %v7347_v39, %v2671_v41  ;;  %v2877_v41 = vld [vmem:[#allocation5 + $0xd0] sm:$0xff] }
 0x48e   : > { %2844 = vst.msk [vmem:[#allocation4 + $0xc0] sm:$0xff] %vm2819_vm1, %v2811_v20  ;;  %v3206_v42 = vpop.f32.mrf.mxu0  ;;  %v2818_v48 = vadd.f32 %v2786_v54, %v2722_v13 }
 0x48f   : > { %3448 = vst [vmem:[#allocation5 + $0xd8] sm:$0xff] %v3416_v0  ;;  %v3414_v52 = vadd.f32 %v3206_v42, %v3044_v26  ;;  %v2752_v10 = vpop.xlane.xlu1 %2751  ;;  %v5035_v34 = vpop.f32.mrf.mxu1  ;;  %v2687_v26 = vld [vmem:[#allocation4 + $0xe0] sm:$0xff]  ;;  %v2874_v0 = vld [vmem:[#allocation5 + $0x70] sm:$0xff] }
 0x490   : > { %2851 = vst.msk [vmem:[#allocation4 + $0xf8] sm:$0xff] %vm2819_vm1, %v2818_v48  ;;  %v5004_v47 = vpop.f32.mrf.mxu0  ;;  %v2801_v37 = vadd.f32 %v2752_v10, %v2705_v36  ;;  %v3432_v25 = vadd.f32 %v5035_v34, %v3062_v4  ;;  %v2719_v54 = vmul.f32 %v7355_v19, %v2687_v26  ;;  %v3066_v61 = vmul.f32 %v7451_v38, %v2874_v0  ;;  %v2873_v4 = vld [vmem:[#allocation5 + $0x90] sm:$0xff] }
 0x491   : > { %3446 = vst [vmem:[#allocation5 + $0xb0] sm:$0xff] %v3414_v52  ;;  %v3417_v30 = vadd.f32 %v5004_v47, %v3047_v24  ;;  %v2750_v51 = vpop.xlane.xlu0 %2749  ;;  %v3351_v28 = vpop.f32.mrf.mxu1  ;;  %v3064_v48 = vmul.f32 %v7447_v32, %v2872_v22  ;;  %v2858_v52 = vld [vmem:[#allocation5 + $0x30] sm:$0xff]  ;;  %v3067_v10 = vmul.f32 %v7467_v23, %v2875_v8  ;;  %v3065_v38 = vmul.f32 %v7475_v16, %v2873_v4  ;;  %v2859_v32 = vld [vmem:[#allocation5 + $0x48] sm:$0xff]  ;;  %v2864_v4 = vld [vmem:[#allocation5 + $0x60] sm:$0xff] }
 0x492   : > { %2834 = vst.msk [vmem:[#allocation4 + $0x70] sm:$0xff] %vm2819_vm1, %v2801_v37  ;;  %v3209_v9 = vpop.f32.mrf.mxu0  ;;  %v2800_v2 = vadd.f32 %v2750_v51, %v2704_v6  ;;  %3464 = vst [vmem:[#allocation5 + $0x40] sm:$0xff] %v3432_v25  ;;  %v3430_v3 = vadd.f32 %v3351_v28, %v3060_v55  ;;  %v2856_v19 = vld [vmem:[#allocation5 + $0x50] sm:$0xff]  ;;  %v3050_v34 = vmul.f32 %v7429_v12, %v2858_v52  ;;  %v2857_v25 = vld [vmem:[#allocation5 + $0x68] sm:$0xff] }
 0x493   : > { %3449 = vst [vmem:[#allocation5 + $0x18] sm:$0xff] %v3417_v30  ;;  %v3415_v15 = vadd.f32 %v3209_v9, %v3045_v29  ;;  %v2784_v45 = vpop.xlane.xlu1 %2783  ;;  %v5036_v35 = vpop.f32.mrf.mxu1  ;;  %v3048_v55 = vmul.f32 %v7426_v59, %v2856_v19  ;;  %v3051_v51 = vmul.f32 %v7462_v17, %v2859_v32  ;;  %v3049_v50 = vmul.f32 %v7471_v14, %v2857_v25  ;;  %v7815_v14 = vld [vmem:[#allocation23_spill] sm:$0xff] }
 0x494   : > { %2833 = vst.msk [vmem:[#allocation4 + $0x68] sm:$0xff] %vm2819_vm1, %v2800_v2  ;;  %v2817_v53 = vadd.f32 %v2784_v45, %v2721_v58  ;;  %3462 = vst [vmem:[#allocation5 + $0x38] sm:$0xff] %v3430_v3  ;;  %v3433_v21 = vadd.f32 %v5036_v35, %v3063_v7  ;;  %v2878_v2 = vld [vmem:[#allocation5 + $0x10] sm:$0xff]  ;;  %v2876_v58 = vld [vmem:[#allocation5 + $0xa8] sm:$0xff] }
 0x495   : > { %3447 = vst [vmem:[#allocation5] sm:$0xff] %v3415_v15  ;;  %v2782_v31 = vpop.xlane.xlu0 %2781  ;;  %v3354_v40 = vpop.f32.mrf.mxu1  ;;  %v3070_v59 = vmul.f32 %v7465_v44, %v2878_v2  ;;  %v2879_v7 = vld [vmem:[#allocation5 + $0x28] sm:$0xff]  ;;  %v3068_v17 = vmul.f32 %v7473_v62, %v2876_v58  ;;  %v7820_v52 = vld [vmem:[#allocation19_spill] sm:$0xff]  ;;  %v7822_v58 = vld [vmem:[#allocation24_spill] sm:$0xff] }
 0x496   : > { %2850 = vst.msk [vmem:[#allocation4 + $0xf0] sm:$0xff] %vm2819_vm1, %v2817_v53  ;;  %v2816_v56 = vadd.f32 %v2782_v31, %v2720_v46  ;;  %3465 = vst [vmem:[#allocation5 + $0xc8] sm:$0xff] %v3433_v21  ;;  %v3431_v20 = vadd.f32 %v3354_v40, %v3061_v49  ;;  %v2862_v3 = vld [vmem:[#allocation5 + $0xe8] sm:$0xff]  ;;  %v2860_v53 = vld [vmem:[#allocation5 + $0x80] sm:$0xff]  ;;  %v3071_v46 = vmul.f32 %v7815_v14, %v2879_v7 }
 0x497   : > { %v2748_v13 = vpop.xlane.xlu1 %2747  ;;  %v7816_v21 = vld [vmem:[#allocation18_spill] sm:$0xff]  ;;  %v2881_v7 = vld [vmem:[#allocation5 + $0xf8] sm:$0xff] }
 0x498   : > { %2849 = vst.msk [vmem:[#allocation4 + $0xe8] sm:$0xff] %vm2819_vm1, %v2816_v56  ;;  %v2799_v33 = vadd.f32 %v2748_v13, %v2703_v43  ;;  %3463 = vst [vmem:[#allocation5 + $0x58] sm:$0xff] %v3431_v20  ;;  %v3054_v31 = vmul.f32 %v7816_v21, %v2862_v3  ;;  %v2863_v56 = vld [vmem:[#allocation5 + $0xb8] sm:$0xff]  ;;  %v3069_v43 = vmul.f32 %v7490_v57, %v2877_v41 }
 0x499   : > { %v7817_v13 = vld [vmem:[#allocation20_spill] sm:$0xff] }
 0x49a   : > { %2832 = vst.msk [vmem:[#allocation4 + $0x60] sm:$0xff] %vm2819_vm1, %v2799_v33  ;;  %v3052_v26 = vmul.f32 %v7817_v13, %v2860_v53  ;;  %v2861_v33 = vld [vmem:[#allocation5 + $0x88] sm:$0xff] }
 0x49b   : > { %v2780_v63 = vpop.xlane.xlu1 %2779 }
 0x49c   : > { %v5039_v42 = vpop.f32.mrf.mxu1  ;;  %v2815_v39 = vadd.f32 %v2780_v63, %v2719_v54 }
 0x49d   : > { %v3436_v36 = vadd.f32 %v5039_v42, %v3066_v61  ;;  %v7818_v61 = vld [vmem:[#allocation21_spill] sm:$0xff]  ;;  %v2866_v42 = vld [vmem:[#allocation5 + $0x8] sm:$0xff] }
 0x49e   : > { %2848 = vst.msk [vmem:[#allocation4 + $0xe0] sm:$0xff] %vm2819_vm1, %v2815_v39  ;;  %v3367_v24 = vpop.f32.mrf.mxu1  ;;  %v3055_v63 = vmul.f32 %v7818_v61, %v2863_v56 }
 0x49f   : > { %3468 = vst [vmem:[#allocation5 + $0x70] sm:$0xff] %v3436_v36  ;;  %v3434_v60 = vadd.f32 %v3367_v24, %v3064_v48  ;;  %v7819_v48 = vld [vmem:[#allocation26_spill] sm:$0xff] }
 0x4a0   : > { %v5040_v11 = vpop.f32.mrf.mxu1  ;;  %v3053_v57 = vmul.f32 %v7819_v48, %v2861_v33 }
 0x4a1   : > { %3466 = vst [vmem:[#allocation5 + $0xe0] sm:$0xff] %v3434_v60  ;;  %v3437_v47 = vadd.f32 %v5040_v11, %v3067_v10  ;;  %v3058_v10 = vmul.f32 %v7820_v52, %v2866_v42  ;;  %v2867_v11 = vld [vmem:[#allocation5 + $0x78] sm:$0xff] }
 0x4a2   : > { %v3370_v37 = vpop.f32.mrf.mxu1 }
 0x4a3   : > { %3469 = vst [vmem:[#allocation5 + $0xc0] sm:$0xff] %v3437_v47  ;;  %v3435_v6 = vadd.f32 %v3370_v37, %v3065_v38  ;;  %v5007_v29 = vpop.f32.mrf.mxu0  ;;  %v7821_v38 = vld [vmem:[#allocation17_spill] sm:$0xff]  ;;  %v2865_v37 = vld [vmem:[#allocation5 + $0xf0] sm:$0xff] }
 0x4a4   : > { %v3420_v30 = vadd.f32 %v5007_v29, %v3050_v34  ;;  %v3056_v47 = vmul.f32 %v7821_v38, %v2864_v4  ;;  %v2882_v29 = vld [vmem:[#allocation5 + $0x20] sm:$0xff] }
 0x4a5   : > { %3467 = vst [vmem:[#allocation5 + $0x90] sm:$0xff] %v3435_v6  ;;  %v3222_v23 = vpop.f32.mrf.mxu0  ;;  %v3059_v6 = vmul.f32 %v7496_v27, %v2867_v11 }
 0x4a6   : > { %3452 = vst [vmem:[#allocation5 + $0x30] sm:$0xff] %v3420_v30  ;;  %v3418_v18 = vadd.f32 %v3222_v23, %v3048_v55  ;;  %v3037_v55 = vpop.permute.xlu0 %3036  ;;  %v2880_v23 = vld [vmem:[#allocation5 + $0xa0] sm:$0xff] }
 0x4a7   : > { %v5008_v16 = vpop.f32.mrf.mxu0 }
 0x4a8   : > { %3450 = vst [vmem:[#allocation5 + $0x50] sm:$0xff] %v3418_v18  ;;  %v3421_v12 = vadd.f32 %v5008_v16, %v3051_v51  ;;  %v3057_v51 = vmul.f32 %v7500_v5, %v2865_v37  ;;  %v3074_v16 = vmul.f32 %v3037_v55, %v2882_v29  ;;  %v3073_v5 = vmul.f32 %v7505_v1, %v2881_v7 }
 0x4a9   : > { %v3225_v9 = vpop.f32.mrf.mxu0 }
 0x4aa   : > { %3453 = vst [vmem:[#allocation5 + $0x48] sm:$0xff] %v3421_v12  ;;  %v3419_v28 = vadd.f32 %v3225_v9, %v3049_v50  ;;  %v2883_v12 = vld [vmem:[#allocation5 + $0x98] sm:$0xff]  ;;  %v3042_v9 = vpop.permute.xlu1 %3041 }
 0x4ab   : > { %v3075_v3 = vmul.f32 %v3042_v9, %v2883_v12 }
 0x4ac   : > { %3451 = vst [vmem:[#allocation5 + $0x68] sm:$0xff] %v3419_v28 }
 0x4b2   : > { %v5043_v15 = vpop.f32.mrf.mxu1 }
 0x4b3   : > { %v3440_v45 = vadd.f32 %v5043_v15, %v3070_v59  ;;  %v3072_v59 = vmul.f32 %v7822_v58, %v2880_v23 }
 0x4b4   : > { %v3383_v35 = vpop.f32.mrf.mxu1 }
 0x4b5   : > { %3472 = vst [vmem:[#allocation5 + $0x10] sm:$0xff] %v3440_v45  ;;  %v3438_v49 = vadd.f32 %v3383_v35, %v3068_v17 }
 0x4b6   : > { %v5044_v40 = vpop.f32.mrf.mxu1 }
 0x4b7   : > { %3470 = vst [vmem:[#allocation5 + $0xa8] sm:$0xff] %v3438_v49  ;;  %v3441_v44 = vadd.f32 %v5044_v40, %v3071_v46  ;;  %v5011_v20 = vpop.f32.mrf.mxu0 }
 0x4b8   : > { %v3424_v62 = vadd.f32 %v5011_v20, %v3054_v31  ;;  %v3386_v0 = vpop.f32.mrf.mxu1 }
 0x4b9   : > { %3473 = vst [vmem:[#allocation5 + $0x28] sm:$0xff] %v3441_v44  ;;  %v3439_v22 = vadd.f32 %v3386_v0, %v3069_v43  ;;  %v3238_v54 = vpop.f32.mrf.mxu0 }
 0x4ba   : > { %3456 = vst [vmem:[#allocation5 + $0xe8] sm:$0xff] %v3424_v62  ;;  %v3422_v8 = vadd.f32 %v3238_v54, %v3052_v26 }
 0x4bb   : > { %3471 = vst [vmem:[#allocation5 + $0xd0] sm:$0xff] %v3439_v22  ;;  %v5012_v39 = vpop.f32.mrf.mxu0 }
 0x4bc   : > { %3454 = vst [vmem:[#allocation5 + $0x80] sm:$0xff] %v3422_v8  ;;  %v3425_v36 = vadd.f32 %v5012_v39, %v3055_v63 }
 0x4bd   : > { %v3241_v24 = vpop.f32.mrf.mxu0 }
 0x4be   : > { %3457 = vst [vmem:[#allocation5 + $0xb8] sm:$0xff] %v3425_v36  ;;  %v3423_v60 = vadd.f32 %v3241_v24, %v3053_v57 }
 0x4bf   : > { %v5015_v19 = vpop.f32.mrf.mxu0 }
 0x4c0   : > { %3455 = vst [vmem:[#allocation5 + $0x88] sm:$0xff] %v3423_v60  ;;  %v3428_v34 = vadd.f32 %v5015_v19, %v3058_v10 }
 0x4c1   : > { %v3254_v32 = vpop.f32.mrf.mxu0 }
 0x4c2   : > { %3460 = vst [vmem:[#allocation5 + $0x8] sm:$0xff] %v3428_v34  ;;  %v3426_v30 = vadd.f32 %v3254_v32, %v3056_v47 }
 0x4c3   : > { %v5016_v25 = vpop.f32.mrf.mxu0 }
 0x4c4   : > { %3458 = vst [vmem:[#allocation5 + $0x60] sm:$0xff] %v3426_v30  ;;  %v3429_v18 = vadd.f32 %v5016_v25, %v3059_v6 }
 0x4c5   : > { %v3257_v50 = vpop.f32.mrf.mxu0 }
 0x4c6   : > { %3461 = vst [vmem:[#allocation5 + $0x78] sm:$0xff] %v3429_v18  ;;  %v3427_v28 = vadd.f32 %v3257_v50, %v3057_v51  ;;  %v5047_v2 = vpop.f32.mrf.mxu1 }
 0x4c7   : > { %v3444_v27 = vadd.f32 %v5047_v2, %v3074_v16 }
 0x4c8   : > { %3459 = vst [vmem:[#allocation5 + $0xf0] sm:$0xff] %v3427_v28  ;;  %v3399_v15 = vpop.f32.mrf.mxu1 }
 0x4c9   : > { %3476 = vst [vmem:[#allocation5 + $0x20] sm:$0xff] %v3444_v27  ;;  %v3442_v17 = vadd.f32 %v3399_v15, %v3072_v59 }
 0x4ca   : > { %v5048_v45 = vpop.f32.mrf.mxu1 }
 0x4cb   : > { %3474 = vst [vmem:[#allocation5 + $0xa0] sm:$0xff] %v3442_v17  ;;  %v3445_v41 = vadd.f32 %v5048_v45, %v3075_v3 }
 0x4cc   : > { %v3402_v35 = vpop.f32.mrf.mxu1 }
 0x4cd   : > { %3477 = vst [vmem:[#allocation5 + $0x98] sm:$0xff] %v3445_v41  ;;  %v3443_v53 = vadd.f32 %v3402_v35, %v3073_v5 }
 0x4cf   : > { %3475 = vst [vmem:[#allocation5 + $0xf8] sm:$0xff] %v3443_v53 }
 0x4d0 PF: > { %p4406_p6 = scmp.ne.s32.totalorder %s5593_s28, 1 }
 0x4d2   : > { %3513 = sbr.rel (%p4406_p6) target bundleno = 1444 (0x5a4), region = 183 }
 0x4d7   : > { %v3548_v14 = vld [vmem:[#allocation4 + $0x10] sm:$0xff]  ;;  %v3546_v46 = vld [vmem:[#allocation4] sm:$0xff]  ;;  %v3549_v49 = vld [vmem:[#allocation4 + $0x18] sm:$0xff]  ;;  %v5624_v21 = vmov 0  }
 0x4d8   : > { %5466 = vset.pattern.permute.xlu1 %v5624_v21  ;;  %5465 = vset.pattern.permute.xlu0 %v5624_v21  ;;  %5467 = vrcp.f32 %v3548_v14  ;;  %v3547_v31 = vld [vmem:[#allocation4 + $0x8] sm:$0xff]  ;;  %v3550_v40 = vld [vmem:[#allocation4 + $0x20] sm:$0xff]  ;;  %v3553_v56 = vld [vmem:[#allocation4 + $0x38] sm:$0xff] }
 0x4d9   : > { %5469 = vrcp.f32 %v3546_v46  ;;  %v3551_v1 = vld [vmem:[#allocation4 + $0x28] sm:$0xff]  ;;  %v3552_v43 = vld [vmem:[#allocation4 + $0x30] sm:$0xff]  ;;  %v3554_v20 = vld [vmem:[#allocation4 + $0x40] sm:$0xff] }
 0x4da   : > { %5471 = vrcp.f32 %v3549_v49  ;;  %v3555_v44 = vld [vmem:[#allocation4 + $0x48] sm:$0xff]  ;;  %v3557_v0 = vld [vmem:[#allocation4 + $0x58] sm:$0xff]  ;;  %v3556_v22 = vld [vmem:[#allocation4 + $0x50] sm:$0xff] }
 0x4db   : > { %5473 = vrcp.f32 %v3547_v31  ;;  %v3559_v61 = vld [vmem:[#allocation4 + $0x68] sm:$0xff]  ;;  %v3558_v8 = vld [vmem:[#allocation4 + $0x60] sm:$0xff]  ;;  %v3561_v39 = vld [vmem:[#allocation4 + $0x78] sm:$0xff] }
 0x4dc   : > { %5475 = vrcp.f32 %v3551_v1  ;;  %v3560_v57 = vld [vmem:[#allocation4 + $0x70] sm:$0xff]  ;;  %v3563_v4 = vld [vmem:[#allocation4 + $0x88] sm:$0xff]  ;;  %v3562_v52 = vld [vmem:[#allocation4 + $0x80] sm:$0xff] }
 0x4dd   : > { %5477 = vrcp.f32 %v3550_v40  ;;  %v3565_v60 = vld [vmem:[#allocation4 + $0x98] sm:$0xff]  ;;  %v3564_v19 = vld [vmem:[#allocation4 + $0x90] sm:$0xff]  ;;  %v3567_v47 = vld [vmem:[#allocation4 + $0xa8] sm:$0xff] }
 0x4de   : > { %5479 = vrcp.f32 %v3553_v56  ;;  %v3566_v37 = vld [vmem:[#allocation4 + $0xa0] sm:$0xff]  ;;  %v3569_v6 = vld [vmem:[#allocation4 + $0xb8] sm:$0xff]  ;;  %v3568_v55 = vld [vmem:[#allocation4 + $0xb0] sm:$0xff] }
 0x4df   : > { %5481 = vrcp.f32 %v3552_v43  ;;  %v3571_v25 = vld [vmem:[#allocation4 + $0xc8] sm:$0xff]  ;;  %v3570_v51 = vld [vmem:[#allocation4 + $0xc0] sm:$0xff]  ;;  %v3573_v16 = vld [vmem:[#allocation4 + $0xd8] sm:$0xff] }
 0x4e0   : > { %5483 = vrcp.f32 %v3555_v44  ;;  %v3572_v12 = vld [vmem:[#allocation4 + $0xd0] sm:$0xff]  ;;  %v3575_v28 = vld [vmem:[#allocation4 + $0xe8] sm:$0xff]  ;;  %v3574_v58 = vld [vmem:[#allocation4 + $0xe0] sm:$0xff] }
 0x4e1   : > { %5485 = vrcp.f32 %v3554_v20  ;;  %v3577_v27 = vld [vmem:[#allocation4 + $0xf8] sm:$0xff]  ;;  %v3576_v15 = vld [vmem:[#allocation4 + $0xf0] sm:$0xff]  ;;  %v3515_v40 = vld [vmem:[#allocation5] sm:$0xff] }
 0x4e2   : > { %5487 = vrcp.f32 %v3557_v0  ;;  %v3516_v21 = vld [vmem:[#allocation5 + $0xd8] sm:$0xff]  ;;  %v3514_v1 = vld [vmem:[#allocation5 + $0xb0] sm:$0xff] }
 0x4e3   : > { %5489 = vrcp.f32 %v3556_v22  ;;  %v3517_v31 = vld [vmem:[#allocation5 + $0x18] sm:$0xff] }
 0x4e4   : > { %5491 = vrcp.f32 %v3559_v61 }
 0x4e5   : > { %v5468_v13 = vpop.eup %5467  ;;  %5493 = vrcp.f32 %v3558_v8 }
 0x4e6   : > { %v5470_v26 = vpop.eup %5469  ;;  %3622 = vperm.xlu1 %5466, %v5468_v13   ;;  %5495 = vrcp.f32 %v3561_v39  ;;  %v3520_v39 = vld [vmem:[#allocation5 + $0x30] sm:$0xff] }
 0x4e7   : > { %v5472_v62 = vpop.eup %5471  ;;  %3612 = vperm.xlu0 %5465, %v5470_v26   ;;  %5497 = vrcp.f32 %v3560_v57 }
 0x4e8   : > { %v5474_v33 = vpop.eup %5473  ;;  %5499 = vrcp.f32 %v3563_v4 }
 0x4e9   : > { %v5476_v54 = vpop.eup %5475  ;;  %5501 = vrcp.f32 %v3562_v52  ;;  %v3523_v52 = vld [vmem:[#allocation5 + $0x88] sm:$0xff] }
 0x4ea   : > { %3627 = vperm.xlu1 %5466, %v5472_v62   ;;  %v5478_v63 = vpop.eup %5477  ;;  %5503 = vrcp.f32 %v3565_v60  ;;  %v3519_v62 = vld [vmem:[#allocation5 + $0x68] sm:$0xff] }
 0x4eb   : > { %3617 = vperm.xlu0 %5465, %v5474_v33   ;;  %v5480_v42 = vpop.eup %5479  ;;  %5505 = vrcp.f32 %v3564_v19  ;;  %v3518_v33 = vld [vmem:[#allocation5 + $0x50] sm:$0xff] }
 0x4ec   : > { %v5482_v48 = vpop.eup %5481  ;;  %5507 = vrcp.f32 %v3567_v47 }
 0x4ed   : > { %v5484_v36 = vpop.eup %5483  ;;  %5509 = vrcp.f32 %v3566_v37  ;;  %v3524_v37 = vld [vmem:[#allocation5 + $0xe8] sm:$0xff] }
 0x4ee   : > { %3637 = vperm.xlu1 %5466, %v5476_v54   ;;  %v5486_v24 = vpop.eup %5485  ;;  %5511 = vrcp.f32 %v3569_v6 }
 0x4ef   : > { %3632 = vperm.xlu0 %5465, %v5478_v63   ;;  %v5488_v10 = vpop.eup %5487  ;;  %5513 = vrcp.f32 %v3568_v55 }
 0x4f0   : > { %v5490_v11 = vpop.eup %5489  ;;  %5515 = vrcp.f32 %v3571_v25  ;;  %v3527_v25 = vld [vmem:[#allocation5 + $0xf0] sm:$0xff] }
 0x4f1   : > { %v5492_v38 = vpop.eup %5491  ;;  %5517 = vrcp.f32 %v3570_v51 }
 0x4f2   : > { %3647 = vperm.xlu1 %5466, %v5480_v42   ;;  %v5494_v34 = vpop.eup %5493  ;;  %5519 = vrcp.f32 %v3573_v16  ;;  %v3521_v42 = vld [vmem:[#allocation5 + $0x48] sm:$0xff] }
 0x4f3   : > { %3642 = vperm.xlu0 %5465, %v5482_v48   ;;  %v5496_v32 = vpop.eup %5495  ;;  %5521 = vrcp.f32 %v3572_v12 }
 0x4f4   : > { %v5498_v29 = vpop.eup %5497  ;;  %5523 = vrcp.f32 %v3575_v28  ;;  %v3528_v28 = vld [vmem:[#allocation5 + $0x8] sm:$0xff] }
 0x4f5   : > { %v5500_v30 = vpop.eup %5499  ;;  %5525 = vrcp.f32 %v3574_v58 }
 0x4f6   : > { %3657 = vperm.xlu1 %5466, %v5484_v36   ;;  %v5502_v23 = vpop.eup %5501  ;;  %5527 = vrcp.f32 %v3577_v27 }
 0x4f7   : > { %3652 = vperm.xlu0 %5465, %v5486_v24   ;;  %v5504_v18 = vpop.eup %5503  ;;  %5529 = vrcp.f32 %v3576_v15  ;;  %v3531_v15 = vld [vmem:[#allocation5 + $0x58] sm:$0xff] }
 0x4f8   : > { %v5506_v50 = vpop.eup %5505 }
 0x4f9   : > { %v5508_v9 = vpop.eup %5507 }
 0x4fa   : > { %3667 = vperm.xlu1 %5466, %v5488_v10   ;;  %v5510_v2 = vpop.eup %5509  ;;  %v3522_v10 = vld [vmem:[#allocation5 + $0x80] sm:$0xff] }
 0x4fb   : > { %3662 = vperm.xlu0 %5465, %v5490_v11   ;;  %v5512_v59 = vpop.eup %5511 }
 0x4fc   : > { %v5514_v7 = vpop.eup %5513 }
 0x4fd   : > { %v5516_v3 = vpop.eup %5515 }
 0x4fe   : > { %3677 = vperm.xlu1 %5466, %v5492_v38   ;;  %v5518_v17 = vpop.eup %5517 }
 0x4ff   : > { %3672 = vperm.xlu0 %5465, %v5494_v34   ;;  %v5520_v45 = vpop.eup %5519  ;;  %v3525_v34 = vld [vmem:[#allocation5 + $0xb8] sm:$0xff] }
 0x500   : > { %v5522_v5 = vpop.eup %5521 }
 0x501   : > { %v5524_v41 = vpop.eup %5523 }
 0x502   : > { %3687 = vperm.xlu1 %5466, %v5496_v32   ;;  %v5526_v35 = vpop.eup %5525 }
 0x503   : > { %3682 = vperm.xlu0 %5465, %v5498_v29   ;;  %v5528_v53 = vpop.eup %5527 }
 0x504   : > { %v5530_v14 = vpop.eup %5529 }
 0x506   : > { %3697 = vperm.xlu1 %5466, %v5500_v30  }
 0x507   : > { %3692 = vperm.xlu0 %5465, %v5502_v23   ;;  %v3526_v23 = vld [vmem:[#allocation5 + $0x60] sm:$0xff] }
 0x50a   : > { %3707 = vperm.xlu1 %5466, %v5504_v18  }
 0x50b   : > { %3702 = vperm.xlu0 %5465, %v5506_v50  }
 0x50e   : > { %3717 = vperm.xlu1 %5466, %v5508_v9   ;;  %v3529_v9 = vld [vmem:[#allocation5 + $0x78] sm:$0xff] }
 0x50f   : > { %3712 = vperm.xlu0 %5465, %v5510_v2  }
 0x512   : > { %3727 = vperm.xlu1 %5466, %v5512_v59  }
 0x513   : > { %3722 = vperm.xlu0 %5465, %v5514_v7  }
 0x516   : > { %3737 = vperm.xlu1 %5466, %v5516_v3   ;;  %v3530_v3 = vld [vmem:[#allocation5 + $0x38] sm:$0xff] }
 0x517   : > { %3732 = vperm.xlu0 %5465, %v5518_v17  }
 0x51a   : > { %3747 = vperm.xlu1 %5466, %v5520_v45  }
 0x51b   : > { %3742 = vperm.xlu0 %5465, %v5522_v5  }
 0x51e   : > { %3757 = vperm.xlu1 %5466, %v5524_v41  }
 0x51f   : > { %3752 = vperm.xlu0 %5465, %v5526_v35  }
 0x522   : > { %3767 = vperm.xlu1 %5466, %v5528_v53   ;;  %v3533_v53 = vld [vmem:[#allocation5 + $0xc8] sm:$0xff] }
 0x523   : > { %3762 = vperm.xlu0 %5465, %v5530_v14   ;;  %v3532_v14 = vld [vmem:[#allocation5 + $0x40] sm:$0xff] }
 0x561   : > { %v3623_v46 = vpop.permute.xlu1 %3622 }
 0x562   : > { %v3613_v49 = vpop.permute.xlu0 %3612  ;;  %v3772_v43 = vmul.f32 %v3623_v46, %v3516_v21 }
 0x563   : > { %v3770_v13 = vmul.f32 %v3613_v49, %v3514_v1 }
 0x565   : > { %v3628_v56 = vpop.permute.xlu1 %3627 }
 0x566   : > { %v3773_v44 = vmul.f32 %v3628_v56, %v3517_v31  ;;  %v3618_v20 = vpop.permute.xlu0 %3617  ;;  %v3534_v56 = vld [vmem:[#allocation5 + $0xe0] sm:$0xff] }
 0x567   : > { %v3771_v26 = vmul.f32 %v3618_v20, %v3515_v40  ;;  %v3535_v40 = vld [vmem:[#allocation5 + $0x90] sm:$0xff] }
 0x568   : > { %v4725_v0 = vpack.c.bf16 %v3773_v44, %v3772_v43 }
 0x569   : > { %v4720_v22 = vpack.c.bf16 %v3771_v26, %v3770_v13  ;;  %v3638_v54 = vpop.permute.xlu1 %3637 }
 0x56a   : > { %4842 = vst [vmem:[%s5886_s24 + $0x8] sm:$0xff] %v4725_v0   ;;  %v3775_v61 = vmul.f32 %v3638_v54, %v3519_v62  ;;  %v3633_v63 = vpop.permute.xlu0 %3632  ;;  %v3537_v62 = vld [vmem:[#allocation5 + $0xc0] sm:$0xff]  ;;  %v3536_v0 = vld [vmem:[#allocation5 + $0x70] sm:$0xff] }
 0x56b   : > { %4721 = vst [vmem:[%s5886_s24] sm:$0xff] %v4720_v22   ;;  %v3774_v8 = vmul.f32 %v3633_v63, %v3518_v33 }
 0x56d   : > { %v4730_v48 = vpack.c.bf16 %v3775_v61, %v3774_v8  ;;  %v3648_v57 = vpop.permute.xlu1 %3647  ;;  %v3539_v8 = vld [vmem:[#allocation5 + $0xd0] sm:$0xff] }
 0x56e   : > { %v3777_v36 = vmul.f32 %v3648_v57, %v3521_v42  ;;  %v3643_v4 = vpop.permute.xlu0 %3642  ;;  %v3538_v42 = vld [vmem:[#allocation5 + $0xa8] sm:$0xff] }
 0x56f   : > { %4843 = vst [vmem:[%s5886_s24 + $0x10] sm:$0xff] %v4730_v48   ;;  %v3776_v24 = vmul.f32 %v3643_v4, %v3520_v39 }
 0x571   : > { %v4735_v60 = vpack.c.bf16 %v3777_v36, %v3776_v24  ;;  %v3658_v11 = vpop.permute.xlu1 %3657  ;;  %v3541_v24 = vld [vmem:[#allocation5 + $0x28] sm:$0xff] }
 0x572   : > { %v3779_v19 = vmul.f32 %v3658_v11, %v3523_v52  ;;  %v3653_v38 = vpop.permute.xlu0 %3652  ;;  %v3540_v52 = vld [vmem:[#allocation5 + $0x10] sm:$0xff] }
 0x573   : > { %4844 = vst [vmem:[%s5886_s24 + $0x18] sm:$0xff] %v4735_v60   ;;  %v3778_v47 = vmul.f32 %v3653_v38, %v3522_v10 }
 0x575   : > { %v4740_v32 = vpack.c.bf16 %v3779_v19, %v3778_v47  ;;  %v3668_v6 = vpop.permute.xlu1 %3667  ;;  %v3543_v47 = vld [vmem:[#allocation5 + $0xf8] sm:$0xff] }
 0x576   : > { %v3781_v29 = vmul.f32 %v3668_v6, %v3525_v34  ;;  %v3663_v55 = vpop.permute.xlu0 %3662  ;;  %v3542_v34 = vld [vmem:[#allocation5 + $0xa0] sm:$0xff] }
 0x577   : > { %4845 = vst [vmem:[%s5886_s24 + $0x20] sm:$0xff] %v4740_v32   ;;  %v3780_v30 = vmul.f32 %v3663_v55, %v3524_v37 }
 0x579   : > { %v4745_v51 = vpack.c.bf16 %v3781_v29, %v3780_v30  ;;  %v3678_v18 = vpop.permute.xlu1 %3677  ;;  %v3545_v30 = vld [vmem:[#allocation5 + $0x98] sm:$0xff] }
 0x57a   : > { %v3783_v16 = vmul.f32 %v3678_v18, %v3527_v25  ;;  %v3673_v50 = vpop.permute.xlu0 %3672  ;;  %v3544_v25 = vld [vmem:[#allocation5 + $0x20] sm:$0xff] }
 0x57b   : > { %4846 = vst [vmem:[%s5886_s24 + $0x28] sm:$0xff] %v4745_v51   ;;  %v3782_v12 = vmul.f32 %v3673_v50, %v3526_v23 }
 0x57d   : > { %v4750_v2 = vpack.c.bf16 %v3783_v16, %v3782_v12  ;;  %v3688_v58 = vpop.permute.xlu1 %3687 }
 0x57e   : > { %v3785_v59 = vmul.f32 %v3688_v58, %v3529_v9  ;;  %v3683_v27 = vpop.permute.xlu0 %3682 }
 0x57f   : > { %4847 = vst [vmem:[%s5886_s24 + $0x30] sm:$0xff] %v4750_v2   ;;  %v3784_v7 = vmul.f32 %v3683_v27, %v3528_v28 }
 0x581   : > { %v4755_v17 = vpack.c.bf16 %v3785_v59, %v3784_v7  ;;  %v3698_v45 = vpop.permute.xlu1 %3697 }
 0x582   : > { %v3787_v5 = vmul.f32 %v3698_v45, %v3531_v15  ;;  %v3693_v41 = vpop.permute.xlu0 %3692 }
 0x583   : > { %4848 = vst [vmem:[%s5886_s24 + $0x38] sm:$0xff] %v4755_v17   ;;  %v3786_v35 = vmul.f32 %v3693_v41, %v3530_v3 }
 0x585   : > { %v4760_v46 = vpack.c.bf16 %v3787_v5, %v3786_v35  ;;  %v3708_v49 = vpop.permute.xlu1 %3707 }
 0x586   : > { %v3789_v21 = vmul.f32 %v3708_v49, %v3533_v53  ;;  %v3703_v31 = vpop.permute.xlu0 %3702 }
 0x587   : > { %4849 = vst [vmem:[%s5886_s24 + $0x40] sm:$0xff] %v4760_v46   ;;  %v3788_v1 = vmul.f32 %v3703_v31, %v3532_v14 }
 0x589   : > { %v4765_v43 = vpack.c.bf16 %v3789_v21, %v3788_v1  ;;  %v3718_v44 = vpop.permute.xlu1 %3717 }
 0x58a   : > { %v3791_v20 = vmul.f32 %v3718_v44, %v3535_v40  ;;  %v3713_v13 = vpop.permute.xlu0 %3712 }
 0x58b   : > { %4850 = vst [vmem:[%s5886_s24 + $0x48] sm:$0xff] %v4765_v43   ;;  %v3790_v26 = vmul.f32 %v3713_v13, %v3534_v56 }
 0x58d   : > { %v4770_v33 = vpack.c.bf16 %v3791_v20, %v3790_v26  ;;  %v3728_v22 = vpop.permute.xlu1 %3727 }
 0x58e   : > { %v3793_v54 = vmul.f32 %v3728_v22, %v3537_v62  ;;  %v3723_v61 = vpop.permute.xlu0 %3722 }
 0x58f   : > { %4851 = vst [vmem:[%s5886_s24 + $0x50] sm:$0xff] %v4770_v33   ;;  %v3792_v63 = vmul.f32 %v3723_v61, %v3536_v0 }
 0x591   : > { %v4775_v39 = vpack.c.bf16 %v3793_v54, %v3792_v63  ;;  %v3738_v48 = vpop.permute.xlu1 %3737 }
 0x592   : > { %v3795_v57 = vmul.f32 %v3738_v48, %v3539_v8  ;;  %v3733_v36 = vpop.permute.xlu0 %3732 }
 0x593   : > { %4852 = vst [vmem:[%s5886_s24 + $0x58] sm:$0xff] %v4775_v39   ;;  %v3794_v4 = vmul.f32 %v3733_v36, %v3538_v42 }
 0x595   : > { %v4780_v10 = vpack.c.bf16 %v3795_v57, %v3794_v4  ;;  %v3748_v60 = vpop.permute.xlu1 %3747 }
 0x596   : > { %v3797_v11 = vmul.f32 %v3748_v60, %v3541_v24  ;;  %v3743_v19 = vpop.permute.xlu0 %3742 }
 0x597   : > { %4853 = vst [vmem:[%s5886_s24 + $0x60] sm:$0xff] %v4780_v10   ;;  %v3796_v38 = vmul.f32 %v3743_v19, %v3540_v52 }
 0x599   : > { %v4785_v37 = vpack.c.bf16 %v3797_v11, %v3796_v38  ;;  %v3758_v32 = vpop.permute.xlu1 %3757 }
 0x59a   : > { %v3799_v6 = vmul.f32 %v3758_v32, %v3543_v47  ;;  %v3753_v29 = vpop.permute.xlu0 %3752 }
 0x59b   : > { %4854 = vst [vmem:[%s5886_s24 + $0x68] sm:$0xff] %v4785_v37   ;;  %v3798_v55 = vmul.f32 %v3753_v29, %v3542_v34 }
 0x59d   : > { %v4790_v23 = vpack.c.bf16 %v3799_v6, %v3798_v55  ;;  %v3768_v51 = vpop.permute.xlu1 %3767 }
 0x59e   : > { %v3801_v18 = vmul.f32 %v3768_v51, %v3545_v30  ;;  %v3763_v16 = vpop.permute.xlu0 %3762 }
 0x59f   : > { %4855 = vst [vmem:[%s5886_s24 + $0x70] sm:$0xff] %v4790_v23   ;;  %v3800_v50 = vmul.f32 %v3763_v16, %v3544_v25 }
 0x5a1   : > { %v4795_v12 = vpack.c.bf16 %v3801_v18, %v3800_v50 }
 0x5a3   : > { %4856 = vst [vmem:[%s5886_s24 + $0x78] sm:$0xff] %v4795_v12  }
 0x5a4 PF: > { %3968 = sbr.rel (!%p5756_p9) target bundleno = 1462 (0x5b6), region = 187  ;;  %s7824_s29 = sld [smem:[#allocation10_spill]] (%p5756_p9)  ;;  %v3990_v9 = vld [vmem:[%s5886_s24] sm:$0xff] (%p5756_p9)   ;;  %v3994_v28 = vld [vmem:[%s5886_s24 + $0x8] sm:$0xff] (%p5756_p9)   ;;  %v3998_v2 = vld [vmem:[%s5886_s24 + $0x10] sm:$0xff] (%p5756_p9)  }
 0x5a5   : > { %v4002_v58 = vld [vmem:[%s5886_s24 + $0x18] sm:$0xff] (%p5756_p9)   ;;  %v4006_v59 = vld [vmem:[%s5886_s24 + $0x20] sm:$0xff] (%p5756_p9)   ;;  %v4010_v27 = vld [vmem:[%s5886_s24 + $0x28] sm:$0xff] (%p5756_p9)   ;;  %s7825_s20 = sld [smem:[#allocation52_spill]] (%p5756_p9) }
 0x5a6   : > { %v4014_v7 = vld [vmem:[%s5886_s24 + $0x30] sm:$0xff] (%p5756_p9)   ;;  %v4018_v15 = vld [vmem:[%s5886_s24 + $0x38] sm:$0xff] (%p5756_p9)   ;;  %v4022_v3 = vld [vmem:[%s5886_s24 + $0x40] sm:$0xff] (%p5756_p9)  }
 0x5a7   : > { %v4026_v17 = vld [vmem:[%s5886_s24 + $0x48] sm:$0xff] (%p5756_p9)   ;;  %v4030_v45 = vld [vmem:[%s5886_s24 + $0x50] sm:$0xff] (%p5756_p9)   ;;  %v4034_v5 = vld [vmem:[%s5886_s24 + $0x58] sm:$0xff] (%p5756_p9)  }
 0x5a8   : > { %v4038_v41 = vld [vmem:[%s5886_s24 + $0x60] sm:$0xff] (%p5756_p9)   ;;  %v4042_v35 = vld [vmem:[%s5886_s24 + $0x68] sm:$0xff] (%p5756_p9)   ;;  %v4046_v53 = vld [vmem:[%s5886_s24 + $0x70] sm:$0xff] (%p5756_p9)  }
 0x5aa   : > { %s4441_s21 = sshll.u32 %s7824_s29, 6  ;;  %v4050_v14 = vld [vmem:[%s5886_s24 + $0x78] sm:$0xff]  }
 0x5ab   : > { %s3971_s23 = sadd.s32 %s4441_s21, %s5853_s16 }
 0x5ac   : > { %s4442_s18 = sshll.u32 %s3971_s23, 2 }
 0x5ad   : > { %s3973_s22 = scalar_lea.vmem %s7825_s20, %s4442_s18 }
 0x5ae   : > { %3991 = vst [vmem:[%s3973_s22] sm:$0xff] %v3990_v9   ;;  %3995 = vst [vmem:[%s3973_s22 + $0x8] sm:$0xff] %v3994_v28  }
 0x5af   : > { %3999 = vst [vmem:[%s3973_s22 + $0x10] sm:$0xff] %v3998_v2   ;;  %4003 = vst [vmem:[%s3973_s22 + $0x18] sm:$0xff] %v4002_v58  }
 0x5b0   : > { %4007 = vst [vmem:[%s3973_s22 + $0x20] sm:$0xff] %v4006_v59   ;;  %4011 = vst [vmem:[%s3973_s22 + $0x28] sm:$0xff] %v4010_v27  }
 0x5b1   : > { %4015 = vst [vmem:[%s3973_s22 + $0x30] sm:$0xff] %v4014_v7   ;;  %4019 = vst [vmem:[%s3973_s22 + $0x38] sm:$0xff] %v4018_v15  }
 0x5b2   : > { %4023 = vst [vmem:[%s3973_s22 + $0x80] sm:$0xff] %v4022_v3   ;;  %4027 = vst [vmem:[%s3973_s22 + $0x88] sm:$0xff] %v4026_v17  }
 0x5b3   : > { %4031 = vst [vmem:[%s3973_s22 + $0x90] sm:$0xff] %v4030_v45   ;;  %4035 = vst [vmem:[%s3973_s22 + $0x98] sm:$0xff] %v4034_v5  }
 0x5b4   : > { %4039 = vst [vmem:[%s3973_s22 + $0xa0] sm:$0xff] %v4038_v41   ;;  %4043 = vst [vmem:[%s3973_s22 + $0xa8] sm:$0xff] %v4042_v35  }
 0x5b5   : > { %4047 = vst [vmem:[%s3973_s22 + $0xb0] sm:$0xff] %v4046_v53   ;;  %4051 = vst [vmem:[%s3973_s22 + $0xb8] sm:$0xff] %v4050_v14  }
 0x5b6 PF: > { %s17_s11 = sadd.s32 1, %s5617_s11   ;;  %s7826_s29 = sld [smem:[#allocation11_spill]] }
 0x5b7   : > { %p14_p7 = scmp.ge.s32.totalorder %s17_s11, 10   ;;  %s7827_s30 = sld [smem:[#allocation12_spill]] }
 0x5b8   : > { %s7828_s16 = sld [smem:[#allocation13_spill]]  ;;  %s7831_s24 = smov %s5581_s25 }
 0x5b9   : > { %s7829_s9 = sld [smem:[#allocation14_spill]]  ;;  %s7832_s25 = smov %s5767_s13 }
 0x5ba   : > { %s7830_s10 = sld [smem:[#allocation15_spill]]  ;;  %s7833_s26 = smov %s5589_s27 }
 0x5bb   : > { %s7834_s27 = smov %s5764_s15  ;;  %s7835_s28 = smov %s5605_s8 }
 0x5bc   :  { %16 = sbr.rel (!%p14_p7) target bundleno = 11 (0xb), region = 287 }
 0x5be   : > { %s7836_s8 = smov %s7828_s16 }

// kernel: transformer_block.5
= control target key start
LH: loop header
LB: loop body
LE: loop exit
PB: predicated region body
PF: predicated region fallthrough
CT: control target
= control target key end

     0   :  { %13 = vsyncpa [#allocation3], 0  ;;  %s10062_s0 = inlined_call_operand.vmem [shape: f32[2,256,256], index: 0, kind: input, shape index: {}]   ;;  %s10063_s1 = inlined_call_operand.vmem [shape: bf16[2,256,256], index: 1, kind: input, shape index: {}]   ;;  %s10064_s2 = inlined_call_operand.vmem [shape: bf16[256,256], index: 2, kind: input, shape index: {}]   ;;  %s10065_s3 = inlined_call_operand.vmem [shape: f32[1,256], index: 3, kind: input, shape index: {}]   ;;  %s10066_s4 = inlined_call_operand.vmem [shape: bf16[256,512], index: 4, kind: input, shape index: {}]   ;;  %s10067_s5 = inlined_call_operand.vmem [shape: bf16[512,1024], index: 5, kind: input, shape index: {}]   ;;  %s10068_s6 = inlined_call_operand.vmem [shape: f32[1,1024], index: 6, kind: input, shape index: {}]   ;;  %s10069_s7 = inlined_call_operand.vmem [shape: bf16[512,256], index: 7, kind: input, shape index: {}]   ;;  %s10070_s8 = inlined_call_operand.hbm [shape: f32[2,256,256], index: 8, kind: output, shape index: {}]  }
   0x1   :  { %15 = vsyncpa [#allocation3 + $0x1], 0  ;;  %s7005_s27 = smov 0   ;;  %s7007_s28 = smov 0  }
   0x2   :  { %s7009_s29 = smov 0   ;;  %s7011_s30 = smov 0  }
   0x3   :  { %s7013_s9 = smov 0   ;;  %s7015_s10 = smov 0  }
   0x4   :  { %s7017_s11 = smov 0   ;;  %s7019_s12 = smov 0  }
   0x5 LB: > { %10147 = sst [smem:[#allocation5_spill]] %s6947_s10  ;;  %s5624_s13 = sadd.s32 4294967295, %s6955_s12   ;;  %s6955_s12 = sphi %s7019_s12, %s21_s12   ;;  %s6951_s11 = sphi %s7017_s11, %s10327_s11   ;;  %s6947_s10 = sphi %s7015_s10, %s10326_s10   ;;  %s6943_s9 = sphi %s7013_s9, %s10325_s9   ;;  %s6939_s30 = sphi %s7011_s30, %s10324_s30   ;;  %s6935_s29 = sphi %s7009_s29, %s10330_s29   ;;  %s6931_s28 = sphi %s7007_s28, %s10329_s28   ;;  %s6927_s27 = sphi %s7005_s27, %s10328_s27  }
   0x6   : > { %10148 = sst [smem:[#allocation6_spill]] %s6951_s11  ;;  %s5625_s14 = sadd.s32 4294967294, %s6955_s12  }
   0x7   : > { %s30_s15 = sadd.s32 1, %s6947_s10  ;;  %s33_s16 = sadd.s32 1, %s6951_s11 }
   0x8   : > { %p31_p0 = scmp.ge.s32.totalorder %s30_s15, 2  ;;  %p234_p1 = scmp.ne.s32.totalorder %s6935_s29, %s6931_s28 }
   0x9   : > { %p235_p2 = scmp.eq.s32.totalorder %s5624_s13, 3  ;;  %p240_p5 = scmp.ne.s32.totalorder %s6931_s28, %s6927_s27 }
   0xa   : > { %s10332_s15 = smov (%p31_p0, %s30_s15), 0  ;;  %s10334_s16 = smov (!%p31_p0, %s33_s16), %s6951_s11 }
   0xb   : > { %10149 = sst [smem:[#allocation7_spill]] %s10332_s15  ;;  %s220_s17 = ssub.s32 %s6947_s10, %s10332_s15 }
   0xc   : > { %p7056_p3 = por %p235_p2, %p234_p1  ;;  %p35_p4 = scmp.ge.s32.totalorder %s10334_s16, 2 }
   0xd   : > { %p241_p6 = scmp.eq.s32.totalorder %s5625_s14, 3  ;;  %p5628_p7 = scmp.ge.s32.totalorder %s6955_s12, 1 }
   0xe   : > { %s10336_s16 = smov (%p35_p4, %s10334_s16), 0  ;;  %p305_p9 = scmp.lt.s32.totalorder %s6955_s12, 5 }
   0xf   : > { %10151 = sst [smem:[#allocation8_spill]] %s10336_s16  ;;  %p7065_p8 = por %p241_p6, %p240_p5 }
  0x10   : > { %s219_s20 = ssub.s32 %s6951_s11, %s10336_s16  ;;  %s224_s21 = sadd.s32 1, %s6935_s29 }
  0x11   : > { %s221_s22 = sor.u32 %s220_s17, %s219_s20  ;;  %p306_p10 = pnand %p5628_p7, %p305_p9 }
  0x12   : > { %p222_p11 = scmp.eq.s32.totalorder %s221_s22, 0 }
  0x13   : > { %309 = sbr.rel (%p306_p10) target bundleno = 1348 (0x544), region = 52 }
  0x14   : > { %s7074_s23 = scalar_select %p222_p11, %s6935_s29, %s224_s21  }
  0x18   : > { %v6247_v0 = vld [vmem:[%s10064_s2 + $0x74] ss:$8 sps:$4 sm:$0xff]   ;;  %s5630_s26 = sshll.u32 %s6939_s30, 4  ;;  %v6249_v1 = vld [vmem:[%s10064_s2 + $0x70] ss:$8 sps:$4 sm:$0xff]   ;;  %p355_p12 = scmp.lt.s32.totalorder %s6943_s9, 1 }
  0x19   : > { %697 = vmatprep.subr.bf16.mxu0 %v6247_v0  ;;  %v6250_v2 = vld [vmem:[%s10064_s2 + $0x64] ss:$8 sps:$4 sm:$0xff]   ;;  %p357_p13 = scmp.lt.s32.totalorder %s5630_s26, 31  ;;  %v6252_v3 = vld [vmem:[%s10064_s2 + $0x60] ss:$8 sps:$4 sm:$0xff]   ;;  %s351_s24 = sand.u32 1, %s6931_s28  }
  0x1a   : > { %698 = vmatpush1.bf16.msra.mxu0 %v6249_v1  ;;  %v6253_v4 = vld [vmem:[%s10064_s2 + $0x54] ss:$8 sps:$4 sm:$0xff]   ;;  %s356_s16 = scalar_select %p355_p12, %s6943_s9, 1  ;;  %v6255_v5 = vld [vmem:[%s10064_s2 + $0x50] ss:$8 sps:$4 sm:$0xff]  }
  0x1b   : > { %699 = vmatprep.subr.bf16.mxu0 %v6250_v2  ;;  %s10338_s26 = smov (!%p357_p13, %s5630_s26), 31  ;;  %v6256_v6 = vld [vmem:[%s10064_s2 + $0x44] ss:$8 sps:$4 sm:$0xff]   ;;  %v6258_v7 = vld [vmem:[%s10064_s2 + $0x40] ss:$8 sps:$4 sm:$0xff]   ;;  %s5629_s25 = sshll.u32 %s351_s24, 8 }
  0x1c   : > { %s5631_s15 = sshll.u32 %s10338_s26, 1  ;;  %s5632_s21 = sshll.u32 %s356_s16, 6  ;;  %v6259_v8 = vld [vmem:[%s10064_s2 + $0x34] ss:$8 sps:$4 sm:$0xff]   ;;  %v6261_v9 = vld [vmem:[%s10064_s2 + $0x30] ss:$8 sps:$4 sm:$0xff]  }
  0x1d   : > { %s7106_s10 = sadd.s32 %s5632_s21, %s5631_s15  ;;  %v6262_v10 = vld [vmem:[%s10064_s2 + $0x24] ss:$8 sps:$4 sm:$0xff]   ;;  %v6264_v11 = vld [vmem:[%s10064_s2 + $0x20] ss:$8 sps:$4 sm:$0xff]   ;;  %v6265_v12 = vld [vmem:[%s10064_s2 + $0x14] ss:$8 sps:$4 sm:$0xff]  }
  0x1e   : > { %700 = vmatpush1.bf16.msra.mxu0 %v6252_v3  ;;  %s5637_s11 = sshll.u32 %s7106_s10, 2  ;;  %v6267_v14 = vld [vmem:[%s10064_s2 + $0x10] ss:$8 sps:$4 sm:$0xff]   ;;  %v6268_v15 = vld [vmem:[%s10064_s2 + $0x4] ss:$8 sps:$4 sm:$0xff]   ;;  %s9899_s13 = scalar_lea.vmem [#allocation2], %s5629_s25 }
  0x1f   : > { %701 = vmatprep.subr.bf16.mxu0 %v6253_v4  ;;  %s7121_s21 = scalar_lea.vmem %s10063_s1, %s5637_s11  ;;  %v6270_v16 = vld [vmem:[%s10064_s2] ss:$8 sps:$4 sm:$0xff]   ;;  %v6271_v17 = vld [vmem:[%s10064_s2 + $0xf4] ss:$8 sps:$4 sm:$0xff]   ;;  %v6273_v18 = vld [vmem:[%s10064_s2 + $0xf0] ss:$8 sps:$4 sm:$0xff]  }
  0x20   : > { %v6297_v13 = vld [vmem:[%s7121_s21 + $0x4] ss:$8 sps:$4 sm:$0xff]   ;;  %v6276_v20 = vld [vmem:[%s10064_s2 + $0xe0] ss:$8 sps:$4 sm:$0xff]   ;;  %v6277_v21 = vld [vmem:[%s10064_s2 + $0xd4] ss:$8 sps:$4 sm:$0xff]  }
  0x21   : > { %729 = vmatprep.mubr.bf16.mxu0 %v6297_v13  ;;  %v6274_v19 = vld [vmem:[%s10064_s2 + $0xe4] ss:$8 sps:$4 sm:$0xff]   ;;  %v6279_v22 = vld [vmem:[%s10064_s2 + $0xd0] ss:$8 sps:$4 sm:$0xff]   ;;  %v6282_v24 = vld [vmem:[%s10064_s2 + $0xc0] ss:$8 sps:$4 sm:$0xff]  }
  0x22   : > { %702 = vmatpush1.bf16.msra.mxu0 %v6255_v5  ;;  %v6280_v23 = vld [vmem:[%s10064_s2 + $0xc4] ss:$8 sps:$4 sm:$0xff]   ;;  %v6283_v25 = vld [vmem:[%s10064_s2 + $0xb4] ss:$8 sps:$4 sm:$0xff]   ;;  %v6285_v26 = vld [vmem:[%s10064_s2 + $0xb0] ss:$8 sps:$4 sm:$0xff]  }
  0x23   : > { %703 = vmatprep.subr.bf16.mxu0 %v6256_v6  ;;  %v6286_v27 = vld [vmem:[%s10064_s2 + $0xa4] ss:$8 sps:$4 sm:$0xff]   ;;  %v6288_v28 = vld [vmem:[%s10064_s2 + $0xa0] ss:$8 sps:$4 sm:$0xff]   ;;  %v6289_v29 = vld [vmem:[%s10064_s2 + $0x94] ss:$8 sps:$4 sm:$0xff]  }
  0x24   : > { %v6291_v30 = vld [vmem:[%s10064_s2 + $0x90] ss:$8 sps:$4 sm:$0xff]   ;;  %v6292_v31 = vld [vmem:[%s10064_s2 + $0x84] ss:$8 sps:$4 sm:$0xff]   ;;  %v6294_v32 = vld [vmem:[%s10064_s2 + $0x80] ss:$8 sps:$4 sm:$0xff]  }
  0x25   : > { %v6295_v33 = vld [vmem:[%s7121_s21] ss:$8 sps:$4 sm:$0xff]   ;;  %v6298_v34 = vld [vmem:[%s7121_s21 + $0x14] ss:$8 sps:$4 sm:$0xff]   ;;  %v6300_v35 = vld [vmem:[%s7121_s21 + $0x10] ss:$8 sps:$4 sm:$0xff]  }
  0x26   : > { %704 = vmatpush1.bf16.msra.mxu0 %v6258_v7  ;;  %v6301_v36 = vld [vmem:[%s7121_s21 + $0x24] ss:$8 sps:$4 sm:$0xff]   ;;  %v6303_v37 = vld [vmem:[%s7121_s21 + $0x20] ss:$8 sps:$4 sm:$0xff]   ;;  %v6304_v38 = vld [vmem:[%s7121_s21 + $0x34] ss:$8 sps:$4 sm:$0xff]  }
  0x27   : > { %705 = vmatprep.subr.bf16.mxu0 %v6259_v8  ;;  %v6306_v39 = vld [vmem:[%s7121_s21 + $0x30] ss:$8 sps:$4 sm:$0xff]   ;;  %v6307_v40 = vld [vmem:[%s7121_s21 + $0x44] ss:$8 sps:$4 sm:$0xff]   ;;  %v6309_v41 = vld [vmem:[%s7121_s21 + $0x40] ss:$8 sps:$4 sm:$0xff]  }
  0x28   : > { %v6310_v42 = vld [vmem:[%s7121_s21 + $0x54] ss:$8 sps:$4 sm:$0xff]   ;;  %v6312_v43 = vld [vmem:[%s7121_s21 + $0x50] ss:$8 sps:$4 sm:$0xff]   ;;  %v6313_v44 = vld [vmem:[%s7121_s21 + $0x64] ss:$8 sps:$4 sm:$0xff]  }
  0x29   : > { %v6315_v45 = vld [vmem:[%s7121_s21 + $0x60] ss:$8 sps:$4 sm:$0xff]   ;;  %v6316_v46 = vld [vmem:[%s7121_s21 + $0x74] ss:$8 sps:$4 sm:$0xff]   ;;  %v6318_v47 = vld [vmem:[%s7121_s21 + $0x70] ss:$8 sps:$4 sm:$0xff]  }
  0x2a   : > { %706 = vmatpush1.bf16.msra.mxu0 %v6261_v9  ;;  %v6319_v48 = vld [vmem:[%s10066_s4 + $0xe4] ss:$16 sps:$4 sm:$0xff]   ;;  %v6321_v49 = vld [vmem:[%s10066_s4 + $0xe8] ss:$16 sps:$4 sm:$0xff]   ;;  %v6323_v50 = vld [vmem:[%s10066_s4 + $0xec] ss:$16 sps:$4 sm:$0xff]  }
  0x2b   : > { %707 = vmatprep.subr.bf16.mxu0 %v6262_v10  ;;  %v6324_v51 = vld [vmem:[%s10066_s4 + $0xe0] ss:$16 sps:$4 sm:$0xff]   ;;  %v6325_v52 = vld [vmem:[%s10066_s4 + $0xc4] ss:$16 sps:$4 sm:$0xff]   ;;  %1543 = vmatprep.subr.bf16.mxu1 %v6319_v48  ;;  %v6329_v53 = vld [vmem:[%s10066_s4 + $0xcc] ss:$16 sps:$4 sm:$0xff]  }
  0x2c   : > { %1544 = vmatpush1.bf16.msra.mxu1 %v6324_v51  ;;  %v6327_v54 = vld [vmem:[%s10066_s4 + $0xc8] ss:$16 sps:$4 sm:$0xff]   ;;  %v6330_v55 = vld [vmem:[%s10066_s4 + $0xc0] ss:$16 sps:$4 sm:$0xff]   ;;  %v6331_v56 = vld [vmem:[%s10066_s4 + $0xa4] ss:$16 sps:$4 sm:$0xff]  }
  0x2d   : > { %1545 = vmatprep.subr.bf16.mxu1 %v6325_v52  ;;  %v6335_v57 = vld [vmem:[%s10066_s4 + $0xac] ss:$16 sps:$4 sm:$0xff]   ;;  %v6333_v58 = vld [vmem:[%s10066_s4 + $0xa8] ss:$16 sps:$4 sm:$0xff]   ;;  %v6336_v59 = vld [vmem:[%s10066_s4 + $0xa0] ss:$16 sps:$4 sm:$0xff]  }
  0x2e   : > { %708 = vmatpush1.bf16.msra.mxu0 %v6264_v11  ;;  %v6337_v60 = vld [vmem:[%s10066_s4 + $0x84] ss:$16 sps:$4 sm:$0xff]   ;;  %v6341_v61 = vld [vmem:[%s10066_s4 + $0x8c] ss:$16 sps:$4 sm:$0xff]   ;;  %v6339_v62 = vld [vmem:[%s10066_s4 + $0x88] ss:$16 sps:$4 sm:$0xff]  }
  0x2f   : > { %709 = vmatprep.subr.bf16.mxu0 %v6265_v12  ;;  %v6342_v63 = vld [vmem:[%s10066_s4 + $0x80] ss:$16 sps:$4 sm:$0xff]   ;;  %v6343_v0 = vld [vmem:[%s10066_s4 + $0x64] ss:$16 sps:$4 sm:$0xff]   ;;  %v6347_v1 = vld [vmem:[%s10066_s4 + $0x6c] ss:$16 sps:$4 sm:$0xff]  }
  0x30   : > { %1546 = vmatpush1.bf16.msra.mxu1 %v6330_v55  ;;  %v6345_v2 = vld [vmem:[%s10066_s4 + $0x68] ss:$16 sps:$4 sm:$0xff]   ;;  %v6348_v3 = vld [vmem:[%s10066_s4 + $0x60] ss:$16 sps:$4 sm:$0xff]   ;;  %v6349_v4 = vld [vmem:[%s10066_s4 + $0x44] ss:$16 sps:$4 sm:$0xff]  }
  0x31   : > { %1547 = vmatprep.subr.bf16.mxu1 %v6331_v56  ;;  %v6353_v5 = vld [vmem:[%s10066_s4 + $0x4c] ss:$16 sps:$4 sm:$0xff]   ;;  %v6351_v6 = vld [vmem:[%s10066_s4 + $0x48] ss:$16 sps:$4 sm:$0xff]   ;;  %s5633_s21 = sshll.u32 %s7106_s10, 3  ;;  %s6141_s14 = sshll.u32 %s6939_s30, 5 }
  0x32   : > { %710 = vmatpush1.bf16.msra.mxu0 %v6267_v14  ;;  %s7272_s20 = scalar_lea.vmem %s10062_s0, %s5633_s21  ;;  %s6137_s16 = sshll.u32 %s6943_s9, 6 }
  0x33   : > { %711 = vmatprep.subr.bf16.mxu0 %v6268_v15  ;;  %v377_v7 = vld [vmem:[%s7272_s20] sm:$0xff]  ;;  %v378_v9 = vld [vmem:[%s7272_s20 + $0x8] sm:$0xff]  ;;  %v379_v12 = vld [vmem:[%s7272_s20 + $0x10] sm:$0xff]  ;;  %s5515_s26 = sadd.s32 %s6141_s14, %s6137_s16  ;;  %s5518_s9 = sshll.u32 %s9899_s13, 4  ;;  %s10004_s9 = int_to_ptr.vmem [resolvable:$true] %s5518_s9 }
  0x34   : > { %1548 = vmatpush1.bf16.msra.mxu1 %v6336_v59  ;;  %v380_v15 = vld [vmem:[%s7272_s20 + $0x18] sm:$0xff]  ;;  %v387_v48 = vld [vmem:[%s7272_s20 + $0x50] sm:$0xff]  ;;  %s6138_s30 = sshll.u32 %s5515_s26, 7  ;;  %s10011_s17 = scalar_lea.sflag [#allocation3], %s351_s24 }
  0x35   : > { %1549 = vmatprep.subr.bf16.mxu1 %v6337_v60  ;;  %v388_v52 = vld [vmem:[%s7272_s20 + $0x58] sm:$0xff]  ;;  %v6360_v59 = vld [vmem:[%s10066_s4 + $0x20] ss:$16 sps:$4 sm:$0xff]   ;;  %s10002_s11 = scalar_lea.hbm %s10070_s8, %s6138_s30  ;;  %s6863_s10 = scalar_lea.vmem %s10004_s9, 4096 }
  0x36   : > { %712 = vmatpush1.bf16.msra.mxu0 %v6270_v16  ;;  %p6864_p0 = scmp.ne.s32.totalorder %s10004_s9, %s6863_s10  ;;  %s6957_s22 = smov [#allocation2]  }
  0x37   : > { %713 = vmatprep.subr.bf16.mxu0 %v6271_v17  ;;  %s6867_s15 = sshll.u32 %s6957_s22, 4  ;;  %s6868_s15 = int_to_ptr.vmem [resolvable:$false] %s6867_s15 }
  0x38   : > { %1550 = vmatpush1.bf16.msra.mxu1 %v6342_v63  ;;  %p6865_p1 = pnand %p6864_p0, %p7056_p3  ;;  %s6869_s25 = scalar_lea.vmem %s6868_s15, 8192 }
  0x39   : > { %1551 = vmatprep.subr.bf16.mxu1 %v6343_v0  ;;  %p6870_p4 = scmp.lt.s32.totalorder %s10004_s9, %s6868_s15  ;;  %p6871_p5 = scmp.lt.s32.totalorder %s6869_s25, %s6863_s10 }
  0x3a   : > { %714 = vmatpush2.bf16.msra.mxu0 %v6273_v18  ;;  %p6866_p2 = pneg %p6865_p1 }
  0x3b   : > { %715 = vmatprep.subr.bf16.mxu0 %v6274_v19  ;;  %p6872_p6 = por %p6871_p5, %p6870_p4 }
  0x3c   : > { %1552 = vmatpush1.bf16.msra.mxu1 %v6348_v3  ;;  %v6365_v3 = vld [vmem:[%s10066_s4 + $0xc] ss:$16 sps:$4 sm:$0xff]  }
  0x3d   : > { %1553 = vmatprep.subr.bf16.mxu1 %v6349_v4  ;;  %p6873_p7 = pnand %p6872_p6, %p6866_p2 }
  0x3e   : > { %716 = vmatpush2.bf16.msra.mxu0 %v6276_v20  ;;  %v381_v20 = vld [vmem:[%s7272_s20 + $0x20] sm:$0xff] }
  0x3f   : > { %717 = vmatprep.subr.bf16.mxu0 %v6277_v21 }
  0x42   : > { %718 = vmatpush2.bf16.msra.mxu0 %v6279_v22 }
  0x43   : > { %719 = vmatprep.subr.bf16.mxu0 %v6280_v23 }
  0x46   : > { %720 = vmatpush2.bf16.msra.mxu0 %v6282_v24  ;;  %v382_v24 = vld [vmem:[%s7272_s20 + $0x28] sm:$0xff] }
  0x47   : > { %721 = vmatprep.subr.bf16.mxu0 %v6283_v25 }
  0x4a   : > { %722 = vmatpush2.bf16.msra.mxu0 %v6285_v26 }
  0x4b   : > { %723 = vmatprep.subr.bf16.mxu0 %v6286_v27 }
  0x4e   : > { %724 = vmatpush2.bf16.msra.mxu0 %v6288_v28 }
  0x4f   : > { %725 = vmatprep.subr.bf16.mxu0 %v6289_v29  ;;  %v383_v29 = vld [vmem:[%s7272_s20 + $0x30] sm:$0xff] }
  0x52   : > { %726 = vmatpush2.bf16.msra.mxu0 %v6291_v30 }
  0x53   : > { %727 = vmatprep.subr.bf16.mxu0 %v6292_v31 }
  0x56   : > { %728 = vmatpush2.bf16.msra.mxu0 %v6294_v32 }
  0x57   : > { %1656 = vmatprep.subr.bf16.mxu0 %v6323_v50 }
  0x59   : > { %730 = vmatmul.mubr.bf16.vlgmr.msra.gmra.mxu0 %v6295_v33  ;;  %v384_v33 = vld [vmem:[%s7272_s20 + $0x38] sm:$0xff] }
  0x5a   : > { %739 = vmatprep.mubr.bf16.mxu0 %v6298_v34  ;;  %1657 = vmatpush1.bf16.msra.mxu0 %v6321_v49 }
  0x5b   : > { %1658 = vmatprep.subr.bf16.mxu0 %v6329_v53  ;;  %v6355_v53 = vld [vmem:[%s10066_s4 + $0x24] ss:$16 sps:$4 sm:$0xff]  }
  0x5e   : > { %1659 = vmatpush1.bf16.msra.mxu0 %v6327_v54  ;;  %v6359_v54 = vld [vmem:[%s10066_s4 + $0x2c] ss:$16 sps:$4 sm:$0xff]  }
  0x5f   : > { %1660 = vmatprep.subr.bf16.mxu0 %v6335_v57 }
  0x61   : > { %740 = vmatmul.mubr.bf16.gmra.mxu0 %v6300_v35 }
  0x62   : > { %749 = vmatprep.mubr.bf16.mxu0 %v6301_v36  ;;  %1661 = vmatpush1.bf16.msra.mxu0 %v6333_v58  ;;  %v6357_v58 = vld [vmem:[%s10066_s4 + $0x28] ss:$16 sps:$4 sm:$0xff]  }
  0x63   : > { %1662 = vmatprep.subr.bf16.mxu0 %v6341_v61  ;;  %v389_v61 = vld [vmem:[%s7272_s20 + $0x60] sm:$0xff] }
  0x66   : > { %1663 = vmatpush1.bf16.msra.mxu0 %v6339_v62 }
  0x67   : > { %1664 = vmatprep.subr.bf16.mxu0 %v6347_v1  ;;  %v390_v1 = vld [vmem:[%s7272_s20 + $0x68] sm:$0xff] }
  0x69   : > { %750 = vmatmul.mubr.bf16.gmra.mxu0 %v6303_v37 }
  0x6a   : > { %759 = vmatprep.mubr.bf16.mxu0 %v6304_v38  ;;  %1665 = vmatpush1.bf16.msra.mxu0 %v6345_v2  ;;  %v385_v38 = vld [vmem:[%s7272_s20 + $0x40] sm:$0xff] }
  0x6b   : > { %1666 = vmatprep.subr.bf16.mxu0 %v6353_v5  ;;  %v6361_v2 = vld [vmem:[%s10066_s4 + $0x4] ss:$16 sps:$4 sm:$0xff]  }
  0x6e   : > { %1667 = vmatpush1.bf16.msra.mxu0 %v6351_v6 }
  0x6f   : > { %1668 = vmatprep.subr.bf16.mxu0 %v6359_v54  ;;  %v6379_v54 = vld [vmem:[%s10066_s4 + $0x1a4] ss:$16 sps:$4 sm:$0xff]  }
  0x71   : > { %760 = vmatmul.mubr.bf16.gmra.mxu0 %v6306_v39 }
  0x72   : > { %769 = vmatprep.mubr.bf16.mxu0 %v6307_v40  ;;  %1669 = vmatpush1.bf16.msra.mxu0 %v6357_v58  ;;  %v397_v58 = vld [vmem:[%s7272_s20 + $0xa0] sm:$0xff] }
  0x73   : > { %1670 = vmatprep.subr.bf16.mxu0 %v6365_v3 }
  0x79   : > { %770 = vmatmul.mubr.bf16.gmra.mxu0 %v6309_v41 }
  0x7a   : > { %779 = vmatprep.mubr.bf16.mxu0 %v6310_v42  ;;  %v386_v42 = vld [vmem:[%s7272_s20 + $0x48] sm:$0xff] }
  0x81   : > { %780 = vmatmul.mubr.bf16.gmra.mxu0 %v6312_v43 }
  0x82   : > { %789 = vmatprep.mubr.bf16.mxu0 %v6313_v44 }
  0x89   : > { %790 = vmatmul.mubr.bf16.gmra.mxu0 %v6315_v45 }
  0x8a   : > { %799 = vmatprep.mubr.bf16.mxu0 %v6316_v46  ;;  %v6354_v46 = vld [vmem:[%s10066_s4 + $0x40] ss:$16 sps:$4 sm:$0xff]  }
  0x8b   : > { %1554 = vmatpush1.bf16.msra.mxu1 %v6354_v46 }
  0x8c   : > { %1555 = vmatprep.subr.bf16.mxu1 %v6355_v53 }
  0x8f   : > { %1556 = vmatpush1.bf16.msra.mxu1 %v6360_v59  ;;  %v6381_v59 = vld [vmem:[%s10066_s4 + $0x1a8] ss:$16 sps:$4 sm:$0xff]  }
  0x90   : > { %1557 = vmatprep.subr.bf16.mxu1 %v6361_v2 }
  0x91   : > { %800 = vmatmul.mubr.bf16.gmra.mxu0 %v6318_v47 }
 0x119   : > { %v731_v8 = vpop.f32.mrf.mxu0 }
 0x11a   : > { %v7276_v10 = vadd.f32 %v731_v8, %v377_v7  ;;  %v6363_v7 = vld [vmem:[%s10066_s4 + $0x8] ss:$16 sps:$4 sm:$0xff]   ;;  %v6366_v8 = vld [vmem:[%s10066_s4] ss:$16 sps:$4 sm:$0xff]  }
 0x11b   : > { %v733_v11 = vpop.f32.mrf.mxu0  ;;  %1558 = vmatpush1.bf16.msra.mxu1 %v6366_v8  ;;  %1671 = vmatpush1.bf16.msra.mxu0 %v6363_v7  ;;  %v6389_v7 = vld [vmem:[%s10066_s4 + $0x18c] ss:$16 sps:$4 sm:$0xff]  }
 0x11c   : > { %10153 = vst [vmem:[#allocation9_spill] sm:$0xff] %v7276_v10  ;;  %v7279_v13 = vadd.f32 %v733_v11, %v378_v9  ;;  %v842_v17 = vmul.f32 %v7276_v10, %v7276_v10  ;;  %v391_v11 = vld [vmem:[%s7272_s20 + $0x70] sm:$0xff] }
 0x11d   : > { %v735_v14 = vpop.f32.mrf.mxu0 }
 0x11e   : > { %10154 = vst [vmem:[#allocation10_spill] sm:$0xff] %v7279_v13  ;;  %v7282_v16 = vadd.f32 %v735_v14, %v379_v12  ;;  %v843_v18 = vmul.f32 %v7279_v13, %v7279_v13 }
 0x11f   : > { %v737_v19 = vpop.f32.mrf.mxu0 }
 0x120   : > { %10155 = vst [vmem:[#allocation11_spill] sm:$0xff] %v7282_v16  ;;  %v7289_v21 = vadd.f32 %v737_v19, %v380_v15  ;;  %v874_v22 = vadd.f32 %v843_v18, %v842_v17  ;;  %v844_v26 = vmul.f32 %v7282_v16, %v7282_v16  ;;  %v392_v17 = vld [vmem:[%s7272_s20 + $0x78] sm:$0xff]  ;;  %v6367_v18 = vld [vmem:[%s10066_s4 + $0x1e4] ss:$16 sps:$4 sm:$0xff]  }
 0x121   : > { %v741_v23 = vpop.f32.mrf.mxu0  ;;  %v6371_v19 = vld [vmem:[%s10066_s4 + $0x1ec] ss:$16 sps:$4 sm:$0xff]   ;;  %1559 = vmatprep.subr.bf16.mxu1 %v6367_v18 }
 0x122   : > { %10156 = vst [vmem:[#allocation12_spill] sm:$0xff] %v7289_v21  ;;  %v7292_v25 = vadd.f32 %v741_v23, %v381_v20  ;;  %875 = vadd.xlane.f32.xlu0 %v874_v22  ;;  %v845_v27 = vmul.f32 %v7289_v21, %v7289_v21  ;;  %1672 = vmatprep.subr.bf16.mxu0 %v6371_v19  ;;  %v400_v19 = vld [vmem:[%s7272_s20 + $0xb8] sm:$0xff] }
 0x123   : > { %v743_v28 = vpop.f32.mrf.mxu0 }
 0x124   : > { %10157 = vst [vmem:[#allocation13_spill] sm:$0xff] %v7292_v25  ;;  %v7299_v30 = vadd.f32 %v743_v28, %v382_v24  ;;  %v877_v31 = vadd.f32 %v845_v27, %v844_v26  ;;  %v846_v35 = vmul.f32 %v7292_v25, %v7292_v25  ;;  %v6369_v24 = vld [vmem:[%s10066_s4 + $0x1e8] ss:$16 sps:$4 sm:$0xff]   ;;  %v6372_v26 = vld [vmem:[%s10066_s4 + $0x1e0] ss:$16 sps:$4 sm:$0xff]  }
 0x125   : > { %v745_v32 = vpop.f32.mrf.mxu0  ;;  %v393_v28 = vld [vmem:[%s7272_s20 + $0x80] sm:$0xff]  ;;  %1560 = vmatpush2.bf16.msra.mxu1 %v6372_v26  ;;  %1673 = vmatpush2.bf16.msra.mxu0 %v6369_v24 }
 0x126   : > { %10158 = vst [vmem:[#allocation14_spill] sm:$0xff] %v7299_v30  ;;  %v7302_v34 = vadd.f32 %v745_v32, %v383_v29  ;;  %878 = vadd.xlane.f32.xlu0 %v877_v31  ;;  %v847_v36 = vmul.f32 %v7299_v30, %v7299_v30  ;;  %v6391_v26 = vld [vmem:[%s10066_s4 + $0x164] ss:$16 sps:$4 sm:$0xff]  }
 0x127   : > { %v747_v37 = vpop.f32.mrf.mxu0 }
 0x128   : > { %10159 = vst [vmem:[#allocation15_spill] sm:$0xff] %v7302_v34  ;;  %v7309_v39 = vadd.f32 %v747_v37, %v384_v33  ;;  %v880_v40 = vadd.f32 %v847_v36, %v846_v35  ;;  %v848_v44 = vmul.f32 %v7302_v34, %v7302_v34  ;;  %v394_v33 = vld [vmem:[%s7272_s20 + $0x88] sm:$0xff]  ;;  %v6373_v35 = vld [vmem:[%s10066_s4 + $0x1c4] ss:$16 sps:$4 sm:$0xff]  }
 0x129   : > { %v751_v41 = vpop.f32.mrf.mxu0  ;;  %v6377_v36 = vld [vmem:[%s10066_s4 + $0x1cc] ss:$16 sps:$4 sm:$0xff]   ;;  %1561 = vmatprep.subr.bf16.mxu1 %v6373_v35 }
 0x12a   : > { %10160 = vst [vmem:[#allocation16_spill] sm:$0xff] %v7309_v39  ;;  %v7312_v43 = vadd.f32 %v751_v41, %v385_v38  ;;  %881 = vadd.xlane.f32.xlu1 %v880_v40  ;;  %v849_v45 = vmul.f32 %v7309_v39, %v7309_v39  ;;  %v6375_v41 = vld [vmem:[%s10066_s4 + $0x1c8] ss:$16 sps:$4 sm:$0xff]   ;;  %1674 = vmatprep.subr.bf16.mxu0 %v6377_v36 }
 0x12b   : > { %v753_v47 = vpop.f32.mrf.mxu0  ;;  %1675 = vmatpush2.bf16.msra.mxu0 %v6375_v41 }
 0x12c   : > { %10161 = vst [vmem:[#allocation17_spill] sm:$0xff] %v7312_v43  ;;  %v7322_v49 = vadd.f32 %v753_v47, %v386_v42  ;;  %v883_v50 = vadd.f32 %v849_v45, %v848_v44  ;;  %v850_v56 = vmul.f32 %v7312_v43, %v7312_v43  ;;  %v395_v44 = vld [vmem:[%s7272_s20 + $0x90] sm:$0xff] }
 0x12d   : > { %v755_v51 = vpop.f32.mrf.mxu0  ;;  %v6378_v45 = vld [vmem:[%s10066_s4 + $0x1c0] ss:$16 sps:$4 sm:$0xff]  }
 0x12e   : > { %10162 = vst [vmem:[#allocation18_spill] sm:$0xff] %v7322_v49  ;;  %v7331_v55 = vadd.f32 %v755_v51, %v387_v48  ;;  %884 = vadd.xlane.f32.xlu1 %v883_v50  ;;  %v851_v57 = vmul.f32 %v7322_v49, %v7322_v49  ;;  %v396_v50 = vld [vmem:[%s7272_s20 + $0x98] sm:$0xff]  ;;  %1562 = vmatpush2.bf16.msra.mxu1 %v6378_v45  ;;  %v6397_v45 = vld [vmem:[%s10066_s4 + $0x144] ss:$16 sps:$4 sm:$0xff]  }
 0x12f   : > { %v757_v60 = vpop.f32.mrf.mxu0  ;;  %1563 = vmatprep.subr.bf16.mxu1 %v6379_v54 }
 0x130   : > { %10163 = vst [vmem:[#allocation19_spill] sm:$0xff] %v7331_v55  ;;  %v7344_v62 = vadd.f32 %v757_v60, %v388_v52  ;;  %v886_v63 = vadd.f32 %v851_v57, %v850_v56  ;;  %v852_v5 = vmul.f32 %v7331_v55, %v7331_v55  ;;  %v6383_v56 = vld [vmem:[%s10066_s4 + $0x1ac] ss:$16 sps:$4 sm:$0xff]   ;;  %v6384_v60 = vld [vmem:[%s10066_s4 + $0x1a0] ss:$16 sps:$4 sm:$0xff]  }
 0x131   : > { %v761_v0 = vpop.f32.mrf.mxu0  ;;  %1676 = vmatprep.subr.bf16.mxu0 %v6383_v56 }
 0x132   : > { %10164 = vst [vmem:[#allocation20_spill] sm:$0xff] %v7344_v62  ;;  %v7353_v4 = vadd.f32 %v761_v0, %v389_v61  ;;  %887 = vadd.xlane.f32.xlu0 %v886_v63  ;;  %v853_v6 = vmul.f32 %v7344_v62, %v7344_v62  ;;  %1564 = vmatpush2.bf16.msra.mxu1 %v6384_v60 }
 0x133   : > { %v763_v9 = vpop.f32.mrf.mxu0  ;;  %1677 = vmatpush2.bf16.msra.mxu0 %v6381_v59 }
 0x134   : > { %10165 = vst [vmem:[#allocation21_spill] sm:$0xff] %v7353_v4  ;;  %v7366_v12 = vadd.f32 %v763_v9, %v390_v1  ;;  %v889_v14 = vadd.f32 %v853_v6, %v852_v5  ;;  %v854_v22 = vmul.f32 %v7353_v4, %v7353_v4  ;;  %v398_v1 = vld [vmem:[%s7272_s20 + $0xa8] sm:$0xff]  ;;  %v6385_v6 = vld [vmem:[%s10066_s4 + $0x184] ss:$16 sps:$4 sm:$0xff]   ;;  %1678 = vmatprep.subr.bf16.mxu0 %v6389_v7  ;;  %v6408_v7 = vld [vmem:[%s10066_s4 + $0x120] ss:$16 sps:$4 sm:$0xff]  }
 0x135   : > { %v765_v15 = vpop.f32.mrf.mxu0  ;;  %v399_v9 = vld [vmem:[%s7272_s20 + $0xb0] sm:$0xff]  ;;  %1565 = vmatprep.subr.bf16.mxu1 %v6385_v6  ;;  %v6405_v6 = vld [vmem:[%s10066_s4 + $0x128] ss:$16 sps:$4 sm:$0xff]  }
 0x136   : > { %10166 = vst [vmem:[#allocation22_spill] sm:$0xff] %v7366_v12  ;;  %v7375_v20 = vadd.f32 %v765_v15, %v391_v11  ;;  %890 = vadd.xlane.f32.xlu1 %v889_v14  ;;  %v855_v23 = vmul.f32 %v7366_v12, %v7366_v12  ;;  %v6387_v11 = vld [vmem:[%s10066_s4 + $0x188] ss:$16 sps:$4 sm:$0xff]   ;;  %v6390_v14 = vld [vmem:[%s10066_s4 + $0x180] ss:$16 sps:$4 sm:$0xff]  }
 0x137   : > { %v767_v27 = vpop.f32.mrf.mxu0  ;;  %1566 = vmatpush2.bf16.msra.mxu1 %v6390_v14  ;;  %1679 = vmatpush2.bf16.msra.mxu0 %v6387_v11  ;;  %v406_v14 = vld [vmem:[%s7272_s20 + $0xe8] sm:$0xff] }
 0x138   : > { %10167 = vst [vmem:[#allocation23_spill] sm:$0xff] %v7375_v20  ;;  %v7388_v29 = vadd.f32 %v767_v27, %v392_v17  ;;  %v892_v31 = vadd.f32 %v855_v23, %v854_v22  ;;  %v856_v38 = vmul.f32 %v7375_v20, %v7375_v20  ;;  %v6395_v27 = vld [vmem:[%s10066_s4 + $0x16c] ss:$16 sps:$4 sm:$0xff]   ;;  %1567 = vmatprep.subr.bf16.mxu1 %v6391_v26 }
 0x139   : > { %v771_v32 = vpop.f32.mrf.mxu0  ;;  %1680 = vmatprep.subr.bf16.mxu0 %v6395_v27  ;;  %v407_v27 = vld [vmem:[%s7272_s20 + $0xf0] sm:$0xff] }
 0x13a   : > { %10168 = vst [vmem:[#allocation24_spill] sm:$0xff] %v7388_v29  ;;  %v7397_v37 = vadd.f32 %v771_v32, %v393_v28  ;;  %893 = vadd.xlane.f32.xlu0 %v892_v31  ;;  %v857_v40 = vmul.f32 %v7388_v29, %v7388_v29  ;;  %v401_v31 = vld [vmem:[%s7272_s20 + $0xc0] sm:$0xff]  ;;  %v6393_v32 = vld [vmem:[%s10066_s4 + $0x168] ss:$16 sps:$4 sm:$0xff]  }
 0x13b   : > { %v773_v42 = vpop.f32.mrf.mxu0  ;;  %1681 = vmatpush2.bf16.msra.mxu0 %v6393_v32 }
 0x13c   : > { %10169 = vst [vmem:[#allocation25_spill] sm:$0xff] %v7397_v37  ;;  %v7410_v46 = vadd.f32 %v773_v42, %v394_v33  ;;  %v895_v47 = vadd.f32 %v857_v40, %v856_v38  ;;  %v858_v52 = vmul.f32 %v7397_v37, %v7397_v37  ;;  %v6396_v33 = vld [vmem:[%s10066_s4 + $0x160] ss:$16 sps:$4 sm:$0xff]   ;;  %v402_v40 = vld [vmem:[%s7272_s20 + $0xc8] sm:$0xff] }
 0x13d   : > { %v775_v48 = vpop.f32.mrf.mxu0  ;;  %1568 = vmatpush2.bf16.msra.mxu1 %v6396_v33 }
 0x13e   : > { %10170 = vst [vmem:[#allocation26_spill] sm:$0xff] %v7410_v46  ;;  %v7413_v51 = vadd.f32 %v775_v48, %v395_v44  ;;  %896 = vadd.xlane.f32.xlu1 %v895_v47  ;;  %v859_v53 = vmul.f32 %v7410_v46, %v7410_v46  ;;  %v6401_v47 = vld [vmem:[%s10066_s4 + $0x14c] ss:$16 sps:$4 sm:$0xff]   ;;  %1569 = vmatprep.subr.bf16.mxu1 %v6397_v45 }
 0x13f   : > { %v777_v57 = vpop.f32.mrf.mxu0  ;;  %1682 = vmatprep.subr.bf16.mxu0 %v6401_v47 }
 0x140   : > { %10171 = vst [vmem:[#allocation27_spill] sm:$0xff] %v7413_v51  ;;  %v7432_v61 = vadd.f32 %v777_v57, %v396_v50  ;;  %v898_v63 = vadd.f32 %v859_v53, %v858_v52  ;;  %v860_v3 = vmul.f32 %v7413_v51, %v7413_v51  ;;  %v403_v50 = vld [vmem:[%s7272_s20 + $0xd0] sm:$0xff]  ;;  %v6399_v52 = vld [vmem:[%s10066_s4 + $0x148] ss:$16 sps:$4 sm:$0xff]  }
 0x141   : > { %v781_v0 = vpop.f32.mrf.mxu0  ;;  %v6402_v53 = vld [vmem:[%s10066_s4 + $0x140] ss:$16 sps:$4 sm:$0xff]   ;;  %1683 = vmatpush2.bf16.msra.mxu0 %v6399_v52 }
 0x142   : > { %10172 = vst [vmem:[#allocation28_spill] sm:$0xff] %v7432_v61  ;;  %v7435_v2 = vadd.f32 %v781_v0, %v397_v58  ;;  %899 = vadd.xlane.f32.xlu0 %v898_v63  ;;  %v861_v5 = vmul.f32 %v7432_v61, %v7432_v61  ;;  %v404_v58 = vld [vmem:[%s7272_s20 + $0xd8] sm:$0xff]  ;;  %1570 = vmatpush2.bf16.msra.mxu1 %v6402_v53  ;;  %v6403_v0 = vld [vmem:[%s10066_s4 + $0x124] ss:$16 sps:$4 sm:$0xff]  }
 0x143   : > { %v783_v8 = vpop.f32.mrf.mxu0  ;;  %1571 = vmatprep.subr.bf16.mxu1 %v6403_v0  ;;  %v7579_v0 = vld [vmem:[%s10067_s5 + $0x5e0] sm:$0xff] }
 0x144   : > { %10173 = vst [vmem:[#allocation29_spill] sm:$0xff] %v7435_v2  ;;  %v7454_v15 = vadd.f32 %v783_v8, %v398_v1  ;;  %v901_v17 = vadd.f32 %v861_v5, %v860_v3  ;;  %v862_v23 = vmul.f32 %v7435_v2, %v7435_v2  ;;  %v6407_v1 = vld [vmem:[%s10066_s4 + $0x12c] ss:$16 sps:$4 sm:$0xff]   ;;  %v405_v5 = vld [vmem:[%s7272_s20 + $0xe0] sm:$0xff] }
 0x145   : > { %v785_v18 = vpop.f32.mrf.mxu0  ;;  %1684 = vmatprep.subr.bf16.mxu0 %v6407_v1 }
 0x146   : > { %10174 = vst [vmem:[#allocation30_spill] sm:$0xff] %v7454_v15  ;;  %v7457_v22 = vadd.f32 %v785_v18, %v399_v9  ;;  %902 = vadd.xlane.f32.xlu1 %v901_v17  ;;  %v863_v24 = vmul.f32 %v7454_v15, %v7454_v15  ;;  %1572 = vmatpush2.bf16.msra.mxu1 %v6408_v7 }
 0x147   : > { %v787_v28 = vpop.f32.mrf.mxu0  ;;  %1685 = vmatpush2.bf16.msra.mxu0 %v6405_v6 }
 0x148   : > { %10175 = vst [vmem:[#allocation31_spill] sm:$0xff] %v7457_v22  ;;  %v7476_v35 = vadd.f32 %v787_v28, %v400_v19  ;;  %v904_v36 = vadd.f32 %v863_v24, %v862_v23  ;;  %v864_v42 = vmul.f32 %v7457_v22, %v7457_v22  ;;  %v6409_v23 = vld [vmem:[%s10066_s4 + $0x104] ss:$16 sps:$4 sm:$0xff]   ;;  %v6413_v24 = vld [vmem:[%s10066_s4 + $0x10c] ss:$16 sps:$4 sm:$0xff]  }
 0x149   : > { %v791_v38 = vpop.f32.mrf.mxu0  ;;  %v6411_v28 = vld [vmem:[%s10066_s4 + $0x108] ss:$16 sps:$4 sm:$0xff]   ;;  %1573 = vmatprep.subr.bf16.mxu1 %v6409_v23  ;;  %1686 = vmatprep.subr.bf16.mxu0 %v6413_v24  ;;  %v1066_v23 = vld [vmem:[%s10065_s3] sm:$0x3] }
 0x14a   : > { %10176 = vst [vmem:[#allocation32_spill] sm:$0xff] %v7476_v35  ;;  %v7479_v41 = vadd.f32 %v791_v38, %v401_v31  ;;  %905 = vadd.xlane.f32.xlu0 %v904_v36  ;;  %v865_v44 = vmul.f32 %v7476_v35, %v7476_v35  ;;  %v6414_v31 = vld [vmem:[%s10066_s4 + $0x100] ss:$16 sps:$4 sm:$0xff]   ;;  %v408_v38 = vld [vmem:[%s7272_s20 + $0xf8] sm:$0xff] }
 0x14b   : > { %v793_v48 = vpop.f32.mrf.mxu0  ;;  %1574 = vmatpush2.bf16.msra.mxu1 %v6414_v31  ;;  %1687 = vmatpush2.bf16.msra.mxu0 %v6411_v28 }
 0x14c   : > { %10177 = vst [vmem:[#allocation33_spill] sm:$0xff] %v7479_v41  ;;  %v7498_v54 = vadd.f32 %v793_v48, %v402_v40  ;;  %v907_v56 = vadd.f32 %v865_v44, %v864_v42  ;;  %v866_v60 = vmul.f32 %v7479_v41, %v7479_v41 }
 0x14d   : > { %v795_v57 = vpop.f32.mrf.mxu0 }
 0x14e   : > { %10178 = vst [vmem:[#allocation34_spill] sm:$0xff] %v7498_v54  ;;  %v7501_v59 = vadd.f32 %v795_v57, %v403_v50  ;;  %908 = vadd.xlane.f32.xlu1 %v907_v56  ;;  %v867_v63 = vmul.f32 %v7498_v54, %v7498_v54  ;;  %v7560_v56 = vld [vmem:[%s10067_s5 + $0x1c0] sm:$0xff] }
 0x14f   : > { %v797_v3 = vpop.f32.mrf.mxu0  ;;  %v7565_v57 = vld [vmem:[%s10067_s5 + $0x1e0] sm:$0xff] }
 0x150   : > { %10179 = vst [vmem:[#allocation35_spill] sm:$0xff] %v7501_v59  ;;  %v7520_v8 = vadd.f32 %v797_v3, %v404_v58  ;;  %v910_v9 = vadd.f32 %v867_v63, %v866_v60  ;;  %v868_v18 = vmul.f32 %v7501_v59, %v7501_v59  ;;  %v7570_v58 = vld [vmem:[%s10067_s5 + $0x5c0] sm:$0xff]  ;;  %v5807_v63 = vcombine.high %v7560_v56, %v7565_v57 }
 0x151   : > { %v801_v11 = vpop.f32.mrf.mxu0  ;;  %v5935_v3 = vcombine.high %v7570_v58, %v7579_v0  ;;  %v7675_v60 = vld [vmem:[%s10067_s5 + $0x180] sm:$0xff] }
 0x152   : > { %10180 = vst [vmem:[#allocation36_spill] sm:$0xff] %v7520_v8  ;;  %v7523_v17 = vadd.f32 %v801_v11, %v405_v5  ;;  %911 = vadd.xlane.f32.xlu0 %v910_v9  ;;  %v869_v19 = vmul.f32 %v7520_v8, %v7520_v8  ;;  %3379 = vmatprep.subr.bf16.mxu1 %v5807_v63  ;;  %v1069_v9 = vlaneseq }
 0x153   : > { %v803_v26 = vpop.f32.mrf.mxu0  ;;  %3492 = vmatprep.subr.bf16.mxu0 %v5935_v3 }
 0x154   : > { %10181 = vst [vmem:[#allocation37_spill] sm:$0xff] %v7523_v17  ;;  %v7542_v32 = vadd.f32 %v803_v26, %v406_v14  ;;  %v913_v33 = vadd.f32 %v869_v19, %v868_v18  ;;  %v870_v42 = vmul.f32 %v7523_v17, %v7523_v17  ;;  %v7585_v18 = vshrl.u32 %v1069_v9, 7 }
 0x155   : > { %v805_v36 = vpop.f32.mrf.mxu0 }
 0x156   : > { %10182 = vst [vmem:[#allocation38_spill] sm:$0xff] %v7542_v32  ;;  %v7545_v40 = vadd.f32 %v805_v36, %v407_v27  ;;  %914 = vadd.xlane.f32.xlu1 %v913_v33  ;;  %v871_v44 = vmul.f32 %v7542_v32, %v7542_v32  ;;  %10185 = vst [vmem:[#allocation41_spill] sm:$0xff] %v7585_v18  ;;  %v1067_v33 = vmul.f32 16.0, %v1066_v23  ;;  %v10076_v36 = vsub.s32 0, %v7585_v18 }
 0x157   : > { %v807_v45 = vpop.f32.mrf.mxu0 }
 0x158   : > { %10183 = vst [vmem:[#allocation39_spill] sm:$0xff] %v7545_v40  ;;  %v7551_v47 = vadd.f32 %v807_v45, %v408_v38  ;;  %v916_v48 = vadd.f32 %v871_v44, %v870_v42  ;;  %v872_v50 = vmul.f32 %v7545_v40, %v7545_v40  ;;  %v10075_v38 = vsub.s32 1, %v7585_v18 }
 0x159   : > { %v7600_v63 = vrot.slane %v1067_v33, %v10076_v36 }
 0x15a   : > { %10184 = vst [vmem:[#allocation40_spill] sm:$0xff] %v7551_v47  ;;  %917 = vadd.xlane.f32.xlu0 %v916_v48  ;;  %v873_v52 = vmul.f32 %v7551_v47, %v7551_v47  ;;  %v7604_v3 = vrot.slane %v1067_v33, %v10075_v38 }
 0x15c   : > { %v919_v53 = vadd.f32 %v873_v52, %v872_v50  ;;  %v7659_v38 = vmul.f32 %v7604_v3, %v7344_v62  ;;  %v7669_v36 = vmul.f32 %v7604_v3, %v7366_v12  ;;  %v7702_v62 = vld [vmem:[%s10067_s5 + $0x5a0] sm:$0xff] }
 0x15e   : > { %920 = vadd.xlane.f32.xlu1 %v919_v53 }
 0x1ab   : > { %v876_v5 = vpop.xlane.xlu0 %875 }
 0x1ac   : > { %6511 = vrsqrt.f32 %v876_v5  ;;  %vm924_vm0 = vcmp.eq.f32.partialorder %v876_v5, inf  ;;  %v927_v24 = vand.u32 2147483648, %v876_v5  ;;  %vm926_vm1 = vcmp.eq.f32.partialorder %v876_v5, 0.0 }
 0x1af   : > { %v879_v6 = vpop.xlane.xlu0 %878 }
 0x1b0   : > { %6513 = vrsqrt.f32 %v879_v6  ;;  %vm931_vm2 = vcmp.eq.f32.partialorder %v879_v6, inf  ;;  %v934_v45 = vand.u32 2147483648, %v879_v6  ;;  %vm933_vm3 = vcmp.eq.f32.partialorder %v879_v6, 0.0 }
 0x1b3   : > { %v882_v7 = vpop.xlane.xlu1 %881 }
 0x1b4   : > { %6515 = vrsqrt.f32 %v882_v7  ;;  %vm938_vm4 = vcmp.eq.f32.partialorder %v882_v7, inf  ;;  %vm940_vm5 = vcmp.eq.f32.partialorder %v882_v7, 0.0 }
 0x1b7   : > { %v885_v11 = vpop.xlane.xlu1 %884 }
 0x1b8   : > { %6517 = vrsqrt.f32 %v885_v11  ;;  %vm945_vm6 = vcmp.eq.f32.partialorder %v885_v11, inf  ;;  %vm947_vm7 = vcmp.eq.f32.partialorder %v885_v11, 0.0 }
 0x1b9   : > { %v6512_v14 = vpop.eup %6511 }
 0x1ba   : > { %v923_v19 = vmul.f32 %v6512_v14, %v876_v5  ;;  %v941_v14 = vand.u32 2147483648, %v882_v7 }
 0x1bb   : > { %v7590_v26 = vpop.xlane.xlu0 %887 }
 0x1bc   : > { %v925_v27 = vsel %vm924_vm0, %v876_v5, %v923_v19  ;;  %6519 = vrsqrt.f32 %v7590_v26  ;;  %vm952_vm8 = vcmp.eq.f32.partialorder %v7590_v26, inf  ;;  %vm954_vm9 = vcmp.eq.f32.partialorder %v7590_v26, 0.0 }
 0x1bd   : > { %v6514_v28 = vpop.eup %6513  ;;  %v928_v31 = vsel %vm926_vm1, %v927_v24, %v925_v27  ;;  %v7611_v27 = vmul.f32 %v7600_v63, %v7276_v10 }
 0x1be   : > { %v930_v42 = vmul.f32 %v6514_v28, %v879_v6  ;;  %v1034_v44 = vadd.f32 1.1920929e-07, %v928_v31  ;;  %v7615_v28 = vmul.f32 %v7604_v3, %v7279_v13 }
 0x1bf   : > { %v7595_v48 = vpop.xlane.xlu1 %890 }
 0x1c0   : > { %v932_v50 = vsel %vm931_vm2, %v879_v6, %v930_v42  ;;  %6521 = vrsqrt.f32 %v7595_v48  ;;  %v1081_v42 = vmul.f32 %v7600_v63, %v7282_v16  ;;  %vm959_vm10 = vcmp.eq.f32.partialorder %v7595_v48, inf }
 0x1c1   : > { %v6516_v52 = vpop.eup %6515  ;;  %v935_v53 = vsel %vm933_vm3, %v934_v45, %v932_v50  ;;  %6523 = vrcp.f32 %v1034_v44  ;;  %v948_v44 = vand.u32 2147483648, %v885_v11  ;;  %v1082_v45 = vmul.f32 %v7604_v3, %v7289_v21 }
 0x1c2   : > { %v1035_v5 = vadd.f32 1.1920929e-07, %v935_v53  ;;  %v937_v9 = vmul.f32 %v6516_v52, %v882_v7  ;;  %v7625_v50 = vmul.f32 %v7600_v63, %v7292_v25  ;;  %vm961_vm11 = vcmp.eq.f32.partialorder %v7595_v48, 0.0 }
 0x1c3   : > { %v7606_v19 = vpop.xlane.xlu0 %893 }
 0x1c4   : > { %6525 = vrcp.f32 %v1035_v5  ;;  %v939_v6 = vsel %vm938_vm4, %v882_v7, %v937_v9  ;;  %v7629_v5 = vmul.f32 %v7604_v3, %v7299_v30  ;;  %v7633_v9 = vmul.f32 %v7600_v63, %v7302_v34 }
 0x1c5   : > { %v6518_v23 = vpop.eup %6517  ;;  %v942_v24 = vsel %vm940_vm5, %v941_v14, %v939_v6  ;;  %6527 = vrsqrt.f32 %v7606_v19  ;;  %v7638_v6 = vmul.f32 %v7604_v3, %v7309_v39  ;;  %vm966_vm12 = vcmp.eq.f32.partialorder %v7606_v19, inf }
 0x1c6   : > { %v1036_v31 = vadd.f32 1.1920929e-07, %v942_v24  ;;  %v944_v33 = vmul.f32 %v6518_v23, %v885_v11  ;;  %v7642_v23 = vmul.f32 %v7600_v63, %v7312_v43  ;;  %v962_v43 = vand.u32 2147483648, %v7595_v48 }
 0x1c7   : > { %v7619_v7 = vpop.xlane.xlu1 %896  ;;  %vm968_vm13 = vcmp.eq.f32.partialorder %v7606_v19, 0.0 }
 0x1c8   : > { %6529 = vrcp.f32 %v1036_v31  ;;  %v946_v52 = vsel %vm945_vm6, %v885_v11, %v944_v33  ;;  %v7647_v31 = vmul.f32 %v7604_v3, %v7322_v49  ;;  %v7651_v33 = vmul.f32 %v7600_v63, %v7331_v55 }
 0x1c9   : > { %v6520_v53 = vpop.eup %6519  ;;  %v949_v14 = vsel %vm947_vm7, %v948_v44, %v946_v52  ;;  %6531 = vrsqrt.f32 %v7619_v7  ;;  %v955_v44 = vand.u32 2147483648, %v7590_v26  ;;  %vm973_vm14 = vcmp.eq.f32.partialorder %v7619_v7, inf }
 0x1ca   : > { %v1037_v11 = vadd.f32 1.1920929e-07, %v949_v14  ;;  %v951_v24 = vmul.f32 %v6520_v53, %v7590_v26  ;;  %v7665_v14 = vmul.f32 %v7600_v63, %v7353_v4  ;;  %v7697_v4 = vld [vmem:[%s10067_s5 + $0x580] sm:$0xff]  ;;  %vm975_vm15 = vcmp.eq.f32.partialorder %v7619_v7, 0.0 }
 0x1cb   : > { %v7655_v52 = vpop.xlane.xlu0 %899  ;;  %v5927_v18 = vcombine.high %v7697_v4, %v7702_v62 }
 0x1cc   : > { %6533 = vrcp.f32 %v1037_v11  ;;  %v953_v53 = vsel %vm952_vm8, %v7590_v26, %v951_v24  ;;  %v7680_v26 = vld [vmem:[%s10067_s5 + $0x1a0] sm:$0xff]  ;;  %v7684_v24 = vmul.f32 %v7600_v63, %v7375_v20  ;;  %v7706_v20 = vmul.f32 %v7604_v3, %v7410_v46 }
 0x1cd   : > { %v956_v1 = vsel %vm954_vm9, %v955_v44, %v953_v53  ;;  %6535 = vrsqrt.f32 %v7655_v52  ;;  %v6522_v11 = vpop.eup %6521  ;;  %v7688_v44 = vmul.f32 %v7604_v3, %v7388_v29  ;;  %v7692_v53 = vmul.f32 %v7600_v63, %v7397_v37 }
 0x1ce   : > { %v1038_v12 = vadd.f32 1.1920929e-07, %v956_v1  ;;  %v7710_v29 = vmul.f32 %v7600_v63, %v7413_v51  ;;  %v7714_v1 = vmul.f32 %v7604_v3, %v7432_v61  ;;  %v958_v37 = vmul.f32 %v6522_v11, %v7595_v48  ;;  %v6524_v49 = vpop.eup %6523 }
 0x1cf   : > { %v7717_v55 = vpop.xlane.xlu1 %902  ;;  %v5799_v51 = vcombine.high %v7675_v60, %v7680_v26  ;;  %v1112_v10 = vmul.f32 %v6524_v49, %v7615_v28  ;;  %v7763_v28 = vld [vmem:[%s10067_s5 + $0x100] sm:$0xff]  ;;  %vm980_vm0 = vcmp.eq.f32.partialorder %v7655_v52, inf  ;;  %vm982_vm1 = vcmp.eq.f32.partialorder %v7655_v52, 0.0 }
 0x1d0   : > { %v960_v34 = vsel %vm959_vm10, %v7595_v48, %v958_v37  ;;  %6537 = vrsqrt.f32 %v7717_v55  ;;  %v1111_v37 = vmul.f32 %v6524_v49, %v7611_v27  ;;  %v7738_v48 = vld [vmem:[%s10067_s5 + $0x140] sm:$0xff]  ;;  %vm987_vm2 = vcmp.eq.f32.partialorder %v7717_v55, inf }
 0x1d1   : > { %v6526_v39 = vpop.eup %6525  ;;  %6539 = vrcp.f32 %v1038_v12  ;;  %v963_v30 = vsel %vm961_vm11, %v962_v43, %v960_v34  ;;  %v7743_v34 = vld [vmem:[%s10067_s5 + $0x160] sm:$0xff]  ;;  %vm989_vm3 = vcmp.eq.f32.partialorder %v7717_v55, 0.0 }
 0x1d2   : > { %v6528_v61 = vpop.eup %6527  ;;  %v1114_v25 = vmul.f32 %v6526_v39, %v1082_v45  ;;  %v1113_v21 = vmul.f32 %v6526_v39, %v1081_v42  ;;  %v1039_v16 = vadd.f32 1.1920929e-07, %v963_v30  ;;  %v969_v30 = vand.u32 2147483648, %v7606_v19  ;;  %v7752_v39 = vld [vmem:[%s10067_s5 + $0x540] sm:$0xff] }
 0x1d3   : > { %v965_v46 = vmul.f32 %v6528_v61, %v7606_v19  ;;  %v7731_v13 = vpop.xlane.xlu0 %905  ;;  %v7757_v43 = vld [vmem:[%s10067_s5 + $0x560] sm:$0xff] }
 0x1d4   : > { %6541 = vrsqrt.f32 %v7731_v13  ;;  %v1144_v61 = vpack.c.bf16 %v1114_v25, %v1112_v10  ;;  %v1143_v27 = vpack.c.bf16 %v1113_v21, %v1111_v37  ;;  %v7768_v42 = vld [vmem:[%s10067_s5 + $0x120] sm:$0xff]  ;;  %v5791_v10 = vcombine.high %v7738_v48, %v7743_v34 }
 0x1d5   : > { %v6530_v49 = vpop.eup %6529  ;;  %6543 = vrcp.f32 %v1039_v16  ;;  %v967_v12 = vsel %vm966_vm12, %v7606_v19, %v965_v46  ;;  %v5919_v37 = vcombine.high %v7752_v39, %v7757_v43  ;;  %v10186_v19 = vcombine.low %v7560_v56, %v7565_v57 }
 0x1d6   : > { %v6532_v45 = vpop.eup %6531  ;;  %v970_v11 = vsel %vm968_vm13, %v969_v30, %v967_v12  ;;  %1575 = vmatprep.mubr.bf16.mxu1 %v1144_v61  ;;  %1688 = vmatprep.mubr.bf16.mxu0 %v1144_v61  ;;  %v976_v30 = vand.u32 2147483648, %v7619_v7  ;;  %v10187_v16 = vcombine.low %v7570_v58, %v7579_v0  ;;  %v1115_v58 = vmul.f32 %v6530_v49, %v7625_v50  ;;  %v7808_v0 = vld [vmem:[%s10067_s5 + $0x500] sm:$0xff] }
 0x1d7   : > { %v1040_v21 = vadd.f32 1.1920929e-07, %v970_v11  ;;  %v972_v25 = vmul.f32 %v6532_v45, %v7619_v7  ;;  %v7777_v46 = vpop.xlane.xlu1 %908  ;;  %1576 = vmatmul.mubr.bf16.vlgmr.msra.gmra.mxu1 %v1143_v27  ;;  %1689 = vmatmul.mubr.bf16.vlgmr.msra.gmra.mxu0 %v1143_v27  ;;  %v1116_v45 = vmul.f32 %v6530_v49, %v7629_v5  ;;  %v5783_v27 = vcombine.high %v7763_v28, %v7768_v42  ;;  %v7813_v5 = vld [vmem:[%s10067_s5 + $0x520] sm:$0xff] }
 0x1d8   : > { %6545 = vrsqrt.f32 %v7777_v46  ;;  %3380 = vmatpush1.bf16.msra.mxu1 %v10186_v19  ;;  %3493 = vmatpush1.bf16.msra.mxu0 %v10187_v16  ;;  %v10188_v49 = vcombine.low %v7675_v60, %v7680_v26  ;;  %v10189_v16 = vcombine.low %v7697_v4, %v7702_v62  ;;  %v7844_v19 = vld [vmem:[%s10067_s5 + $0x4e0] sm:$0xff]  ;;  %v5910_v60 = vcombine.low %v7808_v0, %v7813_v5 }
 0x1d9   : > { %v6534_v12 = vpop.eup %6533  ;;  %v974_v61 = vsel %vm973_vm14, %v7619_v7, %v972_v25  ;;  %3381 = vmatprep.subr.bf16.mxu1 %v5799_v51  ;;  %3494 = vmatprep.subr.bf16.mxu0 %v5927_v18  ;;  %6547 = vrcp.f32 %v1040_v21  ;;  %v983_v51 = vand.u32 2147483648, %v7655_v52  ;;  %v7827_v18 = vld [vmem:[%s10067_s5 + $0xe0] sm:$0xff]  ;;  %v5911_v62 = vcombine.high %v7808_v0, %v7813_v5 }
 0x1da   : > { %v6536_v47 = vpop.eup %6535  ;;  %v977_v11 = vsel %vm975_vm15, %v976_v30, %v974_v61  ;;  %v1118_v40 = vmul.f32 %v6534_v12, %v7638_v6  ;;  %v1117_v25 = vmul.f32 %v6534_v12, %v7633_v9  ;;  %v7839_v21 = vld [vmem:[%s10067_s5 + $0x4c0] sm:$0xff]  ;;  %vm994_vm4 = vcmp.eq.f32.partialorder %v7731_v13, inf }
 0x1db   : > { %v1041_v7 = vadd.f32 1.1920929e-07, %v977_v11  ;;  %v979_v56 = vmul.f32 %v6536_v47, %v7655_v52  ;;  %v7802_v57 = vpop.xlane.xlu0 %911  ;;  %v7822_v47 = vld [vmem:[%s10067_s5 + $0xc0] sm:$0xff]  ;;  %v5902_v61 = vcombine.low %v7839_v21, %v7844_v19  ;;  %vm996_vm5 = vcmp.eq.f32.partialorder %v7731_v13, 0.0 }
 0x1dc   : > { %6549 = vrsqrt.f32 %v7802_v57  ;;  %v1146_v9 = vpack.c.bf16 %v1118_v40, %v1116_v45  ;;  %v1145_v6 = vpack.c.bf16 %v1117_v25, %v1115_v58  ;;  %3382 = vmatpush1.bf16.msra.mxu1 %v10188_v49  ;;  %3495 = vmatpush1.bf16.msra.mxu0 %v10189_v16  ;;  %v5774_v12 = vcombine.low %v7822_v47, %v7827_v18 }
 0x1dd   : > { %6551 = vrcp.f32 %v1041_v7  ;;  %v981_v50 = vsel %vm980_vm0, %v7655_v52, %v979_v56  ;;  %v6538_v40 = vpop.eup %6537  ;;  %3383 = vmatprep.subr.bf16.mxu1 %v5791_v10  ;;  %3496 = vmatprep.subr.bf16.mxu0 %v5919_v37  ;;  %v5775_v10 = vcombine.high %v7822_v47, %v7827_v18  ;;  %v990_v37 = vand.u32 2147483648, %v7717_v55  ;;  %v7960_v47 = vld [vmem:[%s10067_s5] sm:$0xff] }
 0x1de   : > { %v984_v52 = vsel %vm982_vm1, %v983_v51, %v981_v50  ;;  %v6540_v4 = vpop.eup %6539  ;;  %v986_v30 = vmul.f32 %v6538_v40, %v7717_v55  ;;  %1585 = vmatprep.mubr.bf16.mxu1 %v1146_v9  ;;  %1698 = vmatprep.mubr.bf16.mxu0 %v1146_v9  ;;  %v10190_v7 = vcombine.low %v7738_v48, %v7743_v34  ;;  %v997_v50 = vand.u32 2147483648, %v7731_v13  ;;  %v7879_v48 = vld [vmem:[%s10067_s5 + $0x80] sm:$0xff] }
 0x1df   : > { %v1042_v26 = vadd.f32 1.1920929e-07, %v984_v52  ;;  %v7851_v11 = vpop.xlane.xlu1 %914  ;;  %1586 = vmatmul.mubr.bf16.gmra.mxu1 %v1145_v6  ;;  %1699 = vmatmul.mubr.bf16.gmra.mxu0 %v1145_v6  ;;  %v10191_v56 = vcombine.low %v7752_v39, %v7757_v43  ;;  %v5903_v58 = vcombine.high %v7839_v21, %v7844_v19  ;;  %v7884_v34 = vld [vmem:[%s10067_s5 + $0xa0] sm:$0xff]  ;;  %v10192_v19 = vcombine.low %v7763_v28, %v7768_v42 }
 0x1e0   : > { %6553 = vrsqrt.f32 %v7851_v11  ;;  %v988_v25 = vsel %vm987_vm2, %v7717_v55, %v986_v30  ;;  %3384 = vmatpush1.bf16.msra.mxu1 %v10190_v7  ;;  %v1120_v55 = vmul.f32 %v6540_v4, %v7647_v31  ;;  %v7898_v6 = vld [vmem:[%s10067_s5 + $0x4a0] sm:$0xff]  ;;  %v5767_v40 = vcombine.high %v7879_v48, %v7884_v34 }
 0x1e1   : > { %v6542_v45 = vpop.eup %6541  ;;  %3497 = vmatpush1.bf16.msra.mxu0 %v10191_v56  ;;  %v991_v5 = vsel %vm989_vm3, %v990_v37, %v988_v25  ;;  %3385 = vmatprep.subr.bf16.mxu1 %v5783_v27  ;;  %6555 = vrcp.f32 %v1042_v26  ;;  %v7893_v27 = vld [vmem:[%s10067_s5 + $0x480] sm:$0xff]  ;;  %vm1001_vm6 = vcmp.eq.f32.partialorder %v7777_v46, inf  ;;  %v1004_v26 = vand.u32 2147483648, %v7777_v46 }
 0x1e2   : > { %v6544_v0 = vpop.eup %6543  ;;  %v993_v51 = vmul.f32 %v6542_v45, %v7731_v13  ;;  %3498 = vmatprep.subr.bf16.mxu0 %v5911_v62  ;;  %v1043_v39 = vadd.f32 1.1920929e-07, %v991_v5  ;;  %v5895_v28 = vcombine.high %v7893_v27, %v7898_v6  ;;  %v7927_v42 = vld [vmem:[%s10067_s5 + $0x440] sm:$0xff]  ;;  %v5894_v37 = vcombine.low %v7893_v27, %v7898_v6 }
 0x1e3   : > { %v7886_v43 = vpop.xlane.xlu0 %917  ;;  %v1122_v9 = vmul.f32 %v6544_v0, %v7659_v38  ;;  %v1121_v31 = vmul.f32 %v6544_v0, %v7651_v33  ;;  %v1119_v38 = vmul.f32 %v6540_v4, %v7642_v23  ;;  %v7919_v23 = vld [vmem:[%s10067_s5 + $0x60] sm:$0xff]  ;;  %vm1003_vm7 = vcmp.eq.f32.partialorder %v7777_v46, 0.0 }
 0x1e4   : > { %v995_v49 = vsel %vm994_vm4, %v7731_v13, %v993_v51  ;;  %6557 = vrsqrt.f32 %v7886_v43  ;;  %3386 = vmatpush1.bf16.msra.mxu1 %v10192_v19  ;;  %v7914_v13 = vld [vmem:[%s10067_s5 + $0x40] sm:$0xff]  ;;  %vm1008_vm8 = vcmp.eq.f32.partialorder %v7802_v57, inf  ;;  %vm1010_vm9 = vcmp.eq.f32.partialorder %v7802_v57, 0.0 }
 0x1e5   : > { %v6546_v33 = vpop.eup %6545  ;;  %6559 = vrcp.f32 %v1043_v39  ;;  %v998_v16 = vsel %vm996_vm5, %v997_v50, %v995_v49  ;;  %v1148_v21 = vpack.c.bf16 %v1122_v9, %v1120_v55  ;;  %3499 = vmatpush1.bf16.msra.mxu0 %v5910_v60  ;;  %v1147_v4 = vpack.c.bf16 %v1121_v31, %v1119_v38  ;;  %3387 = vmatprep.subr.bf16.mxu1 %v5775_v10  ;;  %v7932_v60 = vld [vmem:[%s10067_s5 + $0x460] sm:$0xff] }
 0x1e6   : > { %v1044_v52 = vadd.f32 1.1920929e-07, %v998_v16  ;;  %v1000_v62 = vmul.f32 %v6546_v33, %v7777_v46  ;;  %3500 = vmatprep.subr.bf16.mxu0 %v5903_v58  ;;  %v5766_v10 = vcombine.low %v7879_v48, %v7884_v34  ;;  %v6548_v45 = vpop.eup %6547  ;;  %v5758_v7 = vcombine.low %v7914_v13, %v7919_v23  ;;  %v7969_v34 = vld [vmem:[%s10067_s5 + $0x20] sm:$0xff] }
 0x1e7   : > { %1595 = vmatprep.mubr.bf16.mxu1 %v1148_v21  ;;  %1708 = vmatprep.mubr.bf16.mxu0 %v1148_v21  ;;  %v7936_v30 = vpop.xlane.xlu1 %920  ;;  %v5759_v0 = vcombine.high %v7914_v13, %v7919_v23  ;;  %v1011_v55 = vand.u32 2147483648, %v7802_v57  ;;  %v1124_v18 = vmul.f32 %v6548_v45, %v7669_v36  ;;  %v7974_v39 = vld [vmem:[%s10067_s5 + $0x400] sm:$0xff]  ;;  %v5751_v33 = vcombine.high %v7960_v47, %v7969_v34 }
 0x1e8   : > { %6561 = vrcp.f32 %v1044_v52  ;;  %v1002_v25 = vsel %vm1001_vm6, %v7777_v46, %v1000_v62  ;;  %1596 = vmatmul.mubr.bf16.gmra.mxu1 %v1147_v4  ;;  %1709 = vmatmul.mubr.bf16.gmra.mxu0 %v1147_v4  ;;  %v5887_v46 = vcombine.high %v7927_v42, %v7932_v60  ;;  %v7979_v36 = vld [vmem:[%s10067_s5 + $0x420] sm:$0xff]  ;;  %vm1015_vm10 = vcmp.eq.f32.partialorder %v7851_v11, inf }
 0x1e9   : > { %v6550_v56 = vpop.eup %6549  ;;  %v1005_v58 = vsel %vm1003_vm7, %v1004_v26, %v1002_v25  ;;  %6563 = vrsqrt.f32 %v7936_v30  ;;  %3388 = vmatpush1.bf16.msra.mxu1 %v5774_v12  ;;  %3501 = vmatpush1.bf16.msra.mxu0 %v5902_v61  ;;  %v1123_v61 = vmul.f32 %v6548_v45, %v7665_v14  ;;  %v7988_v6 = vld [vmem:[%s10067_s5 + $0x3c0] sm:$0xff]  ;;  %v5879_v16 = vcombine.high %v7974_v39, %v7979_v36 }
 0x1ea   : > { %v6552_v5 = vpop.eup %6551  ;;  %v1045_v51 = vadd.f32 1.1920929e-07, %v1005_v58  ;;  %v1007_v50 = vmul.f32 %v6550_v56, %v7802_v57  ;;  %3389 = vmatprep.subr.bf16.mxu1 %v5767_v40  ;;  %3502 = vmatprep.subr.bf16.mxu0 %v5895_v28  ;;  %v7993_v49 = vld [vmem:[%s10067_s5 + $0x3e0] sm:$0xff]  ;;  %v8012_v40 = vmul.f32 %v7600_v63, %v7435_v2  ;;  %v1018_v13 = vand.u32 2147483648, %v7851_v11 }
 0x1eb   : > { %v1126_v12 = vmul.f32 %v6552_v5, %v7688_v44  ;;  %v1125_v48 = vmul.f32 %v6552_v5, %v7684_v24  ;;  %v5886_v24 = vcombine.low %v7927_v42, %v7932_v60  ;;  %v8003_v21 = vld [vmem:[%s10067_s5 + $0x7c0] sm:$0xff]  ;;  %v5750_v23 = vcombine.low %v7960_v47, %v7969_v34 }
 0x1ec   : > { %6565 = vrcp.f32 %v1045_v51  ;;  %v1009_v14 = vsel %vm1008_vm8, %v7802_v57, %v1007_v50  ;;  %v8008_v19 = vld [vmem:[%s10067_s5 + $0x7e0] sm:$0xff]  ;;  %vm1017_vm11 = vcmp.eq.f32.partialorder %v7851_v11, 0.0  ;;  %v5878_v4 = vcombine.low %v7974_v39, %v7979_v36 }
 0x1ed   : > { %v6554_v44 = vpop.eup %6553  ;;  %v1012_v9 = vsel %vm1010_vm9, %v1011_v55, %v1009_v14  ;;  %v1150_v31 = vpack.c.bf16 %v1126_v12, %v1124_v18  ;;  %v1149_v27 = vpack.c.bf16 %v1125_v48, %v1123_v61  ;;  %3390 = vmatpush1.bf16.msra.mxu1 %v5766_v10  ;;  %3503 = vmatpush1.bf16.msra.mxu0 %v5894_v37  ;;  %vm1022_vm12 = vcmp.eq.f32.partialorder %v7886_v43, inf  ;;  %v1917_v5 = vld [vmem:[%s10067_s5 + $0x3a0] sm:$0xff] }
 0x1ee   : > { %v1046_v57 = vadd.f32 1.1920929e-07, %v1012_v9  ;;  %v1014_v38 = vmul.f32 %v6554_v44, %v7851_v11  ;;  %3391 = vmatprep.subr.bf16.mxu1 %v5759_v0  ;;  %3504 = vmatprep.subr.bf16.mxu0 %v5887_v46  ;;  %v6556_v52 = vpop.eup %6555  ;;  %v5870_v28 = vcombine.low %v7988_v6, %v7993_v49  ;;  %v5871_v26 = vcombine.high %v7988_v6, %v7993_v49  ;;  %v2041_v51 = vld [vmem:[%s10067_s5 + $0x780] sm:$0xff] }
 0x1ef   : > { %1605 = vmatprep.mubr.bf16.mxu1 %v1150_v31  ;;  %1718 = vmatprep.mubr.bf16.mxu0 %v1150_v31  ;;  %v5999_v10 = vcombine.high %v8003_v21, %v8008_v19  ;;  %v1025_v25 = vand.u32 2147483648, %v7886_v43  ;;  %v1128_v56 = vmul.f32 %v6556_v52, %v7706_v20  ;;  %v1127_v0 = vmul.f32 %v6556_v52, %v7692_v53  ;;  %v2045_v50 = vld [vmem:[%s10067_s5 + $0x7a0] sm:$0xff] }
 0x1f0   : > { %v1016_v62 = vsel %vm1015_vm10, %v7851_v11, %v1014_v38  ;;  %1606 = vmatmul.mubr.bf16.gmra.mxu1 %v1149_v27  ;;  %1719 = vmatmul.mubr.bf16.gmra.mxu0 %v1149_v27  ;;  %6567 = vrcp.f32 %v1046_v57  ;;  %vm1024_vm13 = vcmp.eq.f32.partialorder %v7886_v43, 0.0  ;;  %v1100_v12 = vmul.f32 %v7604_v3, %v7454_v15  ;;  %v1905_v14 = vld [vmem:[%s10067_s5 + $0x340] sm:$0xff] }
 0x1f1   : > { %v6558_v42 = vpop.eup %6557  ;;  %v1019_v60 = vsel %vm1017_vm11, %v1018_v13, %v1016_v62  ;;  %3392 = vmatpush1.bf16.msra.mxu1 %v5758_v7  ;;  %3505 = vmatpush1.bf16.msra.mxu0 %v5886_v24  ;;  %v8034_v7 = vld [vmem:[%s10067_s5 + $0x380] sm:$0xff]  ;;  %v5991_v48 = vcombine.high %v2041_v51, %v2045_v50  ;;  %v1102_v34 = vmul.f32 %v7604_v3, %v7476_v35  ;;  %vm1029_vm14 = vcmp.eq.f32.partialorder %v7936_v30, inf }
 0x1f2   : > { %v6560_v11 = vpop.eup %6559  ;;  %v1047_v37 = vadd.f32 1.1920929e-07, %v1019_v60  ;;  %v1021_v45 = vmul.f32 %v6558_v42, %v7886_v43  ;;  %3393 = vmatprep.subr.bf16.mxu1 %v5751_v33  ;;  %3506 = vmatprep.subr.bf16.mxu0 %v5879_v16  ;;  %v5863_v61 = vcombine.high %v8034_v7, %v1917_v5  ;;  %v1032_v24 = vand.u32 2147483648, %v7936_v30  ;;  %v1909_v31 = vld [vmem:[%s10067_s5 + $0x360] sm:$0xff] }
 0x1f3   : > { %v1130_v58 = vmul.f32 %v6560_v11, %v7714_v1  ;;  %v1129_v46 = vmul.f32 %v6560_v11, %v7710_v29  ;;  %v5998_v29 = vcombine.low %v8003_v21, %v8008_v19  ;;  %v5862_v44 = vcombine.low %v8034_v7, %v1917_v5  ;;  %v2033_v27 = vld [vmem:[%s10067_s5 + $0x740] sm:$0xff] }
 0x1f4   : > { %6569 = vrcp.f32 %v1047_v37  ;;  %v1023_v20 = vsel %vm1022_vm12, %v7886_v43, %v1021_v45  ;;  %v1101_v43 = vmul.f32 %v7600_v63, %v7457_v22  ;;  %v5990_v9 = vcombine.low %v2041_v51, %v2045_v50  ;;  %v2037_v6 = vld [vmem:[%s10067_s5 + $0x760] sm:$0xff] }
 0x1f5   : > { %v6562_v53 = vpop.eup %6561  ;;  %v1026_v1 = vsel %vm1024_vm13, %v1025_v25, %v1023_v20  ;;  %v1152_v55 = vpack.c.bf16 %v1130_v58, %v1128_v56  ;;  %v1151_v47 = vpack.c.bf16 %v1129_v46, %v1127_v0  ;;  %3394 = vmatpush1.bf16.msra.mxu1 %v5750_v23  ;;  %3507 = vmatpush1.bf16.msra.mxu0 %v5878_v4  ;;  %vm1031_vm15 = vcmp.eq.f32.partialorder %v7936_v30, 0.0  ;;  %v1897_v13 = vld [vmem:[%s10067_s5 + $0x300] sm:$0xff] }
 0x1f6   : > { %v6564_v18 = vpop.eup %6563  ;;  %3395 = vmatprep.subr.bf16.mxu1 %v5871_v26  ;;  %3508 = vmatprep.subr.bf16.mxu0 %v5999_v10  ;;  %v1048_v39 = vadd.f32 1.1920929e-07, %v1026_v1  ;;  %v1132_v38 = vmul.f32 %v6562_v53, %v1100_v12  ;;  %v1131_v33 = vmul.f32 %v6562_v53, %v8012_v40  ;;  %v5855_v52 = vcombine.high %v1905_v14, %v1909_v31  ;;  %v2025_v40 = vld [vmem:[%s10067_s5 + $0x700] sm:$0xff] }
 0x1f7   : > { %v1028_v36 = vmul.f32 %v6564_v18, %v7936_v30  ;;  %1615 = vmatprep.mubr.bf16.mxu1 %v1152_v55  ;;  %1728 = vmatprep.mubr.bf16.mxu0 %v1152_v55  ;;  %v5983_v62 = vcombine.high %v2033_v27, %v2037_v6  ;;  %v2029_v4 = vld [vmem:[%s10067_s5 + $0x720] sm:$0xff]  ;;  %v5854_v60 = vcombine.low %v1905_v14, %v1909_v31 }
 0x1f8   : > { %1616 = vmatmul.mubr.bf16.gmra.mxu1 %v1151_v47  ;;  %1729 = vmatmul.mubr.bf16.gmra.mxu0 %v1151_v47  ;;  %6571 = vrcp.f32 %v1048_v39  ;;  %v5982_v26 = vcombine.low %v2033_v27, %v2037_v6  ;;  %v5975_v37 = vcombine.high %v2025_v40, %v2029_v4  ;;  %v1104_v45 = vmul.f32 %v7604_v3, %v7498_v54  ;;  %v1889_v25 = vld [vmem:[%s10067_s5 + $0x2c0] sm:$0xff]  ;;  %v10193_v6 = vld [vmem:[#allocation39_spill] sm:$0xff] }
 0x1f9   : > { %v6566_v49 = vpop.eup %6565  ;;  %v1030_v57 = vsel %vm1029_vm14, %v7936_v30, %v1028_v36  ;;  %3396 = vmatpush2.bf16.msra.mxu1 %v5870_v28  ;;  %3509 = vmatpush2.bf16.msra.mxu0 %v5998_v29  ;;  %v1901_v30 = vld [vmem:[%s10067_s5 + $0x320] sm:$0xff]  ;;  %v1103_v7 = vmul.f32 %v7600_v63, %v7479_v41  ;;  %v1105_v56 = vmul.f32 %v7600_v63, %v7501_v59 }
 0x1fa   : > { %v1033_v16 = vsel %vm1031_vm15, %v1032_v24, %v1030_v57  ;;  %v1134_v21 = vmul.f32 %v6566_v49, %v1102_v34  ;;  %v1133_v19 = vmul.f32 %v6566_v49, %v1101_v43  ;;  %3397 = vmatprep.subr.bf16.mxu1 %v5863_v61  ;;  %3510 = vmatprep.subr.bf16.mxu0 %v5991_v48  ;;  %v1893_v0 = vld [vmem:[%s10067_s5 + $0x2e0] sm:$0xff]  ;;  %v10194_v57 = vld [vmem:[#allocation40_spill] sm:$0xff] }
 0x1fb   : > { %v1049_v23 = vadd.f32 1.1920929e-07, %v1033_v16  ;;  %v5847_v11 = vcombine.high %v1897_v13, %v1901_v30  ;;  %v1106_v58 = vmul.f32 %v7604_v3, %v7520_v8  ;;  %v2017_v46 = vld [vmem:[%s10067_s5 + $0x6c0] sm:$0xff]  ;;  %v5846_v20 = vcombine.low %v1897_v13, %v1901_v30 }
 0x1fc   : > { %v1154_v28 = vpack.c.bf16 %v1134_v21, %v1132_v38  ;;  %v1153_v42 = vpack.c.bf16 %v1133_v19, %v1131_v33  ;;  %v2021_v5 = vld [vmem:[%s10067_s5 + $0x6e0] sm:$0xff]  ;;  %v5974_v29 = vcombine.low %v2025_v40, %v2029_v4  ;;  %v5839_v18 = vcombine.high %v1889_v25, %v1893_v0 }
 0x1fd   : > { %6573 = vrcp.f32 %v1049_v23  ;;  %3398 = vmatpush2.bf16.msra.mxu1 %v5862_v44  ;;  %3511 = vmatpush2.bf16.msra.mxu0 %v5990_v9  ;;  %v6568_v10 = vpop.eup %6567  ;;  %v1881_v47 = vld [vmem:[%s10067_s5 + $0x280] sm:$0xff]  ;;  %v5967_v12 = vcombine.high %v2017_v46, %v2021_v5  ;;  %v5838_v36 = vcombine.low %v1889_v25, %v1893_v0  ;;  %v5966_v14 = vcombine.low %v2017_v46, %v2021_v5  ;;  %v1858_v0 = vld [vmem:[%s10067_s5 + $0x1c8] sm:$0xff] }
 0x1fe   : > { %1625 = vmatprep.mubr.bf16.mxu1 %v1154_v28  ;;  %1738 = vmatprep.mubr.bf16.mxu0 %v1154_v28  ;;  %v1136_v50 = vmul.f32 %v6568_v10, %v1104_v45  ;;  %v1135_v1 = vmul.f32 %v6568_v10, %v1103_v7  ;;  %v1885_v61 = vld [vmem:[%s10067_s5 + $0x2a0] sm:$0xff]  ;;  %v1107_v31 = vmul.f32 %v7600_v63, %v7523_v17  ;;  %v1862_v46 = vld [vmem:[%s10067_s5 + $0x1e8] sm:$0xff] }
 0x1ff   : > { %3399 = vmatprep.subr.bf16.mxu1 %v5855_v52  ;;  %3512 = vmatprep.subr.bf16.mxu0 %v5983_v62  ;;  %v2009_v48 = vld [vmem:[%s10067_s5 + $0x680] sm:$0xff]  ;;  %v5831_v24 = vcombine.high %v1881_v47, %v1885_v61  ;;  %v1108_v27 = vmul.f32 %v7604_v3, %v7542_v32  ;;  %v1109_v49 = vmul.f32 %v7600_v63, %v10193_v6  ;;  %v1986_v5 = vld [vmem:[%s10067_s5 + $0x5c8] sm:$0xff] }
 0x200   : > { %1626 = vmatmul.mubr.bf16.gmra.mxu1 %v1153_v42  ;;  %1739 = vmatmul.mubr.bf16.gmra.mxu0 %v1153_v42  ;;  %v2013_v43 = vld [vmem:[%s10067_s5 + $0x6a0] sm:$0xff]  ;;  %v1110_v38 = vmul.f32 %v7604_v3, %v10194_v57  ;;  %v5830_v33 = vcombine.low %v1881_v47, %v1885_v61 }
 0x201   : > { %v6570_v51 = vpop.eup %6569  ;;  %3400 = vmatpush2.bf16.msra.mxu1 %v5854_v60  ;;  %3513 = vmatpush2.bf16.msra.mxu0 %v5982_v26  ;;  %v5959_v44 = vcombine.high %v2009_v48, %v2013_v43  ;;  %v5958_v16 = vcombine.low %v2009_v48, %v2013_v43  ;;  %v1873_v63 = vld [vmem:[%s10067_s5 + $0x240] sm:$0xff]  ;;  %v1850_v48 = vld [vmem:[%s10067_s5 + $0x188] sm:$0xff] }
 0x202   : > { %v1138_v53 = vmul.f32 %v6570_v51, %v1106_v58  ;;  %v1137_v55 = vmul.f32 %v6570_v51, %v1105_v56  ;;  %3401 = vmatprep.subr.bf16.mxu1 %v5847_v11  ;;  %3514 = vmatprep.subr.bf16.mxu0 %v5975_v37  ;;  %v1877_v3 = vld [vmem:[%s10067_s5 + $0x260] sm:$0xff]  ;;  %v5808_v51 = vcombine.low %v1858_v0, %v1862_v46  ;;  %v1854_v43 = vld [vmem:[%s10067_s5 + $0x1a8] sm:$0xff] }
 0x203   : > { %v2001_v40 = vld [vmem:[%s10067_s5 + $0x640] sm:$0xff]  ;;  %v5822_v4 = vcombine.low %v1873_v63, %v1877_v3  ;;  %v5823_v28 = vcombine.high %v1873_v63, %v1877_v3 }
 0x204   : > { %v1156_v34 = vpack.c.bf16 %v1138_v53, %v1136_v50  ;;  %v1155_v39 = vpack.c.bf16 %v1137_v55, %v1135_v1  ;;  %v2005_v42 = vld [vmem:[%s10067_s5 + $0x660] sm:$0xff]  ;;  %v5809_v50 = vcombine.high %v1858_v0, %v1862_v46 }
 0x205   : > { %3402 = vmatpush2.bf16.msra.mxu1 %v5846_v20  ;;  %3515 = vmatpush2.bf16.msra.mxu0 %v5974_v29  ;;  %v6572_v9 = vpop.eup %6571  ;;  %v5950_v60 = vcombine.low %v2001_v40, %v2005_v42  ;;  %v5951_v26 = vcombine.high %v2001_v40, %v2005_v42  ;;  %v1865_v10 = vld [vmem:[%s10067_s5 + $0x200] sm:$0xff]  ;;  %v1990_v20 = vld [vmem:[%s10067_s5 + $0x5e8] sm:$0xff] }
 0x206   : > { %1635 = vmatprep.mubr.bf16.mxu1 %v1156_v34  ;;  %1748 = vmatprep.mubr.bf16.mxu0 %v1156_v34  ;;  %v1140_v19 = vmul.f32 %v6572_v9, %v1108_v27  ;;  %v1139_v23 = vmul.f32 %v6572_v9, %v1107_v31  ;;  %v1869_v11 = vld [vmem:[%s10067_s5 + $0x220] sm:$0xff]  ;;  %v5936_v29 = vcombine.low %v1986_v5, %v1990_v20  ;;  %v1978_v34 = vld [vmem:[%s10067_s5 + $0x588] sm:$0xff] }
 0x207   : > { %3403 = vmatprep.subr.bf16.mxu1 %v5839_v18  ;;  %3516 = vmatprep.subr.bf16.mxu0 %v5967_v12  ;;  %v1993_v37 = vld [vmem:[%s10067_s5 + $0x600] sm:$0xff]  ;;  %v5814_v45 = vcombine.low %v1865_v10, %v1869_v11  ;;  %v5815_v25 = vcombine.high %v1865_v10, %v1869_v11  ;;  %v5937_v53 = vcombine.high %v1986_v5, %v1990_v20  ;;  %v1838_v42 = vld [vmem:[%s10067_s5 + $0x128] sm:$0xff] }
 0x208   : > { %1636 = vmatmul.mubr.bf16.gmra.mxu1 %v1155_v39  ;;  %1749 = vmatmul.mubr.bf16.gmra.mxu0 %v1155_v39  ;;  %v1997_v7 = vld [vmem:[%s10067_s5 + $0x620] sm:$0xff]  ;;  %v1982_v39 = vld [vmem:[%s10067_s5 + $0x5a8] sm:$0xff] }
 0x209   : > { %3404 = vmatpush2.bf16.msra.mxu1 %v5838_v36  ;;  %3517 = vmatpush2.bf16.msra.mxu0 %v5966_v14  ;;  %v5942_v56 = vcombine.low %v1993_v37, %v1997_v7  ;;  %v5943_v58 = vcombine.high %v1993_v37, %v1997_v7  ;;  %v1830_v20 = vld [vmem:[%s10067_s5 + $0xe8] sm:$0xff] }
 0x20a   : > { %v6574_v21 = vpop.eup %6573  ;;  %3405 = vmatprep.subr.bf16.mxu1 %v5831_v24  ;;  %3518 = vmatprep.subr.bf16.mxu0 %v5959_v44  ;;  %v6510_v54 = vld [vmem:[%s10069_s7 + $0x184] ss:$8 sps:$4 sm:$0xff]  }
 0x20b   : > { %v1142_v13 = vmul.f32 %v6574_v21, %v1110_v38  ;;  %v1141_v52 = vmul.f32 %v6574_v21, %v1109_v49  ;;  %v5801_v38 = vcombine.high %v1850_v48, %v1854_v43  ;;  %v1846_v21 = vld [vmem:[%s10067_s5 + $0x168] sm:$0xff] }
 0x20d   : > { %v1158_v62 = vpack.c.bf16 %v1142_v13, %v1140_v19  ;;  %v1157_v30 = vpack.c.bf16 %v1141_v52, %v1139_v23  ;;  %3406 = vmatpush2.bf16.msra.mxu1 %v5830_v33  ;;  %3519 = vmatpush2.bf16.msra.mxu0 %v5958_v16  ;;  %v5929_v33 = vcombine.high %v1978_v34, %v1982_v39  ;;  %v1842_v16 = vld [vmem:[%s10067_s5 + $0x148] sm:$0xff] }
 0x20e   : > { %3407 = vmatprep.subr.bf16.mxu1 %v5823_v28  ;;  %3520 = vmatprep.subr.bf16.mxu0 %v5951_v26  ;;  %v1970_v19 = vld [vmem:[%s10067_s5 + $0x548] sm:$0xff]  ;;  %v5793_v40 = vcombine.high %v1842_v16, %v1846_v21  ;;  %v5792_v37 = vcombine.low %v1842_v16, %v1846_v21 }
 0x20f   : > { %1645 = vmatprep.mubr.bf16.mxu1 %v1158_v62  ;;  %1758 = vmatprep.mubr.bf16.mxu0 %v1158_v62  ;;  %v1974_v13 = vld [vmem:[%s10067_s5 + $0x568] sm:$0xff]  ;;  %v5800_v62 = vcombine.low %v1850_v48, %v1854_v43 }
 0x210   : > { %1646 = vmatmul.mubr.bf16.gmra.mxu1 %v1157_v30  ;;  %1759 = vmatmul.mubr.bf16.gmra.mxu0 %v1157_v30  ;;  %v5928_v30 = vcombine.low %v1978_v34, %v1982_v39  ;;  %v1834_v28 = vld [vmem:[%s10067_s5 + $0x108] sm:$0xff] }
 0x211   : > { %3408 = vmatpush2.bf16.msra.mxu1 %v5822_v4  ;;  %3521 = vmatpush2.bf16.msra.mxu0 %v5950_v60  ;;  %v5921_v4 = vcombine.high %v1970_v19, %v1974_v13  ;;  %v1962_v60 = vld [vmem:[%s10067_s5 + $0x508] sm:$0xff] }
 0x212   : > { %3409 = vmatprep.subr.bf16.mxu1 %v5815_v25  ;;  %3522 = vmatprep.subr.bf16.mxu0 %v5943_v58  ;;  %v1966_v26 = vld [vmem:[%s10067_s5 + $0x528] sm:$0xff] }
 0x213   : > { %v1818_v34 = vld [vmem:[%s10067_s5 + $0x88] sm:$0xff] }
 0x214   : > { %v1822_v39 = vld [vmem:[%s10067_s5 + $0xa8] sm:$0xff] }
 0x215   : > { %3410 = vmatpush2.bf16.msra.mxu1 %v5814_v45  ;;  %3523 = vmatpush2.bf16.msra.mxu0 %v5942_v56  ;;  %v5920_v45 = vcombine.low %v1970_v19, %v1974_v13  ;;  %v5785_v56 = vcombine.high %v1834_v28, %v1838_v42  ;;  %v5769_v19 = vcombine.high %v1818_v34, %v1822_v39 }
 0x216   : > { %3605 = vmatprep.subr.bf16.mxu1 %v5809_v50  ;;  %3718 = vmatprep.subr.bf16.mxu0 %v5937_v53  ;;  %v1826_v50 = vld [vmem:[%s10067_s5 + $0xc8] sm:$0xff] }
 0x217   : > { %v1958_v53 = vld [vmem:[%s10067_s5 + $0x4e8] sm:$0xff]  ;;  %v5777_v48 = vcombine.high %v1826_v50, %v1830_v20 }
 0x297   : > { %v1577_v1 = vpop.f32.mrf.mxu1  ;;  %v1690_v55 = vpop.f32.mrf.mxu0 }
 0x299   : > { %v1579_v47 = vpop.f32.mrf.mxu1  ;;  %v1692_v18 = vpop.f32.mrf.mxu0 }
 0x29b   : > { %v1581_v12 = vpop.f32.mrf.mxu1  ;;  %v1694_v61 = vpop.f32.mrf.mxu0 }
 0x29c   : > { %v8183_v9 = vpack.c.bf16 %v1581_v12, %v1577_v1  ;;  %v8185_v31 = vpack.c.bf16 %v1694_v61, %v1690_v55 }
 0x29d   : > { %v1583_v36 = vpop.f32.mrf.mxu1  ;;  %v1696_v14 = vpop.f32.mrf.mxu0 }
 0x29e   : > { %v8179_v24 = vpack.c.bf16 %v1583_v36, %v1579_v47  ;;  %v8181_v44 = vpack.c.bf16 %v1696_v14, %v1692_v18  ;;  %v5784_v47 = vcombine.low %v1834_v28, %v1838_v42  ;;  %v5912_v18 = vcombine.low %v1962_v60, %v1966_v26  ;;  %v1946_v36 = vld [vmem:[%s10067_s5 + $0x488] sm:$0xff] }
 0x29f   : > { %v1587_v27 = vpop.f32.mrf.mxu1  ;;  %v1700_v49 = vpop.f32.mrf.mxu0  ;;  %v1950_v14 = vld [vmem:[%s10067_s5 + $0x4a8] sm:$0xff] }
 0x2a0   : > { %3411 = vmatprep.mubr.bf16.mxu1 %v8179_v24  ;;  %3524 = vmatprep.mubr.bf16.mxu0 %v8181_v44 }
 0x2a1   : > { %v1589_v23 = vpop.f32.mrf.mxu1  ;;  %v1702_v52 = vpop.f32.mrf.mxu0  ;;  %3412 = vmatmul.mubr.bf16.vlgmr.msra.gmra.mxu1 %v8183_v9  ;;  %3525 = vmatmul.mubr.bf16.vlgmr.msra.gmra.mxu0 %v8185_v31 }
 0x2a2   : > { %3606 = vmatpush1.bf16.msra.mxu1 %v5808_v51  ;;  %3719 = vmatpush1.bf16.msra.mxu0 %v5936_v29  ;;  %v5913_v51 = vcombine.high %v1962_v60, %v1966_v26  ;;  %v1954_v29 = vld [vmem:[%s10067_s5 + $0x4c8] sm:$0xff]  ;;  %v5768_v60 = vcombine.low %v1818_v34, %v1822_v39  ;;  %v5896_v26 = vcombine.low %v1946_v36, %v1950_v14 }
 0x2a3   : > { %v1591_v63 = vpop.f32.mrf.mxu1  ;;  %v1704_v3 = vpop.f32.mrf.mxu0  ;;  %3607 = vmatprep.subr.bf16.mxu1 %v5801_v38  ;;  %3720 = vmatprep.subr.bf16.mxu0 %v5929_v33  ;;  %v5905_v43 = vcombine.high %v1954_v29, %v1958_v53  ;;  %v5776_v38 = vcombine.low %v1826_v50, %v1830_v20  ;;  %v5904_v33 = vcombine.low %v1954_v29, %v1958_v53  ;;  %v1922_v34 = vld [vmem:[%s10067_s5 + $0x3c8] sm:$0xff] }
 0x2a4   : > { %v8219_v58 = vpack.c.bf16 %v1591_v63, %v1587_v27  ;;  %v8221_v0 = vpack.c.bf16 %v1704_v3, %v1700_v49  ;;  %v1810_v63 = vld [vmem:[%s10067_s5 + $0x48] sm:$0xff] }
 0x2a5   : > { %v1593_v10 = vpop.f32.mrf.mxu1  ;;  %v1706_v11 = vpop.f32.mrf.mxu0  ;;  %v1814_v3 = vld [vmem:[%s10067_s5 + $0x68] sm:$0xff] }
 0x2a6   : > { %v8215_v25 = vpack.c.bf16 %v1593_v10, %v1589_v23  ;;  %v8217_v7 = vpack.c.bf16 %v1706_v11, %v1702_v52  ;;  %3608 = vmatpush1.bf16.msra.mxu1 %v5800_v62  ;;  %3721 = vmatpush1.bf16.msra.mxu0 %v5928_v30  ;;  %v5897_v30 = vcombine.high %v1946_v36, %v1950_v14  ;;  %v1926_v39 = vld [vmem:[%s10067_s5 + $0x3e8] sm:$0xff] }
 0x2a7   : > { %3609 = vmatprep.subr.bf16.mxu1 %v5793_v40  ;;  %3722 = vmatprep.subr.bf16.mxu0 %v5921_v4  ;;  %v1938_v40 = vld [vmem:[%s10067_s5 + $0x448] sm:$0xff]  ;;  %v5760_v29 = vcombine.low %v1810_v63, %v1814_v3 }
 0x2a8   : > { %v1597_v46 = vpop.f32.mrf.mxu1  ;;  %v1710_v5 = vpop.f32.mrf.mxu0  ;;  %3421 = vmatprep.mubr.bf16.mxu1 %v8215_v25  ;;  %3534 = vmatprep.mubr.bf16.mxu0 %v8217_v7  ;;  %v1942_v4 = vld [vmem:[%s10067_s5 + $0x468] sm:$0xff] }
 0x2a9   : > { %3422 = vmatmul.mubr.bf16.gmra.mxu1 %v8219_v58  ;;  %3535 = vmatmul.mubr.bf16.gmra.mxu0 %v8221_v0  ;;  %v5888_v53 = vcombine.low %v1938_v40, %v1942_v4  ;;  %v2050_v36 = vld [vmem:[%s10067_s5 + $0x7c8] sm:$0xff] }
 0x2aa   : > { %v1599_v1 = vpop.f32.mrf.mxu1  ;;  %v1712_v55 = vpop.f32.mrf.mxu0  ;;  %3610 = vmatpush1.bf16.msra.mxu1 %v5792_v37  ;;  %3723 = vmatpush1.bf16.msra.mxu0 %v5920_v45  ;;  %v5761_v37 = vcombine.high %v1810_v63, %v1814_v3  ;;  %v5889_v45 = vcombine.high %v1938_v40, %v1942_v4  ;;  %v2054_v14 = vld [vmem:[%s10067_s5 + $0x7e8] sm:$0xff] }
 0x2ab   : > { %3611 = vmatprep.subr.bf16.mxu1 %v5785_v56  ;;  %3724 = vmatprep.subr.bf16.mxu0 %v5913_v51  ;;  %v1802_v56 = vld [vmem:[%s10067_s5 + $0x8] sm:$0xff] }
 0x2ac   : > { %v1601_v12 = vpop.f32.mrf.mxu1  ;;  %v1714_v61 = vpop.f32.mrf.mxu0  ;;  %v1934_v51 = vld [vmem:[%s10067_s5 + $0x428] sm:$0xff] }
 0x2ad   : > { %v8255_v13 = vpack.c.bf16 %v1601_v12, %v1597_v46  ;;  %v8257_v23 = vpack.c.bf16 %v1714_v61, %v1710_v5  ;;  %v1806_v46 = vld [vmem:[%s10067_s5 + $0x28] sm:$0xff] }
 0x2ae   : > { %v1603_v27 = vpop.f32.mrf.mxu1  ;;  %v1716_v49 = vpop.f32.mrf.mxu0  ;;  %3612 = vmatpush1.bf16.msra.mxu1 %v5784_v47  ;;  %3725 = vmatpush1.bf16.msra.mxu0 %v5912_v18  ;;  %v1930_v5 = vld [vmem:[%s10067_s5 + $0x408] sm:$0xff]  ;;  %v5753_v47 = vcombine.high %v1802_v56, %v1806_v46 }
 0x2af   : > { %v8251_v16 = vpack.c.bf16 %v1603_v27, %v1599_v1  ;;  %v8253_v21 = vpack.c.bf16 %v1716_v49, %v1712_v55  ;;  %3613 = vmatprep.subr.bf16.mxu1 %v5777_v48  ;;  %3726 = vmatprep.subr.bf16.mxu0 %v5905_v43  ;;  %v5881_v43 = vcombine.high %v1930_v5, %v1934_v51  ;;  %v1914_v63 = vld [vmem:[%s10067_s5 + $0x388] sm:$0xff] }
 0x2b0   : > { %v1607_v52 = vpop.f32.mrf.mxu1  ;;  %v1720_v62 = vpop.f32.mrf.mxu0  ;;  %v1918_v3 = vld [vmem:[%s10067_s5 + $0x3a8] sm:$0xff] }
 0x2b1   : > { %3431 = vmatprep.mubr.bf16.mxu1 %v8251_v16  ;;  %3544 = vmatprep.mubr.bf16.mxu0 %v8253_v21  ;;  %v2042_v40 = vld [vmem:[%s10067_s5 + $0x788] sm:$0xff] }
 0x2b2   : > { %v1609_v28 = vpop.f32.mrf.mxu1  ;;  %v1722_v42 = vpop.f32.mrf.mxu0  ;;  %3432 = vmatmul.mubr.bf16.gmra.mxu1 %v8255_v13  ;;  %3545 = vmatmul.mubr.bf16.gmra.mxu0 %v8257_v23  ;;  %v2046_v4 = vld [vmem:[%s10067_s5 + $0x7a8] sm:$0xff] }
 0x2b3   : > { %3614 = vmatpush1.bf16.msra.mxu1 %v5776_v38  ;;  %3727 = vmatpush1.bf16.msra.mxu0 %v5904_v33  ;;  %v5752_v38 = vcombine.low %v1802_v56, %v1806_v46  ;;  %v5880_v33 = vcombine.low %v1930_v5, %v1934_v51  ;;  %v5993_v51 = vcombine.high %v2042_v40, %v2046_v4 }
 0x2b4   : > { %v1611_v10 = vpop.f32.mrf.mxu1  ;;  %v1724_v11 = vpop.f32.mrf.mxu0  ;;  %3615 = vmatprep.subr.bf16.mxu1 %v5769_v19  ;;  %3728 = vmatprep.subr.bf16.mxu0 %v5897_v30  ;;  %v6001_v30 = vcombine.high %v2050_v36, %v2054_v14 }
 0x2b5   : > { %v8291_v18 = vpack.c.bf16 %v1611_v10, %v1607_v52  ;;  %v8293_v12 = vpack.c.bf16 %v1724_v11, %v1720_v62  ;;  %v5873_v62 = vcombine.high %v1922_v34, %v1926_v39 }
 0x2b6   : > { %v1613_v50 = vpop.f32.mrf.mxu1  ;;  %v1726_v20 = vpop.f32.mrf.mxu0 }
 0x2b7   : > { %v8287_v1 = vpack.c.bf16 %v1613_v50, %v1609_v28  ;;  %v8289_v55 = vpack.c.bf16 %v1726_v20, %v1722_v42  ;;  %3616 = vmatpush1.bf16.msra.mxu1 %v5768_v60  ;;  %3729 = vmatpush1.bf16.msra.mxu0 %v5896_v26  ;;  %v5872_v60 = vcombine.low %v1922_v34, %v1926_v39  ;;  %v1906_v50 = vld [vmem:[%s10067_s5 + $0x348] sm:$0xff] }
 0x2b8   : > { %v1617_v61 = vpop.f32.mrf.mxu1  ;;  %v1730_v48 = vpop.f32.mrf.mxu0  ;;  %3617 = vmatprep.subr.bf16.mxu1 %v5761_v37  ;;  %3730 = vmatprep.subr.bf16.mxu0 %v5889_v45  ;;  %v6000_v26 = vcombine.low %v2050_v36, %v2054_v14  ;;  %v5865_v37 = vcombine.high %v1914_v63, %v1918_v3  ;;  %v1910_v20 = vld [vmem:[%s10067_s5 + $0x368] sm:$0xff] }
 0x2b9   : > { %3441 = vmatprep.mubr.bf16.mxu1 %v8287_v1  ;;  %3554 = vmatprep.mubr.bf16.mxu0 %v8289_v55  ;;  %v5857_v36 = vcombine.high %v1906_v50, %v1910_v20 }
 0x2ba   : > { %v1619_v27 = vpop.f32.mrf.mxu1  ;;  %v1732_v49 = vpop.f32.mrf.mxu0  ;;  %3442 = vmatmul.mubr.bf16.gmra.mxu1 %v8291_v18  ;;  %3555 = vmatmul.mubr.bf16.gmra.mxu0 %v8293_v12 }
 0x2bb   : > { %3618 = vmatpush1.bf16.msra.mxu1 %v5760_v29  ;;  %3731 = vmatpush1.bf16.msra.mxu0 %v5888_v53  ;;  %v2034_v29 = vld [vmem:[%s10067_s5 + $0x748] sm:$0xff] }
 0x2bc   : > { %v1621_v19 = vpop.f32.mrf.mxu1  ;;  %v1734_v52 = vpop.f32.mrf.mxu0  ;;  %3619 = vmatprep.subr.bf16.mxu1 %v5753_v47  ;;  %3732 = vmatprep.subr.bf16.mxu0 %v5881_v43  ;;  %v2038_v53 = vld [vmem:[%s10067_s5 + $0x768] sm:$0xff]  ;;  %v5992_v43 = vcombine.low %v2042_v40, %v2046_v4 }
 0x2bd   : > { %v8327_v45 = vpack.c.bf16 %v1621_v19, %v1617_v61  ;;  %v8329_v56 = vpack.c.bf16 %v1734_v52, %v1730_v48  ;;  %v5864_v48 = vcombine.low %v1914_v63, %v1918_v3  ;;  %v5985_v14 = vcombine.high %v2034_v29, %v2038_v53 }
 0x2be   : > { %v1623_v28 = vpop.f32.mrf.mxu1  ;;  %v1736_v42 = vpop.f32.mrf.mxu0 }
 0x2bf   : > { %v8323_v10 = vpack.c.bf16 %v1623_v28, %v1619_v27  ;;  %v8325_v11 = vpack.c.bf16 %v1736_v42, %v1732_v49  ;;  %3620 = vmatpush1.bf16.msra.mxu1 %v5752_v38  ;;  %3733 = vmatpush1.bf16.msra.mxu0 %v5880_v33  ;;  %v1898_v27 = vld [vmem:[%s10067_s5 + $0x308] sm:$0xff] }
 0x2c0   : > { %v1627_v46 = vpop.f32.mrf.mxu1  ;;  %v1740_v5 = vpop.f32.mrf.mxu0  ;;  %3621 = vmatprep.subr.bf16.mxu1 %v5873_v62  ;;  %3734 = vmatprep.subr.bf16.mxu0 %v6001_v30  ;;  %v1902_v49 = vld [vmem:[%s10067_s5 + $0x328] sm:$0xff]  ;;  %v5856_v62 = vcombine.low %v1906_v50, %v1910_v20  ;;  %v5984_v30 = vcombine.low %v2034_v29, %v2038_v53 }
 0x2c1   : > { %3451 = vmatprep.mubr.bf16.mxu1 %v8323_v10  ;;  %3564 = vmatprep.mubr.bf16.mxu0 %v8325_v11  ;;  %v2026_v38 = vld [vmem:[%s10067_s5 + $0x708] sm:$0xff]  ;;  %v5849_v40 = vcombine.high %v1898_v27, %v1902_v49  ;;  %v5848_v29 = vcombine.low %v1898_v27, %v1902_v49 }
 0x2c2   : > { %v1629_v47 = vpop.f32.mrf.mxu1  ;;  %v1742_v61 = vpop.f32.mrf.mxu0  ;;  %3452 = vmatmul.mubr.bf16.gmra.mxu1 %v8327_v45  ;;  %3565 = vmatmul.mubr.bf16.gmra.mxu0 %v8329_v56  ;;  %v2030_v33 = vld [vmem:[%s10067_s5 + $0x728] sm:$0xff] }
 0x2c3   : > { %3622 = vmatpush2.bf16.msra.mxu1 %v5872_v60  ;;  %3735 = vmatpush2.bf16.msra.mxu0 %v6000_v26  ;;  %v5977_v26 = vcombine.high %v2026_v38, %v2030_v33  ;;  %v5976_v53 = vcombine.low %v2026_v38, %v2030_v33 }
 0x2c4   : > { %v1631_v34 = vpop.f32.mrf.mxu1  ;;  %v1744_v39 = vpop.f32.mrf.mxu0  ;;  %3623 = vmatprep.subr.bf16.mxu1 %v5865_v37  ;;  %3736 = vmatprep.subr.bf16.mxu0 %v5993_v51  ;;  %v1890_v37 = vld [vmem:[%s10067_s5 + $0x2c8] sm:$0xff] }
 0x2c5   : > { %v8363_v4 = vpack.c.bf16 %v1631_v34, %v1627_v46  ;;  %v8365_v28 = vpack.c.bf16 %v1744_v39, %v1740_v5  ;;  %v1894_v46 = vld [vmem:[%s10067_s5 + $0x2e8] sm:$0xff] }
 0x2c6   : > { %v1633_v19 = vpop.f32.mrf.mxu1  ;;  %v1746_v52 = vpop.f32.mrf.mxu0  ;;  %v2018_v5 = vld [vmem:[%s10067_s5 + $0x6c8] sm:$0xff]  ;;  %v5840_v38 = vcombine.low %v1890_v37, %v1894_v46 }
 0x2c7   : > { %v8359_v63 = vpack.c.bf16 %v1633_v19, %v1629_v47  ;;  %v8361_v3 = vpack.c.bf16 %v1746_v52, %v1742_v61  ;;  %3624 = vmatpush2.bf16.msra.mxu1 %v5864_v48  ;;  %3737 = vmatpush2.bf16.msra.mxu0 %v5992_v43  ;;  %v2022_v51 = vld [vmem:[%s10067_s5 + $0x6e8] sm:$0xff]  ;;  %v5841_v48 = vcombine.high %v1890_v37, %v1894_v46 }
 0x2c8   : > { %v1637_v42 = vpop.f32.mrf.mxu1  ;;  %v1750_v60 = vpop.f32.mrf.mxu0  ;;  %3625 = vmatprep.subr.bf16.mxu1 %v5857_v36  ;;  %3738 = vmatprep.subr.bf16.mxu0 %v5985_v14  ;;  %v5969_v43 = vcombine.high %v2018_v5, %v2022_v51  ;;  %v1882_v34 = vld [vmem:[%s10067_s5 + $0x288] sm:$0xff]  ;;  %v5968_v33 = vcombine.low %v2018_v5, %v2022_v51 }
 0x2c9   : > { %3461 = vmatprep.mubr.bf16.mxu1 %v8359_v63  ;;  %3574 = vmatprep.mubr.bf16.mxu0 %v8361_v3  ;;  %v1886_v39 = vld [vmem:[%s10067_s5 + $0x2a8] sm:$0xff] }
 0x2ca   : > { %v1639_v50 = vpop.f32.mrf.mxu1  ;;  %v1752_v20 = vpop.f32.mrf.mxu0  ;;  %3462 = vmatmul.mubr.bf16.gmra.mxu1 %v8363_v4  ;;  %3575 = vmatmul.mubr.bf16.gmra.mxu0 %v8365_v28  ;;  %v2010_v36 = vld [vmem:[%s10067_s5 + $0x688] sm:$0xff] }
 0x2cb   : > { %3626 = vmatpush2.bf16.msra.mxu1 %v5856_v62  ;;  %3739 = vmatpush2.bf16.msra.mxu0 %v5984_v30  ;;  %v2014_v14 = vld [vmem:[%s10067_s5 + $0x6a8] sm:$0xff]  ;;  %v5833_v62 = vcombine.high %v1882_v34, %v1886_v39 }
 0x2cc   : > { %v1641_v47 = vpop.f32.mrf.mxu1  ;;  %v1754_v61 = vpop.f32.mrf.mxu0  ;;  %3627 = vmatprep.subr.bf16.mxu1 %v5849_v40  ;;  %3740 = vmatprep.subr.bf16.mxu0 %v5977_v26  ;;  %v5961_v6 = vcombine.high %v2010_v36, %v2014_v14  ;;  %v1874_v37 = vld [vmem:[%s10067_s5 + $0x248] sm:$0xff] }
 0x2cd   : > { %v8399_v30 = vpack.c.bf16 %v1641_v47, %v1637_v42  ;;  %v8401_v40 = vpack.c.bf16 %v1754_v61, %v1750_v60  ;;  %v1878_v42 = vld [vmem:[%s10067_s5 + $0x268] sm:$0xff] }
 0x2ce   : > { %v1643_v27 = vpop.f32.mrf.mxu1  ;;  %v1756_v49 = vpop.f32.mrf.mxu0  ;;  %v2002_v60 = vld [vmem:[%s10067_s5 + $0x648] sm:$0xff]  ;;  %v5825_v47 = vcombine.high %v1874_v37, %v1878_v42 }
 0x2cf   : > { %v8395_v19 = vpack.c.bf16 %v1643_v27, %v1639_v50  ;;  %v8397_v52 = vpack.c.bf16 %v1756_v49, %v1752_v20  ;;  %3628 = vmatpush2.bf16.msra.mxu1 %v5848_v29  ;;  %3741 = vmatpush2.bf16.msra.mxu0 %v5976_v53  ;;  %v2006_v46 = vld [vmem:[%s10067_s5 + $0x668] sm:$0xff]  ;;  %v5832_v50 = vcombine.low %v1882_v34, %v1886_v39 }
 0x2d0   : > { %v1647_v26 = vpop.f32.mrf.mxu1  ;;  %v1760_v57 = vpop.f32.mrf.mxu0  ;;  %3629 = vmatprep.subr.bf16.mxu1 %v5841_v48  ;;  %3742 = vmatprep.subr.bf16.mxu0 %v5969_v43  ;;  %v5960_v20 = vcombine.low %v2010_v36, %v2014_v14  ;;  %v5953_v61 = vcombine.high %v2002_v60, %v2006_v46  ;;  %v1866_v48 = vld [vmem:[%s10067_s5 + $0x208] sm:$0xff]  ;;  %v5824_v14 = vcombine.low %v1874_v37, %v1878_v42  ;;  %v1991_v37 = vld [vmem:[%s10067_s5 + $0x5f0] sm:$0xff] }
 0x2d1   : > { %3471 = vmatprep.mubr.bf16.mxu1 %v8395_v19  ;;  %3584 = vmatprep.mubr.bf16.mxu0 %v8397_v52  ;;  %v1870_v49 = vld [vmem:[%s10067_s5 + $0x228] sm:$0xff] }
 0x2d2   : > { %v1649_v5 = vpop.f32.mrf.mxu1  ;;  %v1762_v51 = vpop.f32.mrf.mxu0  ;;  %3472 = vmatmul.mubr.bf16.gmra.mxu1 %v8399_v30  ;;  %3585 = vmatmul.mubr.bf16.gmra.mxu0 %v8401_v40  ;;  %v1994_v34 = vld [vmem:[%s10067_s5 + $0x608] sm:$0xff]  ;;  %v5817_v32 = vcombine.high %v1866_v48, %v1870_v49  ;;  %v5816_v42 = vcombine.low %v1866_v48, %v1870_v49  ;;  %v1847_v48 = vld [vmem:[%s10067_s5 + $0x170] sm:$0xff] }
 0x2d3   : > { %3630 = vmatpush2.bf16.msra.mxu1 %v5840_v38  ;;  %3743 = vmatpush2.bf16.msra.mxu0 %v5968_v33  ;;  %v1971_v49 = vld [vmem:[%s10067_s5 + $0x550] sm:$0xff] }
 0x2d4   : > { %v1651_v29 = vpop.f32.mrf.mxu1  ;;  %v1764_v53 = vpop.f32.mrf.mxu0  ;;  %3631 = vmatprep.subr.bf16.mxu1 %v5833_v62  ;;  %3744 = vmatprep.subr.bf16.mxu0 %v5961_v6  ;;  %v1998_v6 = vld [vmem:[%s10067_s5 + $0x628] sm:$0xff]  ;;  %v5952_v62 = vcombine.low %v2002_v60, %v2006_v46 }
 0x2d5   : > { %v8435_v38 = vpack.c.bf16 %v1651_v29, %v1647_v26  ;;  %v8437_v33 = vpack.c.bf16 %v1764_v53, %v1760_v57  ;;  %v5945_v17 = vcombine.high %v1994_v34, %v1998_v6  ;;  %v1863_v26 = vld [vmem:[%s10067_s5 + $0x1f0] sm:$0xff]  ;;  %v5944_v60 = vcombine.low %v1994_v34, %v1998_v6 }
 0x2d6   : > { %v1653_v43 = vpop.f32.mrf.mxu1  ;;  %v1766_v27 = vpop.f32.mrf.mxu0  ;;  %v1987_v57 = vld [vmem:[%s10067_s5 + $0x5d0] sm:$0xff] }
 0x2d7   : > { %v8431_v39 = vpack.c.bf16 %v1653_v43, %v1649_v5  ;;  %v8433_v36 = vpack.c.bf16 %v1766_v27, %v1762_v51  ;;  %3632 = vmatpush2.bf16.msra.mxu1 %v5832_v50  ;;  %3745 = vmatpush2.bf16.msra.mxu0 %v5960_v20  ;;  %v1859_v5 = vld [vmem:[%s10067_s5 + $0x1d0] sm:$0xff]  ;;  %v5939_v51 = vcombine.high %v1987_v57, %v1991_v37 }
 0x2d8   : > { %3633 = vmatprep.subr.bf16.mxu1 %v5825_v47  ;;  %3746 = vmatprep.subr.bf16.mxu0 %v5953_v61  ;;  %v5811_v46 = vcombine.high %v1859_v5, %v1863_v26  ;;  %v1851_v50 = vld [vmem:[%s10067_s5 + $0x190] sm:$0xff]  ;;  %v5810_v29 = vcombine.low %v1859_v5, %v1863_v26 }
 0x2d9   : > { %3481 = vmatprep.mubr.bf16.mxu1 %v8431_v39  ;;  %3594 = vmatprep.mubr.bf16.mxu0 %v8433_v36  ;;  %v1855_v20 = vld [vmem:[%s10067_s5 + $0x1b0] sm:$0xff] }
 0x2da   : > { %3482 = vmatmul.mubr.bf16.gmra.mxu1 %v8435_v38  ;;  %3595 = vmatmul.mubr.bf16.gmra.mxu0 %v8437_v33  ;;  %v1979_v53 = vld [vmem:[%s10067_s5 + $0x590] sm:$0xff]  ;;  %v5803_v47 = vcombine.high %v1851_v50, %v1855_v20  ;;  %v5802_v27 = vcombine.low %v1851_v50, %v1855_v20 }
 0x2db   : > { %3634 = vmatpush2.bf16.msra.mxu1 %v5824_v14  ;;  %3637 = vmatprep.mubr.bf16.mxu1 %v8179_v24  ;;  %v1843_v61 = vld [vmem:[%s10067_s5 + $0x150] sm:$0xff] }
 0x2dc   : > { %3747 = vmatpush2.bf16.msra.mxu0 %v5952_v62  ;;  %3750 = vmatprep.mubr.bf16.mxu0 %v8181_v44  ;;  %v1975_v34 = vld [vmem:[%s10067_s5 + $0x570] sm:$0xff]  ;;  %v5795_v6 = vcombine.high %v1843_v61, %v1847_v48 }
 0x2dd   : > { %3635 = vmatprep.subr.bf16.mxu1 %v5817_v32  ;;  %3748 = vmatprep.subr.bf16.mxu0 %v5945_v17  ;;  %v1983_v32 = vld [vmem:[%s10067_s5 + $0x5b0] sm:$0xff]  ;;  %v5938_v17 = vcombine.low %v1987_v57, %v1991_v37  ;;  %v5923_v62 = vcombine.high %v1971_v49, %v1975_v34  ;;  %v5794_v57 = vcombine.low %v1843_v61, %v1847_v48 }
 0x2de   : > { %v5931_v43 = vcombine.high %v1979_v53, %v1983_v32  ;;  %v5930_v14 = vcombine.low %v1979_v53, %v1983_v32  ;;  %v1835_v5 = vld [vmem:[%s10067_s5 + $0x110] sm:$0xff] }
 0x2df   : > { %3636 = vmatpush2.bf16.msra.mxu1 %v5816_v42  ;;  %v1839_v26 = vld [vmem:[%s10067_s5 + $0x130] sm:$0xff] }
 0x2e0   : > { %3749 = vmatpush2.bf16.msra.mxu0 %v5944_v60  ;;  %3831 = vmatprep.subr.bf16.mxu1 %v5811_v46  ;;  %v1963_v37 = vld [vmem:[%s10067_s5 + $0x510] sm:$0xff]  ;;  %v5922_v60 = vcombine.low %v1971_v49, %v1975_v34  ;;  %v5787_v46 = vcombine.high %v1835_v5, %v1839_v26 }
 0x2e1   : > { %3944 = vmatprep.subr.bf16.mxu0 %v5939_v51  ;;  %v1967_v42 = vld [vmem:[%s10067_s5 + $0x530] sm:$0xff] }
 0x2e2   : > { %3638 = vmatmul.mubr.bf16.vlgmr.msra.gmra.mxu1 %v8183_v9  ;;  %v1827_v51 = vld [vmem:[%s10067_s5 + $0xd0] sm:$0xff]  ;;  %v5915_v20 = vcombine.high %v1963_v37, %v1967_v42 }
 0x2e3   : > { %3751 = vmatmul.mubr.bf16.vlgmr.msra.gmra.mxu0 %v8185_v31  ;;  %3832 = vmatpush1.bf16.msra.mxu1 %v5810_v29  ;;  %v1831_v50 = vld [vmem:[%s10067_s5 + $0xf0] sm:$0xff]  ;;  %v5786_v29 = vcombine.low %v1835_v5, %v1839_v26 }
 0x2e4   : > { %3647 = vmatprep.mubr.bf16.mxu1 %v8215_v25  ;;  %3760 = vmatprep.mubr.bf16.mxu0 %v8217_v7  ;;  %v1955_v53 = vld [vmem:[%s10067_s5 + $0x4d0] sm:$0xff] }
 0x2e5   : > { %3945 = vmatpush1.bf16.msra.mxu0 %v5938_v17  ;;  %3833 = vmatprep.subr.bf16.mxu1 %v5803_v47  ;;  %v1959_v32 = vld [vmem:[%s10067_s5 + $0x4f0] sm:$0xff]  ;;  %v5779_v17 = vcombine.high %v1827_v51, %v1831_v50  ;;  %v5914_v47 = vcombine.low %v1963_v37, %v1967_v42 }
 0x2e6   : > { %3946 = vmatprep.subr.bf16.mxu0 %v5931_v43  ;;  %v5907_v61 = vcombine.high %v1955_v53, %v1959_v32  ;;  %v1819_v48 = vld [vmem:[%s10067_s5 + $0x90] sm:$0xff] }
 0x2e7   : > { %3834 = vmatpush1.bf16.msra.mxu1 %v5802_v27  ;;  %v1823_v43 = vld [vmem:[%s10067_s5 + $0xb0] sm:$0xff]  ;;  %v5778_v27 = vcombine.low %v1827_v51, %v1831_v50 }
 0x2e8   : > { %3835 = vmatprep.subr.bf16.mxu1 %v5795_v6  ;;  %v1947_v49 = vld [vmem:[%s10067_s5 + $0x490] sm:$0xff]  ;;  %v5906_v6 = vcombine.low %v1955_v53, %v1959_v32 }
 0x2e9   : > { %3947 = vmatpush1.bf16.msra.mxu0 %v5930_v14  ;;  %v1951_v34 = vld [vmem:[%s10067_s5 + $0x4b0] sm:$0xff]  ;;  %v5771_v14 = vcombine.high %v1819_v48, %v1823_v43 }
 0x2ea   : > { %3648 = vmatmul.mubr.bf16.gmra.mxu1 %v8219_v58  ;;  %3948 = vmatprep.subr.bf16.mxu0 %v5923_v62  ;;  %v1811_v62 = vld [vmem:[%s10067_s5 + $0x50] sm:$0xff]  ;;  %v5899_v26 = vcombine.high %v1947_v49, %v1951_v34 }
 0x2eb   : > { %3761 = vmatmul.mubr.bf16.gmra.mxu0 %v8221_v0  ;;  %3836 = vmatpush1.bf16.msra.mxu1 %v5794_v57  ;;  %v1815_v5 = vld [vmem:[%s10067_s5 + $0x70] sm:$0xff]  ;;  %v5770_v57 = vcombine.low %v1819_v48, %v1823_v43 }
 0x2ec   : > { %3657 = vmatprep.mubr.bf16.mxu1 %v8251_v16  ;;  %3770 = vmatprep.mubr.bf16.mxu0 %v8253_v21  ;;  %v1939_v37 = vld [vmem:[%s10067_s5 + $0x450] sm:$0xff] }
 0x2ed   : > { %3949 = vmatpush1.bf16.msra.mxu0 %v5922_v60  ;;  %3837 = vmatprep.subr.bf16.mxu1 %v5787_v46  ;;  %v1943_v42 = vld [vmem:[%s10067_s5 + $0x470] sm:$0xff]  ;;  %v5763_v60 = vcombine.high %v1811_v62, %v1815_v5  ;;  %v5898_v46 = vcombine.low %v1947_v49, %v1951_v34 }
 0x2ee   : > { %3950 = vmatprep.subr.bf16.mxu0 %v5915_v20  ;;  %v5891_v51 = vcombine.high %v1939_v37, %v1943_v42  ;;  %v1803_v50 = vld [vmem:[%s10067_s5 + $0x10] sm:$0xff] }
 0x2ef   : > { %3838 = vmatpush1.bf16.msra.mxu1 %v5786_v29  ;;  %v1807_v20 = vld [vmem:[%s10067_s5 + $0x30] sm:$0xff]  ;;  %v5762_v29 = vcombine.low %v1811_v62, %v1815_v5 }
 0x2f0   : > { %3839 = vmatprep.subr.bf16.mxu1 %v5779_v17  ;;  %v1931_v53 = vld [vmem:[%s10067_s5 + $0x410] sm:$0xff]  ;;  %v5890_v17 = vcombine.low %v1939_v37, %v1943_v42 }
 0x2f1   : > { %3951 = vmatpush1.bf16.msra.mxu0 %v5914_v47  ;;  %v1935_v32 = vld [vmem:[%s10067_s5 + $0x430] sm:$0xff]  ;;  %v5755_v47 = vcombine.high %v1803_v50, %v1807_v20 }
 0x2f2   : > { %3658 = vmatmul.mubr.bf16.gmra.mxu1 %v8255_v13  ;;  %3952 = vmatprep.subr.bf16.mxu0 %v5907_v61  ;;  %v1923_v61 = vld [vmem:[%s10067_s5 + $0x3d0] sm:$0xff]  ;;  %v5883_v43 = vcombine.high %v1931_v53, %v1935_v32 }
 0x2f3   : > { %3771 = vmatmul.mubr.bf16.gmra.mxu0 %v8257_v23  ;;  %3840 = vmatpush1.bf16.msra.mxu1 %v5778_v27  ;;  %v1927_v48 = vld [vmem:[%s10067_s5 + $0x3f0] sm:$0xff]  ;;  %v5754_v27 = vcombine.low %v1803_v50, %v1807_v20 }
 0x2f4   : > { %3667 = vmatprep.mubr.bf16.mxu1 %v8287_v1  ;;  %3780 = vmatprep.mubr.bf16.mxu0 %v8289_v55  ;;  %v2051_v49 = vld [vmem:[%s10067_s5 + $0x7d0] sm:$0xff] }
 0x2f5   : > { %3953 = vmatpush1.bf16.msra.mxu0 %v5906_v6  ;;  %3841 = vmatprep.subr.bf16.mxu1 %v5771_v14  ;;  %v2055_v34 = vld [vmem:[%s10067_s5 + $0x7f0] sm:$0xff]  ;;  %v5875_v6 = vcombine.high %v1923_v61, %v1927_v48  ;;  %v5882_v14 = vcombine.low %v1931_v53, %v1935_v32 }
 0x2f6   : > { %3954 = vmatprep.subr.bf16.mxu0 %v5899_v26  ;;  %v6003_v62 = vcombine.high %v2051_v49, %v2055_v34  ;;  %v1915_v5 = vld [vmem:[%s10067_s5 + $0x390] sm:$0xff] }
 0x2f7   : > { %3842 = vmatpush1.bf16.msra.mxu1 %v5770_v57  ;;  %v1919_v26 = vld [vmem:[%s10067_s5 + $0x3b0] sm:$0xff]  ;;  %v5874_v57 = vcombine.low %v1923_v61, %v1927_v48 }
 0x2f8   : > { %3843 = vmatprep.subr.bf16.mxu1 %v5763_v60  ;;  %v2043_v37 = vld [vmem:[%s10067_s5 + $0x790] sm:$0xff]  ;;  %v6002_v60 = vcombine.low %v2051_v49, %v2055_v34 }
 0x2f9   : > { %3955 = vmatpush1.bf16.msra.mxu0 %v5898_v46  ;;  %v2047_v42 = vld [vmem:[%s10067_s5 + $0x7b0] sm:$0xff]  ;;  %v5867_v46 = vcombine.high %v1915_v5, %v1919_v26 }
 0x2fa   : > { %3668 = vmatmul.mubr.bf16.gmra.mxu1 %v8291_v18  ;;  %3956 = vmatprep.subr.bf16.mxu0 %v5891_v51  ;;  %v1907_v51 = vld [vmem:[%s10067_s5 + $0x350] sm:$0xff]  ;;  %v5995_v20 = vcombine.high %v2043_v37, %v2047_v42 }
 0x2fb   : > { %3781 = vmatmul.mubr.bf16.gmra.mxu0 %v8293_v12  ;;  %3844 = vmatpush1.bf16.msra.mxu1 %v5762_v29  ;;  %v1911_v50 = vld [vmem:[%s10067_s5 + $0x370] sm:$0xff]  ;;  %v5866_v29 = vcombine.low %v1915_v5, %v1919_v26 }
 0x2fc   : > { %3677 = vmatprep.mubr.bf16.mxu1 %v8323_v10  ;;  %3790 = vmatprep.mubr.bf16.mxu0 %v8325_v11  ;;  %v2035_v53 = vld [vmem:[%s10067_s5 + $0x750] sm:$0xff] }
 0x2fd   : > { %3957 = vmatpush1.bf16.msra.mxu0 %v5890_v17  ;;  %3845 = vmatprep.subr.bf16.mxu1 %v5755_v47  ;;  %v2039_v32 = vld [vmem:[%s10067_s5 + $0x770] sm:$0xff]  ;;  %v5859_v17 = vcombine.high %v1907_v51, %v1911_v50  ;;  %v5994_v47 = vcombine.low %v2043_v37, %v2047_v42 }
 0x2fe   : > { %3958 = vmatprep.subr.bf16.mxu0 %v5883_v43  ;;  %v5987_v61 = vcombine.high %v2035_v53, %v2039_v32  ;;  %v1899_v48 = vld [vmem:[%s10067_s5 + $0x310] sm:$0xff] }
 0x2ff   : > { %3846 = vmatpush1.bf16.msra.mxu1 %v5754_v27  ;;  %v1903_v43 = vld [vmem:[%s10067_s5 + $0x330] sm:$0xff]  ;;  %v5858_v27 = vcombine.low %v1907_v51, %v1911_v50 }
 0x300   : > { %3847 = vmatprep.subr.bf16.mxu1 %v5875_v6  ;;  %v2027_v49 = vld [vmem:[%s10067_s5 + $0x710] sm:$0xff]  ;;  %v5986_v6 = vcombine.low %v2035_v53, %v2039_v32 }
 0x301   : > { %3959 = vmatpush1.bf16.msra.mxu0 %v5882_v14  ;;  %v2031_v34 = vld [vmem:[%s10067_s5 + $0x730] sm:$0xff]  ;;  %v5851_v14 = vcombine.high %v1899_v48, %v1903_v43 }
 0x302   : > { %3678 = vmatmul.mubr.bf16.gmra.mxu1 %v8327_v45  ;;  %3960 = vmatprep.subr.bf16.mxu0 %v6003_v62  ;;  %v1891_v62 = vld [vmem:[%s10067_s5 + $0x2d0] sm:$0xff]  ;;  %v5979_v26 = vcombine.high %v2027_v49, %v2031_v34 }
 0x303   : > { %3791 = vmatmul.mubr.bf16.gmra.mxu0 %v8329_v56  ;;  %3848 = vmatpush2.bf16.msra.mxu1 %v5874_v57  ;;  %v1895_v5 = vld [vmem:[%s10067_s5 + $0x2f0] sm:$0xff]  ;;  %v5850_v57 = vcombine.low %v1899_v48, %v1903_v43 }
 0x304   : > { %3687 = vmatprep.mubr.bf16.mxu1 %v8359_v63  ;;  %3800 = vmatprep.mubr.bf16.mxu0 %v8361_v3  ;;  %v2019_v37 = vld [vmem:[%s10067_s5 + $0x6d0] sm:$0xff] }
 0x305   : > { %3961 = vmatpush2.bf16.msra.mxu0 %v6002_v60  ;;  %3849 = vmatprep.subr.bf16.mxu1 %v5867_v46  ;;  %v2023_v42 = vld [vmem:[%s10067_s5 + $0x6f0] sm:$0xff]  ;;  %v5843_v60 = vcombine.high %v1891_v62, %v1895_v5  ;;  %v5978_v46 = vcombine.low %v2027_v49, %v2031_v34 }
 0x306   : > { %3962 = vmatprep.subr.bf16.mxu0 %v5995_v20  ;;  %v5971_v51 = vcombine.high %v2019_v37, %v2023_v42  ;;  %v1883_v50 = vld [vmem:[%s10067_s5 + $0x290] sm:$0xff] }
 0x307   : > { %3850 = vmatpush2.bf16.msra.mxu1 %v5866_v29  ;;  %v1887_v20 = vld [vmem:[%s10067_s5 + $0x2b0] sm:$0xff]  ;;  %v5842_v29 = vcombine.low %v1891_v62, %v1895_v5 }
 0x308   : > { %3851 = vmatprep.subr.bf16.mxu1 %v5859_v17  ;;  %v2011_v53 = vld [vmem:[%s10067_s5 + $0x690] sm:$0xff]  ;;  %v5970_v17 = vcombine.low %v2019_v37, %v2023_v42 }
 0x309   : > { %3963 = vmatpush2.bf16.msra.mxu0 %v5994_v47  ;;  %v2015_v32 = vld [vmem:[%s10067_s5 + $0x6b0] sm:$0xff]  ;;  %v5835_v47 = vcombine.high %v1883_v50, %v1887_v20 }
 0x30a   : > { %3688 = vmatmul.mubr.bf16.gmra.mxu1 %v8363_v4  ;;  %3964 = vmatprep.subr.bf16.mxu0 %v5987_v61  ;;  %v1875_v61 = vld [vmem:[%s10067_s5 + $0x250] sm:$0xff]  ;;  %v5963_v43 = vcombine.high %v2011_v53, %v2015_v32 }
 0x30b   : > { %3801 = vmatmul.mubr.bf16.gmra.mxu0 %v8365_v28  ;;  %3852 = vmatpush2.bf16.msra.mxu1 %v5858_v27  ;;  %v1879_v48 = vld [vmem:[%s10067_s5 + $0x270] sm:$0xff]  ;;  %v5834_v27 = vcombine.low %v1883_v50, %v1887_v20  ;;  %v1864_v50 = vld [vmem:[%s10067_s5 + $0x1f8] sm:$0xff] }
 0x30c   : > { %3697 = vmatprep.mubr.bf16.mxu1 %v8395_v19  ;;  %3810 = vmatprep.mubr.bf16.mxu0 %v8397_v52  ;;  %v2003_v49 = vld [vmem:[%s10067_s5 + $0x650] sm:$0xff] }
 0x30d   : > { %3965 = vmatpush2.bf16.msra.mxu0 %v5986_v6  ;;  %3853 = vmatprep.subr.bf16.mxu1 %v5851_v14  ;;  %v2007_v34 = vld [vmem:[%s10067_s5 + $0x670] sm:$0xff]  ;;  %v5827_v6 = vcombine.high %v1875_v61, %v1879_v48  ;;  %v5962_v14 = vcombine.low %v2011_v53, %v2015_v32  ;;  %v1988_v53 = vld [vmem:[%s10067_s5 + $0x5d8] sm:$0xff] }
 0x30e   : > { %3966 = vmatprep.subr.bf16.mxu0 %v5979_v26  ;;  %v5955_v62 = vcombine.high %v2003_v49, %v2007_v34  ;;  %v1867_v5 = vld [vmem:[%s10067_s5 + $0x210] sm:$0xff]  ;;  %v1992_v32 = vld [vmem:[%s10067_s5 + $0x5f8] sm:$0xff] }
 0x30f   : > { %3854 = vmatpush2.bf16.msra.mxu1 %v5850_v57  ;;  %v1871_v26 = vld [vmem:[%s10067_s5 + $0x230] sm:$0xff]  ;;  %v5826_v57 = vcombine.low %v1875_v61, %v1879_v48  ;;  %v1852_v61 = vld [vmem:[%s10067_s5 + $0x198] sm:$0xff] }
 0x310   : > { %3855 = vmatprep.subr.bf16.mxu1 %v5843_v60  ;;  %v1995_v37 = vld [vmem:[%s10067_s5 + $0x610] sm:$0xff]  ;;  %v5954_v60 = vcombine.low %v2003_v49, %v2007_v34  ;;  %v1856_v48 = vld [vmem:[%s10067_s5 + $0x1b8] sm:$0xff] }
 0x311   : > { %3967 = vmatpush2.bf16.msra.mxu0 %v5978_v46  ;;  %v1999_v42 = vld [vmem:[%s10067_s5 + $0x630] sm:$0xff]  ;;  %v5819_v46 = vcombine.high %v1867_v5, %v1871_v26  ;;  %v1980_v49 = vld [vmem:[%s10067_s5 + $0x598] sm:$0xff] }
 0x312   : > { %3698 = vmatmul.mubr.bf16.gmra.mxu1 %v8399_v30  ;;  %3968 = vmatprep.subr.bf16.mxu0 %v5971_v51  ;;  %v1860_v51 = vld [vmem:[%s10067_s5 + $0x1d8] sm:$0xff]  ;;  %v5947_v20 = vcombine.high %v1995_v37, %v1999_v42 }
 0x313   : > { %3811 = vmatmul.mubr.bf16.gmra.mxu0 %v8401_v40  ;;  %3856 = vmatpush2.bf16.msra.mxu1 %v5842_v29  ;;  %v5818_v29 = vcombine.low %v1867_v5, %v1871_v26  ;;  %v1984_v34 = vld [vmem:[%s10067_s5 + $0x5b8] sm:$0xff] }
 0x314   : > { %3707 = vmatprep.mubr.bf16.mxu1 %v8431_v39  ;;  %3820 = vmatprep.mubr.bf16.mxu0 %v8433_v36  ;;  %v1848_v5 = vld [vmem:[%s10067_s5 + $0x178] sm:$0xff]  ;;  %v5933_v26 = vcombine.high %v1980_v49, %v1984_v34 }
 0x315   : > { %3969 = vmatpush2.bf16.msra.mxu0 %v5970_v17  ;;  %3857 = vmatprep.subr.bf16.mxu1 %v5835_v47  ;;  %v5813_v17 = vcombine.high %v1860_v51, %v1864_v50  ;;  %v5946_v47 = vcombine.low %v1995_v37, %v1999_v42  ;;  %v1972_v37 = vld [vmem:[%s10067_s5 + $0x558] sm:$0xff] }
 0x316   : > { %3970 = vmatprep.subr.bf16.mxu0 %v5963_v43  ;;  %v5941_v43 = vcombine.high %v1988_v53, %v1992_v32  ;;  %v1976_v42 = vld [vmem:[%s10067_s5 + $0x578] sm:$0xff] }
 0x317   : > { %3858 = vmatpush2.bf16.msra.mxu1 %v5834_v27  ;;  %v5812_v27 = vcombine.low %v1860_v51, %v1864_v50  ;;  %v1836_v51 = vld [vmem:[%s10067_s5 + $0x118] sm:$0xff] }
 0x318   : > { %3859 = vmatprep.subr.bf16.mxu1 %v5827_v6  ;;  %v5805_v6 = vcombine.high %v1852_v61, %v1856_v48  ;;  %v1840_v50 = vld [vmem:[%s10067_s5 + $0x138] sm:$0xff] }
 0x319   : > { %3971 = vmatpush2.bf16.msra.mxu0 %v5962_v14  ;;  %v5940_v14 = vcombine.low %v1988_v53, %v1992_v32  ;;  %v1964_v53 = vld [vmem:[%s10067_s5 + $0x518] sm:$0xff] }
 0x31a   : > { %3708 = vmatmul.mubr.bf16.gmra.mxu1 %v8435_v38  ;;  %3972 = vmatprep.subr.bf16.mxu0 %v5955_v62  ;;  %v1844_v62 = vld [vmem:[%s10067_s5 + $0x158] sm:$0xff] }
 0x31b   : > { %3821 = vmatmul.mubr.bf16.gmra.mxu0 %v8437_v33  ;;  %3860 = vmatpush2.bf16.msra.mxu1 %v5826_v57  ;;  %v5804_v57 = vcombine.low %v1852_v61, %v1856_v48  ;;  %v1968_v32 = vld [vmem:[%s10067_s5 + $0x538] sm:$0xff] }
 0x31c   : > { %3863 = vmatprep.mubr.bf16.mxu1 %v8179_v24  ;;  %3976 = vmatprep.mubr.bf16.mxu0 %v8181_v44  ;;  %v1828_v61 = vld [vmem:[%s10067_s5 + $0xd8] sm:$0xff] }
 0x31d   : > { %3973 = vmatpush2.bf16.msra.mxu0 %v5954_v60  ;;  %3861 = vmatprep.subr.bf16.mxu1 %v5819_v46  ;;  %v5797_v60 = vcombine.high %v1844_v62, %v1848_v5  ;;  %v5932_v46 = vcombine.low %v1980_v49, %v1984_v34  ;;  %v1832_v48 = vld [vmem:[%s10067_s5 + $0xf8] sm:$0xff] }
 0x31e   : > { %3974 = vmatprep.subr.bf16.mxu0 %v5947_v20  ;;  %v5925_v20 = vcombine.high %v1972_v37, %v1976_v42  ;;  %v1956_v49 = vld [vmem:[%s10067_s5 + $0x4d8] sm:$0xff] }
 0x31f   : > { %3862 = vmatpush2.bf16.msra.mxu1 %v5818_v29  ;;  %v5796_v29 = vcombine.low %v1844_v62, %v1848_v5  ;;  %v1960_v34 = vld [vmem:[%s10067_s5 + $0x4f8] sm:$0xff] }
 0x320   : > { %4057 = vmatprep.subr.bf16.mxu1 %v5813_v17  ;;  %v5789_v17 = vcombine.high %v1836_v51, %v1840_v50  ;;  %v1820_v62 = vld [vmem:[%s10067_s5 + $0x98] sm:$0xff] }
 0x321   : > { %3975 = vmatpush2.bf16.msra.mxu0 %v5946_v47  ;;  %v5924_v47 = vcombine.low %v1972_v37, %v1976_v42  ;;  %v1824_v5 = vld [vmem:[%s10067_s5 + $0xb8] sm:$0xff] }
 0x322   : > { %3864 = vmatmul.mubr.bf16.vlgmr.msra.gmra.mxu1 %v8183_v9  ;;  %4170 = vmatprep.subr.bf16.mxu0 %v5941_v43  ;;  %v5917_v43 = vcombine.high %v1964_v53, %v1968_v32  ;;  %v1948_v37 = vld [vmem:[%s10067_s5 + $0x498] sm:$0xff] }
 0x323   : > { %4058 = vmatpush1.bf16.msra.mxu1 %v5812_v27  ;;  %3873 = vmatprep.mubr.bf16.mxu1 %v8215_v25  ;;  %v5788_v27 = vcombine.low %v1836_v51, %v1840_v50  ;;  %v1952_v42 = vld [vmem:[%s10067_s5 + $0x4b8] sm:$0xff] }
 0x324   : > { %3977 = vmatmul.mubr.bf16.vlgmr.msra.gmra.mxu0 %v8185_v31  ;;  %4059 = vmatprep.subr.bf16.mxu1 %v5805_v6  ;;  %v5781_v6 = vcombine.high %v1828_v61, %v1832_v48  ;;  %v1812_v51 = vld [vmem:[%s10067_s5 + $0x58] sm:$0xff] }
 0x325   : > { %3986 = vmatprep.mubr.bf16.mxu0 %v8217_v7  ;;  %4171 = vmatpush1.bf16.msra.mxu0 %v5940_v14  ;;  %v5916_v14 = vcombine.low %v1964_v53, %v1968_v32  ;;  %v1816_v50 = vld [vmem:[%s10067_s5 + $0x78] sm:$0xff] }
 0x326   : > { %4172 = vmatprep.subr.bf16.mxu0 %v5933_v26  ;;  %v5909_v26 = vcombine.high %v1956_v49, %v1960_v34  ;;  %v1940_v53 = vld [vmem:[%s10067_s5 + $0x458] sm:$0xff] }
 0x327   : > { %4060 = vmatpush1.bf16.msra.mxu1 %v5804_v57  ;;  %v5780_v57 = vcombine.low %v1828_v61, %v1832_v48  ;;  %v1944_v32 = vld [vmem:[%s10067_s5 + $0x478] sm:$0xff] }
 0x328   : > { %4061 = vmatprep.subr.bf16.mxu1 %v5797_v60  ;;  %v5773_v60 = vcombine.high %v1820_v62, %v1824_v5  ;;  %v1804_v61 = vld [vmem:[%s10067_s5 + $0x18] sm:$0xff] }
 0x329   : > { %4173 = vmatpush1.bf16.msra.mxu0 %v5932_v46  ;;  %v5908_v46 = vcombine.low %v1956_v49, %v1960_v34  ;;  %v1808_v48 = vld [vmem:[%s10067_s5 + $0x38] sm:$0xff] }
 0x32a   : > { %3874 = vmatmul.mubr.bf16.gmra.mxu1 %v8219_v58  ;;  %4174 = vmatprep.subr.bf16.mxu0 %v5925_v20  ;;  %v5901_v20 = vcombine.high %v1948_v37, %v1952_v42  ;;  %v1932_v49 = vld [vmem:[%s10067_s5 + $0x418] sm:$0xff] }
 0x32b   : > { %4062 = vmatpush1.bf16.msra.mxu1 %v5796_v29  ;;  %3883 = vmatprep.mubr.bf16.mxu1 %v8251_v16  ;;  %v5772_v29 = vcombine.low %v1820_v62, %v1824_v5  ;;  %v1936_v34 = vld [vmem:[%s10067_s5 + $0x438] sm:$0xff] }
 0x32c   : > { %3987 = vmatmul.mubr.bf16.gmra.mxu0 %v8221_v0  ;;  %4063 = vmatprep.subr.bf16.mxu1 %v5789_v17  ;;  %v5765_v17 = vcombine.high %v1812_v51, %v1816_v50  ;;  %v1924_v62 = vld [vmem:[%s10067_s5 + $0x3d8] sm:$0xff] }
 0x32d   : > { %3996 = vmatprep.mubr.bf16.mxu0 %v8253_v21  ;;  %4175 = vmatpush1.bf16.msra.mxu0 %v5924_v47  ;;  %v5900_v47 = vcombine.low %v1948_v37, %v1952_v42  ;;  %v1928_v5 = vld [vmem:[%s10067_s5 + $0x3f8] sm:$0xff] }
 0x32e   : > { %4176 = vmatprep.subr.bf16.mxu0 %v5917_v43  ;;  %v5893_v43 = vcombine.high %v1940_v53, %v1944_v32  ;;  %v2052_v37 = vld [vmem:[%s10067_s5 + $0x7d8] sm:$0xff] }
 0x32f   : > { %4064 = vmatpush1.bf16.msra.mxu1 %v5788_v27  ;;  %v5764_v27 = vcombine.low %v1812_v51, %v1816_v50  ;;  %v2056_v42 = vld [vmem:[%s10067_s5 + $0x7f8] sm:$0xff] }
 0x330   : > { %4065 = vmatprep.subr.bf16.mxu1 %v5781_v6  ;;  %v5757_v6 = vcombine.high %v1804_v61, %v1808_v48  ;;  %v1916_v51 = vld [vmem:[%s10067_s5 + $0x398] sm:$0xff] }
 0x331   : > { %4177 = vmatpush1.bf16.msra.mxu0 %v5916_v14  ;;  %v5892_v14 = vcombine.low %v1940_v53, %v1944_v32  ;;  %v1920_v50 = vld [vmem:[%s10067_s5 + $0x3b8] sm:$0xff] }
 0x332   : > { %3884 = vmatmul.mubr.bf16.gmra.mxu1 %v8255_v13  ;;  %4178 = vmatprep.subr.bf16.mxu0 %v5909_v26  ;;  %v5885_v26 = vcombine.high %v1932_v49, %v1936_v34  ;;  %v2044_v53 = vld [vmem:[%s10067_s5 + $0x798] sm:$0xff] }
 0x333   : > { %4066 = vmatpush1.bf16.msra.mxu1 %v5780_v57  ;;  %3893 = vmatprep.mubr.bf16.mxu1 %v8287_v1  ;;  %v5756_v57 = vcombine.low %v1804_v61, %v1808_v48  ;;  %v2048_v32 = vld [vmem:[%s10067_s5 + $0x7b8] sm:$0xff] }
 0x334   : > { %3997 = vmatmul.mubr.bf16.gmra.mxu0 %v8257_v23  ;;  %4067 = vmatprep.subr.bf16.mxu1 %v5773_v60  ;;  %v5877_v60 = vcombine.high %v1924_v62, %v1928_v5  ;;  %v1908_v61 = vld [vmem:[%s10067_s5 + $0x358] sm:$0xff] }
 0x335   : > { %4006 = vmatprep.mubr.bf16.mxu0 %v8289_v55  ;;  %4179 = vmatpush1.bf16.msra.mxu0 %v5908_v46  ;;  %v5884_v46 = vcombine.low %v1932_v49, %v1936_v34  ;;  %v1912_v48 = vld [vmem:[%s10067_s5 + $0x378] sm:$0xff] }
 0x336   : > { %4180 = vmatprep.subr.bf16.mxu0 %v5901_v20  ;;  %v6005_v20 = vcombine.high %v2052_v37, %v2056_v42  ;;  %v2036_v49 = vld [vmem:[%s10067_s5 + $0x758] sm:$0xff] }
 0x337   : > { %4068 = vmatpush1.bf16.msra.mxu1 %v5772_v29  ;;  %v5876_v29 = vcombine.low %v1924_v62, %v1928_v5  ;;  %v2040_v34 = vld [vmem:[%s10067_s5 + $0x778] sm:$0xff] }
 0x338   : > { %4069 = vmatprep.subr.bf16.mxu1 %v5765_v17  ;;  %v5869_v17 = vcombine.high %v1916_v51, %v1920_v50  ;;  %v1900_v62 = vld [vmem:[%s10067_s5 + $0x318] sm:$0xff] }
 0x339   : > { %4181 = vmatpush1.bf16.msra.mxu0 %v5900_v47  ;;  %v6004_v47 = vcombine.low %v2052_v37, %v2056_v42  ;;  %v1904_v5 = vld [vmem:[%s10067_s5 + $0x338] sm:$0xff] }
 0x33a   : > { %3894 = vmatmul.mubr.bf16.gmra.mxu1 %v8291_v18  ;;  %4182 = vmatprep.subr.bf16.mxu0 %v5893_v43  ;;  %v5997_v43 = vcombine.high %v2044_v53, %v2048_v32  ;;  %v2028_v37 = vld [vmem:[%s10067_s5 + $0x718] sm:$0xff] }
 0x33b   : > { %4070 = vmatpush1.bf16.msra.mxu1 %v5764_v27  ;;  %3903 = vmatprep.mubr.bf16.mxu1 %v8323_v10  ;;  %v5868_v27 = vcombine.low %v1916_v51, %v1920_v50  ;;  %v2032_v42 = vld [vmem:[%s10067_s5 + $0x738] sm:$0xff] }
 0x33c   : > { %4007 = vmatmul.mubr.bf16.gmra.mxu0 %v8293_v12  ;;  %4071 = vmatprep.subr.bf16.mxu1 %v5757_v6  ;;  %v5861_v6 = vcombine.high %v1908_v61, %v1912_v48  ;;  %v1892_v51 = vld [vmem:[%s10067_s5 + $0x2d8] sm:$0xff] }
 0x33d   : > { %4016 = vmatprep.mubr.bf16.mxu0 %v8325_v11  ;;  %4183 = vmatpush1.bf16.msra.mxu0 %v5892_v14  ;;  %v5996_v14 = vcombine.low %v2044_v53, %v2048_v32  ;;  %v1896_v50 = vld [vmem:[%s10067_s5 + $0x2f8] sm:$0xff] }
 0x33e   : > { %4184 = vmatprep.subr.bf16.mxu0 %v5885_v26  ;;  %v5989_v26 = vcombine.high %v2036_v49, %v2040_v34  ;;  %v2020_v53 = vld [vmem:[%s10067_s5 + $0x6d8] sm:$0xff] }
 0x33f   : > { %4072 = vmatpush1.bf16.msra.mxu1 %v5756_v57  ;;  %v5860_v57 = vcombine.low %v1908_v61, %v1912_v48  ;;  %v2024_v32 = vld [vmem:[%s10067_s5 + $0x6f8] sm:$0xff] }
 0x340   : > { %4073 = vmatprep.subr.bf16.mxu1 %v5877_v60  ;;  %v5853_v60 = vcombine.high %v1900_v62, %v1904_v5  ;;  %v1884_v61 = vld [vmem:[%s10067_s5 + $0x298] sm:$0xff] }
 0x341   : > { %4185 = vmatpush1.bf16.msra.mxu0 %v5884_v46  ;;  %v5988_v46 = vcombine.low %v2036_v49, %v2040_v34  ;;  %v1888_v48 = vld [vmem:[%s10067_s5 + $0x2b8] sm:$0xff] }
 0x342   : > { %3904 = vmatmul.mubr.bf16.gmra.mxu1 %v8327_v45  ;;  %4186 = vmatprep.subr.bf16.mxu0 %v6005_v20  ;;  %v5981_v20 = vcombine.high %v2028_v37, %v2032_v42  ;;  %v2012_v49 = vld [vmem:[%s10067_s5 + $0x698] sm:$0xff] }
 0x343   : > { %4074 = vmatpush2.bf16.msra.mxu1 %v5876_v29  ;;  %3913 = vmatprep.mubr.bf16.mxu1 %v8359_v63  ;;  %v5852_v29 = vcombine.low %v1900_v62, %v1904_v5  ;;  %v2016_v34 = vld [vmem:[%s10067_s5 + $0x6b8] sm:$0xff] }
 0x344   : > { %4017 = vmatmul.mubr.bf16.gmra.mxu0 %v8329_v56  ;;  %4075 = vmatprep.subr.bf16.mxu1 %v5869_v17  ;;  %v5845_v17 = vcombine.high %v1892_v51, %v1896_v50  ;;  %v1876_v62 = vld [vmem:[%s10067_s5 + $0x258] sm:$0xff] }
 0x345   : > { %4026 = vmatprep.mubr.bf16.mxu0 %v8361_v3  ;;  %4187 = vmatpush2.bf16.msra.mxu0 %v6004_v47  ;;  %v5980_v47 = vcombine.low %v2028_v37, %v2032_v42  ;;  %v1880_v5 = vld [vmem:[%s10067_s5 + $0x278] sm:$0xff] }
 0x346   : > { %4188 = vmatprep.subr.bf16.mxu0 %v5997_v43  ;;  %v5973_v43 = vcombine.high %v2020_v53, %v2024_v32  ;;  %v2004_v37 = vld [vmem:[%s10067_s5 + $0x658] sm:$0xff] }
 0x347   : > { %4076 = vmatpush2.bf16.msra.mxu1 %v5868_v27  ;;  %v5844_v27 = vcombine.low %v1892_v51, %v1896_v50  ;;  %v2008_v42 = vld [vmem:[%s10067_s5 + $0x678] sm:$0xff] }
 0x348   : > { %4077 = vmatprep.subr.bf16.mxu1 %v5861_v6  ;;  %v5837_v6 = vcombine.high %v1884_v61, %v1888_v48  ;;  %v1868_v51 = vld [vmem:[%s10067_s5 + $0x218] sm:$0xff] }
 0x349   : > { %4189 = vmatpush2.bf16.msra.mxu0 %v5996_v14  ;;  %v5972_v14 = vcombine.low %v2020_v53, %v2024_v32  ;;  %v1872_v50 = vld [vmem:[%s10067_s5 + $0x238] sm:$0xff] }
 0x34a   : > { %3914 = vmatmul.mubr.bf16.gmra.mxu1 %v8363_v4  ;;  %4190 = vmatprep.subr.bf16.mxu0 %v5989_v26  ;;  %v5965_v26 = vcombine.high %v2012_v49, %v2016_v34  ;;  %v1996_v53 = vld [vmem:[%s10067_s5 + $0x618] sm:$0xff] }
 0x34b   : > { %4078 = vmatpush2.bf16.msra.mxu1 %v5860_v57  ;;  %3923 = vmatprep.mubr.bf16.mxu1 %v8395_v19  ;;  %v5836_v57 = vcombine.low %v1884_v61, %v1888_v48  ;;  %v2000_v32 = vld [vmem:[%s10067_s5 + $0x638] sm:$0xff]  ;;  %v5820_v48 = vcombine.low %v1868_v51, %v1872_v50 }
 0x34c   : > { %4027 = vmatmul.mubr.bf16.gmra.mxu0 %v8365_v28  ;;  %4079 = vmatprep.subr.bf16.mxu1 %v5853_v60  ;;  %v5829_v60 = vcombine.high %v1876_v62, %v1880_v5  ;;  %v5949_v61 = vcombine.high %v1996_v53, %v2000_v32 }
 0x34d   : > { %4036 = vmatprep.mubr.bf16.mxu0 %v8397_v52  ;;  %4191 = vmatpush2.bf16.msra.mxu0 %v5988_v46  ;;  %v5964_v46 = vcombine.low %v2012_v49, %v2016_v34  ;;  %v5948_v49 = vcombine.low %v1996_v53, %v2000_v32 }
 0x34e   : > { %4192 = vmatprep.subr.bf16.mxu0 %v5981_v20  ;;  %v5957_v20 = vcombine.high %v2004_v37, %v2008_v42 }
 0x34f   : > { %4080 = vmatpush2.bf16.msra.mxu1 %v5852_v29  ;;  %v5828_v29 = vcombine.low %v1876_v62, %v1880_v5  ;;  %v6420_v62 = vld [vmem:[%s10069_s7 + $0x64] ss:$8 sps:$4 sm:$0xff]  }
 0x350   : > { %4081 = vmatprep.subr.bf16.mxu1 %v5845_v17  ;;  %v5821_v17 = vcombine.high %v1868_v51, %v1872_v50  ;;  %v6423_v51 = vld [vmem:[%s10069_s7 + $0x54] ss:$8 sps:$4 sm:$0xff]  }
 0x351   : > { %4193 = vmatpush2.bf16.msra.mxu0 %v5980_v47  ;;  %v5956_v47 = vcombine.low %v2004_v37, %v2008_v42  ;;  %v6418_v42 = vld [vmem:[%s10069_s7 + $0x60] ss:$8 sps:$4 sm:$0xff]  }
 0x352   : > { %3924 = vmatmul.mubr.bf16.gmra.mxu1 %v8399_v30  ;;  %4194 = vmatprep.subr.bf16.mxu0 %v5973_v43  ;;  %v8895_v43 = vld [vmem:[%s10068_s6] sm:$0xff] }
 0x353   : > { %4082 = vmatpush2.bf16.msra.mxu1 %v5844_v27  ;;  %3933 = vmatprep.mubr.bf16.mxu1 %v8431_v39  ;;  %v6417_v27 = vld [vmem:[%s10069_s7 + $0x74] ss:$8 sps:$4 sm:$0xff]  }
 0x354   : > { %4037 = vmatmul.mubr.bf16.gmra.mxu0 %v8401_v40  ;;  %4083 = vmatprep.subr.bf16.mxu1 %v5837_v6 }
 0x355   : > { %4046 = vmatprep.mubr.bf16.mxu0 %v8433_v36  ;;  %4195 = vmatpush2.bf16.msra.mxu0 %v5972_v14  ;;  %v6415_v14 = vld [vmem:[%s10069_s7 + $0x70] ss:$8 sps:$4 sm:$0xff]  }
 0x356   : > { %4196 = vmatprep.subr.bf16.mxu0 %v5965_v26 }
 0x357   : > { %4084 = vmatpush2.bf16.msra.mxu1 %v5836_v57 }
 0x358   : > { %4085 = vmatprep.subr.bf16.mxu1 %v5829_v60 }
 0x359   : > { %4197 = vmatpush2.bf16.msra.mxu0 %v5964_v46 }
 0x35a   : > { %3934 = vmatmul.mubr.bf16.gmra.mxu1 %v8435_v38  ;;  %4198 = vmatprep.subr.bf16.mxu0 %v5957_v20 }
 0x35b   : > { %4086 = vmatpush2.bf16.msra.mxu1 %v5828_v29  ;;  %4089 = vmatprep.mubr.bf16.mxu1 %v8179_v24  ;;  %v10195_v24 = vld [vmem:[#allocation41_spill] sm:$0xff] }
 0x35c   : > { %4047 = vmatmul.mubr.bf16.gmra.mxu0 %v8437_v33  ;;  %4087 = vmatprep.subr.bf16.mxu1 %v5821_v17  ;;  %v10196_v34 = vsub.s32 0, %v10195_v24 }
 0x35d   : > { %4199 = vmatpush2.bf16.msra.mxu0 %v5956_v47  ;;  %4202 = vmatprep.mubr.bf16.mxu0 %v8181_v44  ;;  %v10197_v44 = vsub.s32 1, %v10195_v24 }
 0x35e   : > { %4200 = vmatprep.subr.bf16.mxu0 %v5949_v61  ;;  %v8904_v6 = vrot.slane %v8895_v43, %v10196_v34 }
 0x35f   : > { %4088 = vmatpush2.bf16.msra.mxu1 %v5820_v48  ;;  %v8915_v5 = vrot.slane %v8895_v43, %v10197_v44 }
 0x360   : > { %5211 = vmatprep.subr.bf16.mxu1 %v6417_v27 }
 0x361   : > { %4201 = vmatpush2.bf16.msra.mxu0 %v5948_v49  ;;  %v3413_v26 = vpop.f32.mrf.mxu1  ;;  %v3526_v57 = vpop.f32.mrf.mxu0 }
 0x362   : > { %4090 = vmatmul.mubr.bf16.vlgmr.msra.gmra.mxu1 %v8183_v9  ;;  %v3414_v37 = vadd.f32 %v3413_v26, %v8904_v6 }
 0x363   : > { %4099 = vmatprep.mubr.bf16.mxu1 %v8215_v25  ;;  %5212 = vmatpush1.bf16.msra.mxu1 %v6415_v14  ;;  %v3415_v60 = vpop.f32.mrf.mxu1  ;;  %v3528_v46 = vpop.f32.mrf.mxu0  ;;  %v6424_v14 = vld [vmem:[%s10069_s7 + $0x40] ss:$8 sps:$4 sm:$0xff]  }
 0x364   : > { %4203 = vmatmul.mubr.bf16.vlgmr.msra.gmra.mxu0 %v8185_v31  ;;  %5213 = vmatprep.subr.bf16.mxu1 %v6420_v62  ;;  %v8927_v50 = vadd.f32 %v3526_v57, %v3414_v37  ;;  %v3416_v9 = vadd.f32 %v3415_v60, %v8915_v5  ;;  %v6421_v31 = vld [vmem:[%s10069_s7 + $0x50] ss:$8 sps:$4 sm:$0xff]  }
 0x365   : > { %4212 = vmatprep.mubr.bf16.mxu0 %v8217_v7  ;;  %v3417_v25 = vpop.f32.mrf.mxu1  ;;  %v3530_v20 = vpop.f32.mrf.mxu0  ;;  %v6426_v7 = vld [vmem:[%s10069_s7 + $0x44] ss:$8 sps:$4 sm:$0xff]  }
 0x366   : > { %v8931_v29 = vadd.f32 %v3528_v46, %v3416_v9  ;;  %v3418_v53 = vadd.f32 %v3417_v25, %v8904_v6 }
 0x367   : > { %5214 = vmatpush1.bf16.msra.mxu1 %v6418_v42  ;;  %v3419_v32 = vpop.f32.mrf.mxu1  ;;  %v3532_v17 = vpop.f32.mrf.mxu0 }
 0x368   : > { %5215 = vmatprep.subr.bf16.mxu1 %v6423_v51  ;;  %v8940_v47 = vadd.f32 %v3530_v20, %v3418_v53  ;;  %v3420_v61 = vadd.f32 %v3419_v32, %v8915_v5 }
 0x369   : > { %v3423_v48 = vpop.f32.mrf.mxu1  ;;  %v3536_v27 = vpop.f32.mrf.mxu0 }
 0x36a   : > { %4100 = vmatmul.mubr.bf16.gmra.mxu1 %v8219_v58  ;;  %v8944_v49 = vadd.f32 %v3532_v17, %v3420_v61  ;;  %v3424_v34 = vadd.f32 %v3423_v48, %v8904_v6  ;;  %v6429_v58 = vld [vmem:[%s10069_s7 + $0x34] ss:$8 sps:$4 sm:$0xff]  }
 0x36b   : > { %4109 = vmatprep.mubr.bf16.mxu1 %v8251_v16  ;;  %5216 = vmatpush1.bf16.msra.mxu1 %v6421_v31  ;;  %v3425_v62 = vpop.f32.mrf.mxu1  ;;  %v3538_v44 = vpop.f32.mrf.mxu0  ;;  %v8975_v31 = vld [vmem:[%s10069_s7 + $0x174] ss:$8 sps:$4 sm:$0xff]  }
 0x36c   : > { %4213 = vmatmul.mubr.bf16.gmra.mxu0 %v8221_v0  ;;  %5217 = vmatprep.subr.bf16.mxu1 %v6426_v7  ;;  %v8955_v26 = vadd.f32 %v3536_v27, %v3424_v34  ;;  %v3426_v16 = vadd.f32 %v3425_v62, %v8915_v5  ;;  %v6427_v0 = vld [vmem:[%s10069_s7 + $0x30] ss:$8 sps:$4 sm:$0xff]   ;;  %v6430_v7 = vld [vmem:[%s10069_s7 + $0x20] ss:$8 sps:$4 sm:$0xff]   ;;  %v6435_v27 = vld [vmem:[%s10069_s7 + $0x14] ss:$8 sps:$4 sm:$0xff]  }
 0x36d   : > { %4222 = vmatprep.mubr.bf16.mxu0 %v8253_v21  ;;  %v3427_v57 = vpop.f32.mrf.mxu1  ;;  %v3540_v37 = vpop.f32.mrf.mxu0  ;;  %v6432_v21 = vld [vmem:[%s10069_s7 + $0x24] ss:$8 sps:$4 sm:$0xff]   ;;  %5324 = vmatprep.subr.bf16.mxu0 %v8975_v31  ;;  %v6011_v8 = vmul.f32 -1.442695, %v8944_v49 }
 0x36e   : > { %v8959_v42 = vadd.f32 %v3538_v44, %v3426_v16  ;;  %v3428_v60 = vadd.f32 %v3427_v57, %v8904_v6 }
 0x36f   : > { %5218 = vmatpush1.bf16.msra.mxu1 %v6424_v14  ;;  %v3429_v46 = vpop.f32.mrf.mxu1  ;;  %v3542_v51 = vpop.f32.mrf.mxu0 }
 0x370   : > { %5219 = vmatprep.subr.bf16.mxu1 %v6429_v58  ;;  %v8968_v9 = vadd.f32 %v3540_v37, %v3428_v60  ;;  %v3430_v25 = vadd.f32 %v3429_v46, %v8915_v5  ;;  %v6433_v58 = vld [vmem:[%s10069_s7 + $0x10] ss:$8 sps:$4 sm:$0xff]   ;;  %v6438_v60 = vld [vmem:[%s10069_s7 + $0x4] ss:$8 sps:$4 sm:$0xff]  }
 0x372   : > { %v3433_v20 = vpop.f32.mrf.mxu1  ;;  %v3546_v53 = vpop.f32.mrf.mxu0  ;;  %4110 = vmatmul.mubr.bf16.gmra.mxu1 %v8255_v13  ;;  %v8977_v32 = vadd.f32 %v3542_v51, %v3430_v25  ;;  %v6463_v13 = vld [vmem:[%s10069_s7 + $0x170] ss:$8 sps:$4 sm:$0xff]   ;;  %v6471_v25 = vld [vmem:[%s10069_s7 + $0x154] ss:$8 sps:$4 sm:$0xff]   ;;  %v6018_v22 = vmul.f32 -1.442695, %v8968_v9 }
 0x373   : > { %v3434_v17 = vadd.f32 %v3433_v20, %v8904_v6  ;;  %4119 = vmatprep.mubr.bf16.mxu1 %v8287_v1  ;;  %5220 = vmatpush1.bf16.msra.mxu1 %v6427_v0 }
 0x374   : > { %4223 = vmatmul.mubr.bf16.gmra.mxu0 %v8257_v23  ;;  %v3435_v61 = vpop.f32.mrf.mxu1  ;;  %v3548_v48 = vpop.f32.mrf.mxu0  ;;  %5221 = vmatprep.subr.bf16.mxu1 %v6432_v21  ;;  %v6468_v23 = vld [vmem:[%s10069_s7 + $0x164] ss:$8 sps:$4 sm:$0xff]  }
 0x375   : > { %v8991_v34 = vadd.f32 %v3546_v53, %v3434_v17  ;;  %4232 = vmatprep.mubr.bf16.mxu0 %v8289_v55  ;;  %v3436_v1 = vadd.f32 %v3435_v61, %v8915_v5  ;;  %5325 = vmatpush1.bf16.msra.mxu0 %v6463_v13  ;;  %v6466_v55 = vld [vmem:[%s10069_s7 + $0x160] ss:$8 sps:$4 sm:$0xff]   ;;  %v6441_v61 = vld [vmem:[%s10069_s7 + $0xf4] ss:$8 sps:$4 sm:$0xff]  }
 0x376   : > { %v3437_v14 = vpop.f32.mrf.mxu1  ;;  %v3550_v62 = vpop.f32.mrf.mxu0  ;;  %5326 = vmatprep.subr.bf16.mxu0 %v6468_v23  ;;  %v6436_v17 = vld [vmem:[%s10069_s7] ss:$8 sps:$4 sm:$0xff]  }
 0x377   : > { %v8999_v44 = vadd.f32 %v3548_v48, %v3436_v1  ;;  %5222 = vmatpush1.bf16.msra.mxu1 %v6430_v7  ;;  %v3438_v16 = vadd.f32 %v3437_v14, %v8904_v6 }
 0x378   : > { %v3439_v57 = vpop.f32.mrf.mxu1  ;;  %v3552_v37 = vpop.f32.mrf.mxu0  ;;  %5223 = vmatprep.subr.bf16.mxu1 %v6435_v27 }
 0x379   : > { %10198 = vst [vmem:[#allocation41_spill] sm:$0xff] %v8999_v44  ;;  %v3440_v0 = vadd.f32 %v3439_v57, %v8915_v5  ;;  %v9012_v46 = vadd.f32 %v3550_v62, %v3438_v16  ;;  %5327 = vmatpush1.bf16.msra.mxu0 %v6466_v55  ;;  %v6439_v62 = vld [vmem:[%s10069_s7 + $0xf0] ss:$8 sps:$4 sm:$0xff]   ;;  %v6444_v16 = vld [vmem:[%s10069_s7 + $0xe4] ss:$8 sps:$4 sm:$0xff]  }
 0x37a   : > { %v3443_v51 = vpop.f32.mrf.mxu1  ;;  %v3556_v21 = vpop.f32.mrf.mxu0  ;;  %4120 = vmatmul.mubr.bf16.gmra.mxu1 %v8291_v18  ;;  %v6469_v18 = vld [vmem:[%s10069_s7 + $0x150] ss:$8 sps:$4 sm:$0xff]   ;;  %5328 = vmatprep.subr.bf16.mxu0 %v6471_v25  ;;  %v6442_v25 = vld [vmem:[%s10069_s7 + $0xe0] ss:$8 sps:$4 sm:$0xff]  }
 0x37b   : > { %10199 = vst [vmem:[#allocation42_spill] sm:$0xff] %v9012_v46  ;;  %v9018_v20 = vadd.f32 %v3552_v37, %v3440_v0  ;;  %v3444_v53 = vadd.f32 %v3443_v51, %v8904_v6  ;;  %4129 = vmatprep.mubr.bf16.mxu1 %v8323_v10  ;;  %5224 = vmatpush1.bf16.msra.mxu1 %v6433_v58  ;;  %v6477_v51 = vld [vmem:[%s10069_s7 + $0x134] ss:$8 sps:$4 sm:$0xff]  }
 0x37c   : > { %4233 = vmatmul.mubr.bf16.gmra.mxu0 %v8293_v12  ;;  %v3445_v7 = vpop.f32.mrf.mxu1  ;;  %v3558_v13 = vpop.f32.mrf.mxu0  ;;  %5225 = vmatprep.subr.bf16.mxu1 %v6438_v60  ;;  %v6474_v12 = vld [vmem:[%s10069_s7 + $0x144] ss:$8 sps:$4 sm:$0xff]  }
 0x37d   : > { %10200 = vst [vmem:[#allocation43_spill] sm:$0xff] %v9018_v20  ;;  %v9032_v48 = vadd.f32 %v3556_v21, %v3444_v53  ;;  %4242 = vmatprep.mubr.bf16.mxu0 %v8325_v11  ;;  %v3446_v10 = vadd.f32 %v3445_v7, %v8915_v5  ;;  %5329 = vmatpush1.bf16.msra.mxu0 %v6469_v18  ;;  %v6472_v11 = vld [vmem:[%s10069_s7 + $0x140] ss:$8 sps:$4 sm:$0xff]   ;;  %v6475_v53 = vld [vmem:[%s10069_s7 + $0x130] ss:$8 sps:$4 sm:$0xff]  }
 0x37e   : > { %v3447_v27 = vpop.f32.mrf.mxu1  ;;  %v3560_v1 = vpop.f32.mrf.mxu0  ;;  %5330 = vmatprep.subr.bf16.mxu0 %v6474_v12  ;;  %v6478_v12 = vld [vmem:[%s10069_s7 + $0x120] ss:$8 sps:$4 sm:$0xff]  }
 0x37f   : > { %v3448_v14 = vadd.f32 %v3447_v27, %v8904_v6  ;;  %5226 = vmatpush1.bf16.msra.mxu1 %v6436_v17  ;;  %v9046_v23 = vadd.f32 %v3558_v13, %v3446_v10 }
 0x380   : > { %v3449_v58 = vpop.f32.mrf.mxu1  ;;  %v3562_v55 = vpop.f32.mrf.mxu0  ;;  %5227 = vmatprep.subr.bf16.mxu1 %v6441_v61 }
 0x381   : > { %v9051_v57 = vadd.f32 %v3560_v1, %v3448_v14  ;;  %v3450_v37 = vadd.f32 %v3449_v58, %v8915_v5  ;;  %5331 = vmatpush1.bf16.msra.mxu0 %v6472_v11  ;;  %v6450_v11 = vld [vmem:[%s10069_s7 + $0xc4] ss:$8 sps:$4 sm:$0xff]  }
 0x382   : > { %v3453_v60 = vpop.f32.mrf.mxu1  ;;  %v3566_v0 = vpop.f32.mrf.mxu0  ;;  %4130 = vmatmul.mubr.bf16.gmra.mxu1 %v8327_v45  ;;  %5332 = vmatprep.subr.bf16.mxu0 %v6477_v51 }
 0x383   : > { %v9058_v21 = vadd.f32 %v3562_v55, %v3450_v37  ;;  %4139 = vmatprep.mubr.bf16.mxu1 %v8359_v63  ;;  %5228 = vmatpush2.bf16.msra.mxu1 %v6439_v62  ;;  %v3454_v45 = vadd.f32 %v3453_v60, %v8904_v6  ;;  %v6447_v63 = vld [vmem:[%s10069_s7 + $0xd4] ss:$8 sps:$4 sm:$0xff]   ;;  %v6448_v60 = vld [vmem:[%s10069_s7 + $0xc0] ss:$8 sps:$4 sm:$0xff]  }
 0x384   : > { %4243 = vmatmul.mubr.bf16.gmra.mxu0 %v8329_v56  ;;  %v3455_v17 = vpop.f32.mrf.mxu1  ;;  %v3568_v18 = vpop.f32.mrf.mxu0  ;;  %5229 = vmatprep.subr.bf16.mxu1 %v6444_v16  ;;  %v6480_v56 = vld [vmem:[%s10069_s7 + $0x124] ss:$8 sps:$4 sm:$0xff]   ;;  %v6483_v37 = vld [vmem:[%s10069_s7 + $0x114] ss:$8 sps:$4 sm:$0xff]  }
 0x385   : > { %4252 = vmatprep.mubr.bf16.mxu0 %v8361_v3  ;;  %v3456_v7 = vadd.f32 %v3455_v17, %v8915_v5  ;;  %v9074_v13 = vadd.f32 %v3566_v0, %v3454_v45  ;;  %5333 = vmatpush1.bf16.msra.mxu0 %v6475_v53  ;;  %v6445_v3 = vld [vmem:[%s10069_s7 + $0xd0] ss:$8 sps:$4 sm:$0xff]  }
 0x386   : > { %v3457_v61 = vpop.f32.mrf.mxu1  ;;  %v3570_v10 = vpop.f32.mrf.mxu0  ;;  %5334 = vmatprep.subr.bf16.mxu0 %v6480_v56  ;;  %v6481_v0 = vld [vmem:[%s10069_s7 + $0x110] ss:$8 sps:$4 sm:$0xff]  }
 0x387   : > { %v9079_v27 = vadd.f32 %v3568_v18, %v3456_v7  ;;  %v3458_v1 = vadd.f32 %v3457_v61, %v8904_v6  ;;  %5230 = vmatpush2.bf16.msra.mxu1 %v6442_v25  ;;  %v6484_v61 = vld [vmem:[%s10069_s7 + $0x100] ss:$8 sps:$4 sm:$0xff]  }
 0x388   : > { %v9088_v14 = vpop.f32.mrf.mxu1  ;;  %v9090_v62 = vpop.f32.mrf.mxu0  ;;  %5231 = vmatprep.subr.bf16.mxu1 %v6447_v63 }
 0x389   : > { %v9095_v58 = vadd.f32 %v3570_v10, %v3458_v1  ;;  %5335 = vmatpush1.bf16.msra.mxu0 %v6478_v12  ;;  %v6456_v1 = vld [vmem:[%s10069_s7 + $0xa4] ss:$8 sps:$4 sm:$0xff]  }
 0x38a   : > { %v3463_v55 = vpop.f32.mrf.mxu1  ;;  %v3576_v16 = vpop.f32.mrf.mxu0  ;;  %4140 = vmatmul.mubr.bf16.gmra.mxu1 %v8363_v4  ;;  %5336 = vmatprep.subr.bf16.mxu0 %v6483_v37  ;;  %v6454_v37 = vld [vmem:[%s10069_s7 + $0xa0] ss:$8 sps:$4 sm:$0xff]  }
 0x38b   : > { %4149 = vmatprep.mubr.bf16.mxu1 %v8395_v19  ;;  %5232 = vmatpush2.bf16.msra.mxu1 %v6445_v3  ;;  %v3464_v51 = vadd.f32 %v3463_v55, %v8904_v6  ;;  %v6453_v19 = vld [vmem:[%s10069_s7 + $0xb4] ss:$8 sps:$4 sm:$0xff]  }
 0x38c   : > { %4253 = vmatmul.mubr.bf16.gmra.mxu0 %v8365_v28  ;;  %v3465_v4 = vpop.f32.mrf.mxu1  ;;  %v3578_v25 = vpop.f32.mrf.mxu0  ;;  %5233 = vmatprep.subr.bf16.mxu1 %v6450_v11  ;;  %v6486_v28 = vld [vmem:[%s10069_s7 + $0x104] ss:$8 sps:$4 sm:$0xff]   ;;  %v6489_v55 = vld [vmem:[%s10069_s7 + $0x1f4] ss:$8 sps:$4 sm:$0xff]  }
 0x38d   : > { %4262 = vmatprep.mubr.bf16.mxu0 %v8397_v52  ;;  %v3466_v53 = vadd.f32 %v3465_v4, %v8915_v5  ;;  %v9115_v45 = vadd.f32 %v3576_v16, %v3464_v51  ;;  %5337 = vmatpush1.bf16.msra.mxu0 %v6481_v0  ;;  %v6451_v52 = vld [vmem:[%s10069_s7 + $0xb0] ss:$8 sps:$4 sm:$0xff]   ;;  %v6459_v51 = vld [vmem:[%s10069_s7 + $0x94] ss:$8 sps:$4 sm:$0xff]  }
 0x38e   : > { %v3467_v17 = vpop.f32.mrf.mxu1  ;;  %v3580_v18 = vpop.f32.mrf.mxu0  ;;  %5338 = vmatprep.subr.bf16.mxu0 %v6486_v28 }
 0x38f   : > { %10201 = vst [vmem:[#allocation44_spill] sm:$0xff] %v9115_v45  ;;  %v9120_v63 = vadd.f32 %v3578_v25, %v3466_v53  ;;  %v3468_v7 = vadd.f32 %v3467_v17, %v8904_v6  ;;  %5234 = vmatpush2.bf16.msra.mxu1 %v6448_v60  ;;  %v6487_v60 = vld [vmem:[%s10069_s7 + $0x1f0] ss:$8 sps:$4 sm:$0xff]  }
 0x390   : > { %v9129_v10 = vpop.f32.mrf.mxu1  ;;  %v9131_v56 = vpop.f32.mrf.mxu0  ;;  %5235 = vmatprep.subr.bf16.mxu1 %v6453_v19 }
 0x391   : > { %10202 = vst [vmem:[#allocation45_spill] sm:$0xff] %v9120_v63  ;;  %v9136_v3 = vadd.f32 %v3580_v18, %v3468_v7  ;;  %5339 = vmatpush1.bf16.msra.mxu0 %v6484_v61  ;;  %v6457_v18 = vld [vmem:[%s10069_s7 + $0x90] ss:$8 sps:$4 sm:$0xff]  }
 0x392   : > { %v3473_v12 = vpop.f32.mrf.mxu1  ;;  %v3586_v11 = vpop.f32.mrf.mxu0  ;;  %4150 = vmatmul.mubr.bf16.gmra.mxu1 %v8399_v30  ;;  %5340 = vmatprep.subr.bf16.mxu0 %v6489_v55 }
 0x393   : > { %10203 = vst [vmem:[#allocation46_spill] sm:$0xff] %v9136_v3  ;;  %v3474_v16 = vadd.f32 %v3473_v12, %v8904_v6  ;;  %4159 = vmatprep.mubr.bf16.mxu1 %v8431_v39  ;;  %5236 = vmatpush2.bf16.msra.mxu1 %v6451_v52  ;;  %v6462_v52 = vld [vmem:[%s10069_s7 + $0x84] ss:$8 sps:$4 sm:$0xff]  }
 0x394   : > { %4263 = vmatmul.mubr.bf16.gmra.mxu0 %v8401_v40  ;;  %v3475_v30 = vpop.f32.mrf.mxu1  ;;  %v3588_v0 = vpop.f32.mrf.mxu0  ;;  %5237 = vmatprep.subr.bf16.mxu1 %v6456_v1  ;;  %v6492_v40 = vld [vmem:[%s10069_s7 + $0x1e4] ss:$8 sps:$4 sm:$0xff]  }
 0x395   : > { %v9154_v4 = vadd.f32 %v3586_v11, %v3474_v16  ;;  %4272 = vmatprep.mubr.bf16.mxu0 %v8433_v36  ;;  %v3476_v39 = vadd.f32 %v3475_v30, %v8915_v5  ;;  %5341 = vmatpush2.bf16.msra.mxu0 %v6487_v60  ;;  %v6490_v36 = vld [vmem:[%s10069_s7 + $0x1e0] ss:$8 sps:$4 sm:$0xff]   ;;  %v6495_v11 = vld [vmem:[%s10069_s7 + $0x1d4] ss:$8 sps:$4 sm:$0xff]   ;;  %v2069_v16 = vsub.s32 2, %v10195_v24 }
 0x396   : > { %v3477_v25 = vpop.f32.mrf.mxu1  ;;  %v3590_v19 = vpop.f32.mrf.mxu0  ;;  %5342 = vmatprep.subr.bf16.mxu0 %v6492_v40  ;;  %v6493_v60 = vld [vmem:[%s10069_s7 + $0x1d0] ss:$8 sps:$4 sm:$0xff]   ;;  %v6498_v40 = vld [vmem:[%s10069_s7 + $0x1c4] ss:$8 sps:$4 sm:$0xff]  }
 0x397   : > { %10204 = vst [vmem:[#allocation47_spill] sm:$0xff] %v9154_v4  ;;  %v9161_v53 = vadd.f32 %v3588_v0, %v3476_v39  ;;  %v3478_v17 = vadd.f32 %v3477_v25, %v8904_v6  ;;  %5238 = vmatpush2.bf16.msra.mxu1 %v6454_v37  ;;  %v6460_v37 = vld [vmem:[%s10069_s7 + $0x80] ss:$8 sps:$4 sm:$0xff]  }
 0x398   : > { %v9170_v28 = vpop.f32.mrf.mxu1  ;;  %v9172_v7 = vpop.f32.mrf.mxu0  ;;  %5239 = vmatprep.subr.bf16.mxu1 %v6459_v51 }
 0x399   : > { %10205 = vst [vmem:[#allocation48_spill] sm:$0xff] %v9161_v53  ;;  %v9177_v61 = vadd.f32 %v3590_v19, %v3478_v17  ;;  %5343 = vmatpush2.bf16.msra.mxu0 %v6490_v36  ;;  %v2073_v19 = vsub.s32 3, %v10195_v24 }
 0x39a   : > { %v3483_v1 = vpop.f32.mrf.mxu1  ;;  %v3596_v12 = vpop.f32.mrf.mxu0  ;;  %4160 = vmatmul.mubr.bf16.gmra.mxu1 %v8435_v38  ;;  %5344 = vmatprep.subr.bf16.mxu0 %v6495_v11 }
 0x39b   : > { %10206 = vst [vmem:[#allocation49_spill] sm:$0xff] %v9177_v61  ;;  %v3484_v55 = vadd.f32 %v3483_v1, %v8904_v6  ;;  %5240 = vmatpush2.bf16.msra.mxu1 %v6457_v18  ;;  %v6496_v18 = vld [vmem:[%s10069_s7 + $0x1c0] ss:$8 sps:$4 sm:$0xff]  }
 0x39c   : > { %4273 = vmatmul.mubr.bf16.gmra.mxu0 %v8437_v33  ;;  %v3485_v38 = vpop.f32.mrf.mxu1  ;;  %v3598_v30 = vpop.f32.mrf.mxu0  ;;  %5241 = vmatprep.subr.bf16.mxu1 %v6462_v52  ;;  %v9202_v33 = vrot.slane %v8895_v43, %v2069_v16  ;;  %v6501_v16 = vld [vmem:[%s10069_s7 + $0x1b4] ss:$8 sps:$4 sm:$0xff]  }
 0x39d   : > { %v9192_v0 = vadd.f32 %v3596_v12, %v3484_v55  ;;  %v3486_v51 = vadd.f32 %v3485_v38, %v8915_v5  ;;  %5345 = vmatpush2.bf16.msra.mxu0 %v6493_v60  ;;  %v9216_v55 = vrot.slane %v8895_v43, %v2073_v19  ;;  %v6499_v60 = vld [vmem:[%s10069_s7 + $0x1b0] ss:$8 sps:$4 sm:$0xff]  }
 0x39e   : > { %v3487_v39 = vpop.f32.mrf.mxu1  ;;  %v3600_v25 = vpop.f32.mrf.mxu0  ;;  %5346 = vmatprep.subr.bf16.mxu0 %v6498_v40 }
 0x39f   : > { %v9199_v17 = vadd.f32 %v3598_v30, %v3486_v51  ;;  %5242 = vmatpush2.bf16.msra.mxu1 %v6460_v37  ;;  %v3488_v36 = vadd.f32 %v3487_v39, %v8904_v6  ;;  %v6504_v39 = vld [vmem:[%s10069_s7 + $0x1a4] ss:$8 sps:$4 sm:$0xff]  }
 0x3a0   : > { %v9208_v52 = vpop.f32.mrf.mxu1  ;;  %v9210_v1 = vpop.f32.mrf.mxu0  ;;  %6142 = vmatprep.subr.bf16.mxu1 %v8975_v31 }
 0x3a1   : > { %v9213_v12 = vadd.f32 %v3600_v25, %v3488_v36  ;;  %5347 = vmatpush2.bf16.msra.mxu0 %v6496_v18  ;;  %v6006_v25 = vmul.f32 -1.442695, %v8927_v50  ;;  %v6502_v18 = vld [vmem:[%s10069_s7 + $0x1a0] ss:$8 sps:$4 sm:$0xff]  }
 0x3a2   : > { %v3639_v11 = vpop.f32.mrf.mxu1  ;;  %5348 = vmatprep.subr.bf16.mxu0 %v6501_v16  ;;  %v6007_v16 = vmul.f32 -1.442695, %v8931_v29 }
 0x3a3   : > { %10207 = vst [vmem:[#allocation50_spill] sm:$0xff] %v9213_v12  ;;  %v3640_v6 = vadd.f32 %v3639_v11, %v9202_v33  ;;  %v3752_v37 = vpop.f32.mrf.mxu0  ;;  %6575 = vpow2.f32 %v6006_v25 }
 0x3a4   : > { %v3641_v31 = vpop.f32.mrf.mxu1  ;;  %6577 = vpow2.f32 %v6007_v16 }
 0x3a5   : > { %v9225_v38 = vadd.f32 %v3752_v37, %v3640_v6  ;;  %v3754_v30 = vpop.f32.mrf.mxu0  ;;  %v3642_v43 = vadd.f32 %v3641_v31, %v9216_v55  ;;  %5349 = vmatpush2.bf16.msra.mxu0 %v6499_v60  ;;  %v6507_v31 = vld [vmem:[%s10069_s7 + $0x194] ss:$8 sps:$4 sm:$0xff]  }
 0x3a6   : > { %v3643_v51 = vpop.f32.mrf.mxu1  ;;  %5350 = vmatprep.subr.bf16.mxu0 %v6504_v39 }
 0x3a7   : > { %v3644_v19 = vadd.f32 %v3643_v51, %v9202_v33  ;;  %v3756_v40 = vpop.f32.mrf.mxu0  ;;  %v9236_v36 = vadd.f32 %v3754_v30, %v3642_v43  ;;  %v6505_v30 = vld [vmem:[%s10069_s7 + $0x190] ss:$8 sps:$4 sm:$0xff]  }
 0x3a8   : > { %v9238_v11 = vpop.f32.mrf.mxu1 }
 0x3a9   : > { %v9241_v6 = vadd.f32 %v3756_v40, %v3644_v19  ;;  %v9243_v37 = vpop.f32.mrf.mxu0  ;;  %5351 = vmatpush2.bf16.msra.mxu0 %v6502_v18  ;;  %v6010_v19 = vmul.f32 -1.442695, %v8940_v47 }
 0x3aa   : > { %v3649_v60 = vpop.f32.mrf.mxu1  ;;  %5352 = vmatprep.subr.bf16.mxu0 %v6507_v31 }
 0x3ab   : > { %v3762_v51 = vpop.f32.mrf.mxu0  ;;  %v3650_v43 = vadd.f32 %v3649_v60, %v9202_v33  ;;  %v6014_v60 = vmul.f32 -1.442695, %v8955_v26  ;;  %6579 = vpow2.f32 %v6010_v19 }
 0x3ac   : > { %v3651_v39 = vpop.f32.mrf.mxu1  ;;  %6581 = vpow2.f32 %v6011_v8 }
 0x3ad   : > { %v3652_v40 = vadd.f32 %v3651_v39, %v9216_v55  ;;  %v3764_v18 = vpop.f32.mrf.mxu0  ;;  %v9255_v59 = vadd.f32 %v3762_v51, %v3650_v43  ;;  %5353 = vmatpush2.bf16.msra.mxu0 %v6505_v30  ;;  %v6508_v39 = vld [vmem:[%s10069_s7 + $0x180] ss:$8 sps:$4 sm:$0xff]   ;;  %v6015_v51 = vmul.f32 -1.442695, %v8959_v42  ;;  %6583 = vpow2.f32 %v6014_v60 }
 0x3ae   : > { %v3653_v25 = vpop.f32.mrf.mxu1  ;;  %5354 = vmatprep.subr.bf16.mxu0 %v6510_v54 }
 0x3af   : > { %10208 = vst [vmem:[#allocation51_spill] sm:$0xff] %v9255_v59  ;;  %v9261_v41 = vadd.f32 %v3764_v18, %v3652_v40  ;;  %v3654_v16 = vadd.f32 %v3653_v25, %v9202_v33  ;;  %v3766_v31 = vpop.f32.mrf.mxu0  ;;  %6585 = vpow2.f32 %v6015_v51 }
 0x3b0   : > { %v9267_v35 = vpop.f32.mrf.mxu1  ;;  %6587 = vpow2.f32 %v6018_v22 }
 0x3b1   : > { %10209 = vst [vmem:[#allocation52_spill] sm:$0xff] %v9261_v41  ;;  %10210 = vst [vmem:[#allocation53_spill] sm:$0xff] %v9267_v35  ;;  %v9270_v30 = vadd.f32 %v3766_v31, %v3654_v16  ;;  %v9272_v43 = vpop.f32.mrf.mxu0  ;;  %5355 = vmatpush2.bf16.msra.mxu0 %v6508_v39  ;;  %v6019_v16 = vmul.f32 -1.442695, %v8977_v32  ;;  %v6576_v39 = vpop.eup %6575 }
 0x3b2   : > { %10212 = vst [vmem:[#allocation55_spill] sm:$0xff] %v9272_v43  ;;  %v3659_v40 = vpop.f32.mrf.mxu1  ;;  %v6022_v43 = vmul.f32 -1.442695, %v8991_v34 }
 0x3b3   : > { %10211 = vst [vmem:[#allocation54_spill] sm:$0xff] %v9270_v30  ;;  %v3660_v18 = vadd.f32 %v3659_v40, %v9202_v33  ;;  %v3772_v25 = vpop.f32.mrf.mxu0  ;;  %6589 = vpow2.f32 %v6019_v16 }
 0x3b4   : > { %v3661_v15 = vpop.f32.mrf.mxu1  ;;  %6591 = vpow2.f32 %v6022_v43  ;;  %v6030_v43 = vmul.f32 -1.442695, %v9032_v48 }
 0x3b5   : > { %v9276_v2 = vadd.f32 %v3772_v25, %v3660_v18  ;;  %v3662_v54 = vadd.f32 %v3661_v15, %v9216_v55  ;;  %v3774_v19 = vpop.f32.mrf.mxu0  ;;  %v6578_v18 = vpop.eup %6577 }
 0x3b6   : > { %v3663_v31 = vpop.f32.mrf.mxu1  ;;  %v4476_v41 = vadd.f32 1.0, %v6578_v18 }
 0x3b7   : > { %10213 = vst [vmem:[#allocation56_spill] sm:$0xff] %v9276_v2  ;;  %v9280_v30 = vadd.f32 %v3774_v19, %v3662_v54  ;;  %v3776_v8 = vpop.f32.mrf.mxu0  ;;  %v3664_v60 = vadd.f32 %v3663_v31, %v9202_v33  ;;  %v4475_v2 = vadd.f32 1.0, %v6576_v39  ;;  %v6027_v39 = vmul.f32 -1.442695, %v9018_v20 }
 0x3b8   : > { %v9283_v40 = vpop.f32.mrf.mxu1  ;;  %v6580_v35 = vpop.eup %6579 }
 0x3b9   : > { %10214 = vst [vmem:[#allocation57_spill] sm:$0xff] %v9280_v30  ;;  %10215 = vst [vmem:[#allocation58_spill] sm:$0xff] %v9283_v40  ;;  %v9286_v51 = vpop.f32.mrf.mxu0  ;;  %v9288_v15 = vadd.f32 %v3776_v8, %v3664_v60  ;;  %v6023_v30 = vmul.f32 -1.442695, %v8999_v44  ;;  %v6582_v60 = vpop.eup %6581  ;;  %6593 = vrcp.f32 %v4475_v2 }
 0x3ba   : > { %10216 = vst [vmem:[#allocation59_spill] sm:$0xff] %v9286_v51  ;;  %v3669_v25 = vpop.f32.mrf.mxu1  ;;  %v6026_v51 = vmul.f32 -1.442695, %v9012_v46  ;;  %v6584_v59 = vpop.eup %6583  ;;  %v4480_v46 = vadd.f32 1.0, %v6582_v60  ;;  %v6034_v60 = vmul.f32 -1.442695, %v9051_v57 }
 0x3bb   : > { %10217 = vst [vmem:[#allocation60_spill] sm:$0xff] %v9288_v15  ;;  %v3670_v54 = vadd.f32 %v3669_v25, %v9202_v33  ;;  %v3782_v19 = vpop.f32.mrf.mxu0  ;;  %6595 = vpow2.f32 %v6023_v30  ;;  %v6031_v30 = vmul.f32 -1.442695, %v9046_v23 }
 0x3bc   : > { %v3671_v22 = vpop.f32.mrf.mxu1  ;;  %6597 = vrcp.f32 %v4476_v41  ;;  %v6586_v2 = vpop.eup %6585 }
 0x3bd   : > { %v9292_v31 = vadd.f32 %v3782_v19, %v3670_v54  ;;  %v3784_v40 = vpop.f32.mrf.mxu0  ;;  %v3672_v16 = vadd.f32 %v3671_v22, %v9216_v55  ;;  %v4479_v19 = vadd.f32 1.0, %v6580_v35  ;;  %6599 = vpow2.f32 %v6026_v51 }
 0x3be   : > { %v3673_v8 = vpop.f32.mrf.mxu1  ;;  %6601 = vpow2.f32 %v6027_v39  ;;  %v4484_v35 = vadd.f32 1.0, %v6586_v2 }
 0x3bf   : > { %10218 = vst [vmem:[#allocation61_spill] sm:$0xff] %v9292_v31  ;;  %v3674_v25 = vadd.f32 %v3673_v8, %v9202_v33  ;;  %v3786_v15 = vpop.f32.mrf.mxu0  ;;  %v9299_v18 = vadd.f32 %v3784_v40, %v3672_v16  ;;  %v4483_v8 = vadd.f32 1.0, %v6584_v59  ;;  %6603 = vpow2.f32 %v6030_v43 }
 0x3c0   : > { %v9301_v54 = vpop.f32.mrf.mxu1  ;;  %6605 = vrcp.f32 %v4479_v19  ;;  %v3460_v59 = vadd.f32 %v9088_v14, %v8915_v5 }
 0x3c1   : > { %10219 = vst [vmem:[#allocation62_spill] sm:$0xff] %v9299_v18  ;;  %v9303_v31 = vadd.f32 %v3786_v15, %v3674_v25  ;;  %v9305_v22 = vpop.f32.mrf.mxu0  ;;  %v6588_v18 = vpop.eup %6587  ;;  %6607 = vrcp.f32 %v4480_v46 }
 0x3c2   : > { %10221 = vst [vmem:[#allocation64_spill] sm:$0xff] %v9305_v22  ;;  %v3679_v20 = vpop.f32.mrf.mxu1  ;;  %v6590_v25 = vpop.eup %6589  ;;  %6609 = vrcp.f32 %v4483_v8 }
 0x3c3   : > { %10220 = vst [vmem:[#allocation63_spill] sm:$0xff] %v9303_v31  ;;  %v3792_v44 = vpop.f32.mrf.mxu0  ;;  %v3680_v40 = vadd.f32 %v3679_v20, %v9202_v33  ;;  %v6035_v20 = vmul.f32 -1.442695, %v9058_v21  ;;  %6611 = vpow2.f32 %v6031_v30  ;;  %v6038_v31 = vmul.f32 -1.442695, %v9074_v13 }
 0x3c4   : > { %v3681_v16 = vpop.f32.mrf.mxu1  ;;  %6613 = vrcp.f32 %v4484_v35  ;;  %v4488_v8 = vadd.f32 1.0, %v6590_v25 }
 0x3c5   : > { %v3682_v41 = vadd.f32 %v3681_v16, %v9216_v55  ;;  %v3794_v15 = vpop.f32.mrf.mxu0  ;;  %v9313_v51 = vadd.f32 %v3792_v44, %v3680_v40  ;;  %v4487_v16 = vadd.f32 1.0, %v6588_v18  ;;  %v6592_v40 = vpop.eup %6591  ;;  %6615 = vpow2.f32 %v6034_v60 }
 0x3c6   : > { %v3683_v39 = vpop.f32.mrf.mxu1  ;;  %6617 = vpow2.f32 %v6035_v20  ;;  %v6039_v18 = vmul.f32 -1.442695, %v9079_v27  ;;  %v9331_v35 = vpop.eup %6593 }
 0x3c7   : > { %10222 = vst [vmem:[#allocation65_spill] sm:$0xff] %v9313_v51  ;;  %v9316_v43 = vadd.f32 %v3794_v15, %v3682_v41  ;;  %v3684_v19 = vadd.f32 %v3683_v39, %v9202_v33  ;;  %v3796_v2 = vpop.f32.mrf.mxu0  ;;  %v9327_v41 = vadd.f32 %v9090_v62, %v3460_v59  ;;  %6619 = vrcp.f32 %v4487_v16 }
 0x3c8   : > { %v9319_v46 = vpop.f32.mrf.mxu1  ;;  %6621 = vpow2.f32 %v6038_v31  ;;  %v6047_v51 = vmul.f32 -1.442695, %v9120_v63 }
 0x3c9   : > { %10223 = vst [vmem:[#allocation66_spill] sm:$0xff] %v9316_v43  ;;  %10224 = vst [vmem:[#allocation67_spill] sm:$0xff] %v9319_v46  ;;  %v9322_v14 = vadd.f32 %v3796_v2, %v3684_v19  ;;  %v9324_v44 = vpop.f32.mrf.mxu0  ;;  %v6042_v19 = vmul.f32 -1.442695, %v9095_v58  ;;  %6623 = vrcp.f32 %v4488_v8  ;;  %v6043_v20 = vmul.f32 -1.442695, %v9327_v41 }
 0x3ca   : > { %10226 = vst [vmem:[#allocation69_spill] sm:$0xff] %v9324_v44  ;;  %v3689_v15 = vpop.f32.mrf.mxu1  ;;  %v4491_v44 = vadd.f32 1.0, %v6592_v40  ;;  %6625 = vpow2.f32 %v6039_v18  ;;  %v6046_v46 = vmul.f32 -1.442695, %v9115_v45 }
 0x3cb   : > { %10225 = vst [vmem:[#allocation68_spill] sm:$0xff] %v9322_v14  ;;  %v3690_v30 = vadd.f32 %v3689_v15, %v9202_v33  ;;  %v3802_v39 = vpop.f32.mrf.mxu0  ;;  %v6596_v14 = vpop.eup %6595  ;;  %v3470_v15 = vadd.f32 %v9129_v10, %v8915_v5  ;;  %6627 = vpow2.f32 %v6042_v19 }
 0x3cc   : > { %v3691_v2 = vpop.f32.mrf.mxu1  ;;  %v9337_v25 = vpop.eup %6597  ;;  %6629 = vrcp.f32 %v4491_v44 }
 0x3cd   : > { %v9334_v60 = vadd.f32 %v3802_v39, %v3690_v30  ;;  %v3692_v62 = vadd.f32 %v3691_v2, %v9216_v55  ;;  %v3804_v59 = vpop.f32.mrf.mxu0  ;;  %v6600_v43 = vpop.eup %6599  ;;  %v4492_v39 = vadd.f32 1.0, %v6596_v14  ;;  %6631 = vpow2.f32 %v6043_v20 }
 0x3ce   : > { %v3693_v16 = vpop.f32.mrf.mxu1  ;;  %v6602_v30 = vpop.eup %6601  ;;  %v4495_v18 = vadd.f32 1.0, %v6600_v43  ;;  %6633 = vpow2.f32 %v6046_v46 }
 0x3cf   : > { %10227 = vst [vmem:[#allocation70_spill] sm:$0xff] %v9334_v60  ;;  %v9343_v40 = vadd.f32 %v3804_v59, %v3692_v62  ;;  %v3806_v31 = vpop.f32.mrf.mxu0  ;;  %v3694_v2 = vadd.f32 %v3693_v16, %v9202_v33  ;;  %v6604_v8 = vpop.eup %6603  ;;  %v9354_v62 = vadd.f32 %v9131_v56, %v3470_v15  ;;  %v4496_v16 = vadd.f32 1.0, %v6602_v30 }
 0x3d0   : > { %v9346_v60 = vpop.f32.mrf.mxu1  ;;  %v9351_v22 = vpop.eup %6605  ;;  %6635 = vrcp.f32 %v4492_v39  ;;  %v6050_v56 = vmul.f32 -1.442695, %v9136_v3  ;;  %v3480_v30 = vadd.f32 %v9170_v28, %v8915_v5 }
 0x3d1   : > { %10228 = vst [vmem:[#allocation71_spill] sm:$0xff] %v9343_v40  ;;  %10229 = vst [vmem:[#allocation72_spill] sm:$0xff] %v9346_v60  ;;  %v9349_v10 = vpop.f32.mrf.mxu0  ;;  %v9356_v59 = vadd.f32 %v3806_v31, %v3694_v2  ;;  %v9358_v19 = vpop.eup %6607  ;;  %6637 = vpow2.f32 %v6047_v51  ;;  %v6051_v46 = vmul.f32 -1.442695, %v9354_v62  ;;  %v6054_v51 = vmul.f32 -1.442695, %v9154_v4 }
 0x3d2   : > { %10230 = vst [vmem:[#allocation73_spill] sm:$0xff] %v9349_v10  ;;  %10231 = vst [vmem:[#allocation74_spill] sm:$0xff] %v9354_v62  ;;  %v3699_v14 = vpop.f32.mrf.mxu1  ;;  %v9361_v60 = vpop.eup %6609  ;;  %v4499_v10 = vadd.f32 1.0, %v6604_v8  ;;  %6639 = vrcp.f32 %v4495_v18 }
 0x3d3   : > { %10232 = vst [vmem:[#allocation75_spill] sm:$0xff] %v9356_v59  ;;  %v3700_v44 = vadd.f32 %v3699_v14, %v9202_v33  ;;  %v3812_v40 = vpop.f32.mrf.mxu0  ;;  %v6612_v43 = vpop.eup %6611  ;;  %6641 = vrcp.f32 %v4496_v16 }
 0x3d4   : > { %v3701_v63 = vpop.f32.mrf.mxu1  ;;  %v9366_v31 = vpop.eup %6613  ;;  %6643 = vrcp.f32 %v4499_v10 }
 0x3d5   : > { %v9364_v20 = vadd.f32 %v3812_v40, %v3700_v44  ;;  %v3814_v15 = vpop.f32.mrf.mxu0  ;;  %v3702_v2 = vadd.f32 %v3701_v63, %v9216_v55  ;;  %v6616_v8 = vpop.eup %6615  ;;  %6645 = vpow2.f32 %v6050_v56  ;;  %v6055_v63 = vmul.f32 -1.442695, %v9161_v53 }
 0x3d6   : > { %v3703_v39 = vpop.f32.mrf.mxu1  ;;  %v6618_v44 = vpop.eup %6617  ;;  %v4503_v3 = vadd.f32 1.0, %v6616_v8  ;;  %6647 = vpow2.f32 %v6051_v46  ;;  %v6058_v56 = vmul.f32 -1.442695, %v9177_v61 }
 0x3d7   : > { %10233 = vst [vmem:[#allocation76_spill] sm:$0xff] %v9364_v20  ;;  %v3704_v14 = vadd.f32 %v3703_v39, %v9202_v33  ;;  %v3816_v40 = vpop.f32.mrf.mxu0  ;;  %v4500_v20 = vadd.f32 1.0, %v6612_v43  ;;  %v9374_v59 = vadd.f32 %v3814_v15, %v3702_v2  ;;  %v9378_v62 = vpop.eup %6619  ;;  %v9386_v39 = vadd.f32 %v9172_v7, %v3480_v30 }
 0x3d8   : > { %v9376_v18 = vpop.f32.mrf.mxu1  ;;  %v6622_v4 = vpop.eup %6621  ;;  %v4504_v15 = vadd.f32 1.0, %v6618_v44  ;;  %6649 = vpow2.f32 %v6054_v51 }
 0x3d9   : > { %10234 = vst [vmem:[#allocation77_spill] sm:$0xff] %v9374_v59  ;;  %10235 = vst [vmem:[#allocation78_spill] sm:$0xff] %v9376_v18  ;;  %v9381_v28 = vadd.f32 %v3816_v40, %v3704_v14  ;;  %v9383_v16 = vpop.f32.mrf.mxu0  ;;  %v9388_v43 = vpop.eup %6623  ;;  %6651 = vrcp.f32 %v4500_v20  ;;  %v4507_v46 = vadd.f32 1.0, %v6622_v4  ;;  %v6059_v51 = vmul.f32 -1.442695, %v9386_v39 }
 0x3da   : > { %10237 = vst [vmem:[#allocation80_spill] sm:$0xff] %v9383_v16  ;;  %10238 = vst [vmem:[#allocation81_spill] sm:$0xff] %v9386_v39  ;;  %v3709_v10 = vpop.f32.mrf.mxu1  ;;  %v6626_v59 = vpop.eup %6625  ;;  %6653 = vpow2.f32 %v6055_v63  ;;  %v2081_v18 = vsub.s32 5, %v10195_v24 }
 0x3db   : > { %10236 = vst [vmem:[#allocation79_spill] sm:$0xff] %v9381_v28  ;;  %v3822_v2 = vpop.f32.mrf.mxu0  ;;  %v3710_v14 = vadd.f32 %v3709_v10, %v9202_v33  ;;  %v2077_v28 = vsub.s32 4, %v10195_v24  ;;  %v6628_v8 = vpop.eup %6627  ;;  %6655 = vrcp.f32 %v4503_v3  ;;  %v4508_v61 = vadd.f32 1.0, %v6626_v59 }
 0x3dc   : > { %v3711_v40 = vpop.f32.mrf.mxu1  ;;  %v9394_v16 = vpop.eup %6629  ;;  %6657 = vrcp.f32 %v4504_v15  ;;  %v4511_v45 = vadd.f32 1.0, %v6628_v8  ;;  %v3490_v3 = vadd.f32 %v9208_v52, %v8915_v5 }
 0x3dd   : > { %v3712_v7 = vadd.f32 %v3711_v40, %v9216_v55  ;;  %v3824_v30 = vpop.f32.mrf.mxu0  ;;  %v9397_v44 = vadd.f32 %v3822_v2, %v3710_v14  ;;  %v6632_v10 = vpop.eup %6631  ;;  %6659 = vpow2.f32 %v6058_v56  ;;  %v9410_v2 = vld [vmem:[%s10068_s6] sm:$0xff] }
 0x3de   : > { %v3713_v20 = vpop.f32.mrf.mxu1  ;;  %v6634_v40 = vpop.eup %6633  ;;  %v9413_v59 = vrot.slane %v9410_v2, %v2077_v28  ;;  %6661 = vrcp.f32 %v4507_v46  ;;  %v4512_v52 = vadd.f32 1.0, %v6632_v10  ;;  %v6063_v46 = vmul.f32 -1.442695, %v9199_v17 }
 0x3df   : > { %10239 = vst [vmem:[#allocation82_spill] sm:$0xff] %v9397_v44  ;;  %v9400_v53 = vadd.f32 %v3824_v30, %v3712_v7  ;;  %v3714_v4 = vadd.f32 %v3713_v20, %v9202_v33  ;;  %v3826_v63 = vpop.f32.mrf.mxu0  ;;  %v9415_v15 = vpop.eup %6635  ;;  %v6062_v33 = vmul.f32 -1.442695, %v9192_v0  ;;  %6663 = vpow2.f32 %v6059_v51 }
 0x3e0   : > { %v9405_v39 = vpop.f32.mrf.mxu1  ;;  %v6638_v5 = vpop.eup %6637  ;;  %v9423_v7 = vrot.slane %v9410_v2, %v2081_v18  ;;  %6665 = vrcp.f32 %v4508_v61  ;;  %v4515_v28 = vadd.f32 1.0, %v6634_v40  ;;  %v4667_v18 = vmul.f32 %v9331_v35, %v8927_v50 }
 0x3e1   : > { %10240 = vst [vmem:[#allocation83_spill] sm:$0xff] %v9400_v53  ;;  %10241 = vst [vmem:[#allocation84_spill] sm:$0xff] %v9405_v39  ;;  %v9418_v14 = vadd.f32 %v3826_v63, %v3714_v4  ;;  %v9420_v56 = vpop.f32.mrf.mxu0  ;;  %v9425_v30 = vpop.eup %6639  ;;  %6667 = vrcp.f32 %v4511_v45  ;;  %v9431_v4 = vadd.f32 %v9210_v1, %v3490_v3  ;;  %v4668_v61 = vmul.f32 %v9337_v25, %v8931_v29 }
 0x3e2   : > { %10243 = vst [vmem:[#allocation86_spill] sm:$0xff] %v9420_v56  ;;  %v3865_v8 = vpop.f32.mrf.mxu1  ;;  %v9427_v20 = vpop.eup %6641  ;;  %v4516_v40 = vadd.f32 1.0, %v6638_v5  ;;  %6669 = vpow2.f32 %v6062_v33  ;;  %v4671_v56 = vmul.f32 %v9351_v22, %v8940_v47  ;;  %v6066_v1 = vmul.f32 -1.442695, %v9213_v12 }
 0x3e3   : > { %10242 = vst [vmem:[#allocation85_spill] sm:$0xff] %v9418_v14  ;;  %10244 = vst [vmem:[#allocation87_spill] sm:$0xff] %v9431_v4  ;;  %v3866_v63 = vadd.f32 %v3865_v8, %v9413_v59  ;;  %v9434_v14 = vpop.eup %6643  ;;  %6671 = vrcp.f32 %v4512_v52  ;;  %v4672_v50 = vmul.f32 %v9358_v19, %v8944_v49  ;;  %v9448_v29 = vmul.f32 %v9361_v60, %v8955_v26 }
 0x3e4   : > { %v3978_v10 = vpop.f32.mrf.mxu0  ;;  %v3867_v51 = vpop.f32.mrf.mxu1  ;;  %v9452_v35 = vmul.f32 %v9366_v31, %v8959_v42  ;;  %6673 = vrcp.f32 %v4515_v28  ;;  %v6067_v22 = vmul.f32 -1.442695, %v9431_v4  ;;  %v4679_v49 = vmul.f32 %v9378_v62, %v8968_v9 }
 0x3e5   : > { %v6646_v45 = vpop.eup %6645  ;;  %v3868_v3 = vadd.f32 %v3867_v51, %v9423_v7  ;;  %6675 = vpow2.f32 %v6063_v46  ;;  %v3979_v25 = vadd.f32 %v3978_v10, %v3866_v63  ;;  %v6008_v39 = vmul.f32 -1.442695, %v9225_v38 }
 0x3e6   : > { %v3980_v8 = vpop.f32.mrf.mxu0  ;;  %v3869_v53 = vpop.f32.mrf.mxu1  ;;  %6677 = vrcp.f32 %v4516_v40  ;;  %v4519_v26 = vadd.f32 1.0, %v6646_v45  ;;  %v3646_v62 = vadd.f32 %v9238_v11, %v9216_v55 }
 0x3e7   : > { %v6648_v44 = vpop.eup %6647  ;;  %v3870_v33 = vadd.f32 %v3869_v53, %v9413_v59  ;;  %6679 = vpow2.f32 %v6066_v1  ;;  %v3981_v31 = vadd.f32 %v3980_v8, %v3868_v3 }
 0x3e8   : > { %v6650_v47 = vpop.eup %6649  ;;  %v3982_v5 = vpop.f32.mrf.mxu0  ;;  %v4520_v19 = vadd.f32 1.0, %v6648_v44  ;;  %6681 = vpow2.f32 %v6067_v22  ;;  %v4731_v44 = vadd.f32 %v4667_v18, %v3979_v25 }
 0x3e9   : > { %v3871_v52 = vpop.f32.mrf.mxu1  ;;  %v9456_v51 = vpop.eup %6651  ;;  %v3983_v28 = vadd.f32 %v3982_v5, %v3870_v33  ;;  %v4523_v53 = vadd.f32 1.0, %v6650_v47  ;;  %6683 = vrcp.f32 %v4519_v26  ;;  %v9479_v26 = vadd.f32 %v9243_v37, %v3646_v62 }
 0x3ea   : > { %v3872_v42 = vadd.f32 %v3871_v52, %v9423_v7  ;;  %v6654_v60 = vpop.eup %6653  ;;  %v3984_v46 = vpop.f32.mrf.mxu0  ;;  %6685 = vrcp.f32 %v4520_v19  ;;  %v6009_v52 = vmul.f32 -1.442695, %v9236_v36  ;;  %v6012_v37 = vmul.f32 -1.442695, %v9241_v6 }
 0x3eb   : > { %v3875_v63 = vpop.f32.mrf.mxu1  ;;  %v9461_v10 = vpop.eup %6655  ;;  %v4735_v40 = vadd.f32 %v4671_v56, %v3983_v28  ;;  %v4524_v8 = vadd.f32 1.0, %v6654_v60  ;;  %v4680_v56 = vmul.f32 %v9388_v43, %v8977_v32  ;;  %6687 = vrcp.f32 %v4523_v53 }
 0x3ec   : > { %v3985_v4 = vadd.f32 %v3984_v46, %v3872_v42  ;;  %v3876_v12 = vadd.f32 %v3875_v63, %v9413_v59  ;;  %v9465_v9 = vpop.eup %6657  ;;  %v3988_v45 = vpop.f32.mrf.mxu0  ;;  %v4732_v42 = vadd.f32 %v4668_v61, %v3981_v31  ;;  %6689 = vpow2.f32 %v6008_v39 }
 0x3ed   : > { %v3877_v1 = vpop.f32.mrf.mxu1  ;;  %v6660_v3 = vpop.eup %6659  ;;  %v4795_v22 = vpack.c.bf16 %v4735_v40, %v4731_v44  ;;  %6691 = vrcp.f32 %v4524_v8  ;;  %v9486_v43 = vmul.f32 %v9394_v16, %v8991_v34  ;;  %v10245_v34 = vld [vmem:[#allocation41_spill] sm:$0xff] }
 0x3ee   : > { %v4736_v33 = vadd.f32 %v4672_v50, %v3985_v4  ;;  %v3878_v47 = vadd.f32 %v3877_v1, %v9423_v7  ;;  %v9470_v5 = vpop.eup %6661  ;;  %v3990_v46 = vpop.f32.mrf.mxu0  ;;  %v3989_v18 = vadd.f32 %v3988_v45, %v3876_v12  ;;  %v4527_v50 = vadd.f32 1.0, %v6660_v3 }
 0x3ef   : > { %v3879_v63 = vpop.f32.mrf.mxu1  ;;  %v6664_v11 = vpop.eup %6663  ;;  %6693 = vpow2.f32 %v6009_v52  ;;  %v9497_v16 = vmul.f32 %v9415_v15, %v10245_v34 }
 0x3f0   : > { %v3880_v25 = vadd.f32 %v3879_v63, %v9413_v59  ;;  %v9476_v4 = vpop.eup %6665  ;;  %v3992_v60 = vpop.f32.mrf.mxu0  ;;  %v4796_v19 = vpack.c.bf16 %v4736_v33, %v4732_v42  ;;  %v3991_v28 = vadd.f32 %v3990_v46, %v3878_v47  ;;  %v4528_v53 = vadd.f32 1.0, %v6664_v11  ;;  %v10246_v47 = vld [vmem:[#allocation42_spill] sm:$0xff] }
 0x3f1   : > { %v3881_v61 = vpop.f32.mrf.mxu1  ;;  %v9481_v31 = vpop.eup %6667  ;;  %v4739_v45 = vadd.f32 %v9448_v29, %v3989_v18  ;;  %v4687_v52 = vmul.f32 %v9425_v30, %v10246_v47  ;;  %6695 = vrcp.f32 %v4527_v50  ;;  %v6013_v42 = vmul.f32 -1.442695, %v9479_v26  ;;  %v6832_v29 = vld [vmem:[%s10069_s7 + $0x170] ss:$8 sps:$4 sm:$0xff]   ;;  %v6833_v30 = vld [vmem:[%s10069_s7 + $0x164] ss:$8 sps:$4 sm:$0xff]  }
 0x3f2   : > { %v3993_v44 = vadd.f32 %v3992_v60, %v3880_v25  ;;  %v3882_v32 = vadd.f32 %v3881_v61, %v9423_v7  ;;  %v6670_v12 = vpop.eup %6669  ;;  %v3994_v39 = vpop.f32.mrf.mxu0  ;;  %5243 = vmatprep.mubr.bf16.mxu1 %v4796_v19  ;;  %v4740_v11 = vadd.f32 %v9452_v35, %v3991_v28  ;;  %6697 = vpow2.f32 %v6012_v37  ;;  %v10247_v50 = vld [vmem:[#allocation51_spill] sm:$0xff]  ;;  %v10248_v61 = vld [vmem:[#allocation53_spill] sm:$0xff] }
 0x3f3   : > { %v3885_v62 = vpop.f32.mrf.mxu1  ;;  %v9489_v40 = vpop.eup %6671  ;;  %5244 = vmatmul.mubr.bf16.vlgmr.msra.gmra.mxu1 %v4795_v22  ;;  %v4531_v22 = vadd.f32 1.0, %v6670_v12  ;;  %v6016_v60 = vmul.f32 -1.442695, %v10247_v50  ;;  %v3656_v19 = vadd.f32 %v10248_v61, %v9216_v55  ;;  %6699 = vrcp.f32 %v4528_v53  ;;  %v6834_v47 = vld [vmem:[%s10069_s7 + $0x160] ss:$8 sps:$4 sm:$0xff]  }
 0x3f4   : > { %v4743_v1 = vadd.f32 %v4679_v49, %v3993_v44  ;;  %v3995_v3 = vadd.f32 %v3994_v39, %v3882_v32  ;;  %v3886_v8 = vadd.f32 %v3885_v62, %v9413_v59  ;;  %v9493_v33 = vpop.eup %6673  ;;  %v3998_v46 = vpop.f32.mrf.mxu0  ;;  %6158 = vmatpush1.bf16.msra.mxu1 %v6832_v29  ;;  %v10249_v62 = vld [vmem:[#allocation43_spill] sm:$0xff]  ;;  %v9520_v37 = vmul.f32 %v9434_v14, %v9032_v48 }
 0x3f5   : > { %v3887_v63 = vpop.f32.mrf.mxu1  ;;  %v6676_v49 = vpop.eup %6675  ;;  %6143 = vmatprep.subr.bf16.mxu1 %v6833_v30  ;;  %6701 = vpow2.f32 %v6013_v42  ;;  %v6835_v48 = vld [vmem:[%s10069_s7 + $0x154] ss:$8 sps:$4 sm:$0xff]  }
 0x3f6   : > { %v4799_v18 = vpack.c.bf16 %v4743_v1, %v4739_v45  ;;  %v4744_v15 = vadd.f32 %v4680_v56, %v3995_v3  ;;  %v9509_v25 = vpop.eup %6677  ;;  %v3888_v44 = vadd.f32 %v3887_v63, %v9423_v7  ;;  %v4000_v32 = vpop.f32.mrf.mxu0  ;;  %v3999_v56 = vadd.f32 %v3998_v46, %v3886_v8  ;;  %v10250_v42 = vld [vmem:[#allocation52_spill] sm:$0xff] }
 0x3f7   : > { %v3889_v12 = vpop.f32.mrf.mxu1  ;;  %v6680_v35 = vpop.eup %6679  ;;  %v4688_v45 = vmul.f32 %v9427_v20, %v10249_v62  ;;  %v4532_v1 = vadd.f32 1.0, %v6676_v49  ;;  %6703 = vrcp.f32 %v4531_v22  ;;  %v6017_v29 = vmul.f32 -1.442695, %v10250_v42  ;;  %v10251_v49 = vld [vmem:[#allocation55_spill] sm:$0xff] }
 0x3f8   : > { %v3890_v28 = vadd.f32 %v3889_v12, %v9413_v59  ;;  %v4800_v39 = vpack.c.bf16 %v4744_v15, %v4740_v11  ;;  %v4002_v3 = vpop.f32.mrf.mxu0  ;;  %6159 = vmatpush1.bf16.msra.mxu1 %v6834_v47  ;;  %v6682_v53 = vpop.eup %6681  ;;  %v4001_v8 = vadd.f32 %v4000_v32, %v3888_v44  ;;  %v4535_v20 = vadd.f32 1.0, %v6680_v35  ;;  %v10252_v35 = vld [vmem:[#allocation54_spill] sm:$0xff] }
 0x3f9   : > { %v3891_v34 = vpop.f32.mrf.mxu1  ;;  %6144 = vmatprep.subr.bf16.mxu1 %v6835_v48  ;;  %v9529_v14 = vpop.eup %6683  ;;  %6705 = vpow2.f32 %v6016_v60  ;;  %v9533_v11 = vadd.f32 %v10251_v49, %v3656_v19  ;;  %v4747_v61 = vadd.f32 %v9486_v43, %v3999_v56  ;;  %v4536_v60 = vadd.f32 1.0, %v6682_v53 }
 0x3fa   : > { %v4003_v46 = vadd.f32 %v4002_v3, %v3890_v28  ;;  %v3892_v63 = vadd.f32 %v3891_v34, %v9423_v7  ;;  %5253 = vmatprep.mubr.bf16.mxu1 %v4800_v39  ;;  %v4004_v22 = vpop.f32.mrf.mxu0  ;;  %v9535_v30 = vpop.eup %6685  ;;  %6707 = vrcp.f32 %v4532_v1  ;;  %v6020_v39 = vmul.f32 -1.442695, %v10252_v35  ;;  %v6836_v3 = vld [vmem:[%s10069_s7 + $0x150] ss:$8 sps:$4 sm:$0xff]   ;;  %v6837_v1 = vld [vmem:[%s10069_s7 + $0x144] ss:$8 sps:$4 sm:$0xff]  }
 0x3fb   : > { %v3895_v15 = vpop.f32.mrf.mxu1  ;;  %5254 = vmatmul.mubr.bf16.gmra.mxu1 %v4799_v18  ;;  %v9539_v28 = vpop.eup %6687  ;;  %v2085_v43 = vsub.s32 6, %v10195_v24  ;;  %v4748_v56 = vadd.f32 %v9497_v16, %v4001_v8  ;;  %6709 = vpow2.f32 %v6017_v29  ;;  %v6021_v16 = vmul.f32 -1.442695, %v9533_v11 }
 0x3fc   : > { %v4751_v44 = vadd.f32 %v4687_v52, %v4003_v46  ;;  %v4005_v32 = vadd.f32 %v4004_v22, %v3892_v63  ;;  %v3896_v12 = vadd.f32 %v3895_v15, %v9413_v59  ;;  %v4008_v62 = vpop.f32.mrf.mxu0  ;;  %6160 = vmatpush1.bf16.msra.mxu1 %v6836_v3  ;;  %v6690_v52 = vpop.eup %6689  ;;  %v4692_v46 = vmul.f32 %v9456_v51, %v9046_v23 }
 0x3fd   : > { %v3897_v19 = vpop.f32.mrf.mxu1  ;;  %6145 = vmatprep.subr.bf16.mxu1 %v6837_v1  ;;  %v9551_v53 = vpop.eup %6691  ;;  %v4695_v63 = vmul.f32 %v9461_v10, %v9051_v57  ;;  %6711 = vrcp.f32 %v4535_v20  ;;  %v6838_v57 = vld [vmem:[%s10069_s7 + $0x140] ss:$8 sps:$4 sm:$0xff]   ;;  %v9566_v10 = vrot.slane %v9410_v2, %v2085_v43  ;;  %v4696_v3 = vmul.f32 %v9465_v9, %v9058_v21  ;;  %v10257_v9 = vld [vmem:[#allocation59_spill] sm:$0xff] }
 0x3fe   : > { %v4803_v34 = vpack.c.bf16 %v4751_v44, %v4747_v61  ;;  %v4752_v18 = vadd.f32 %v4688_v45, %v4005_v32  ;;  %v3898_v47 = vadd.f32 %v3897_v19, %v9423_v7  ;;  %v4010_v8 = vpop.f32.mrf.mxu0  ;;  %v6694_v48 = vpop.eup %6693  ;;  %v4009_v49 = vadd.f32 %v4008_v62, %v3896_v12  ;;  %v10253_v61 = vld [vmem:[#allocation56_spill] sm:$0xff]  ;;  %v10254_v32 = vld [vmem:[#allocation58_spill] sm:$0xff]  ;;  %v10255_v43 = vld [vmem:[#allocation57_spill] sm:$0xff] }
 0x3ff   : > { %v3899_v45 = vpop.f32.mrf.mxu1  ;;  %6713 = vpow2.f32 %v6020_v39  ;;  %v6024_v44 = vmul.f32 -1.442695, %v10253_v61  ;;  %v3666_v23 = vadd.f32 %v10254_v32, %v9216_v55  ;;  %v9568_v20 = vpop.eup %6695  ;;  %v6839_v62 = vld [vmem:[%s10069_s7 + $0x134] ss:$8 sps:$4 sm:$0xff]  }
 0x400   : > { %v3900_v22 = vadd.f32 %v3899_v45, %v9413_v59  ;;  %v4804_v15 = vpack.c.bf16 %v4752_v18, %v4748_v56  ;;  %v4012_v51 = vpop.f32.mrf.mxu0  ;;  %6161 = vmatpush1.bf16.msra.mxu1 %v6838_v57  ;;  %6715 = vrcp.f32 %v4536_v60  ;;  %v4011_v29 = vadd.f32 %v4010_v8, %v3898_v47  ;;  %v6698_v60 = vpop.eup %6697 }
 0x401   : > { %v3901_v19 = vpop.f32.mrf.mxu1  ;;  %6146 = vmatprep.subr.bf16.mxu1 %v6839_v62  ;;  %v4477_v56 = vadd.f32 1.0, %v6690_v52  ;;  %6717 = vpow2.f32 %v6021_v16  ;;  %v6025_v18 = vmul.f32 -1.442695, %v10255_v43  ;;  %v4755_v47 = vadd.f32 %v9520_v37, %v4009_v49  ;;  %v9579_v32 = vpop.eup %6699  ;;  %v6840_v37 = vld [vmem:[%s10069_s7 + $0x130] ss:$8 sps:$4 sm:$0xff]  }
 0x402   : > { %v4013_v12 = vadd.f32 %v4012_v51, %v3900_v22  ;;  %v3902_v39 = vadd.f32 %v3901_v19, %v9423_v7  ;;  %5263 = vmatprep.mubr.bf16.mxu1 %v4804_v15  ;;  %v4014_v1 = vpop.f32.mrf.mxu0  ;;  %v4478_v51 = vadd.f32 1.0, %v6694_v48  ;;  %6719 = vpow2.f32 %v6024_v44  ;;  %v10256_v19 = vld [vmem:[#allocation60_spill] sm:$0xff]  ;;  %v6841_v48 = vld [vmem:[%s10069_s7 + $0x124] ss:$8 sps:$4 sm:$0xff]  }
 0x403   : > { %v3905_v45 = vpop.f32.mrf.mxu1  ;;  %5264 = vmatmul.mubr.bf16.gmra.mxu1 %v4803_v34  ;;  %v6028_v21 = vmul.f32 -1.442695, %v10256_v19  ;;  %v9583_v52 = vadd.f32 %v10257_v9, %v3666_v23  ;;  %v4756_v49 = vadd.f32 %v4692_v46, %v4011_v29  ;;  %v4699_v23 = vmul.f32 %v9470_v5, %v9074_v13 }
 0x404   : > { %v4759_v8 = vadd.f32 %v4695_v63, %v4013_v12  ;;  %v4015_v22 = vadd.f32 %v4014_v1, %v3902_v39  ;;  %v3906_v15 = vadd.f32 %v3905_v45, %v9413_v59  ;;  %v4018_v16 = vpop.f32.mrf.mxu0  ;;  %6162 = vmatpush1.bf16.msra.mxu1 %v6840_v37  ;;  %v6702_v63 = vpop.eup %6701  ;;  %v4700_v62 = vmul.f32 %v9476_v4, %v9079_v27  ;;  %v6842_v4 = vld [vmem:[%s10069_s7 + $0x120] ss:$8 sps:$4 sm:$0xff]  }
 0x405   : > { %v3907_v57 = vpop.f32.mrf.mxu1  ;;  %6147 = vmatprep.subr.bf16.mxu1 %v6841_v48  ;;  %v9592_v44 = vpop.eup %6703  ;;  %6721 = vrcp.f32 %v4477_v56  ;;  %v4481_v1 = vadd.f32 1.0, %v6698_v60  ;;  %v4704_v9 = vmul.f32 %v9489_v40, %v9327_v41  ;;  %v6029_v13 = vmul.f32 -1.442695, %v9583_v52  ;;  %v6843_v41 = vld [vmem:[%s10069_s7 + $0x114] ss:$8 sps:$4 sm:$0xff]   ;;  %v10258_v40 = vld [vmem:[#allocation61_spill] sm:$0xff] }
 0x406   : > { %v4807_v12 = vpack.c.bf16 %v4759_v8, %v4755_v47  ;;  %v4760_v34 = vadd.f32 %v4696_v3, %v4015_v22  ;;  %v3908_v39 = vadd.f32 %v3907_v57, %v9423_v7  ;;  %v4020_v46 = vpop.f32.mrf.mxu0  ;;  %v6706_v3 = vpop.eup %6705  ;;  %6723 = vpow2.f32 %v6025_v18 }
 0x407   : > { %v3909_v29 = vpop.f32.mrf.mxu1  ;;  %v4019_v45 = vadd.f32 %v4018_v16, %v3906_v15  ;;  %v4703_v22 = vmul.f32 %v9481_v31, %v9095_v58  ;;  %6725 = vrcp.f32 %v4478_v51  ;;  %v9607_v56 = vpop.eup %6707  ;;  %v4482_v31 = vadd.f32 1.0, %v6702_v63 }
 0x408   : > { %v3910_v47 = vadd.f32 %v3909_v29, %v9413_v59  ;;  %v4808_v8 = vpack.c.bf16 %v4760_v34, %v4756_v49  ;;  %v4022_v27 = vpop.f32.mrf.mxu0  ;;  %6163 = vmatpush1.bf16.msra.mxu1 %v6842_v4  ;;  %6727 = vpow2.f32 %v6028_v21  ;;  %v4021_v18 = vadd.f32 %v4020_v46, %v3908_v39  ;;  %v6710_v21 = vpop.eup %6709 }
 0x409   : > { %v3911_v5 = vpop.f32.mrf.mxu1  ;;  %6148 = vmatprep.subr.bf16.mxu1 %v6843_v41  ;;  %6729 = vrcp.f32 %v4481_v1  ;;  %v6032_v15 = vmul.f32 -1.442695, %v10258_v40  ;;  %v3676_v51 = vadd.f32 %v9301_v54, %v9216_v55  ;;  %v4763_v37 = vadd.f32 %v4699_v23, %v4019_v45  ;;  %v10259_v1 = vld [vmem:[#allocation62_spill] sm:$0xff]  ;;  %v6844_v54 = vld [vmem:[%s10069_s7 + $0x110] ss:$8 sps:$4 sm:$0xff]  }
 0x40a   : > { %v4023_v60 = vadd.f32 %v4022_v27, %v3910_v47  ;;  %v3912_v58 = vadd.f32 %v3911_v5, %v9423_v7  ;;  %5273 = vmatprep.mubr.bf16.mxu1 %v4808_v8  ;;  %v4024_v16 = vpop.f32.mrf.mxu0  ;;  %v9617_v48 = vpop.eup %6711  ;;  %v4485_v46 = vadd.f32 1.0, %v6706_v3  ;;  %6731 = vpow2.f32 %v6029_v13  ;;  %v6845_v3 = vld [vmem:[%s10069_s7 + $0x104] ss:$8 sps:$4 sm:$0xff]   ;;  %v10260_v5 = vld [vmem:[#allocation44_spill] sm:$0xff] }
 0x40b   : > { %v3915_v57 = vpop.f32.mrf.mxu1  ;;  %5274 = vmatmul.mubr.bf16.gmra.mxu1 %v4807_v12  ;;  %v6033_v63 = vmul.f32 -1.442695, %v10259_v1  ;;  %v2089_v8 = vsub.s32 7, %v10195_v24  ;;  %v4764_v45 = vadd.f32 %v4700_v62, %v4021_v18  ;;  %v4707_v4 = vmul.f32 %v9493_v33, %v10260_v5  ;;  %v10264_v33 = vld [vmem:[#allocation63_spill] sm:$0xff] }
 0x40c   : > { %v4767_v49 = vadd.f32 %v4703_v22, %v4023_v60  ;;  %v4025_v34 = vadd.f32 %v4024_v16, %v3912_v58  ;;  %v3916_v39 = vadd.f32 %v3915_v57, %v9413_v59  ;;  %v4028_v29 = vpop.f32.mrf.mxu0  ;;  %6164 = vmatpush1.bf16.msra.mxu1 %v6844_v54  ;;  %v6714_v23 = vpop.eup %6713  ;;  %6733 = vrcp.f32 %v4482_v31  ;;  %v10261_v58 = vld [vmem:[#allocation64_spill] sm:$0xff] }
 0x40d   : > { %v3917_v47 = vpop.f32.mrf.mxu1  ;;  %6149 = vmatprep.subr.bf16.mxu1 %v6845_v3  ;;  %v9628_v13 = vpop.eup %6715  ;;  %v4486_v60 = vadd.f32 1.0, %v6710_v21  ;;  %v9633_v41 = vadd.f32 %v10261_v58, %v3676_v51  ;;  %6735 = vpow2.f32 %v6032_v15  ;;  %v6036_v31 = vmul.f32 -1.442695, %v10264_v33  ;;  %v6846_v3 = vld [vmem:[%s10069_s7 + $0x100] ss:$8 sps:$4 sm:$0xff]  }
 0x40e   : > { %v4811_v22 = vpack.c.bf16 %v4767_v49, %v4763_v37  ;;  %v4768_v27 = vadd.f32 %v4704_v9, %v4025_v34  ;;  %v3918_v12 = vadd.f32 %v3917_v47, %v9423_v7  ;;  %v4030_v62 = vpop.f32.mrf.mxu0  ;;  %v6718_v9 = vpop.eup %6717  ;;  %v4029_v16 = vadd.f32 %v4028_v29, %v3916_v39  ;;  %v10262_v49 = vld [vmem:[#allocation45_spill] sm:$0xff]  ;;  %v10263_v47 = vld [vmem:[#allocation46_spill] sm:$0xff] }
 0x40f   : > { %v3919_v18 = vpop.f32.mrf.mxu1  ;;  %v4708_v34 = vmul.f32 %v9509_v25, %v10262_v49  ;;  %v4711_v54 = vmul.f32 %v9529_v14, %v10263_v47  ;;  %6737 = vrcp.f32 %v4485_v46  ;;  %v6720_v15 = vpop.eup %6719  ;;  %v6847_v25 = vld [vmem:[%s10069_s7 + $0x1f4] ss:$8 sps:$4 sm:$0xff]   ;;  %v10265_v14 = vld [vmem:[#allocation74_spill] sm:$0xff]  ;;  %v6037_v5 = vmul.f32 -1.442695, %v9633_v41 }
 0x410   : > { %v3920_v57 = vadd.f32 %v3919_v18, %v9413_v59  ;;  %v4812_v37 = vpack.c.bf16 %v4768_v27, %v4764_v45  ;;  %v4032_v21 = vpop.f32.mrf.mxu0  ;;  %6165 = vmatpush1.bf16.msra.mxu1 %v6846_v3  ;;  %6739 = vpow2.f32 %v6033_v63  ;;  %v4031_v39 = vadd.f32 %v4030_v62, %v3918_v12  ;;  %v10266_v47 = vld [vmem:[#allocation47_spill] sm:$0xff] }
 0x411   : > { %v3921_v51 = vpop.f32.mrf.mxu1  ;;  %6150 = vmatprep.subr.bf16.mxu1 %v6847_v25  ;;  %v4712_v46 = vmul.f32 %v9535_v30, %v10265_v14  ;;  %6741 = vrcp.f32 %v4486_v60  ;;  %v4489_v27 = vadd.f32 1.0, %v6714_v23  ;;  %v4771_v12 = vadd.f32 %v4707_v4, %v4029_v16  ;;  %v6848_v3 = vld [vmem:[%s10069_s7 + $0x1f0] ss:$8 sps:$4 sm:$0xff]  }
 0x412   : > { %v4033_v29 = vadd.f32 %v4032_v21, %v3920_v57  ;;  %v3922_v45 = vadd.f32 %v3921_v51, %v9423_v7  ;;  %5283 = vmatprep.mubr.bf16.mxu1 %v4812_v37  ;;  %v4034_v58 = vpop.f32.mrf.mxu0  ;;  %v9651_v63 = vpop.eup %6721  ;;  %v4715_v21 = vmul.f32 %v9539_v28, %v10266_v47  ;;  %v4490_v51 = vadd.f32 1.0, %v6718_v9  ;;  %v6849_v28 = vld [vmem:[%s10069_s7 + $0x1e4] ss:$8 sps:$4 sm:$0xff]   ;;  %v10269_v14 = vld [vmem:[#allocation67_spill] sm:$0xff] }
 0x413   : > { %v3925_v18 = vpop.f32.mrf.mxu1  ;;  %5284 = vmatmul.mubr.bf16.gmra.mxu1 %v4811_v22  ;;  %v6724_v49 = vpop.eup %6723  ;;  %v4493_v30 = vadd.f32 1.0, %v6720_v15  ;;  %6743 = vpow2.f32 %v6036_v31  ;;  %v4772_v16 = vadd.f32 %v4708_v34, %v4031_v39  ;;  %v10267_v31 = vld [vmem:[#allocation48_spill] sm:$0xff] }
 0x414   : > { %v4775_v62 = vadd.f32 %v4711_v54, %v4033_v29  ;;  %v4035_v57 = vadd.f32 %v4034_v58, %v3922_v45  ;;  %v3926_v37 = vadd.f32 %v3925_v18, %v9413_v59  ;;  %v4038_v23 = vpop.f32.mrf.mxu0  ;;  %6166 = vmatpush2.bf16.msra.mxu1 %v6848_v3  ;;  %v9659_v4 = vpop.eup %6725  ;;  %v4716_v15 = vmul.f32 %v9551_v53, %v10267_v31  ;;  %v10268_v45 = vld [vmem:[#allocation65_spill] sm:$0xff] }
 0x415   : > { %v3927_v60 = vpop.f32.mrf.mxu1  ;;  %6151 = vmatprep.subr.bf16.mxu1 %v6849_v28  ;;  %v6728_v9 = vpop.eup %6727  ;;  %6745 = vrcp.f32 %v4489_v27  ;;  %v6040_v25 = vmul.f32 -1.442695, %v10268_v45  ;;  %v3686_v58 = vadd.f32 %v10269_v14, %v9216_v55  ;;  %v4494_v27 = vadd.f32 1.0, %v6724_v49  ;;  %v6850_v31 = vld [vmem:[%s10069_s7 + $0x1e0] ss:$8 sps:$4 sm:$0xff]  }
 0x416   : > { %v4815_v54 = vpack.c.bf16 %v4775_v62, %v4771_v12  ;;  %v4776_v29 = vadd.f32 %v4712_v46, %v4035_v57  ;;  %v3928_v22 = vadd.f32 %v3927_v60, %v9423_v7  ;;  %v4040_v34 = vpop.f32.mrf.mxu0  ;;  %v9670_v46 = vpop.eup %6729  ;;  %6747 = vpow2.f32 %v6037_v5  ;;  %v10270_v57 = vld [vmem:[#allocation49_spill] sm:$0xff]  ;;  %v10272_v49 = vld [vmem:[#allocation66_spill] sm:$0xff] }
 0x417   : > { %v3929_v39 = vpop.f32.mrf.mxu1  ;;  %v4039_v18 = vadd.f32 %v4038_v23, %v3926_v37  ;;  %v4719_v47 = vmul.f32 %v9568_v20, %v10270_v57  ;;  %v10271_v60 = vld [vmem:[#allocation81_spill] sm:$0xff]  ;;  %6749 = vrcp.f32 %v4490_v51  ;;  %v6732_v5 = vpop.eup %6731  ;;  %v6851_v20 = vld [vmem:[%s10069_s7 + $0x1d4] ss:$8 sps:$4 sm:$0xff]   ;;  %v6041_v51 = vmul.f32 -1.442695, %v10272_v49 }
 0x418   : > { %v3930_v12 = vadd.f32 %v3929_v39, %v9413_v59  ;;  %v4816_v62 = vpack.c.bf16 %v4776_v29, %v4772_v16  ;;  %v4720_v53 = vmul.f32 %v9579_v32, %v10271_v60  ;;  %v4042_v3 = vpop.f32.mrf.mxu0  ;;  %6167 = vmatpush2.bf16.msra.mxu1 %v6850_v31  ;;  %6751 = vrcp.f32 %v4493_v30  ;;  %v10273_v29 = vld [vmem:[#allocation69_spill] sm:$0xff] }
 0x419   : > { %v3931_v28 = vpop.f32.mrf.mxu1  ;;  %v4041_v37 = vadd.f32 %v4040_v34, %v3928_v22  ;;  %6152 = vmatprep.subr.bf16.mxu1 %v6851_v20  ;;  %v4497_v32 = vadd.f32 1.0, %v6728_v9  ;;  %6753 = vpow2.f32 %v6040_v25  ;;  %v9686_v14 = vadd.f32 %v10273_v29, %v3686_v58  ;;  %v9688_v30 = vpop.eup %6733  ;;  %v10274_v9 = vld [vmem:[#allocation68_spill] sm:$0xff] }
 0x41a   : > { %v4043_v23 = vadd.f32 %v4042_v3, %v3930_v12  ;;  %v3932_v16 = vadd.f32 %v3931_v28, %v9423_v7  ;;  %5293 = vmatprep.mubr.bf16.mxu1 %v4816_v62  ;;  %v4044_v39 = vpop.f32.mrf.mxu0  ;;  %v4779_v22 = vadd.f32 %v4715_v21, %v4039_v18  ;;  %v6736_v60 = vpop.eup %6735  ;;  %6755 = vrcp.f32 %v4494_v27  ;;  %v6852_v21 = vld [vmem:[%s10069_s7 + $0x1d0] ss:$8 sps:$4 sm:$0xff]  }
 0x41b   : > { %v3935_v57 = vpop.f32.mrf.mxu1  ;;  %5294 = vmatmul.mubr.bf16.gmra.mxu1 %v4815_v54  ;;  %v4498_v3 = vadd.f32 1.0, %v6732_v5  ;;  %v6044_v25 = vmul.f32 -1.442695, %v10274_v9  ;;  %v9695_v58 = vrot.slane %v9410_v2, %v2089_v8  ;;  %v4780_v54 = vadd.f32 %v4716_v15, %v4041_v37 }
 0x41c   : > { %v4783_v34 = vadd.f32 %v4719_v47, %v4043_v23  ;;  %v4045_v12 = vadd.f32 %v4044_v39, %v3932_v16  ;;  %v3936_v62 = vadd.f32 %v3935_v57, %v9413_v59  ;;  %v4048_v28 = vpop.f32.mrf.mxu0  ;;  %6168 = vmatpush2.bf16.msra.mxu1 %v6852_v21  ;;  %v9700_v18 = vpop.eup %6737  ;;  %v6853_v23 = vld [vmem:[%s10069_s7 + $0x1c4] ss:$8 sps:$4 sm:$0xff]   ;;  %v4723_v2 = vmul.f32 %v9592_v44, %v9192_v0 }
 0x41d   : > { %v3937_v31 = vpop.f32.mrf.mxu1  ;;  %6153 = vmatprep.subr.bf16.mxu1 %v6853_v23  ;;  %v6740_v24 = vpop.eup %6739  ;;  %v4724_v8 = vmul.f32 %v9607_v56, %v9199_v17  ;;  %6757 = vpow2.f32 %v6041_v51  ;;  %v6045_v16 = vmul.f32 -1.442695, %v9686_v14  ;;  %v10275_v57 = vld [vmem:[#allocation50_spill] sm:$0xff]  ;;  %v4501_v44 = vadd.f32 1.0, %v6736_v60 }
 0x41e   : > { %v4819_v47 = vpack.c.bf16 %v4783_v34, %v4779_v22  ;;  %v4784_v27 = vadd.f32 %v4720_v53, %v4045_v12  ;;  %v3938_v5 = vadd.f32 %v3937_v31, %v9423_v7  ;;  %v4050_v15 = vpop.f32.mrf.mxu0  ;;  %v9711_v53 = vpop.eup %6741  ;;  %6759 = vrcp.f32 %v4497_v32  ;;  %v10276_v34 = vld [vmem:[#allocation87_spill] sm:$0xff]  ;;  %v6854_v51 = vld [vmem:[%s10069_s7 + $0x1c0] ss:$8 sps:$4 sm:$0xff]  }
 0x41f   : > { %v3939_v37 = vpop.f32.mrf.mxu1  ;;  %v4049_v20 = vadd.f32 %v4048_v28, %v3936_v62  ;;  %v4727_v22 = vmul.f32 %v9617_v48, %v10275_v57  ;;  %v4728_v0 = vmul.f32 %v9628_v13, %v10276_v34  ;;  %6761 = vpow2.f32 %v6044_v25  ;;  %v6855_v48 = vld [vmem:[%s10069_s7 + $0x1b4] ss:$8 sps:$4 sm:$0xff]   ;;  %v10277_v60 = vld [vmem:[#allocation70_spill] sm:$0xff]  ;;  %v6856_v34 = vld [vmem:[%s10069_s7 + $0x1b0] ss:$8 sps:$4 sm:$0xff]  }
 0x420   : > { %v3940_v29 = vadd.f32 %v3939_v37, %v9413_v59  ;;  %v4820_v39 = vpack.c.bf16 %v4784_v27, %v4780_v54  ;;  %v4052_v17 = vpop.f32.mrf.mxu0  ;;  %6169 = vmatpush2.bf16.msra.mxu1 %v6854_v51  ;;  %v6744_v32 = vpop.eup %6743  ;;  %6763 = vrcp.f32 %v4498_v3  ;;  %v4051_v12 = vadd.f32 %v4050_v15, %v3938_v5  ;;  %v10278_v28 = vld [vmem:[#allocation72_spill] sm:$0xff]  ;;  %v10279_v37 = vld [vmem:[#allocation71_spill] sm:$0xff] }
 0x421   : > { %v3941_v56 = vpop.f32.mrf.mxu1  ;;  %6154 = vmatprep.subr.bf16.mxu1 %v6855_v48  ;;  %v4502_v13 = vadd.f32 1.0, %v6740_v24  ;;  %6765 = vpow2.f32 %v6045_v16  ;;  %v6048_v25 = vmul.f32 -1.442695, %v10277_v60  ;;  %v3696_v31 = vadd.f32 %v10278_v28, %v9216_v55 }
 0x422   : > { %v4053_v59 = vadd.f32 %v4052_v17, %v3940_v29  ;;  %v3942_v62 = vadd.f32 %v3941_v56, %v9423_v7  ;;  %5303 = vmatprep.mubr.bf16.mxu1 %v4820_v39  ;;  %v4054_v21 = vpop.f32.mrf.mxu0  ;;  %v9728_v3 = vpop.eup %6745  ;;  %v4787_v27 = vadd.f32 %v4723_v2, %v4049_v20  ;;  %v4669_v24 = vmul.f32 %v9651_v63, %v9225_v38  ;;  %v6857_v38 = vld [vmem:[%s10069_s7 + $0x1a4] ss:$8 sps:$4 sm:$0xff]   ;;  %v10280_v56 = vld [vmem:[#allocation75_spill] sm:$0xff] }
 0x423   : > { %v4091_v54 = vpop.f32.mrf.mxu1  ;;  %5304 = vmatmul.mubr.bf16.gmra.mxu1 %v4819_v47  ;;  %v6748_v15 = vpop.eup %6747  ;;  %6767 = vrcp.f32 %v4501_v44  ;;  %v4505_v16 = vadd.f32 1.0, %v6744_v32  ;;  %v6049_v29 = vmul.f32 -1.442695, %v10279_v37  ;;  %v4788_v20 = vadd.f32 %v4724_v8, %v4051_v12  ;;  %v10281_v32 = vld [vmem:[#allocation73_spill] sm:$0xff] }
 0x424   : > { %v4791_v5 = vadd.f32 %v4727_v22, %v4053_v59  ;;  %v4055_v7 = vadd.f32 %v4054_v21, %v3942_v62  ;;  %v4092_v23 = vadd.f32 %v4091_v54, %v9566_v10  ;;  %v4204_v39 = vpop.f32.mrf.mxu0  ;;  %6170 = vmatpush2.bf16.msra.mxu1 %v6856_v34  ;;  %v9737_v2 = vpop.eup %6749  ;;  %v4670_v44 = vmul.f32 %v9659_v4, %v9236_v36 }
 0x425   : > { %v4093_v57 = vpop.f32.mrf.mxu1  ;;  %6155 = vmatprep.subr.bf16.mxu1 %v6857_v38  ;;  %v9743_v63 = vpop.eup %6751  ;;  %6769 = vpow2.f32 %v6048_v25  ;;  %v6052_v51 = vmul.f32 -1.442695, %v10280_v56  ;;  %v9749_v59 = vadd.f32 %v10281_v32, %v3696_v31  ;;  %v4673_v21 = vmul.f32 %v9670_v46, %v9241_v6  ;;  %v6858_v31 = vld [vmem:[%s10069_s7 + $0x1a0] ss:$8 sps:$4 sm:$0xff]   ;;  %v6859_v6 = vld [vmem:[%s10069_s7 + $0x194] ss:$8 sps:$4 sm:$0xff]  }
 0x426   : > { %v4823_v22 = vpack.c.bf16 %v4791_v5, %v4787_v27  ;;  %v4792_v47 = vadd.f32 %v4728_v0, %v4055_v7  ;;  %v4094_v17 = vadd.f32 %v4093_v57, %v9695_v58  ;;  %v4206_v8 = vpop.f32.mrf.mxu0  ;;  %v6754_v12 = vpop.eup %6753  ;;  %6771 = vrcp.f32 %v4502_v13  ;;  %v10282_v46 = vld [vmem:[#allocation76_spill] sm:$0xff]  ;;  %v10284_v32 = vld [vmem:[#allocation77_spill] sm:$0xff] }
 0x427   : > { %v4095_v0 = vpop.f32.mrf.mxu1  ;;  %v4205_v62 = vadd.f32 %v4204_v39, %v4092_v23  ;;  %v4674_v36 = vmul.f32 %v9688_v30, %v9479_v26  ;;  %v4506_v4 = vadd.f32 1.0, %v6748_v15  ;;  %6773 = vpow2.f32 %v6049_v29  ;;  %v9759_v13 = vpop.eup %6755  ;;  %v10283_v23 = vld [vmem:[#allocation78_spill] sm:$0xff] }
 0x428   : > { %v4096_v48 = vadd.f32 %v4095_v0, %v9566_v10  ;;  %v4824_v28 = vpack.c.bf16 %v4792_v47, %v4788_v20  ;;  %v4208_v25 = vpop.f32.mrf.mxu0  ;;  %6171 = vmatpush2.bf16.msra.mxu1 %v6858_v31  ;;  %6775 = vrcp.f32 %v4505_v16  ;;  %v4207_v27 = vadd.f32 %v4206_v8, %v4094_v17 }
 0x429   : > { %v4097_v54 = vpop.f32.mrf.mxu1  ;;  %6156 = vmatprep.subr.bf16.mxu1 %v6859_v6  ;;  %6777 = vpow2.f32 %v6052_v51  ;;  %v6053_v26 = vmul.f32 -1.442695, %v9749_v59  ;;  %v6056_v30 = vmul.f32 -1.442695, %v10282_v46  ;;  %v3706_v15 = vadd.f32 %v10283_v23, %v9216_v55 }
 0x42a   : > { %v4209_v5 = vadd.f32 %v4208_v25, %v4096_v48  ;;  %v4098_v7 = vadd.f32 %v4097_v54, %v9695_v58  ;;  %5313 = vmatprep.mubr.bf16.mxu1 %v4824_v28  ;;  %v4210_v29 = vpop.f32.mrf.mxu0  ;;  %v6758_v39 = vpop.eup %6757  ;;  %v4733_v57 = vadd.f32 %v4669_v24, %v4205_v62  ;;  %v4677_v38 = vmul.f32 %v9700_v18, %v10247_v50  ;;  %v6860_v24 = vld [vmem:[%s10069_s7 + $0x190] ss:$8 sps:$4 sm:$0xff]   ;;  %v6861_v50 = vld [vmem:[%s10069_s7 + $0x184] ss:$8 sps:$4 sm:$0xff]  }
 0x42b   : > { %v4101_v16 = vpop.f32.mrf.mxu1  ;;  %5314 = vmatmul.mubr.bf16.gmra.mxu1 %v4823_v22  ;;  %v9770_v17 = vpop.eup %6759  ;;  %6779 = vrcp.f32 %v4506_v4  ;;  %v4509_v51 = vadd.f32 1.0, %v6754_v12  ;;  %v6057_v8 = vmul.f32 -1.442695, %v10284_v32  ;;  %v4734_v28 = vadd.f32 %v4670_v44, %v4207_v27  ;;  %v10285_v54 = vld [vmem:[#allocation80_spill] sm:$0xff] }
 0x42c   : > { %v4737_v34 = vadd.f32 %v4673_v21, %v4209_v5  ;;  %v4211_v20 = vadd.f32 %v4210_v29, %v4098_v7  ;;  %v4102_v47 = vadd.f32 %v4101_v16, %v9566_v10  ;;  %v4214_v0 = vpop.f32.mrf.mxu0  ;;  %6172 = vmatpush2.bf16.msra.mxu1 %v6860_v24  ;;  %v6762_v62 = vpop.eup %6761  ;;  %v4678_v12 = vmul.f32 %v9711_v53, %v10250_v42  ;;  %v10286_v42 = vld [vmem:[#allocation79_spill] sm:$0xff]  ;;  %v6862_v16 = vld [vmem:[%s10069_s7 + $0x180] ss:$8 sps:$4 sm:$0xff]  }
 0x42d   : > { %v4103_v48 = vpop.f32.mrf.mxu1  ;;  %6157 = vmatprep.subr.bf16.mxu1 %v6861_v50  ;;  %v9782_v18 = vpop.eup %6763  ;;  %v4510_v4 = vadd.f32 1.0, %v6758_v39  ;;  %6781 = vpow2.f32 %v6053_v26  ;;  %v9787_v31 = vadd.f32 %v10285_v54, %v3706_v15  ;;  %v4681_v23 = vmul.f32 %v9728_v3, %v10252_v35 }
 0x42e   : > { %v4797_v21 = vpack.c.bf16 %v4737_v34, %v4733_v57  ;;  %v4738_v22 = vadd.f32 %v4674_v36, %v4211_v20  ;;  %v4104_v25 = vadd.f32 %v4103_v48, %v9695_v58  ;;  %v4216_v44 = vpop.f32.mrf.mxu0  ;;  %v6766_v36 = vpop.eup %6765  ;;  %6783 = vpow2.f32 %v6056_v30 }
 0x42f   : > { %v4105_v27 = vpop.f32.mrf.mxu1  ;;  %v4215_v5 = vadd.f32 %v4214_v0, %v4102_v47  ;;  %v4682_v29 = vmul.f32 %v9737_v2, %v9533_v11  ;;  %6785 = vrcp.f32 %v4509_v51  ;;  %v6060_v53 = vmul.f32 -1.442695, %v10286_v42  ;;  %v10287_v2 = vld [vmem:[#allocation84_spill] sm:$0xff] }
 0x430   : > { %v4106_v7 = vadd.f32 %v4105_v27, %v9566_v10  ;;  %v4798_v6 = vpack.c.bf16 %v4738_v22, %v4734_v28  ;;  %v4218_v26 = vpop.f32.mrf.mxu0  ;;  %6173 = vmatpush2.bf16.msra.mxu1 %v6862_v16  ;;  %v9798_v30 = vpop.eup %6767  ;;  %6787 = vpow2.f32 %v6057_v8  ;;  %v4217_v39 = vadd.f32 %v4216_v44, %v4104_v25  ;;  %v10288_v25 = vld [vmem:[#allocation82_spill] sm:$0xff] }
 0x431   : > { %v4107_v15 = vpop.f32.mrf.mxu1  ;;  %6789 = vrcp.f32 %v4510_v4  ;;  %v4513_v11 = vadd.f32 1.0, %v6762_v62  ;;  %v6061_v3 = vmul.f32 -1.442695, %v9787_v31  ;;  %v3716_v34 = vadd.f32 %v10287_v2, %v9216_v55 }
 0x432   : > { %v4219_v57 = vadd.f32 %v4218_v26, %v4106_v7  ;;  %v4108_v35 = vadd.f32 %v4107_v15, %v9695_v58  ;;  %5356 = vmatprep.mubr.bf16.mxu0 %v4798_v6  ;;  %v4220_v20 = vpop.f32.mrf.mxu0  ;;  %v6770_v51 = vpop.eup %6769  ;;  %v4741_v0 = vadd.f32 %v4677_v38, %v4215_v5  ;;  %v4514_v22 = vadd.f32 1.0, %v6766_v36  ;;  %v10289_v5 = vld [vmem:[#allocation83_spill] sm:$0xff] }
 0x433   : > { %v4111_v47 = vpop.f32.mrf.mxu1  ;;  %5357 = vmatmul.mubr.bf16.vlgmr.msra.gmra.mxu0 %v4797_v21  ;;  %v9805_v28 = vpop.eup %6771  ;;  %6791 = vpow2.f32 %v6060_v53  ;;  %v6064_v62 = vmul.f32 -1.442695, %v10288_v25  ;;  %v4742_v44 = vadd.f32 %v4678_v12, %v4217_v39  ;;  %v4685_v38 = vmul.f32 %v9743_v63, %v10253_v61  ;;  %v10291_v63 = vld [vmem:[#allocation85_spill] sm:$0xff] }
 0x434   : > { %v4745_v48 = vadd.f32 %v4681_v23, %v4219_v57  ;;  %v4221_v24 = vadd.f32 %v4220_v20, %v4108_v35  ;;  %v4112_v8 = vadd.f32 %v4111_v47, %v9566_v10  ;;  %v4224_v50 = vpop.f32.mrf.mxu0  ;;  %v6774_v54 = vpop.eup %6773  ;;  %6793 = vpow2.f32 %v6061_v3  ;;  %v10290_v23 = vld [vmem:[#allocation86_spill] sm:$0xff] }
 0x435   : > { %v4113_v4 = vpop.f32.mrf.mxu1  ;;  %v6776_v7 = vpop.eup %6775  ;;  %v6065_v6 = vmul.f32 -1.442695, %v10289_v5  ;;  %v9813_v36 = vadd.f32 %v10290_v23, %v3716_v34  ;;  %6795 = vrcp.f32 %v4513_v11  ;;  %v4686_v39 = vmul.f32 %v9759_v13, %v10255_v43 }
 0x436   : > { %v4801_v55 = vpack.c.bf16 %v4745_v48, %v4741_v0  ;;  %v4746_v27 = vadd.f32 %v4682_v29, %v4221_v24  ;;  %v4114_v21 = vadd.f32 %v4113_v4, %v9695_v58  ;;  %v4226_v53 = vpop.f32.mrf.mxu0  ;;  %v6778_v15 = vpop.eup %6777  ;;  %v4225_v16 = vadd.f32 %v4224_v50, %v4112_v8 }
 0x437   : > { %v4115_v26 = vpop.f32.mrf.mxu1  ;;  %v4689_v61 = vmul.f32 %v9770_v17, %v10256_v19  ;;  %6797 = vrcp.f32 %v4514_v22  ;;  %v6068_v57 = vmul.f32 -1.442695, %v10291_v63  ;;  %v4690_v47 = vmul.f32 %v9782_v18, %v9583_v52 }
 0x438   : > { %v4116_v12 = vadd.f32 %v4115_v26, %v9566_v10  ;;  %v4802_v29 = vpack.c.bf16 %v4746_v27, %v4742_v44  ;;  %v4228_v35 = vpop.f32.mrf.mxu0  ;;  %v6780_v2 = vpop.eup %6779  ;;  %6799 = vpow2.f32 %v6064_v62  ;;  %v4227_v34 = vadd.f32 %v4226_v53, %v4114_v21 }
 0x439   : > { %v4117_v3 = vpop.f32.mrf.mxu1  ;;  %v4517_v0 = vadd.f32 1.0, %v6770_v51  ;;  %6801 = vpow2.f32 %v6065_v6  ;;  %v6069_v43 = vmul.f32 -1.442695, %v9813_v36  ;;  %v4749_v48 = vadd.f32 %v4685_v38, %v4225_v16 }
 0x43a   : > { %v4229_v20 = vadd.f32 %v4228_v35, %v4116_v12  ;;  %v4118_v11 = vadd.f32 %v4117_v3, %v9695_v58  ;;  %5366 = vmatprep.mubr.bf16.mxu0 %v4802_v29  ;;  %v4230_v19 = vpop.f32.mrf.mxu0  ;;  %v6782_v17 = vpop.eup %6781  ;;  %v4518_v50 = vadd.f32 1.0, %v6774_v54  ;;  %v4521_v4 = vadd.f32 1.0, %v6778_v15 }
 0x43b   : > { %v4121_v13 = vpop.f32.mrf.mxu1  ;;  %5367 = vmatmul.mubr.bf16.gmra.mxu0 %v4801_v55  ;;  %v6784_v62 = vpop.eup %6783  ;;  %6803 = vpow2.f32 %v6068_v57  ;;  %v4750_v18 = vadd.f32 %v4686_v39, %v4227_v34  ;;  %v4522_v55 = vadd.f32 1.0, %v6782_v17  ;;  %v4693_v12 = vmul.f32 %v9798_v30, %v10258_v40 }
 0x43c   : > { %v4753_v24 = vadd.f32 %v4689_v61, %v4229_v20  ;;  %v4231_v8 = vadd.f32 %v4230_v19, %v4118_v11  ;;  %v4122_v22 = vadd.f32 %v4121_v13, %v9566_v10  ;;  %v4234_v44 = vpop.f32.mrf.mxu0  ;;  %v6786_v52 = vpop.eup %6785  ;;  %6805 = vpow2.f32 %v6069_v43 }
 0x43d   : > { %v4123_v27 = vpop.f32.mrf.mxu1  ;;  %v6788_v23 = vpop.eup %6787  ;;  %6807 = vrcp.f32 %v4517_v0  ;;  %v4697_v29 = vmul.f32 %v6776_v7, %v10264_v33  ;;  %v4694_v20 = vmul.f32 %v9805_v28, %v10259_v1  ;;  %v4698_v11 = vmul.f32 %v6780_v2, %v9633_v41 }
 0x43e   : > { %v4805_v51 = vpack.c.bf16 %v4753_v24, %v4749_v48  ;;  %v4754_v21 = vadd.f32 %v4690_v47, %v4231_v8  ;;  %v4124_v6 = vadd.f32 %v4123_v27, %v9695_v58  ;;  %v4236_v38 = vpop.f32.mrf.mxu0  ;;  %v6790_v26 = vpop.eup %6789  ;;  %v4235_v16 = vadd.f32 %v4234_v44, %v4122_v22 }
 0x43f   : > { %v4125_v53 = vpop.f32.mrf.mxu1  ;;  %6809 = vrcp.f32 %v4521_v4  ;;  %v4525_v47 = vadd.f32 1.0, %v6784_v62  ;;  %v4526_v17 = vadd.f32 1.0, %v6788_v23 }
 0x440   : > { %v4126_v54 = vadd.f32 %v4125_v53, %v9566_v10  ;;  %v4806_v15 = vpack.c.bf16 %v4754_v21, %v4750_v18  ;;  %v4238_v39 = vpop.f32.mrf.mxu0  ;;  %v6792_v57 = vpop.eup %6791  ;;  %6811 = vrcp.f32 %v4518_v50  ;;  %v4237_v35 = vadd.f32 %v4236_v38, %v4124_v6 }
 0x441   : > { %v4127_v61 = vpop.f32.mrf.mxu1  ;;  %6813 = vrcp.f32 %v4522_v55  ;;  %v6794_v33 = vpop.eup %6793  ;;  %v4757_v7 = vadd.f32 %v4693_v12, %v4235_v16  ;;  %v4529_v48 = vadd.f32 1.0, %v6792_v57  ;;  %v4701_v6 = vmul.f32 %v6786_v52, %v10268_v45 }
 0x442   : > { %v4239_v3 = vadd.f32 %v4238_v39, %v4126_v54  ;;  %v4128_v34 = vadd.f32 %v4127_v61, %v9695_v58  ;;  %5376 = vmatprep.mubr.bf16.mxu0 %v4806_v15  ;;  %v4240_v40 = vpop.f32.mrf.mxu0  ;;  %v6796_v13 = vpop.eup %6795  ;;  %v4758_v1 = vadd.f32 %v4694_v20, %v4237_v35  ;;  %v4530_v50 = vadd.f32 1.0, %v6794_v33 }
 0x443   : > { %v4131_v30 = vpop.f32.mrf.mxu1  ;;  %5377 = vmatmul.mubr.bf16.gmra.mxu0 %v4805_v51  ;;  %6815 = vrcp.f32 %v4525_v47  ;;  %v4705_v23 = vmul.f32 %v6796_v13, %v10274_v9  ;;  %v4702_v12 = vmul.f32 %v6790_v26, %v10272_v49 }
 0x444   : > { %v4761_v0 = vadd.f32 %v4697_v29, %v4239_v3  ;;  %v4241_v43 = vadd.f32 %v4240_v40, %v4128_v34  ;;  %v4132_v19 = vadd.f32 %v4131_v30, %v9566_v10  ;;  %v4244_v24 = vpop.f32.mrf.mxu0  ;;  %v6798_v22 = vpop.eup %6797  ;;  %6817 = vrcp.f32 %v4526_v17 }
 0x445   : > { %v4133_v8 = vpop.f32.mrf.mxu1  ;;  %v6800_v62 = vpop.eup %6799  ;;  %6819 = vrcp.f32 %v4529_v48  ;;  %v4706_v29 = vmul.f32 %v6798_v22, %v9686_v14 }
 0x446   : > { %v4809_v28 = vpack.c.bf16 %v4761_v0, %v4757_v7  ;;  %v4762_v41 = vadd.f32 %v4698_v11, %v4241_v43  ;;  %v4134_v2 = vadd.f32 %v4133_v8, %v9695_v58  ;;  %v4246_v4 = vpop.f32.mrf.mxu0  ;;  %v6802_v27 = vpop.eup %6801  ;;  %v4245_v18 = vadd.f32 %v4244_v24, %v4132_v19 }
 0x447   : > { %v4135_v44 = vpop.f32.mrf.mxu1  ;;  %6821 = vrcp.f32 %v4530_v50  ;;  %v4533_v39 = vadd.f32 1.0, %v6800_v62  ;;  %v4534_v20 = vadd.f32 1.0, %v6802_v27 }
 0x448   : > { %v4136_v51 = vadd.f32 %v4135_v44, %v9566_v10  ;;  %v4810_v21 = vpack.c.bf16 %v4762_v41, %v4758_v1  ;;  %v4248_v55 = vpop.f32.mrf.mxu0  ;;  %v6804_v53 = vpop.eup %6803  ;;  %v4247_v16 = vadd.f32 %v4246_v4, %v4134_v2  ;;  %v4765_v52 = vadd.f32 %v4701_v6, %v4245_v18 }
 0x449   : > { %v4137_v38 = vpop.f32.mrf.mxu1  ;;  %v6806_v9 = vpop.eup %6805  ;;  %v4537_v11 = vadd.f32 1.0, %v6804_v53  ;;  %6823 = vrcp.f32 %v4533_v39 }
 0x44a   : > { %v4249_v54 = vadd.f32 %v4248_v55, %v4136_v51  ;;  %v4138_v15 = vadd.f32 %v4137_v38, %v9695_v58  ;;  %5386 = vmatprep.mubr.bf16.mxu0 %v4810_v21  ;;  %v4250_v61 = vpop.f32.mrf.mxu0  ;;  %v6808_v34 = vpop.eup %6807  ;;  %v4766_v49 = vadd.f32 %v4702_v12, %v4247_v16  ;;  %v4538_v0 = vadd.f32 1.0, %v6806_v9 }
 0x44b   : > { %v4141_v45 = vpop.f32.mrf.mxu1  ;;  %5387 = vmatmul.mubr.bf16.gmra.mxu0 %v4809_v28  ;;  %v4709_v8 = vmul.f32 %v6808_v34, %v10277_v60  ;;  %6825 = vrcp.f32 %v4534_v20 }
 0x44c   : > { %v4769_v57 = vadd.f32 %v4705_v23, %v4249_v54  ;;  %v4251_v35 = vadd.f32 %v4250_v61, %v4138_v15  ;;  %v4142_v3 = vadd.f32 %v4141_v45, %v9566_v10  ;;  %v4254_v47 = vpop.f32.mrf.mxu0  ;;  %v6810_v30 = vpop.eup %6809  ;;  %6827 = vrcp.f32 %v4537_v11 }
 0x44d   : > { %v4143_v40 = vpop.f32.mrf.mxu1  ;;  %v6812_v7 = vpop.eup %6811  ;;  %v4713_v22 = vmul.f32 %v6810_v30, %v10280_v56  ;;  %6829 = vrcp.f32 %v4538_v0 }
 0x44e   : > { %v4813_v26 = vpack.c.bf16 %v4769_v57, %v4765_v52  ;;  %v4770_v14 = vadd.f32 %v4706_v29, %v4251_v35  ;;  %v4144_v33 = vadd.f32 %v4143_v40, %v9695_v58  ;;  %v4256_v43 = vpop.f32.mrf.mxu0  ;;  %v6814_v13 = vpop.eup %6813  ;;  %v4255_v17 = vadd.f32 %v4254_v47, %v4142_v3 }
 0x44f   : > { %v4145_v19 = vpop.f32.mrf.mxu1  ;;  %v4710_v50 = vmul.f32 %v6812_v7, %v10279_v37  ;;  %v4714_v4 = vmul.f32 %v6814_v13, %v9749_v59 }
 0x450   : > { %v4146_v48 = vadd.f32 %v4145_v19, %v9566_v10  ;;  %v4814_v24 = vpack.c.bf16 %v4770_v14, %v4766_v49  ;;  %v4258_v1 = vpop.f32.mrf.mxu0  ;;  %v4257_v41 = vadd.f32 %v4256_v43, %v4144_v33  ;;  %v4773_v60 = vadd.f32 %v4709_v8, %v4255_v17  ;;  %v6816_v21 = vpop.eup %6815 }
 0x451   : > { %v4147_v28 = vpop.f32.mrf.mxu1  ;;  %v6818_v55 = vpop.eup %6817  ;;  %v4717_v45 = vmul.f32 %v6816_v21, %v10282_v46 }
 0x452   : > { %v4259_v2 = vadd.f32 %v4258_v1, %v4146_v48  ;;  %v4148_v62 = vadd.f32 %v4147_v28, %v9695_v58  ;;  %5396 = vmatprep.mubr.bf16.mxu1 %v4814_v24  ;;  %v4260_v44 = vpop.f32.mrf.mxu0  ;;  %v4774_v38 = vadd.f32 %v4710_v50, %v4257_v41  ;;  %v6820_v54 = vpop.eup %6819  ;;  %v4718_v20 = vmul.f32 %v6818_v55, %v10284_v32 }
 0x453   : > { %v4151_v27 = vpop.f32.mrf.mxu1  ;;  %5397 = vmatmul.mubr.bf16.vlgmr.msra.gmra.mxu1 %v4813_v26  ;;  %v4721_v57 = vmul.f32 %v6820_v54, %v10286_v42 }
 0x454   : > { %v4777_v18 = vadd.f32 %v4713_v22, %v4259_v2  ;;  %v4261_v56 = vadd.f32 %v4260_v44, %v4148_v62  ;;  %v4152_v51 = vadd.f32 %v4151_v27, %v9566_v10  ;;  %v4264_v6 = vpop.f32.mrf.mxu0  ;;  %v6822_v12 = vpop.eup %6821 }
 0x455   : > { %v4153_v23 = vpop.f32.mrf.mxu1  ;;  %v4722_v11 = vmul.f32 %v6822_v12, %v9787_v31 }
 0x456   : > { %v4817_v53 = vpack.c.bf16 %v4777_v18, %v4773_v60  ;;  %v4778_v16 = vadd.f32 %v4714_v4, %v4261_v56  ;;  %v4154_v37 = vadd.f32 %v4153_v23, %v9695_v58  ;;  %v4266_v59 = vpop.f32.mrf.mxu0  ;;  %v4265_v29 = vadd.f32 %v4264_v6, %v4152_v51  ;;  %v6824_v14 = vpop.eup %6823 }
 0x457   : > { %v4155_v15 = vpop.f32.mrf.mxu1  ;;  %v4725_v1 = vmul.f32 %v6824_v14, %v10288_v25  ;;  %v10293_v14 = vld [vmem:[#allocation10_spill] sm:$0xff] }
 0x458   : > { %v4156_v39 = vadd.f32 %v4155_v15, %v9566_v10  ;;  %v4818_v61 = vpack.c.bf16 %v4778_v16, %v4774_v38  ;;  %v4268_v9 = vpop.f32.mrf.mxu0  ;;  %v4267_v35 = vadd.f32 %v4266_v59, %v4154_v37  ;;  %v4781_v30 = vadd.f32 %v4717_v45, %v4265_v29  ;;  %v6826_v7 = vpop.eup %6825 }
 0x459   : > { %v4157_v52 = vpop.f32.mrf.mxu1  ;;  %v6828_v32 = vpop.eup %6827  ;;  %v4726_v44 = vmul.f32 %v6826_v7, %v10289_v5 }
 0x45a   : > { %v4269_v3 = vadd.f32 %v4268_v9, %v4156_v39  ;;  %v4158_v34 = vadd.f32 %v4157_v52, %v9695_v58  ;;  %5406 = vmatprep.mubr.bf16.mxu1 %v4818_v61  ;;  %v4270_v47 = vpop.f32.mrf.mxu0  ;;  %v4782_v0 = vadd.f32 %v4718_v20, %v4267_v35  ;;  %v6830_v48 = vpop.eup %6829  ;;  %v4729_v2 = vmul.f32 %v6828_v32, %v10291_v63 }
 0x45b   : > { %v4161_v40 = vpop.f32.mrf.mxu1  ;;  %5407 = vmatmul.mubr.bf16.gmra.mxu1 %v4817_v53  ;;  %v4730_v60 = vmul.f32 %v6830_v48, %v9813_v36 }
 0x45c   : > { %v4785_v49 = vadd.f32 %v4721_v57, %v4269_v3  ;;  %v4271_v26 = vadd.f32 %v4270_v47, %v4158_v34  ;;  %v4162_v46 = vadd.f32 %v4161_v40, %v9566_v10  ;;  %v4274_v33 = vpop.f32.mrf.mxu0 }
 0x45d   : > { %v4163_v42 = vpop.f32.mrf.mxu1 }
 0x45e   : > { %v4821_v43 = vpack.c.bf16 %v4785_v49, %v4781_v30  ;;  %v4786_v19 = vadd.f32 %v4722_v11, %v4271_v26  ;;  %v4164_v13 = vadd.f32 %v4163_v42, %v9695_v58  ;;  %v4276_v17 = vpop.f32.mrf.mxu0  ;;  %v4275_v24 = vadd.f32 %v4274_v33, %v4162_v46  ;;  %v10292_v30 = vld [vmem:[#allocation9_spill] sm:$0xff] }
 0x45f   : > { %v4165_v31 = vpop.f32.mrf.mxu1 }
 0x460   : > { %v4166_v8 = vadd.f32 %v4165_v31, %v9566_v10  ;;  %v4822_v22 = vpack.c.bf16 %v4786_v19, %v4782_v0  ;;  %v4278_v28 = vpop.f32.mrf.mxu0  ;;  %v4277_v62 = vadd.f32 %v4276_v17, %v4164_v13  ;;  %v4789_v18 = vadd.f32 %v4725_v1, %v4275_v24  ;;  %v10295_v17 = vld [vmem:[#allocation12_spill] sm:$0xff] }
 0x461   : > { %v4167_v41 = vpop.f32.mrf.mxu1 }
 0x462   : > { %v4279_v50 = vadd.f32 %v4278_v28, %v4166_v8  ;;  %v4168_v4 = vadd.f32 %v4167_v41, %v9695_v58  ;;  %5416 = vmatprep.mubr.bf16.mxu1 %v4822_v22  ;;  %v4280_v27 = vpop.f32.mrf.mxu0  ;;  %v4790_v51 = vadd.f32 %v4726_v44, %v4277_v62  ;;  %v10296_v22 = vld [vmem:[#allocation13_spill] sm:$0xff] }
 0x463   : > { %5417 = vmatmul.mubr.bf16.gmra.mxu1 %v4821_v43  ;;  %v10294_v43 = vld [vmem:[#allocation11_spill] sm:$0xff] }
 0x464   : > { %v4793_v10 = vadd.f32 %v4729_v2, %v4279_v50  ;;  %v4281_v56 = vadd.f32 %v4280_v27, %v4168_v4  ;;  %v10297_v2 = vld [vmem:[#allocation14_spill] sm:$0xff]  ;;  %v10298_v27 = vld [vmem:[#allocation15_spill] sm:$0xff] }
 0x466   : > { %v4825_v25 = vpack.c.bf16 %v4793_v10, %v4789_v18  ;;  %v4794_v21 = vadd.f32 %v4730_v60, %v4281_v56  ;;  %v10299_v56 = vld [vmem:[#allocation16_spill] sm:$0xff] }
 0x468   : > { %v4826_v6 = vpack.c.bf16 %v4794_v21, %v4790_v51 }
 0x46a   : > { %5426 = vmatprep.mubr.bf16.mxu1 %v4826_v6 }
 0x46b   : > { %5427 = vmatmul.mubr.bf16.gmra.mxu1 %v4825_v25 }
 0x4b3   : > { %v5245_v63 = vpop.f32.mrf.mxu1 }
 0x4b5   : > { %v5247_v23 = vpop.f32.mrf.mxu1 }
 0x4b7   : > { %v5249_v55 = vpop.f32.mrf.mxu1 }
 0x4b9   : > { %v5251_v58 = vpop.f32.mrf.mxu1 }
 0x4bb   : > { %v5255_v38 = vpop.f32.mrf.mxu1 }
 0x4bd   : > { %v5257_v53 = vpop.f32.mrf.mxu1 }
 0x4bf   : > { %v5259_v5 = vpop.f32.mrf.mxu1 }
 0x4c1   : > { %v5261_v16 = vpop.f32.mrf.mxu1 }
 0x4c3   : > { %v5265_v37 = vpop.f32.mrf.mxu1 }
 0x4c5   : > { %v5267_v36 = vpop.f32.mrf.mxu1 }
 0x4c7   : > { %v5269_v54 = vpop.f32.mrf.mxu1 }
 0x4c9   : > { %v9867_v59 = vpop.f32.mrf.mxu1 }
 0x4cb   : > { %v9869_v15 = vpop.f32.mrf.mxu1 }
 0x4cd   : > { %v9871_v12 = vpop.f32.mrf.mxu1 }
 0x4cf   : > { %v9873_v29 = vpop.f32.mrf.mxu1 }
 0x4d1   : > { %v9875_v39 = vpop.f32.mrf.mxu1 }
 0x4d3   : > { %v9877_v61 = vpop.f32.mrf.mxu1 }
 0x4d5   : > { %v9879_v45 = vpop.f32.mrf.mxu1 }
 0x4d7   : > { %v9881_v9 = vpop.f32.mrf.mxu1 }
 0x4d9   : > { %v9883_v52 = vpop.f32.mrf.mxu1 }
 0x4db   : > { %v9885_v57 = vpop.f32.mrf.mxu1 }
 0x4dd   : > { %v9887_v35 = vpop.f32.mrf.mxu1 }
 0x4df   : > { %v9889_v3 = vpop.f32.mrf.mxu1 }
 0x4e1   : > { %v9892_v34 = vpop.f32.mrf.mxu1 }
 0x4e3   : > { %v9896_v47 = vpop.f32.mrf.mxu1 }
 0x4e5   : > { %v9903_v7 = vpop.f32.mrf.mxu1 }
 0x4e7   : > { %v9909_v24 = vpop.f32.mrf.mxu1 }
 0x4e9   : > { %v9915_v4 = vpop.f32.mrf.mxu1 }
 0x4eb   : > { %v9921_v21 = vpop.f32.mrf.mxu1 }
 0x4f3   : > { %v5358_v20 = vpop.f32.mrf.mxu0 }
 0x4f4   : > { %v5359_v11 = vadd.f32 %v5358_v20, %v5245_v63  ;;  %v10300_v63 = vld [vmem:[#allocation17_spill] sm:$0xff] }
 0x4f5   : > { %v5360_v40 = vpop.f32.mrf.mxu0 }
 0x4f6   : > { %v5437_v49 = vadd.f32 %v5359_v11, %v10292_v30  ;;  %v5361_v26 = vadd.f32 %v5360_v40, %v5247_v23 }
 0x4f7   : > { %v5362_v46 = vpop.f32.mrf.mxu0 }
 0x4f8   : > { %5469 = vst [vmem:[%s9899_s13] sm:$0xff] %v5437_v49  ;;  %v5438_v33 = vadd.f32 %v5361_v26, %v10293_v14  ;;  %v5363_v42 = vadd.f32 %v5362_v46, %v5249_v55  ;;  %v10303_v49 = vld [vmem:[#allocation20_spill] sm:$0xff]  ;;  %v10304_v14 = vld [vmem:[#allocation21_spill] sm:$0xff] }
 0x4f9   : > { %v5364_v0 = vpop.f32.mrf.mxu0 }
 0x4fa   : > { %5470 = vst [vmem:[%s9899_s13 + $0x8] sm:$0xff] %v5438_v33  ;;  %v5439_v19 = vadd.f32 %v5363_v42, %v10294_v43  ;;  %v5365_v13 = vadd.f32 %v5364_v0, %v5251_v58 }
 0x4fb   : > { %v5368_v32 = vpop.f32.mrf.mxu0 }
 0x4fc   : > { %5471 = vst [vmem:[%s9899_s13 + $0x10] sm:$0xff] %v5439_v19  ;;  %v5440_v31 = vadd.f32 %v5365_v13, %v10295_v17  ;;  %v5369_v48 = vadd.f32 %v5368_v32, %v5255_v38  ;;  %v10301_v38 = vld [vmem:[#allocation18_spill] sm:$0xff]  ;;  %v10306_v32 = vld [vmem:[#allocation23_spill] sm:$0xff] }
 0x4fd   : > { %v5370_v8 = vpop.f32.mrf.mxu0 }
 0x4fe   : > { %5472 = vst [vmem:[%s9899_s13 + $0x18] sm:$0xff] %v5440_v31  ;;  %v5441_v1 = vadd.f32 %v5369_v48, %v10296_v22  ;;  %v5371_v28 = vadd.f32 %v5370_v8, %v5257_v53  ;;  %v10307_v8 = vld [vmem:[#allocation24_spill] sm:$0xff] }
 0x4ff   : > { %v5372_v41 = vpop.f32.mrf.mxu0 }
 0x500   : > { %5473 = vst [vmem:[%s9899_s13 + $0x20] sm:$0xff] %v5441_v1  ;;  %v5442_v62 = vadd.f32 %v5371_v28, %v10297_v2  ;;  %v5373_v50 = vadd.f32 %v5372_v41, %v5259_v5  ;;  %v10308_v28 = vld [vmem:[#allocation25_spill] sm:$0xff] }
 0x501   : > { %v5374_v44 = vpop.f32.mrf.mxu0 }
 0x502   : > { %5474 = vst [vmem:[%s9899_s13 + $0x28] sm:$0xff] %v5442_v62  ;;  %v5443_v60 = vadd.f32 %v5373_v50, %v10298_v27  ;;  %v5375_v18 = vadd.f32 %v5374_v44, %v5261_v16  ;;  %v9927_v16 = vpop.f32.mrf.mxu1  ;;  %v10309_v62 = vld [vmem:[#allocation26_spill] sm:$0xff]  ;;  %v10310_v27 = vld [vmem:[#allocation27_spill] sm:$0xff] }
 0x503   : > { %v5378_v10 = vpop.f32.mrf.mxu0 }
 0x504   : > { %5475 = vst [vmem:[%s9899_s13 + $0x30] sm:$0xff] %v5443_v60  ;;  %v5444_v51 = vadd.f32 %v5375_v18, %v10299_v56  ;;  %v5379_v25 = vadd.f32 %v5378_v10, %v5265_v37  ;;  %v10302_v37 = vld [vmem:[#allocation19_spill] sm:$0xff]  ;;  %v9935_v46 = vpop.f32.mrf.mxu1  ;;  %v10311_v10 = vld [vmem:[#allocation28_spill] sm:$0xff] }
 0x505   : > { %v5380_v6 = vpop.f32.mrf.mxu0 }
 0x506   : > { %5476 = vst [vmem:[%s9899_s13 + $0x38] sm:$0xff] %v5444_v51  ;;  %v5445_v23 = vadd.f32 %v5379_v25, %v10300_v63  ;;  %v5381_v55 = vadd.f32 %v5380_v6, %v5267_v36  ;;  %v9943_v13 = vpop.f32.mrf.mxu1  ;;  %v10312_v25 = vld [vmem:[#allocation29_spill] sm:$0xff] }
 0x507   : > { %v5382_v58 = vpop.f32.mrf.mxu0 }
 0x508   : > { %5477 = vst [vmem:[%s9899_s13 + $0x40] sm:$0xff] %v5445_v23  ;;  %v5446_v53 = vadd.f32 %v5381_v55, %v10301_v38  ;;  %v5383_v5 = vadd.f32 %v5382_v58, %v5269_v54  ;;  %v10313_v23 = vld [vmem:[#allocation30_spill] sm:$0xff]  ;;  %v10314_v38 = vld [vmem:[#allocation31_spill] sm:$0xff] }
 0x509   : > { %v5384_v20 = vpop.f32.mrf.mxu0 }
 0x50a   : > { %5478 = vst [vmem:[%s9899_s13 + $0x48] sm:$0xff] %v5446_v53  ;;  %v5447_v11 = vadd.f32 %v5383_v5, %v10302_v37  ;;  %v5385_v40 = vadd.f32 %v5384_v20, %v9867_v59  ;;  %v10305_v59 = vld [vmem:[#allocation22_spill] sm:$0xff]  ;;  %v10315_v20 = vld [vmem:[#allocation32_spill] sm:$0xff] }
 0x50b   : > { %v5388_v30 = vpop.f32.mrf.mxu0 }
 0x50c   : > { %5479 = vst [vmem:[%s9899_s13 + $0x50] sm:$0xff] %v5447_v11  ;;  %v5448_v36 = vadd.f32 %v5385_v40, %v10303_v49  ;;  %v5389_v26 = vadd.f32 %v5388_v30, %v9869_v15  ;;  %v10316_v40 = vld [vmem:[#allocation33_spill] sm:$0xff] }
 0x50d   : > { %v5390_v54 = vpop.f32.mrf.mxu0 }
 0x50e   : > { %5480 = vst [vmem:[%s9899_s13 + $0x58] sm:$0xff] %v5448_v36  ;;  %v5449_v33 = vadd.f32 %v5389_v26, %v10304_v14  ;;  %v5391_v42 = vadd.f32 %v5390_v54, %v9871_v12  ;;  %v10317_v36 = vld [vmem:[#allocation34_spill] sm:$0xff]  ;;  %v10318_v14 = vld [vmem:[#allocation35_spill] sm:$0xff] }
 0x50f   : > { %v5392_v0 = vpop.f32.mrf.mxu0 }
 0x510   : > { %5481 = vst [vmem:[%s9899_s13 + $0x60] sm:$0xff] %v5449_v33  ;;  %v5450_v43 = vadd.f32 %v5391_v42, %v10305_v59  ;;  %v5393_v19 = vadd.f32 %v5392_v0, %v9873_v29 }
 0x511   : > { %v5394_v15 = vpop.f32.mrf.mxu0 }
 0x512   : > { %5482 = vst [vmem:[%s9899_s13 + $0x68] sm:$0xff] %v5450_v43  ;;  %v5451_v17 = vadd.f32 %v5393_v19, %v10306_v32  ;;  %v5395_v31 = vadd.f32 %v5394_v15, %v9875_v39  ;;  %v10321_v32 = vld [vmem:[#allocation38_spill] sm:$0xff] }
 0x513   : > { %v5398_v48 = vpop.f32.mrf.mxu1 }
 0x514   : > { %5483 = vst [vmem:[%s9899_s13 + $0x70] sm:$0xff] %v5451_v17  ;;  %v5452_v12 = vadd.f32 %v5395_v31, %v10307_v8  ;;  %v5399_v22 = vadd.f32 %v5398_v48, %v9877_v61  ;;  %v10322_v48 = vld [vmem:[#allocation39_spill] sm:$0xff] }
 0x515   : > { %v5400_v1 = vpop.f32.mrf.mxu1 }
 0x516   : > { %5484 = vst [vmem:[%s9899_s13 + $0x78] sm:$0xff] %v5452_v12  ;;  %v5453_v29 = vadd.f32 %v5399_v22, %v10308_v28  ;;  %v5401_v41 = vadd.f32 %v5400_v1, %v9879_v45 }
 0x517   : > { %v5402_v2 = vpop.f32.mrf.mxu1 }
 0x518   : > { %5485 = vst [vmem:[%s9899_s13 + $0x80] sm:$0xff] %v5453_v29  ;;  %v5454_v50 = vadd.f32 %v5401_v41, %v10309_v62  ;;  %v5403_v39 = vadd.f32 %v5402_v2, %v9881_v9 }
 0x519   : > { %v5404_v44 = vpop.f32.mrf.mxu1 }
 0x51a   : > { %5486 = vst [vmem:[%s9899_s13 + $0x88] sm:$0xff] %v5454_v50  ;;  %v5455_v60 = vadd.f32 %v5403_v39, %v10310_v27  ;;  %v5405_v61 = vadd.f32 %v5404_v44, %v9883_v52 }
 0x51b   : > { %v5408_v18 = vpop.f32.mrf.mxu1 }
 0x51c   : > { %5487 = vst [vmem:[%s9899_s13 + $0x90] sm:$0xff] %v5455_v60  ;;  %v5456_v56 = vadd.f32 %v5405_v61, %v10311_v10  ;;  %v5409_v45 = vadd.f32 %v5408_v18, %v9885_v57 }
 0x51d   : > { %v5410_v51 = vpop.f32.mrf.mxu1 }
 0x51e   : > { %5488 = vst [vmem:[%s9899_s13 + $0x98] sm:$0xff] %v5456_v56  ;;  %v5457_v6 = vadd.f32 %v5409_v45, %v10312_v25  ;;  %v5411_v9 = vadd.f32 %v5410_v51, %v9887_v35 }
 0x51f   : > { %v5412_v63 = vpop.f32.mrf.mxu1 }
 0x520   : > { %5489 = vst [vmem:[%s9899_s13 + $0xa0] sm:$0xff] %v5457_v6  ;;  %v5458_v55 = vadd.f32 %v5411_v9, %v10313_v23  ;;  %v5413_v52 = vadd.f32 %v5412_v63, %v9889_v3 }
 0x521   : > { %v5414_v58 = vpop.f32.mrf.mxu1 }
 0x522   : > { %5490 = vst [vmem:[%s9899_s13 + $0xa8] sm:$0xff] %v5458_v55  ;;  %v5459_v53 = vadd.f32 %v5413_v52, %v10314_v38  ;;  %v5415_v57 = vadd.f32 %v5414_v58, %v9892_v34 }
 0x523   : > { %v5418_v5 = vpop.f32.mrf.mxu1 }
 0x524   : > { %5491 = vst [vmem:[%s9899_s13 + $0xb0] sm:$0xff] %v5459_v53  ;;  %v5460_v35 = vadd.f32 %v5415_v57, %v10315_v20  ;;  %v5419_v37 = vadd.f32 %v5418_v5, %v9896_v47 }
 0x525   : > { %v5420_v11 = vpop.f32.mrf.mxu1 }
 0x526   : > { %5492 = vst [vmem:[%s9899_s13 + $0xb8] sm:$0xff] %v5460_v35  ;;  %v5461_v3 = vadd.f32 %v5419_v37, %v10316_v40  ;;  %v5421_v30 = vadd.f32 %v5420_v11, %v9903_v7  ;;  %v10319_v7 = vld [vmem:[#allocation36_spill] sm:$0xff] }
 0x527   : > { %v5422_v49 = vpop.f32.mrf.mxu1 }
 0x528   : > { %5493 = vst [vmem:[%s9899_s13 + $0xc0] sm:$0xff] %v5461_v3  ;;  %v5462_v34 = vadd.f32 %v5421_v30, %v10317_v36  ;;  %v5423_v26 = vadd.f32 %v5422_v49, %v9909_v24  ;;  %v10320_v24 = vld [vmem:[#allocation37_spill] sm:$0xff] }
 0x529   : > { %v5424_v54 = vpop.f32.mrf.mxu1 }
 0x52a   : > { %5494 = vst [vmem:[%s9899_s13 + $0xc8] sm:$0xff] %v5462_v34  ;;  %v5463_v33 = vadd.f32 %v5423_v26, %v10318_v14  ;;  %v5425_v47 = vadd.f32 %v5424_v54, %v9915_v4 }
 0x52b   : > { %v5428_v42 = vpop.f32.mrf.mxu1 }
 0x52c   : > { %5495 = vst [vmem:[%s9899_s13 + $0xd0] sm:$0xff] %v5463_v33  ;;  %v5464_v0 = vadd.f32 %v5425_v47, %v10319_v7  ;;  %v5429_v59 = vadd.f32 %v5428_v42, %v9921_v21 }
 0x52d   : > { %v5430_v43 = vpop.f32.mrf.mxu1 }
 0x52e   : > { %5496 = vst [vmem:[%s9899_s13 + $0xd8] sm:$0xff] %v5464_v0  ;;  %v5465_v19 = vadd.f32 %v5429_v59, %v10320_v24  ;;  %v5431_v15 = vadd.f32 %v5430_v43, %v9927_v16  ;;  %v10323_v16 = vld [vmem:[#allocation40_spill] sm:$0xff] }
 0x52f   : > { %v5432_v4 = vpop.f32.mrf.mxu1 }
 0x530   : > { %5497 = vst [vmem:[%s9899_s13 + $0xe0] sm:$0xff] %v5465_v19  ;;  %v5466_v17 = vadd.f32 %v5431_v15, %v10321_v32  ;;  %v5433_v31 = vadd.f32 %v5432_v4, %v9935_v46 }
 0x531   : > { %v5434_v21 = vpop.f32.mrf.mxu1 }
 0x532   : > { %5498 = vst [vmem:[%s9899_s13 + $0xe8] sm:$0xff] %v5466_v17  ;;  %v5467_v8 = vadd.f32 %v5433_v31, %v10322_v48  ;;  %v5435_v12 = vadd.f32 %v5434_v21, %v9943_v13 }
 0x534   : > { %5499 = vst [vmem:[%s9899_s13 + $0xf0] sm:$0xff] %v5467_v8  ;;  %v5468_v46 = vadd.f32 %v5435_v12, %v10323_v16 }
 0x536   : > { %5500 = vst [vmem:[%s9899_s13 + $0xf8] sm:$0xff] %v5468_v46 }
 0x537   : > { %6876 = shalt.err (!%p6873_p7)
}
 0x538   : > { %s6877_s24 = scalar_lea.hbm %s10002_s11, 4096  ;;  %s6881_s16 = scalar_lea.hbm %s10070_s8, 16384 }
 0x539   : > { %p6878_p9 = scmp.ne.s32.totalorder %s10002_s11, %s6877_s24  ;;  %p6882_p12 = scmp.lt.s32.totalorder %s10002_s11, %s10070_s8 }
 0x53a   : > { %p6883_p13 = scmp.lt.s32.totalorder %s6881_s16, %s6877_s24 }
 0x53b   : > { %p6879_p10 = pnand %p6878_p9, %p7056_p3 }
 0x53c   : > { %p6884_p0 = por %p6883_p13, %p6882_p12 }
 0x53d   : > { %p6880_p11 = pneg %p6879_p10 }
 0x53f   : > { %p6885_p1 = pnand %p6884_p0, %p6880_p11 }
 0x541   : > { %6888 = shalt.err (!%p6885_p1)
}
 0x542   : > { %s6958_s21 = smov 256   ;;  %s6959_s20 = smov 16  }
 0x543   : > { %6174 = dma.vmem_to_hbm [thread:$0]  (%p7056_p3), %s10004_s9, 4096, %s10002_s11, %s10011_s17, %s6958_s21, %s6958_s21, %s6959_s20  }
 0x544 PF: > { %p6180_p2 = scmp.ge.s32.totalorder %s6955_s12, 2  ;;  %s5533_s10 = sand.u32 1, %s6927_s27  }
 0x545   : > { %s5534_s22 = scalar_lea.sflag [#allocation3], %s5533_s10 }
 0x546   : > { %p6177_p4 = pnand %p6180_p2, %p7065_p8 }
 0x548   : > { %p6178_p5 = pneg %p6177_p4 }
 0x54a   : > { %6922 = dma.done.wait (%p6178_p5), %s5534_s22, 4096  }
 0x54b   : > { %6924 = vsyncadd (%p6178_p5), %s5534_s22, 4294963200  ;;  %s21_s12 = sadd.s32 1, %s6955_s12   ;;  %s10324_s30 = sld [smem:[#allocation5_spill]] }
 0x54c   : > { %p18_p6 = scmp.ge.s32.totalorder %s21_s12, 6   ;;  %s10325_s9 = sld [smem:[#allocation6_spill]] }
 0x54d   : > { %s10326_s10 = sld [smem:[#allocation7_spill]]  ;;  %s10328_s27 = smov %s6931_s28 }
 0x54e   : > { %s10327_s11 = sld [smem:[#allocation8_spill]]  ;;  %s10329_s28 = smov %s6935_s29 }
 0x54f   : > { %s10330_s29 = smov %s7074_s23  ;;  %20 = sbr.rel (!%p18_p6) target bundleno = 5 (0x5), region = 90 }
 0x554   :  { %5539 = vsyncpa [#allocation3], 1 }
 0x555   :  { %5541 = vsyncpa [#allocation3 + $0x1], 1 }

</bundles_post_ra>
